<compile_context>
chip_gen: v6e
topology: v6e:2x2x1
jax: 0.10.0
libtpu: 0.0.40
codegen_flags: <defaults>
</compile_context>

<pallas_src>
import random

import jax
import jax.numpy as jnp
from jax import lax
from jax.experimental import pallas as pl
from jax.experimental.pallas import tpu as pltpu


_VMEM = pl.BlockSpec(memory_space=pltpu.MemorySpace.VMEM)
_NEG_PAD = -1.0e9        # bias value for padded vocab lanes (never wins argmax)


def _round_up(x, m):
    return -(-x // m) * m


# ----------------------------------------------------------------------------
# Encoder kernel: BOTH bidirectional GRU layers fused into one pallas_call.
# ----------------------------------------------------------------------------
def _encoder_kernel(x_ref, *refs):
    """x_ref: [T*Bp, E] time-major rows (batch padded to Bp, multiple of 8).

    refs, per layer: wih_both [In, 2*GP] bf16  (fwd r,z,n at lanes [0:3H],
                     bwd r,z,n at [GP:GP+3H], GP = roundup(3H, 128)),
                     bih_both [1, 2*GP] f32,
                     whh_f [H, 3H] bf16, bhh_f [1, 3H] f32,
                     whh_b [H, 3H] bf16, bhh_b [1, 3H] f32.
    Then: h0_ref [L*Bp, 2H] f32 output (cat(fwd_final, bwd_final) per layer),
          seq_scr [T*Bp, 2H] f32 scratch (intermediate layer output),
          gi_scr  [T*Bp, 2*GP] f32 scratch (hoisted input projections)."""
    L = (len(refs) - 3) // 6
    layers = [refs[6 * l:6 * l + 6] for l in range(L)]
    h0_ref, seq_scr, gi_scr = refs[6 * L], refs[6 * L + 1], refs[6 * L + 2]

    H = layers[0][2].shape[0]                  # whh_f: [H, 3H]
    Bp = h0_ref.shape[0] // L
    T = x_ref.shape[0] // Bp
    GP = gi_scr.shape[1] // 2

    for l in range(L):
        wih_ref, bih_ref, whh_f_ref, bhh_f_ref, whh_b_ref, bhh_b_ref = layers[l]
        last = (l == L - 1)

        xin = x_ref[...] if l == 0 else seq_scr[...]
        # Fused hoisted input projection: ONE [T*B, In] @ [In, 2*GP] matmul for
        # all 3 gates of BOTH directions; parked in VMEM scratch (not vregs).
        gi_scr[...] = (jnp.dot(xin.astype(jnp.bfloat16), wih_ref[...],
                               preferred_element_type=jnp.float32)
                       + bih_ref[...])

        # Hoisted hidden-bias broadcasts (JAX does not CSE broadcast_in_dim).
        bhf = jnp.broadcast_to(bhh_f_ref[...], (Bp, 3 * H))
        bhb = jnp.broadcast_to(bhh_b_ref[...], (Bp, 3 * H))

        def cell(gi, h, whh_ref, bhh):
            # Single fused [B, H] @ [H, 3H] hidden matmul; slice r/z/n lanes.
            gh = jnp.dot(h.astype(jnp.bfloat16), whh_ref[...],
                         preferred_element_type=jnp.float32) + bhh
            r = jax.nn.sigmoid(gi[:, 0:H] + gh[:, 0:H])
            z = jax.nn.sigmoid(gi[:, H:2 * H] + gh[:, H:2 * H])
            n = jnp.tanh(gi[:, 2 * H:3 * H] + r * gh[:, 2 * H:3 * H])
            return (1.0 - z) * n + z * h

        # TODO(synk): on v7x the two independent directions could be sharded
        #             across the two TensorCores; here they run back-to-back.
        h = jnp.zeros((Bp, H), jnp.float32)                 # forward direction
        for t in range(T):
            rows = slice(t * Bp, (t + 1) * Bp)              # 8-aligned rows
            h = cell(gi_scr[rows, 0:3 * H], h, whh_f_ref, bhf)
            if not last:                                    # last layer's seq
                seq_scr[rows, 0:H] = h                      # output is unused
        h_fwd = h

        h = jnp.zeros((Bp, H), jnp.float32)                 # backward direction
        for t in range(T - 1, -1, -1):                      # time reversal is
            rows = slice(t * Bp, (t + 1) * Bp)              # index arithmetic
            h = cell(gi_scr[rows, GP:GP + 3 * H], h, whh_b_ref, bhb)
            if not last:
                seq_scr[rows, H:2 * H] = h

        # Decoder init hidden for this layer: cat(fwd_final, bwd_final).
        h0_ref[l * Bp:(l + 1) * Bp, 0:H] = h_fwd
        h0_ref[l * Bp:(l + 1) * Bp, H:2 * H] = h


def _encoder_call(params, x2d, T, Bp):
    enc = params["enc_gru"]
    L = len(enc)
    H = enc[0]["whh_f"].shape[0]
    GP2 = enc[0]["wih"].shape[1]
    flat = []
    for layer in enc:
        flat += [layer["wih"], layer["bih"], layer["whh_f"], layer["bhh_f"],
                 layer["whh_b"], layer["bhh_b"]]
    h0_2d = pl.pallas_call(
        _encoder_kernel,
        out_shape=jax.ShapeDtypeStruct((L * Bp, 2 * H), jnp.float32),
        in_specs=[_VMEM] * (1 + len(flat)),
        out_specs=_VMEM,
        scratch_shapes=[pltpu.VMEM((T * Bp, 2 * H), jnp.float32),
                        pltpu.VMEM((T * Bp, GP2), jnp.float32)],
    )(x2d, *flat)
    return h0_2d.reshape(L, Bp, 2 * H)


# ----------------------------------------------------------------------------
# Decoder kernel: the entire autoregressive rollout, no grid, loop in-kernel.
# ----------------------------------------------------------------------------
def _decoder_kernel(flags_ref, tgtoh_ref, h0_ref, emb_ref, *refs):
    """flags_ref [steps,1,1] f32 (1.0 = use target), tgtoh_ref [steps,Bp,Vp],
    h0_ref [L,Bp,DH], emb_ref [Vp,E] bf16.
    refs: per layer (wih [In,3DH] bf16, whh [DH,3DH] bf16, bih/bhh [1,3DH] f32),
          then lin1 w/b, lin2 w/b, lin3 w/b (Vp-padded), out_ref [steps,Bp,Vp]."""
    L = h0_ref.shape[0]
    gru = [refs[4 * l:4 * l + 4] for l in range(L)]
    base = 4 * L
    l1w_ref, l1b_ref, l2w_ref, l2b_ref, l3w_ref, l3b_ref, out_ref = refs[base:base + 7]
    steps, Bp, Vp = out_ref.shape
    DH = h0_ref.shape[2]

    def gru_cell(xin, h, wih_ref, whh_ref, bih_ref, bhh_ref):
        # Fused gates: one x@W and one h@W, slice r/z/n lanes.
        gi = jnp.dot(xin.astype(jnp.bfloat16), wih_ref[...],
                     preferred_element_type=jnp.float32) + bih_ref[...]
        gh = jnp.dot(h.astype(jnp.bfloat16), whh_ref[...],
                     preferred_element_type=jnp.float32) + bhh_ref[...]
        r = jax.nn.sigmoid(gi[:, 0:DH] + gh[:, 0:DH])
        z = jax.nn.sigmoid(gi[:, DH:2 * DH] + gh[:, DH:2 * DH])
        n = jnp.tanh(gi[:, 2 * DH:3 * DH] + r * gh[:, 2 * DH:3 * DH])
        return (1.0 - z) * n + z * h

    ids_bv = lax.broadcasted_iota(jnp.int32, (Bp, Vp), 1)   # hoisted
    hid = [h0_ref[l] for l in range(L)]                     # carried in vregs
    prev_oh = jnp.zeros((Bp, Vp), jnp.float32)

    for t in range(steps):                                  # steps is small/static
        # ---- input token: teacher forcing vs previous argmax (as one-hot).
        fl = flags_ref[t]                                   # [1,1] f32
        x_oh = fl * tgtoh_ref[t] + (1.0 - fl) * prev_oh     # [Bp, Vp]

        # ---- embedding lookup as one-hot @ table (MXU, table VMEM-resident).
        x = jnp.dot(x_oh.astype(jnp.bfloat16), emb_ref[...],
                    preferred_element_type=jnp.float32)     # [Bp, E]

        h_in = x
        for l in range(L):
            h_new = gru_cell(h_in, hid[l], *gru[l])
            hid[l] = h_new
            h_in = h_new

        # ---- fused 3-linear vocab head (intermediates stay in vregs).
        o = jnp.dot(h_in.astype(jnp.bfloat16), l1w_ref[...],
                    preferred_element_type=jnp.float32) + l1b_ref[...]
        o = jnp.dot(o.astype(jnp.bfloat16), l2w_ref[...],
                    preferred_element_type=jnp.float32) + l2b_ref[...]
        pred = jnp.dot(o.astype(jnp.bfloat16), l3w_ref[...],
                       preferred_element_type=jnp.float32) + l3b_ref[...]   # [Bp, Vp]
        out_ref[t] = pred                                   # 128-lane-dense store

        # ---- argmax (first max; padded lanes are ~-1e9 so never selected).
        m = jnp.max(pred, axis=1, keepdims=True)
        cand = jnp.where(pred == m, ids_bv, jnp.iinfo(jnp.int32).max)
        top1 = jnp.min(cand, axis=1, keepdims=True)         # [Bp, 1]
        prev_oh = (ids_bv == top1).astype(jnp.float32)


def _decoder_call(params, h0, tgt_oh, flags):
    steps, Bp, Vp = tgt_oh.shape
    gru_flat = [a for cell in params["dec_gru"] for a in cell]
    lin_flat = [params["lin1"][0], params["lin1"][1],
                params["lin2"][0], params["lin2"][1],
                params["lin3"][0], params["lin3"][1]]
    inputs = [flags, tgt_oh, h0, params["emb_cn"]] + gru_flat + lin_flat
    return pl.pallas_call(
        _decoder_kernel,
        out_shape=jax.ShapeDtypeStruct((steps, Bp, Vp), jnp.float32),
        in_specs=[_VMEM] * len(inputs),
        out_specs=_VMEM,
    )(*inputs)


# ----------------------------------------------------------------------------
# Parameter init (deterministic, synthetic).  Matmul weights stored bf16,
# fused per-gate layouts, vocab head padded to a lane-dense 128.
# ----------------------------------------------------------------------------
def init_params(key, en_vocab, cn_vocab, emb_dim, hid_dim, n_layers):
    dec_hid = 2 * hid_dim
    Vp = _round_up(cn_vocab, 128)
    GP = _round_up(3 * hid_dim, 128)
    kit = iter(jax.random.split(key, 256))
    wf32 = lambda shp: 0.1 * jax.random.normal(next(kit), shp, jnp.float32)
    wbf = lambda shp: wf32(shp).astype(jnp.bfloat16)

    def enc_layer(in_dim, hid):
        pad = GP - 3 * hid
        wih = jnp.concatenate(
            [wf32((in_dim, 3 * hid)), jnp.zeros((in_dim, pad), jnp.float32),
             wf32((in_dim, 3 * hid)), jnp.zeros((in_dim, pad), jnp.float32)],
            axis=1).astype(jnp.bfloat16)                       # [In, 2*GP]
        bih = jnp.concatenate(
            [wf32((1, 3 * hid)), jnp.zeros((1, pad), jnp.float32),
             wf32((1, 3 * hid)), jnp.zeros((1, pad), jnp.float32)], axis=1)
        return {"wih": wih, "bih": bih,
                "whh_f": wbf((hid, 3 * hid)), "bhh_f": wf32((1, 3 * hid)),
                "whh_b": wbf((hid, 3 * hid)), "bhh_b": wf32((1, 3 * hid))}

    def dec_layer(in_dim, hid):
        return (wbf((in_dim, 3 * hid)),      # W_ih^T, gates r|z|n fused in lanes
                wbf((hid, 3 * hid)),         # W_hh^T
                wf32((1, 3 * hid)),          # b_ih
                wf32((1, 3 * hid)))          # b_hh

    emb_cn = jnp.pad(wf32((cn_vocab, emb_dim)),
                     ((0, Vp - cn_vocab), (0, 0))).astype(jnp.bfloat16)
    w3 = jnp.pad(wf32((4 * dec_hid, cn_vocab)),
                 ((0, 0), (0, Vp - cn_vocab))).astype(jnp.bfloat16)
    b3 = jnp.pad(wf32((1, cn_vocab)), ((0, 0), (0, Vp - cn_vocab)),
                 constant_values=_NEG_PAD)

    return {
        "emb_en": wf32((en_vocab, emb_dim)),
        "emb_cn": emb_cn,
        "enc_gru": [enc_layer(emb_dim if l == 0 else 2 * hid_dim, hid_dim)
                    for l in range(n_layers)],
        "dec_gru": [dec_layer(emb_dim if l == 0 else dec_hid, dec_hid)
                    for l in range(n_layers)],
        "lin1": (wbf((dec_hid, 2 * dec_hid)), wf32((1, 2 * dec_hid))),
        "lin2": (wbf((2 * dec_hid, 4 * dec_hid)), wf32((1, 4 * dec_hid))),
        "lin3": (w3, b3),
    }


# ----------------------------------------------------------------------------
# Forward (jitted): fused encoder call + fused decoder rollout call.
# ----------------------------------------------------------------------------
def _forward_impl(params, input_ids, target_ids, tf_mask, cn_vocab):
    B, src_len = input_ids.shape
    tgt_len = target_ids.shape[1]
    steps = tgt_len - 1
    V = cn_vocab
    Vp = params["emb_cn"].shape[0]
    Bp = _round_up(B, 8)                                     # 8-sublane batch pad

    # ---- encoder (dropout in the reference is treated as identity / eval).
    emb = params["emb_en"][input_ids]                        # [B, S, E] (XLA gather)
    emb = jnp.transpose(emb, (1, 0, 2))                      # [S, B, E]
    if Bp != B:
        emb = jnp.pad(emb, ((0, 0), (0, Bp - B), (0, 0)))
    x2d = emb.reshape(src_len * Bp, -1)                      # time-major rows
    h0 = _encoder_call(params, x2d, src_len, Bp)             # [L, Bp, 2H]

    # ---- decoder inputs: vocab-padded target one-hots + teacher-force flags.
    tgt_oh = jax.nn.one_hot(jnp.transpose(target_ids[:, :steps]), Vp,
                            dtype=jnp.float32)               # [steps, B, Vp]
    if Bp != B:
        tgt_oh = jnp.pad(tgt_oh, ((0, 0), (0, Bp - B), (0, 0)))
    flags = jnp.concatenate(
        [jnp.ones((1,), jnp.float32), tf_mask[:steps - 1].astype(jnp.float32)]
    ).reshape(steps, 1, 1)                                   # step 0 uses target[:,0]

    logits = _decoder_call(params, h0, tgt_oh, flags)        # [steps, Bp, Vp]
    step_logits = logits[:, :B, :V]                          # drop batch/vocab pad
    outputs = jnp.concatenate(
        [jnp.zeros((1, B, V), jnp.float32), step_logits], axis=0)   # outputs[:,0]=0
    outputs = jnp.transpose(outputs, (1, 0, 2))              # [B, T, V]
    preds = jnp.transpose(jnp.argmax(step_logits, axis=-1)).astype(jnp.int32)
    return outputs, preds


_forward_jit = jax.jit(_forward_impl, static_argnames=("cn_vocab",))


def seq2seq_forward(params, input_ids, target_ids, teacher_forcing_ratio, cn_vocab):
    # Teacher-forcing decisions drawn host-side (like the PyTorch module, with
    # `<=` as in the reference) and passed as data so jit does not freeze them.
    steps = target_ids.shape[1] - 1
    tf_mask = jnp.asarray(
        [1 if random.random() <= teacher_forcing_ratio else 0 for _ in range(steps)],
        jnp.int32)
    # TODO(synk): attention path (isatt=True) of the hw8 Decoder not implemented;
    #             default isatt=False is reproduced (encoder_outputs unused).
    return _forward_jit(params, input_ids, target_ids, tf_mask, cn_vocab=cn_vocab)


# ----------------------------------------------------------------------------
if __name__ == "__main__":
    random.seed(0)                                           # deterministic TF draws
    key = jax.random.PRNGKey(0)
    k_par, k_in, k_tg = jax.random.split(key, 3)

    EN_VOCAB, CN_VOCAB = 37, 53
    EMB_DIM, HID_DIM, N_LAYERS = 16, 32, 2
    BATCH, SRC_LEN, TGT_LEN = 2, 8, 6

    params = init_params(k_par, EN_VOCAB, CN_VOCAB, EMB_DIM, HID_DIM, N_LAYERS)
    input_ids = jax.random.randint(k_in, (BATCH, SRC_LEN), 0, EN_VOCAB, jnp.int32)
    target_ids = jax.random.randint(k_tg, (BATCH, TGT_LEN), 0, CN_VOCAB, jnp.int32)

    outputs, preds = seq2seq_forward(params, input_ids, target_ids,
                                     teacher_forcing_ratio=1.0, cn_vocab=CN_VOCAB)
    outputs = jax.block_until_ready(outputs)
    preds = jax.block_until_ready(preds)

    assert outputs.shape == (BATCH, TGT_LEN, CN_VOCAB), outputs.shape
    assert preds.shape == (BATCH, TGT_LEN - 1), preds.shape
    assert bool(jnp.all(jnp.isfinite(outputs)))
    print("KERNEL_OK")
</pallas_src>

<mosaic_0001>
module attributes {stable_mosaic.version = 11 : i64} {
  func.func @_decoder_kernel(%arg0: memref<5x1x1xf32, #tpu.memory_space<vmem>>, %arg1: memref<5x8x128xf32, #tpu.memory_space<vmem>>, %arg2: memref<2x8x64xf32, #tpu.memory_space<vmem>>, %arg3: memref<128x16xbf16, #tpu.memory_space<vmem>>, %arg4: memref<16x192xbf16, #tpu.memory_space<vmem>>, %arg5: memref<64x192xbf16, #tpu.memory_space<vmem>>, %arg6: memref<1x192xf32, #tpu.memory_space<vmem>>, %arg7: memref<1x192xf32, #tpu.memory_space<vmem>>, %arg8: memref<64x192xbf16, #tpu.memory_space<vmem>>, %arg9: memref<64x192xbf16, #tpu.memory_space<vmem>>, %arg10: memref<1x192xf32, #tpu.memory_space<vmem>>, %arg11: memref<1x192xf32, #tpu.memory_space<vmem>>, %arg12: memref<64x128xbf16, #tpu.memory_space<vmem>>, %arg13: memref<1x128xf32, #tpu.memory_space<vmem>>, %arg14: memref<128x256xbf16, #tpu.memory_space<vmem>>, %arg15: memref<1x256xf32, #tpu.memory_space<vmem>>, %arg16: memref<256x128xbf16, #tpu.memory_space<vmem>>, %arg17: memref<1x128xf32, #tpu.memory_space<vmem>>, %arg18: memref<5x8x128xf32, #tpu.memory_space<vmem>>) attributes {dimension_semantics = [], scalar_prefetch = 0 : i64, scratch_operands = 0 : i64, tpu.core_type = #tpu.core_type<tc>} {
    %0 = tpu.iota {dimensions = array<i32: 1>} : vector<8x128xi32>
    %c0 = arith.constant 0 : index
    %c0_0 = arith.constant 0 : index
    %c0_1 = arith.constant 0 : index
    %1 = vector.load %arg2[%c0, %c0_0, %c0_1] : memref<2x8x64xf32, #tpu.memory_space<vmem>>, vector<1x8x64xf32>
    %2 = vector.shape_cast %1 : vector<1x8x64xf32> to vector<8x64xf32>
    %c1 = arith.constant 1 : index
    %c0_2 = arith.constant 0 : index
    %c0_3 = arith.constant 0 : index
    %3 = vector.load %arg2[%c1, %c0_2, %c0_3] : memref<2x8x64xf32, #tpu.memory_space<vmem>>, vector<1x8x64xf32>
    %4 = vector.shape_cast %3 : vector<1x8x64xf32> to vector<8x64xf32>
    %cst = arith.constant 0.000000e+00 : f32
    %5 = vector.broadcast %cst : f32 to vector<8x128xf32>
    %c0_4 = arith.constant 0 : index
    %c0_5 = arith.constant 0 : index
    %c0_6 = arith.constant 0 : index
    %6 = vector.load %arg0[%c0_4, %c0_5, %c0_6] : memref<5x1x1xf32, #tpu.memory_space<vmem>>, vector<1x1x1xf32>
    %7 = vector.shape_cast %6 : vector<1x1x1xf32> to vector<1x1xf32>
    %c0_7 = arith.constant 0 : index
    %c0_8 = arith.constant 0 : index
    %c0_9 = arith.constant 0 : index
    %8 = vector.load %arg1[%c0_7, %c0_8, %c0_9] : memref<5x8x128xf32, #tpu.memory_space<vmem>>, vector<1x8x128xf32>
    %9 = vector.shape_cast %8 : vector<1x8x128xf32> to vector<8x128xf32>
    %10 = vector.broadcast %7 : vector<1x1xf32> to vector<8x128xf32>
    %11 = arith.mulf %10, %9 : vector<8x128xf32>
    %cst_10 = arith.constant 1.000000e+00 : f32
    %12 = vector.broadcast %cst_10 : f32 to vector<1x1xf32>
    %13 = arith.subf %12, %7 : vector<1x1xf32>
    %14 = vector.broadcast %13 : vector<1x1xf32> to vector<8x128xf32>
    %15 = arith.mulf %14, %5 : vector<8x128xf32>
    %16 = arith.addf %11, %15 : vector<8x128xf32>
    %17 = arith.truncf %16 : vector<8x128xf32> to vector<8x128xbf16>
    %c0_11 = arith.constant 0 : index
    %c0_12 = arith.constant 0 : index
    %18 = vector.load %arg3[%c0_11, %c0_12] : memref<128x16xbf16, #tpu.memory_space<vmem>>, vector<128x16xbf16>
    %cst_13 = arith.constant dense<0.000000e+00> : vector<8x16xf32>
    %19 = tpu.matmul %17, %18, %cst_13 {dimension_numbers = #tpu.dot_dimension_numbers<[1], [0], [0], [1], [0, 0, 1, 1], [], []>} : vector<8x128xbf16>, vector<128x16xbf16>, vector<8x16xf32> -> vector<8x16xf32>
    %20 = arith.truncf %19 : vector<8x16xf32> to vector<8x16xbf16>
    %c0_14 = arith.constant 0 : index
    %c0_15 = arith.constant 0 : index
    %21 = vector.load %arg4[%c0_14, %c0_15] : memref<16x192xbf16, #tpu.memory_space<vmem>>, vector<16x192xbf16>
    %cst_16 = arith.constant dense<0.000000e+00> : vector<8x192xf32>
    %22 = tpu.matmul %20, %21, %cst_16 {dimension_numbers = #tpu.dot_dimension_numbers<[1], [0], [0], [1], [0, 0, 1, 1], [], []>} : vector<8x16xbf16>, vector<16x192xbf16>, vector<8x192xf32> -> vector<8x192xf32>
    %c0_17 = arith.constant 0 : index
    %c0_18 = arith.constant 0 : index
    %23 = vector.load %arg6[%c0_17, %c0_18] : memref<1x192xf32, #tpu.memory_space<vmem>>, vector<1x192xf32>
    %24 = vector.broadcast %23 : vector<1x192xf32> to vector<8x192xf32>
    %25 = arith.addf %22, %24 : vector<8x192xf32>
    %26 = arith.truncf %2 : vector<8x64xf32> to vector<8x64xbf16>
    %c0_19 = arith.constant 0 : index
    %c0_20 = arith.constant 0 : index
    %27 = vector.load %arg5[%c0_19, %c0_20] : memref<64x192xbf16, #tpu.memory_space<vmem>>, vector<64x192xbf16>
    %cst_21 = arith.constant dense<0.000000e+00> : vector<8x192xf32>
    %28 = tpu.matmul %26, %27, %cst_21 {dimension_numbers = #tpu.dot_dimension_numbers<[1], [0], [0], [1], [0, 0, 1, 1], [], []>} : vector<8x64xbf16>, vector<64x192xbf16>, vector<8x192xf32> -> vector<8x192xf32>
    %c0_22 = arith.constant 0 : index
    %c0_23 = arith.constant 0 : index
    %29 = vector.load %arg7[%c0_22, %c0_23] : memref<1x192xf32, #tpu.memory_space<vmem>>, vector<1x192xf32>
    %30 = vector.broadcast %29 : vector<1x192xf32> to vector<8x192xf32>
    %31 = arith.addf %28, %30 : vector<8x192xf32>
    %32 = vector.extract_strided_slice %25 {offsets = [0, 0], sizes = [8, 64], strides = [1, 1]} : vector<8x192xf32> to vector<8x64xf32>
    %33 = vector.extract_strided_slice %31 {offsets = [0, 0], sizes = [8, 64], strides = [1, 1]} : vector<8x192xf32> to vector<8x64xf32>
    %34 = arith.addf %32, %33 : vector<8x64xf32>
    %35 = arith.negf %34 : vector<8x64xf32>
    %36 = math.exp %35 : vector<8x64xf32>
    %cst_24 = arith.constant 1.000000e+00 : f32
    %37 = vector.broadcast %cst_24 : f32 to vector<8x64xf32>
    %38 = arith.addf %37, %36 : vector<8x64xf32>
    %39 = arith.divf %37, %38 : vector<8x64xf32>
    %40 = vector.extract_strided_slice %25 {offsets = [0, 64], sizes = [8, 64], strides = [1, 1]} : vector<8x192xf32> to vector<8x64xf32>
    %41 = vector.extract_strided_slice %31 {offsets = [0, 64], sizes = [8, 64], strides = [1, 1]} : vector<8x192xf32> to vector<8x64xf32>
    %42 = arith.addf %40, %41 : vector<8x64xf32>
    %43 = arith.negf %42 : vector<8x64xf32>
    %44 = math.exp %43 : vector<8x64xf32>
    %cst_25 = arith.constant 1.000000e+00 : f32
    %45 = vector.broadcast %cst_25 : f32 to vector<8x64xf32>
    %46 = arith.addf %45, %44 : vector<8x64xf32>
    %47 = arith.divf %45, %46 : vector<8x64xf32>
    %48 = vector.extract_strided_slice %25 {offsets = [0, 128], sizes = [8, 64], strides = [1, 1]} : vector<8x192xf32> to vector<8x64xf32>
    %49 = vector.extract_strided_slice %31 {offsets = [0, 128], sizes = [8, 64], strides = [1, 1]} : vector<8x192xf32> to vector<8x64xf32>
    %50 = arith.mulf %39, %49 : vector<8x64xf32>
    %51 = arith.addf %48, %50 : vector<8x64xf32>
    %52 = math.tanh %51 : vector<8x64xf32>
    %cst_26 = arith.constant 1.000000e+00 : f32
    %53 = vector.broadcast %cst_26 : f32 to vector<8x64xf32>
    %54 = arith.subf %53, %47 : vector<8x64xf32>
    %55 = arith.mulf %54, %52 : vector<8x64xf32>
    %56 = arith.mulf %47, %2 : vector<8x64xf32>
    %57 = arith.addf %55, %56 : vector<8x64xf32>
    %58 = arith.truncf %57 : vector<8x64xf32> to vector<8x64xbf16>
    %c0_27 = arith.constant 0 : index
    %c0_28 = arith.constant 0 : index
    %59 = vector.load %arg8[%c0_27, %c0_28] : memref<64x192xbf16, #tpu.memory_space<vmem>>, vector<64x192xbf16>
    %cst_29 = arith.constant dense<0.000000e+00> : vector<8x192xf32>
    %60 = tpu.matmul %58, %59, %cst_29 {dimension_numbers = #tpu.dot_dimension_numbers<[1], [0], [0], [1], [0, 0, 1, 1], [], []>} : vector<8x64xbf16>, vector<64x192xbf16>, vector<8x192xf32> -> vector<8x192xf32>
    %c0_30 = arith.constant 0 : index
    %c0_31 = arith.constant 0 : index
    %61 = vector.load %arg10[%c0_30, %c0_31] : memref<1x192xf32, #tpu.memory_space<vmem>>, vector<1x192xf32>
    %62 = vector.broadcast %61 : vector<1x192xf32> to vector<8x192xf32>
    %63 = arith.addf %60, %62 : vector<8x192xf32>
    %64 = arith.truncf %4 : vector<8x64xf32> to vector<8x64xbf16>
    %c0_32 = arith.constant 0 : index
    %c0_33 = arith.constant 0 : index
    %65 = vector.load %arg9[%c0_32, %c0_33] : memref<64x192xbf16, #tpu.memory_space<vmem>>, vector<64x192xbf16>
    %cst_34 = arith.constant dense<0.000000e+00> : vector<8x192xf32>
    %66 = tpu.matmul %64, %65, %cst_34 {dimension_numbers = #tpu.dot_dimension_numbers<[1], [0], [0], [1], [0, 0, 1, 1], [], []>} : vector<8x64xbf16>, vector<64x192xbf16>, vector<8x192xf32> -> vector<8x192xf32>
    %c0_35 = arith.constant 0 : index
    %c0_36 = arith.constant 0 : index
    %67 = vector.load %arg11[%c0_35, %c0_36] : memref<1x192xf32, #tpu.memory_space<vmem>>, vector<1x192xf32>
    %68 = vector.broadcast %67 : vector<1x192xf32> to vector<8x192xf32>
    %69 = arith.addf %66, %68 : vector<8x192xf32>
    %70 = vector.extract_strided_slice %63 {offsets = [0, 0], sizes = [8, 64], strides = [1, 1]} : vector<8x192xf32> to vector<8x64xf32>
    %71 = vector.extract_strided_slice %69 {offsets = [0, 0], sizes = [8, 64], strides = [1, 1]} : vector<8x192xf32> to vector<8x64xf32>
    %72 = arith.addf %70, %71 : vector<8x64xf32>
    %73 = arith.negf %72 : vector<8x64xf32>
    %74 = math.exp %73 : vector<8x64xf32>
    %cst_37 = arith.constant 1.000000e+00 : f32
    %75 = vector.broadcast %cst_37 : f32 to vector<8x64xf32>
    %76 = arith.addf %75, %74 : vector<8x64xf32>
    %77 = arith.divf %75, %76 : vector<8x64xf32>
    %78 = vector.extract_strided_slice %63 {offsets = [0, 64], sizes = [8, 64], strides = [1, 1]} : vector<8x192xf32> to vector<8x64xf32>
    %79 = vector.extract_strided_slice %69 {offsets = [0, 64], sizes = [8, 64], strides = [1, 1]} : vector<8x192xf32> to vector<8x64xf32>
    %80 = arith.addf %78, %79 : vector<8x64xf32>
    %81 = arith.negf %80 : vector<8x64xf32>
    %82 = math.exp %81 : vector<8x64xf32>
    %cst_38 = arith.constant 1.000000e+00 : f32
    %83 = vector.broadcast %cst_38 : f32 to vector<8x64xf32>
    %84 = arith.addf %83, %82 : vector<8x64xf32>
    %85 = arith.divf %83, %84 : vector<8x64xf32>
    %86 = vector.extract_strided_slice %63 {offsets = [0, 128], sizes = [8, 64], strides = [1, 1]} : vector<8x192xf32> to vector<8x64xf32>
    %87 = vector.extract_strided_slice %69 {offsets = [0, 128], sizes = [8, 64], strides = [1, 1]} : vector<8x192xf32> to vector<8x64xf32>
    %88 = arith.mulf %77, %87 : vector<8x64xf32>
    %89 = arith.addf %86, %88 : vector<8x64xf32>
    %90 = math.tanh %89 : vector<8x64xf32>
    %cst_39 = arith.constant 1.000000e+00 : f32
    %91 = vector.broadcast %cst_39 : f32 to vector<8x64xf32>
    %92 = arith.subf %91, %85 : vector<8x64xf32>
    %93 = arith.mulf %92, %90 : vector<8x64xf32>
    %94 = arith.mulf %85, %4 : vector<8x64xf32>
    %95 = arith.addf %93, %94 : vector<8x64xf32>
    %96 = arith.truncf %95 : vector<8x64xf32> to vector<8x64xbf16>
    %c0_40 = arith.constant 0 : index
    %c0_41 = arith.constant 0 : index
    %97 = vector.load %arg12[%c0_40, %c0_41] : memref<64x128xbf16, #tpu.memory_space<vmem>>, vector<64x128xbf16>
    %cst_42 = arith.constant dense<0.000000e+00> : vector<8x128xf32>
    %98 = tpu.matmul %96, %97, %cst_42 {dimension_numbers = #tpu.dot_dimension_numbers<[1], [0], [0], [1], [0, 0, 1, 1], [], []>} : vector<8x64xbf16>, vector<64x128xbf16>, vector<8x128xf32> -> vector<8x128xf32>
    %c0_43 = arith.constant 0 : index
    %c0_44 = arith.constant 0 : index
    %99 = vector.load %arg13[%c0_43, %c0_44] : memref<1x128xf32, #tpu.memory_space<vmem>>, vector<1x128xf32>
    %100 = vector.broadcast %99 : vector<1x128xf32> to vector<8x128xf32>
    %101 = arith.addf %98, %100 : vector<8x128xf32>
    %102 = arith.truncf %101 : vector<8x128xf32> to vector<8x128xbf16>
    %c0_45 = arith.constant 0 : index
    %c0_46 = arith.constant 0 : index
    %103 = vector.load %arg14[%c0_45, %c0_46] : memref<128x256xbf16, #tpu.memory_space<vmem>>, vector<128x256xbf16>
    %cst_47 = arith.constant dense<0.000000e+00> : vector<8x256xf32>
    %104 = tpu.matmul %102, %103, %cst_47 {dimension_numbers = #tpu.dot_dimension_numbers<[1], [0], [0], [1], [0, 0, 1, 1], [], []>} : vector<8x128xbf16>, vector<128x256xbf16>, vector<8x256xf32> -> vector<8x256xf32>
    %c0_48 = arith.constant 0 : index
    %c0_49 = arith.constant 0 : index
    %105 = vector.load %arg15[%c0_48, %c0_49] : memref<1x256xf32, #tpu.memory_space<vmem>>, vector<1x256xf32>
    %106 = vector.broadcast %105 : vector<1x256xf32> to vector<8x256xf32>
    %107 = arith.addf %104, %106 : vector<8x256xf32>
    %108 = arith.truncf %107 : vector<8x256xf32> to vector<8x256xbf16>
    %c0_50 = arith.constant 0 : index
    %c0_51 = arith.constant 0 : index
    %109 = vector.load %arg16[%c0_50, %c0_51] : memref<256x128xbf16, #tpu.memory_space<vmem>>, vector<256x128xbf16>
    %cst_52 = arith.constant dense<0.000000e+00> : vector<8x128xf32>
    %110 = tpu.matmul %108, %109, %cst_52 {dimension_numbers = #tpu.dot_dimension_numbers<[1], [0], [0], [1], [0, 0, 1, 1], [], []>} : vector<8x256xbf16>, vector<256x128xbf16>, vector<8x128xf32> -> vector<8x128xf32>
    %c0_53 = arith.constant 0 : index
    %c0_54 = arith.constant 0 : index
    %111 = vector.load %arg17[%c0_53, %c0_54] : memref<1x128xf32, #tpu.memory_space<vmem>>, vector<1x128xf32>
    %112 = vector.broadcast %111 : vector<1x128xf32> to vector<8x128xf32>
    %113 = arith.addf %110, %112 : vector<8x128xf32>
    %c0_55 = arith.constant 0 : index
    %c0_56 = arith.constant 0 : index
    %c0_57 = arith.constant 0 : index
    %114 = vector.load %arg18[%c0_55, %c0_56, %c0_57] : memref<5x8x128xf32, #tpu.memory_space<vmem>>, vector<1x8x128xf32>
    %115 = vector.shape_cast %114 : vector<1x8x128xf32> to vector<8x128xf32>
    %116 = vector.shape_cast %113 : vector<8x128xf32> to vector<1x8x128xf32>
    tpu.vector_store %arg18[%c0_55, %c0_56, %c0_57], %116 {strides = array<i32>} : memref<5x8x128xf32, #tpu.memory_space<vmem>>, vector<1x8x128xf32>,
    %cst_58 = arith.constant dense<0xFF800000> : vector<8xf32>
    %117 = vector.multi_reduction <maximumf>, %113, %cst_58 [1] : vector<8x128xf32> to vector<8xf32>
    %118 = vector.shape_cast %117 : vector<8xf32> to vector<8x1xf32>
    %119 = vector.broadcast %118 : vector<8x1xf32> to vector<8x128xf32>
    %120 = arith.cmpf oeq, %113, %119 : vector<8x128xf32>
    %c2147483647_i32 = arith.constant 2147483647 : i32
    %121 = vector.broadcast %c2147483647_i32 : i32 to vector<8x128xi32>
    %122 = arith.select %120, %0, %121 : vector<8x128xi1>, vector<8x128xi32>
    %cst_59 = arith.constant dense<2147483647> : vector<8xi32>
    %123 = vector.multi_reduction <minsi>, %122, %cst_59 [1] : vector<8x128xi32> to vector<8xi32>
    %124 = vector.shape_cast %123 : vector<8xi32> to vector<8x1xi32>
    %125 = vector.broadcast %124 : vector<8x1xi32> to vector<8x128xi32>
    %126 = arith.cmpi eq, %0, %125 : vector<8x128xi32>
    %127 = arith.extui %126 : vector<8x128xi1> to vector<8x128xi32>
    %128 = arith.sitofp %127 : vector<8x128xi32> to vector<8x128xf32>
    %c1_60 = arith.constant 1 : index
    %c0_61 = arith.constant 0 : index
    %c0_62 = arith.constant 0 : index
    %129 = vector.load %arg0[%c1_60, %c0_61, %c0_62] : memref<5x1x1xf32, #tpu.memory_space<vmem>>, vector<1x1x1xf32>
    %130 = vector.shape_cast %129 : vector<1x1x1xf32> to vector<1x1xf32>
    %c1_63 = arith.constant 1 : index
    %c0_64 = arith.constant 0 : index
    %c0_65 = arith.constant 0 : index
    %131 = vector.load %arg1[%c1_63, %c0_64, %c0_65] : memref<5x8x128xf32, #tpu.memory_space<vmem>>, vector<1x8x128xf32>
    %132 = vector.shape_cast %131 : vector<1x8x128xf32> to vector<8x128xf32>
    %133 = vector.broadcast %130 : vector<1x1xf32> to vector<8x128xf32>
    %134 = arith.mulf %133, %132 : vector<8x128xf32>
    %cst_66 = arith.constant 1.000000e+00 : f32
    %135 = vector.broadcast %cst_66 : f32 to vector<1x1xf32>
    %136 = arith.subf %135, %130 : vector<1x1xf32>
    %137 = vector.broadcast %136 : vector<1x1xf32> to vector<8x128xf32>
    %138 = arith.mulf %137, %128 : vector<8x128xf32>
    %139 = arith.addf %134, %138 : vector<8x128xf32>
    %140 = arith.truncf %139 : vector<8x128xf32> to vector<8x128xbf16>
    %c0_67 = arith.constant 0 : index
    %c0_68 = arith.constant 0 : index
    %141 = vector.load %arg3[%c0_67, %c0_68] : memref<128x16xbf16, #tpu.memory_space<vmem>>, vector<128x16xbf16>
    %cst_69 = arith.constant dense<0.000000e+00> : vector<8x16xf32>
    %142 = tpu.matmul %140, %141, %cst_69 {dimension_numbers = #tpu.dot_dimension_numbers<[1], [0], [0], [1], [0, 0, 1, 1], [], []>} : vector<8x128xbf16>, vector<128x16xbf16>, vector<8x16xf32> -> vector<8x16xf32>
    %143 = arith.truncf %142 : vector<8x16xf32> to vector<8x16xbf16>
    %c0_70 = arith.constant 0 : index
    %c0_71 = arith.constant 0 : index
    %144 = vector.load %arg4[%c0_70, %c0_71] : memref<16x192xbf16, #tpu.memory_space<vmem>>, vector<16x192xbf16>
    %cst_72 = arith.constant dense<0.000000e+00> : vector<8x192xf32>
    %145 = tpu.matmul %143, %144, %cst_72 {dimension_numbers = #tpu.dot_dimension_numbers<[1], [0], [0], [1], [0, 0, 1, 1], [], []>} : vector<8x16xbf16>, vector<16x192xbf16>, vector<8x192xf32> -> vector<8x192xf32>
    %c0_73 = arith.constant 0 : index
    %c0_74 = arith.constant 0 : index
    %146 = vector.load %arg6[%c0_73, %c0_74] : memref<1x192xf32, #tpu.memory_space<vmem>>, vector<1x192xf32>
    %147 = vector.broadcast %146 : vector<1x192xf32> to vector<8x192xf32>
    %148 = arith.addf %145, %147 : vector<8x192xf32>
    %149 = arith.truncf %57 : vector<8x64xf32> to vector<8x64xbf16>
    %c0_75 = arith.constant 0 : index
    %c0_76 = arith.constant 0 : index
    %150 = vector.load %arg5[%c0_75, %c0_76] : memref<64x192xbf16, #tpu.memory_space<vmem>>, vector<64x192xbf16>
    %cst_77 = arith.constant dense<0.000000e+00> : vector<8x192xf32>
    %151 = tpu.matmul %149, %150, %cst_77 {dimension_numbers = #tpu.dot_dimension_numbers<[1], [0], [0], [1], [0, 0, 1, 1], [], []>} : vector<8x64xbf16>, vector<64x192xbf16>, vector<8x192xf32> -> vector<8x192xf32>
    %c0_78 = arith.constant 0 : index
    %c0_79 = arith.constant 0 : index
    %152 = vector.load %arg7[%c0_78, %c0_79] : memref<1x192xf32, #tpu.memory_space<vmem>>, vector<1x192xf32>
    %153 = vector.broadcast %152 : vector<1x192xf32> to vector<8x192xf32>
    %154 = arith.addf %151, %153 : vector<8x192xf32>
    %155 = vector.extract_strided_slice %148 {offsets = [0, 0], sizes = [8, 64], strides = [1, 1]} : vector<8x192xf32> to vector<8x64xf32>
    %156 = vector.extract_strided_slice %154 {offsets = [0, 0], sizes = [8, 64], strides = [1, 1]} : vector<8x192xf32> to vector<8x64xf32>
    %157 = arith.addf %155, %156 : vector<8x64xf32>
    %158 = arith.negf %157 : vector<8x64xf32>
    %159 = math.exp %158 : vector<8x64xf32>
    %cst_80 = arith.constant 1.000000e+00 : f32
    %160 = vector.broadcast %cst_80 : f32 to vector<8x64xf32>
    %161 = arith.addf %160, %159 : vector<8x64xf32>
    %162 = arith.divf %160, %161 : vector<8x64xf32>
    %163 = vector.extract_strided_slice %148 {offsets = [0, 64], sizes = [8, 64], strides = [1, 1]} : vector<8x192xf32> to vector<8x64xf32>
    %164 = vector.extract_strided_slice %154 {offsets = [0, 64], sizes = [8, 64], strides = [1, 1]} : vector<8x192xf32> to vector<8x64xf32>
    %165 = arith.addf %163, %164 : vector<8x64xf32>
    %166 = arith.negf %165 : vector<8x64xf32>
    %167 = math.exp %166 : vector<8x64xf32>
    %cst_81 = arith.constant 1.000000e+00 : f32
    %168 = vector.broadcast %cst_81 : f32 to vector<8x64xf32>
    %169 = arith.addf %168, %167 : vector<8x64xf32>
    %170 = arith.divf %168, %169 : vector<8x64xf32>
    %171 = vector.extract_strided_slice %148 {offsets = [0, 128], sizes = [8, 64], strides = [1, 1]} : vector<8x192xf32> to vector<8x64xf32>
    %172 = vector.extract_strided_slice %154 {offsets = [0, 128], sizes = [8, 64], strides = [1, 1]} : vector<8x192xf32> to vector<8x64xf32>
    %173 = arith.mulf %162, %172 : vector<8x64xf32>
    %174 = arith.addf %171, %173 : vector<8x64xf32>
    %175 = math.tanh %174 : vector<8x64xf32>
    %cst_82 = arith.constant 1.000000e+00 : f32
    %176 = vector.broadcast %cst_82 : f32 to vector<8x64xf32>
    %177 = arith.subf %176, %170 : vector<8x64xf32>
    %178 = arith.mulf %177, %175 : vector<8x64xf32>
    %179 = arith.mulf %170, %57 : vector<8x64xf32>
    %180 = arith.addf %178, %179 : vector<8x64xf32>
    %181 = arith.truncf %180 : vector<8x64xf32> to vector<8x64xbf16>
    %c0_83 = arith.constant 0 : index
    %c0_84 = arith.constant 0 : index
    %182 = vector.load %arg8[%c0_83, %c0_84] : memref<64x192xbf16, #tpu.memory_space<vmem>>, vector<64x192xbf16>
    %cst_85 = arith.constant dense<0.000000e+00> : vector<8x192xf32>
    %183 = tpu.matmul %181, %182, %cst_85 {dimension_numbers = #tpu.dot_dimension_numbers<[1], [0], [0], [1], [0, 0, 1, 1], [], []>} : vector<8x64xbf16>, vector<64x192xbf16>, vector<8x192xf32> -> vector<8x192xf32>
    %c0_86 = arith.constant 0 : index
    %c0_87 = arith.constant 0 : index
    %184 = vector.load %arg10[%c0_86, %c0_87] : memref<1x192xf32, #tpu.memory_space<vmem>>, vector<1x192xf32>
    %185 = vector.broadcast %184 : vector<1x192xf32> to vector<8x192xf32>
    %186 = arith.addf %183, %185 : vector<8x192xf32>
    %187 = arith.truncf %95 : vector<8x64xf32> to vector<8x64xbf16>
    %c0_88 = arith.constant 0 : index
    %c0_89 = arith.constant 0 : index
    %188 = vector.load %arg9[%c0_88, %c0_89] : memref<64x192xbf16, #tpu.memory_space<vmem>>, vector<64x192xbf16>
    %cst_90 = arith.constant dense<0.000000e+00> : vector<8x192xf32>
    %189 = tpu.matmul %187, %188, %cst_90 {dimension_numbers = #tpu.dot_dimension_numbers<[1], [0], [0], [1], [0, 0, 1, 1], [], []>} : vector<8x64xbf16>, vector<64x192xbf16>, vector<8x192xf32> -> vector<8x192xf32>
    %c0_91 = arith.constant 0 : index
    %c0_92 = arith.constant 0 : index
    %190 = vector.load %arg11[%c0_91, %c0_92] : memref<1x192xf32, #tpu.memory_space<vmem>>, vector<1x192xf32>
    %191 = vector.broadcast %190 : vector<1x192xf32> to vector<8x192xf32>
    %192 = arith.addf %189, %191 : vector<8x192xf32>
    %193 = vector.extract_strided_slice %186 {offsets = [0, 0], sizes = [8, 64], strides = [1, 1]} : vector<8x192xf32> to vector<8x64xf32>
    %194 = vector.extract_strided_slice %192 {offsets = [0, 0], sizes = [8, 64], strides = [1, 1]} : vector<8x192xf32> to vector<8x64xf32>
    %195 = arith.addf %193, %194 : vector<8x64xf32>
    %196 = arith.negf %195 : vector<8x64xf32>
    %197 = math.exp %196 : vector<8x64xf32>
    %cst_93 = arith.constant 1.000000e+00 : f32
    %198 = vector.broadcast %cst_93 : f32 to vector<8x64xf32>
    %199 = arith.addf %198, %197 : vector<8x64xf32>
    %200 = arith.divf %198, %199 : vector<8x64xf32>
    %201 = vector.extract_strided_slice %186 {offsets = [0, 64], sizes = [8, 64], strides = [1, 1]} : vector<8x192xf32> to vector<8x64xf32>
    %202 = vector.extract_strided_slice %192 {offsets = [0, 64], sizes = [8, 64], strides = [1, 1]} : vector<8x192xf32> to vector<8x64xf32>
    %203 = arith.addf %201, %202 : vector<8x64xf32>
    %204 = arith.negf %203 : vector<8x64xf32>
    %205 = math.exp %204 : vector<8x64xf32>
    %cst_94 = arith.constant 1.000000e+00 : f32
    %206 = vector.broadcast %cst_94 : f32 to vector<8x64xf32>
    %207 = arith.addf %206, %205 : vector<8x64xf32>
    %208 = arith.divf %206, %207 : vector<8x64xf32>
    %209 = vector.extract_strided_slice %186 {offsets = [0, 128], sizes = [8, 64], strides = [1, 1]} : vector<8x192xf32> to vector<8x64xf32>
    %210 = vector.extract_strided_slice %192 {offsets = [0, 128], sizes = [8, 64], strides = [1, 1]} : vector<8x192xf32> to vector<8x64xf32>
    %211 = arith.mulf %200, %210 : vector<8x64xf32>
    %212 = arith.addf %209, %211 : vector<8x64xf32>
    %213 = math.tanh %212 : vector<8x64xf32>
    %cst_95 = arith.constant 1.000000e+00 : f32
    %214 = vector.broadcast %cst_95 : f32 to vector<8x64xf32>
    %215 = arith.subf %214, %208 : vector<8x64xf32>
    %216 = arith.mulf %215, %213 : vector<8x64xf32>
    %217 = arith.mulf %208, %95 : vector<8x64xf32>
    %218 = arith.addf %216, %217 : vector<8x64xf32>
    %219 = arith.truncf %218 : vector<8x64xf32> to vector<8x64xbf16>
    %c0_96 = arith.constant 0 : index
    %c0_97 = arith.constant 0 : index
    %220 = vector.load %arg12[%c0_96, %c0_97] : memref<64x128xbf16, #tpu.memory_space<vmem>>, vector<64x128xbf16>
    %cst_98 = arith.constant dense<0.000000e+00> : vector<8x128xf32>
    %221 = tpu.matmul %219, %220, %cst_98 {dimension_numbers = #tpu.dot_dimension_numbers<[1], [0], [0], [1], [0, 0, 1, 1], [], []>} : vector<8x64xbf16>, vector<64x128xbf16>, vector<8x128xf32> -> vector<8x128xf32>
    %c0_99 = arith.constant 0 : index
    %c0_100 = arith.constant 0 : index
    %222 = vector.load %arg13[%c0_99, %c0_100] : memref<1x128xf32, #tpu.memory_space<vmem>>, vector<1x128xf32>
    %223 = vector.broadcast %222 : vector<1x128xf32> to vector<8x128xf32>
    %224 = arith.addf %221, %223 : vector<8x128xf32>
    %225 = arith.truncf %224 : vector<8x128xf32> to vector<8x128xbf16>
    %c0_101 = arith.constant 0 : index
    %c0_102 = arith.constant 0 : index
    %226 = vector.load %arg14[%c0_101, %c0_102] : memref<128x256xbf16, #tpu.memory_space<vmem>>, vector<128x256xbf16>
    %cst_103 = arith.constant dense<0.000000e+00> : vector<8x256xf32>
    %227 = tpu.matmul %225, %226, %cst_103 {dimension_numbers = #tpu.dot_dimension_numbers<[1], [0], [0], [1], [0, 0, 1, 1], [], []>} : vector<8x128xbf16>, vector<128x256xbf16>, vector<8x256xf32> -> vector<8x256xf32>
    %c0_104 = arith.constant 0 : index
    %c0_105 = arith.constant 0 : index
    %228 = vector.load %arg15[%c0_104, %c0_105] : memref<1x256xf32, #tpu.memory_space<vmem>>, vector<1x256xf32>
    %229 = vector.broadcast %228 : vector<1x256xf32> to vector<8x256xf32>
    %230 = arith.addf %227, %229 : vector<8x256xf32>
    %231 = arith.truncf %230 : vector<8x256xf32> to vector<8x256xbf16>
    %c0_106 = arith.constant 0 : index
    %c0_107 = arith.constant 0 : index
    %232 = vector.load %arg16[%c0_106, %c0_107] : memref<256x128xbf16, #tpu.memory_space<vmem>>, vector<256x128xbf16>
    %cst_108 = arith.constant dense<0.000000e+00> : vector<8x128xf32>
    %233 = tpu.matmul %231, %232, %cst_108 {dimension_numbers = #tpu.dot_dimension_numbers<[1], [0], [0], [1], [0, 0, 1, 1], [], []>} : vector<8x256xbf16>, vector<256x128xbf16>, vector<8x128xf32> -> vector<8x128xf32>
    %c0_109 = arith.constant 0 : index
    %c0_110 = arith.constant 0 : index
    %234 = vector.load %arg17[%c0_109, %c0_110] : memref<1x128xf32, #tpu.memory_space<vmem>>, vector<1x128xf32>
    %235 = vector.broadcast %234 : vector<1x128xf32> to vector<8x128xf32>
    %236 = arith.addf %233, %235 : vector<8x128xf32>
    %c1_111 = arith.constant 1 : index
    %c0_112 = arith.constant 0 : index
    %c0_113 = arith.constant 0 : index
    %237 = vector.load %arg18[%c1_111, %c0_112, %c0_113] : memref<5x8x128xf32, #tpu.memory_space<vmem>>, vector<1x8x128xf32>
    %238 = vector.shape_cast %237 : vector<1x8x128xf32> to vector<8x128xf32>
    %239 = vector.shape_cast %236 : vector<8x128xf32> to vector<1x8x128xf32>
    tpu.vector_store %arg18[%c1_111, %c0_112, %c0_113], %239 {strides = array<i32>} : memref<5x8x128xf32, #tpu.memory_space<vmem>>, vector<1x8x128xf32>,
    %cst_114 = arith.constant dense<0xFF800000> : vector<8xf32>
    %240 = vector.multi_reduction <maximumf>, %236, %cst_114 [1] : vector<8x128xf32> to vector<8xf32>
    %241 = vector.shape_cast %240 : vector<8xf32> to vector<8x1xf32>
    %242 = vector.broadcast %241 : vector<8x1xf32> to vector<8x128xf32>
    %243 = arith.cmpf oeq, %236, %242 : vector<8x128xf32>
    %c2147483647_i32_115 = arith.constant 2147483647 : i32
    %244 = vector.broadcast %c2147483647_i32_115 : i32 to vector<8x128xi32>
    %245 = arith.select %243, %0, %244 : vector<8x128xi1>, vector<8x128xi32>
    %cst_116 = arith.constant dense<2147483647> : vector<8xi32>
    %246 = vector.multi_reduction <minsi>, %245, %cst_116 [1] : vector<8x128xi32> to vector<8xi32>
    %247 = vector.shape_cast %246 : vector<8xi32> to vector<8x1xi32>
    %248 = vector.broadcast %247 : vector<8x1xi32> to vector<8x128xi32>
    %249 = arith.cmpi eq, %0, %248 : vector<8x128xi32>
    %250 = arith.extui %249 : vector<8x128xi1> to vector<8x128xi32>
    %251 = arith.sitofp %250 : vector<8x128xi32> to vector<8x128xf32>
    %c2 = arith.constant 2 : index
    %c0_117 = arith.constant 0 : index
    %c0_118 = arith.constant 0 : index
    %252 = vector.load %arg0[%c2, %c0_117, %c0_118] : memref<5x1x1xf32, #tpu.memory_space<vmem>>, vector<1x1x1xf32>
    %253 = vector.shape_cast %252 : vector<1x1x1xf32> to vector<1x1xf32>
    %c2_119 = arith.constant 2 : index
    %c0_120 = arith.constant 0 : index
    %c0_121 = arith.constant 0 : index
    %254 = vector.load %arg1[%c2_119, %c0_120, %c0_121] : memref<5x8x128xf32, #tpu.memory_space<vmem>>, vector<1x8x128xf32>
    %255 = vector.shape_cast %254 : vector<1x8x128xf32> to vector<8x128xf32>
    %256 = vector.broadcast %253 : vector<1x1xf32> to vector<8x128xf32>
    %257 = arith.mulf %256, %255 : vector<8x128xf32>
    %cst_122 = arith.constant 1.000000e+00 : f32
    %258 = vector.broadcast %cst_122 : f32 to vector<1x1xf32>
    %259 = arith.subf %258, %253 : vector<1x1xf32>
    %260 = vector.broadcast %259 : vector<1x1xf32> to vector<8x128xf32>
    %261 = arith.mulf %260, %251 : vector<8x128xf32>
    %262 = arith.addf %257, %261 : vector<8x128xf32>
    %263 = arith.truncf %262 : vector<8x128xf32> to vector<8x128xbf16>
    %c0_123 = arith.constant 0 : index
    %c0_124 = arith.constant 0 : index
    %264 = vector.load %arg3[%c0_123, %c0_124] : memref<128x16xbf16, #tpu.memory_space<vmem>>, vector<128x16xbf16>
    %cst_125 = arith.constant dense<0.000000e+00> : vector<8x16xf32>
    %265 = tpu.matmul %263, %264, %cst_125 {dimension_numbers = #tpu.dot_dimension_numbers<[1], [0], [0], [1], [0, 0, 1, 1], [], []>} : vector<8x128xbf16>, vector<128x16xbf16>, vector<8x16xf32> -> vector<8x16xf32>
    %266 = arith.truncf %265 : vector<8x16xf32> to vector<8x16xbf16>
    %c0_126 = arith.constant 0 : index
    %c0_127 = arith.constant 0 : index
    %267 = vector.load %arg4[%c0_126, %c0_127] : memref<16x192xbf16, #tpu.memory_space<vmem>>, vector<16x192xbf16>
    %cst_128 = arith.constant dense<0.000000e+00> : vector<8x192xf32>
    %268 = tpu.matmul %266, %267, %cst_128 {dimension_numbers = #tpu.dot_dimension_numbers<[1], [0], [0], [1], [0, 0, 1, 1], [], []>} : vector<8x16xbf16>, vector<16x192xbf16>, vector<8x192xf32> -> vector<8x192xf32>
    %c0_129 = arith.constant 0 : index
    %c0_130 = arith.constant 0 : index
    %269 = vector.load %arg6[%c0_129, %c0_130] : memref<1x192xf32, #tpu.memory_space<vmem>>, vector<1x192xf32>
    %270 = vector.broadcast %269 : vector<1x192xf32> to vector<8x192xf32>
    %271 = arith.addf %268, %270 : vector<8x192xf32>
    %272 = arith.truncf %180 : vector<8x64xf32> to vector<8x64xbf16>
    %c0_131 = arith.constant 0 : index
    %c0_132 = arith.constant 0 : index
    %273 = vector.load %arg5[%c0_131, %c0_132] : memref<64x192xbf16, #tpu.memory_space<vmem>>, vector<64x192xbf16>
    %cst_133 = arith.constant dense<0.000000e+00> : vector<8x192xf32>
    %274 = tpu.matmul %272, %273, %cst_133 {dimension_numbers = #tpu.dot_dimension_numbers<[1], [0], [0], [1], [0, 0, 1, 1], [], []>} : vector<8x64xbf16>, vector<64x192xbf16>, vector<8x192xf32> -> vector<8x192xf32>
    %c0_134 = arith.constant 0 : index
    %c0_135 = arith.constant 0 : index
    %275 = vector.load %arg7[%c0_134, %c0_135] : memref<1x192xf32, #tpu.memory_space<vmem>>, vector<1x192xf32>
    %276 = vector.broadcast %275 : vector<1x192xf32> to vector<8x192xf32>
    %277 = arith.addf %274, %276 : vector<8x192xf32>
    %278 = vector.extract_strided_slice %271 {offsets = [0, 0], sizes = [8, 64], strides = [1, 1]} : vector<8x192xf32> to vector<8x64xf32>
    %279 = vector.extract_strided_slice %277 {offsets = [0, 0], sizes = [8, 64], strides = [1, 1]} : vector<8x192xf32> to vector<8x64xf32>
    %280 = arith.addf %278, %279 : vector<8x64xf32>
    %281 = arith.negf %280 : vector<8x64xf32>
    %282 = math.exp %281 : vector<8x64xf32>
    %cst_136 = arith.constant 1.000000e+00 : f32
    %283 = vector.broadcast %cst_136 : f32 to vector<8x64xf32>
    %284 = arith.addf %283, %282 : vector<8x64xf32>
    %285 = arith.divf %283, %284 : vector<8x64xf32>
    %286 = vector.extract_strided_slice %271 {offsets = [0, 64], sizes = [8, 64], strides = [1, 1]} : vector<8x192xf32> to vector<8x64xf32>
    %287 = vector.extract_strided_slice %277 {offsets = [0, 64], sizes = [8, 64], strides = [1, 1]} : vector<8x192xf32> to vector<8x64xf32>
    %288 = arith.addf %286, %287 : vector<8x64xf32>
    %289 = arith.negf %288 : vector<8x64xf32>
    %290 = math.exp %289 : vector<8x64xf32>
    %cst_137 = arith.constant 1.000000e+00 : f32
    %291 = vector.broadcast %cst_137 : f32 to vector<8x64xf32>
    %292 = arith.addf %291, %290 : vector<8x64xf32>
    %293 = arith.divf %291, %292 : vector<8x64xf32>
    %294 = vector.extract_strided_slice %271 {offsets = [0, 128], sizes = [8, 64], strides = [1, 1]} : vector<8x192xf32> to vector<8x64xf32>
    %295 = vector.extract_strided_slice %277 {offsets = [0, 128], sizes = [8, 64], strides = [1, 1]} : vector<8x192xf32> to vector<8x64xf32>
    %296 = arith.mulf %285, %295 : vector<8x64xf32>
    %297 = arith.addf %294, %296 : vector<8x64xf32>
    %298 = math.tanh %297 : vector<8x64xf32>
    %cst_138 = arith.constant 1.000000e+00 : f32
    %299 = vector.broadcast %cst_138 : f32 to vector<8x64xf32>
    %300 = arith.subf %299, %293 : vector<8x64xf32>
    %301 = arith.mulf %300, %298 : vector<8x64xf32>
    %302 = arith.mulf %293, %180 : vector<8x64xf32>
    %303 = arith.addf %301, %302 : vector<8x64xf32>
    %304 = arith.truncf %303 : vector<8x64xf32> to vector<8x64xbf16>
    %c0_139 = arith.constant 0 : index
    %c0_140 = arith.constant 0 : index
    %305 = vector.load %arg8[%c0_139, %c0_140] : memref<64x192xbf16, #tpu.memory_space<vmem>>, vector<64x192xbf16>
    %cst_141 = arith.constant dense<0.000000e+00> : vector<8x192xf32>
    %306 = tpu.matmul %304, %305, %cst_141 {dimension_numbers = #tpu.dot_dimension_numbers<[1], [0], [0], [1], [0, 0, 1, 1], [], []>} : vector<8x64xbf16>, vector<64x192xbf16>, vector<8x192xf32> -> vector<8x192xf32>
    %c0_142 = arith.constant 0 : index
    %c0_143 = arith.constant 0 : index
    %307 = vector.load %arg10[%c0_142, %c0_143] : memref<1x192xf32, #tpu.memory_space<vmem>>, vector<1x192xf32>
    %308 = vector.broadcast %307 : vector<1x192xf32> to vector<8x192xf32>
    %309 = arith.addf %306, %308 : vector<8x192xf32>
    %310 = arith.truncf %218 : vector<8x64xf32> to vector<8x64xbf16>
    %c0_144 = arith.constant 0 : index
    %c0_145 = arith.constant 0 : index
    %311 = vector.load %arg9[%c0_144, %c0_145] : memref<64x192xbf16, #tpu.memory_space<vmem>>, vector<64x192xbf16>
    %cst_146 = arith.constant dense<0.000000e+00> : vector<8x192xf32>
    %312 = tpu.matmul %310, %311, %cst_146 {dimension_numbers = #tpu.dot_dimension_numbers<[1], [0], [0], [1], [0, 0, 1, 1], [], []>} : vector<8x64xbf16>, vector<64x192xbf16>, vector<8x192xf32> -> vector<8x192xf32>
    %c0_147 = arith.constant 0 : index
    %c0_148 = arith.constant 0 : index
    %313 = vector.load %arg11[%c0_147, %c0_148] : memref<1x192xf32, #tpu.memory_space<vmem>>, vector<1x192xf32>
    %314 = vector.broadcast %313 : vector<1x192xf32> to vector<8x192xf32>
    %315 = arith.addf %312, %314 : vector<8x192xf32>
    %316 = vector.extract_strided_slice %309 {offsets = [0, 0], sizes = [8, 64], strides = [1, 1]} : vector<8x192xf32> to vector<8x64xf32>
    %317 = vector.extract_strided_slice %315 {offsets = [0, 0], sizes = [8, 64], strides = [1, 1]} : vector<8x192xf32> to vector<8x64xf32>
    %318 = arith.addf %316, %317 : vector<8x64xf32>
    %319 = arith.negf %318 : vector<8x64xf32>
    %320 = math.exp %319 : vector<8x64xf32>
    %cst_149 = arith.constant 1.000000e+00 : f32
    %321 = vector.broadcast %cst_149 : f32 to vector<8x64xf32>
    %322 = arith.addf %321, %320 : vector<8x64xf32>
    %323 = arith.divf %321, %322 : vector<8x64xf32>
    %324 = vector.extract_strided_slice %309 {offsets = [0, 64], sizes = [8, 64], strides = [1, 1]} : vector<8x192xf32> to vector<8x64xf32>
    %325 = vector.extract_strided_slice %315 {offsets = [0, 64], sizes = [8, 64], strides = [1, 1]} : vector<8x192xf32> to vector<8x64xf32>
    %326 = arith.addf %324, %325 : vector<8x64xf32>
    %327 = arith.negf %326 : vector<8x64xf32>
    %328 = math.exp %327 : vector<8x64xf32>
    %cst_150 = arith.constant 1.000000e+00 : f32
    %329 = vector.broadcast %cst_150 : f32 to vector<8x64xf32>
    %330 = arith.addf %329, %328 : vector<8x64xf32>
    %331 = arith.divf %329, %330 : vector<8x64xf32>
    %332 = vector.extract_strided_slice %309 {offsets = [0, 128], sizes = [8, 64], strides = [1, 1]} : vector<8x192xf32> to vector<8x64xf32>
    %333 = vector.extract_strided_slice %315 {offsets = [0, 128], sizes = [8, 64], strides = [1, 1]} : vector<8x192xf32> to vector<8x64xf32>
    %334 = arith.mulf %323, %333 : vector<8x64xf32>
    %335 = arith.addf %332, %334 : vector<8x64xf32>
    %336 = math.tanh %335 : vector<8x64xf32>
    %cst_151 = arith.constant 1.000000e+00 : f32
    %337 = vector.broadcast %cst_151 : f32 to vector<8x64xf32>
    %338 = arith.subf %337, %331 : vector<8x64xf32>
    %339 = arith.mulf %338, %336 : vector<8x64xf32>
    %340 = arith.mulf %331, %218 : vector<8x64xf32>
    %341 = arith.addf %339, %340 : vector<8x64xf32>
    %342 = arith.truncf %341 : vector<8x64xf32> to vector<8x64xbf16>
    %c0_152 = arith.constant 0 : index
    %c0_153 = arith.constant 0 : index
    %343 = vector.load %arg12[%c0_152, %c0_153] : memref<64x128xbf16, #tpu.memory_space<vmem>>, vector<64x128xbf16>
    %cst_154 = arith.constant dense<0.000000e+00> : vector<8x128xf32>
    %344 = tpu.matmul %342, %343, %cst_154 {dimension_numbers = #tpu.dot_dimension_numbers<[1], [0], [0], [1], [0, 0, 1, 1], [], []>} : vector<8x64xbf16>, vector<64x128xbf16>, vector<8x128xf32> -> vector<8x128xf32>
    %c0_155 = arith.constant 0 : index
    %c0_156 = arith.constant 0 : index
    %345 = vector.load %arg13[%c0_155, %c0_156] : memref<1x128xf32, #tpu.memory_space<vmem>>, vector<1x128xf32>
    %346 = vector.broadcast %345 : vector<1x128xf32> to vector<8x128xf32>
    %347 = arith.addf %344, %346 : vector<8x128xf32>
    %348 = arith.truncf %347 : vector<8x128xf32> to vector<8x128xbf16>
    %c0_157 = arith.constant 0 : index
    %c0_158 = arith.constant 0 : index
    %349 = vector.load %arg14[%c0_157, %c0_158] : memref<128x256xbf16, #tpu.memory_space<vmem>>, vector<128x256xbf16>
    %cst_159 = arith.constant dense<0.000000e+00> : vector<8x256xf32>
    %350 = tpu.matmul %348, %349, %cst_159 {dimension_numbers = #tpu.dot_dimension_numbers<[1], [0], [0], [1], [0, 0, 1, 1], [], []>} : vector<8x128xbf16>, vector<128x256xbf16>, vector<8x256xf32> -> vector<8x256xf32>
    %c0_160 = arith.constant 0 : index
    %c0_161 = arith.constant 0 : index
    %351 = vector.load %arg15[%c0_160, %c0_161] : memref<1x256xf32, #tpu.memory_space<vmem>>, vector<1x256xf32>
    %352 = vector.broadcast %351 : vector<1x256xf32> to vector<8x256xf32>
    %353 = arith.addf %350, %352 : vector<8x256xf32>
    %354 = arith.truncf %353 : vector<8x256xf32> to vector<8x256xbf16>
    %c0_162 = arith.constant 0 : index
    %c0_163 = arith.constant 0 : index
    %355 = vector.load %arg16[%c0_162, %c0_163] : memref<256x128xbf16, #tpu.memory_space<vmem>>, vector<256x128xbf16>
    %cst_164 = arith.constant dense<0.000000e+00> : vector<8x128xf32>
    %356 = tpu.matmul %354, %355, %cst_164 {dimension_numbers = #tpu.dot_dimension_numbers<[1], [0], [0], [1], [0, 0, 1, 1], [], []>} : vector<8x256xbf16>, vector<256x128xbf16>, vector<8x128xf32> -> vector<8x128xf32>
    %c0_165 = arith.constant 0 : index
    %c0_166 = arith.constant 0 : index
    %357 = vector.load %arg17[%c0_165, %c0_166] : memref<1x128xf32, #tpu.memory_space<vmem>>, vector<1x128xf32>
    %358 = vector.broadcast %357 : vector<1x128xf32> to vector<8x128xf32>
    %359 = arith.addf %356, %358 : vector<8x128xf32>
    %c2_167 = arith.constant 2 : index
    %c0_168 = arith.constant 0 : index
    %c0_169 = arith.constant 0 : index
    %360 = vector.load %arg18[%c2_167, %c0_168, %c0_169] : memref<5x8x128xf32, #tpu.memory_space<vmem>>, vector<1x8x128xf32>
    %361 = vector.shape_cast %360 : vector<1x8x128xf32> to vector<8x128xf32>
    %362 = vector.shape_cast %359 : vector<8x128xf32> to vector<1x8x128xf32>
    tpu.vector_store %arg18[%c2_167, %c0_168, %c0_169], %362 {strides = array<i32>} : memref<5x8x128xf32, #tpu.memory_space<vmem>>, vector<1x8x128xf32>,
    %cst_170 = arith.constant dense<0xFF800000> : vector<8xf32>
    %363 = vector.multi_reduction <maximumf>, %359, %cst_170 [1] : vector<8x128xf32> to vector<8xf32>
    %364 = vector.shape_cast %363 : vector<8xf32> to vector<8x1xf32>
    %365 = vector.broadcast %364 : vector<8x1xf32> to vector<8x128xf32>
    %366 = arith.cmpf oeq, %359, %365 : vector<8x128xf32>
    %c2147483647_i32_171 = arith.constant 2147483647 : i32
    %367 = vector.broadcast %c2147483647_i32_171 : i32 to vector<8x128xi32>
    %368 = arith.select %366, %0, %367 : vector<8x128xi1>, vector<8x128xi32>
    %cst_172 = arith.constant dense<2147483647> : vector<8xi32>
    %369 = vector.multi_reduction <minsi>, %368, %cst_172 [1] : vector<8x128xi32> to vector<8xi32>
    %370 = vector.shape_cast %369 : vector<8xi32> to vector<8x1xi32>
    %371 = vector.broadcast %370 : vector<8x1xi32> to vector<8x128xi32>
    %372 = arith.cmpi eq, %0, %371 : vector<8x128xi32>
    %373 = arith.extui %372 : vector<8x128xi1> to vector<8x128xi32>
    %374 = arith.sitofp %373 : vector<8x128xi32> to vector<8x128xf32>
    %c3 = arith.constant 3 : index
    %c0_173 = arith.constant 0 : index
    %c0_174 = arith.constant 0 : index
    %375 = vector.load %arg0[%c3, %c0_173, %c0_174] : memref<5x1x1xf32, #tpu.memory_space<vmem>>, vector<1x1x1xf32>
    %376 = vector.shape_cast %375 : vector<1x1x1xf32> to vector<1x1xf32>
    %c3_175 = arith.constant 3 : index
    %c0_176 = arith.constant 0 : index
    %c0_177 = arith.constant 0 : index
    %377 = vector.load %arg1[%c3_175, %c0_176, %c0_177] : memref<5x8x128xf32, #tpu.memory_space<vmem>>, vector<1x8x128xf32>
    %378 = vector.shape_cast %377 : vector<1x8x128xf32> to vector<8x128xf32>
    %379 = vector.broadcast %376 : vector<1x1xf32> to vector<8x128xf32>
    %380 = arith.mulf %379, %378 : vector<8x128xf32>
    %cst_178 = arith.constant 1.000000e+00 : f32
    %381 = vector.broadcast %cst_178 : f32 to vector<1x1xf32>
    %382 = arith.subf %381, %376 : vector<1x1xf32>
    %383 = vector.broadcast %382 : vector<1x1xf32> to vector<8x128xf32>
    %384 = arith.mulf %383, %374 : vector<8x128xf32>
    %385 = arith.addf %380, %384 : vector<8x128xf32>
    %386 = arith.truncf %385 : vector<8x128xf32> to vector<8x128xbf16>
    %c0_179 = arith.constant 0 : index
    %c0_180 = arith.constant 0 : index
    %387 = vector.load %arg3[%c0_179, %c0_180] : memref<128x16xbf16, #tpu.memory_space<vmem>>, vector<128x16xbf16>
    %cst_181 = arith.constant dense<0.000000e+00> : vector<8x16xf32>
    %388 = tpu.matmul %386, %387, %cst_181 {dimension_numbers = #tpu.dot_dimension_numbers<[1], [0], [0], [1], [0, 0, 1, 1], [], []>} : vector<8x128xbf16>, vector<128x16xbf16>, vector<8x16xf32> -> vector<8x16xf32>
    %389 = arith.truncf %388 : vector<8x16xf32> to vector<8x16xbf16>
    %c0_182 = arith.constant 0 : index
    %c0_183 = arith.constant 0 : index
    %390 = vector.load %arg4[%c0_182, %c0_183] : memref<16x192xbf16, #tpu.memory_space<vmem>>, vector<16x192xbf16>
    %cst_184 = arith.constant dense<0.000000e+00> : vector<8x192xf32>
    %391 = tpu.matmul %389, %390, %cst_184 {dimension_numbers = #tpu.dot_dimension_numbers<[1], [0], [0], [1], [0, 0, 1, 1], [], []>} : vector<8x16xbf16>, vector<16x192xbf16>, vector<8x192xf32> -> vector<8x192xf32>
    %c0_185 = arith.constant 0 : index
    %c0_186 = arith.constant 0 : index
    %392 = vector.load %arg6[%c0_185, %c0_186] : memref<1x192xf32, #tpu.memory_space<vmem>>, vector<1x192xf32>
    %393 = vector.broadcast %392 : vector<1x192xf32> to vector<8x192xf32>
    %394 = arith.addf %391, %393 : vector<8x192xf32>
    %395 = arith.truncf %303 : vector<8x64xf32> to vector<8x64xbf16>
    %c0_187 = arith.constant 0 : index
    %c0_188 = arith.constant 0 : index
    %396 = vector.load %arg5[%c0_187, %c0_188] : memref<64x192xbf16, #tpu.memory_space<vmem>>, vector<64x192xbf16>
    %cst_189 = arith.constant dense<0.000000e+00> : vector<8x192xf32>
    %397 = tpu.matmul %395, %396, %cst_189 {dimension_numbers = #tpu.dot_dimension_numbers<[1], [0], [0], [1], [0, 0, 1, 1], [], []>} : vector<8x64xbf16>, vector<64x192xbf16>, vector<8x192xf32> -> vector<8x192xf32>
    %c0_190 = arith.constant 0 : index
    %c0_191 = arith.constant 0 : index
    %398 = vector.load %arg7[%c0_190, %c0_191] : memref<1x192xf32, #tpu.memory_space<vmem>>, vector<1x192xf32>
    %399 = vector.broadcast %398 : vector<1x192xf32> to vector<8x192xf32>
    %400 = arith.addf %397, %399 : vector<8x192xf32>
    %401 = vector.extract_strided_slice %394 {offsets = [0, 0], sizes = [8, 64], strides = [1, 1]} : vector<8x192xf32> to vector<8x64xf32>
    %402 = vector.extract_strided_slice %400 {offsets = [0, 0], sizes = [8, 64], strides = [1, 1]} : vector<8x192xf32> to vector<8x64xf32>
    %403 = arith.addf %401, %402 : vector<8x64xf32>
    %404 = arith.negf %403 : vector<8x64xf32>
    %405 = math.exp %404 : vector<8x64xf32>
    %cst_192 = arith.constant 1.000000e+00 : f32
    %406 = vector.broadcast %cst_192 : f32 to vector<8x64xf32>
    %407 = arith.addf %406, %405 : vector<8x64xf32>
    %408 = arith.divf %406, %407 : vector<8x64xf32>
    %409 = vector.extract_strided_slice %394 {offsets = [0, 64], sizes = [8, 64], strides = [1, 1]} : vector<8x192xf32> to vector<8x64xf32>
    %410 = vector.extract_strided_slice %400 {offsets = [0, 64], sizes = [8, 64], strides = [1, 1]} : vector<8x192xf32> to vector<8x64xf32>
    %411 = arith.addf %409, %410 : vector<8x64xf32>
    %412 = arith.negf %411 : vector<8x64xf32>
    %413 = math.exp %412 : vector<8x64xf32>
    %cst_193 = arith.constant 1.000000e+00 : f32
    %414 = vector.broadcast %cst_193 : f32 to vector<8x64xf32>
    %415 = arith.addf %414, %413 : vector<8x64xf32>
    %416 = arith.divf %414, %415 : vector<8x64xf32>
    %417 = vector.extract_strided_slice %394 {offsets = [0, 128], sizes = [8, 64], strides = [1, 1]} : vector<8x192xf32> to vector<8x64xf32>
    %418 = vector.extract_strided_slice %400 {offsets = [0, 128], sizes = [8, 64], strides = [1, 1]} : vector<8x192xf32> to vector<8x64xf32>
    %419 = arith.mulf %408, %418 : vector<8x64xf32>
    %420 = arith.addf %417, %419 : vector<8x64xf32>
    %421 = math.tanh %420 : vector<8x64xf32>
    %cst_194 = arith.constant 1.000000e+00 : f32
    %422 = vector.broadcast %cst_194 : f32 to vector<8x64xf32>
    %423 = arith.subf %422, %416 : vector<8x64xf32>
    %424 = arith.mulf %423, %421 : vector<8x64xf32>
    %425 = arith.mulf %416, %303 : vector<8x64xf32>
    %426 = arith.addf %424, %425 : vector<8x64xf32>
    %427 = arith.truncf %426 : vector<8x64xf32> to vector<8x64xbf16>
    %c0_195 = arith.constant 0 : index
    %c0_196 = arith.constant 0 : index
    %428 = vector.load %arg8[%c0_195, %c0_196] : memref<64x192xbf16, #tpu.memory_space<vmem>>, vector<64x192xbf16>
    %cst_197 = arith.constant dense<0.000000e+00> : vector<8x192xf32>
    %429 = tpu.matmul %427, %428, %cst_197 {dimension_numbers = #tpu.dot_dimension_numbers<[1], [0], [0], [1], [0, 0, 1, 1], [], []>} : vector<8x64xbf16>, vector<64x192xbf16>, vector<8x192xf32> -> vector<8x192xf32>
    %c0_198 = arith.constant 0 : index
    %c0_199 = arith.constant 0 : index
    %430 = vector.load %arg10[%c0_198, %c0_199] : memref<1x192xf32, #tpu.memory_space<vmem>>, vector<1x192xf32>
    %431 = vector.broadcast %430 : vector<1x192xf32> to vector<8x192xf32>
    %432 = arith.addf %429, %431 : vector<8x192xf32>
    %433 = arith.truncf %341 : vector<8x64xf32> to vector<8x64xbf16>
    %c0_200 = arith.constant 0 : index
    %c0_201 = arith.constant 0 : index
    %434 = vector.load %arg9[%c0_200, %c0_201] : memref<64x192xbf16, #tpu.memory_space<vmem>>, vector<64x192xbf16>
    %cst_202 = arith.constant dense<0.000000e+00> : vector<8x192xf32>
    %435 = tpu.matmul %433, %434, %cst_202 {dimension_numbers = #tpu.dot_dimension_numbers<[1], [0], [0], [1], [0, 0, 1, 1], [], []>} : vector<8x64xbf16>, vector<64x192xbf16>, vector<8x192xf32> -> vector<8x192xf32>
    %c0_203 = arith.constant 0 : index
    %c0_204 = arith.constant 0 : index
    %436 = vector.load %arg11[%c0_203, %c0_204] : memref<1x192xf32, #tpu.memory_space<vmem>>, vector<1x192xf32>
    %437 = vector.broadcast %436 : vector<1x192xf32> to vector<8x192xf32>
    %438 = arith.addf %435, %437 : vector<8x192xf32>
    %439 = vector.extract_strided_slice %432 {offsets = [0, 0], sizes = [8, 64], strides = [1, 1]} : vector<8x192xf32> to vector<8x64xf32>
    %440 = vector.extract_strided_slice %438 {offsets = [0, 0], sizes = [8, 64], strides = [1, 1]} : vector<8x192xf32> to vector<8x64xf32>
    %441 = arith.addf %439, %440 : vector<8x64xf32>
    %442 = arith.negf %441 : vector<8x64xf32>
    %443 = math.exp %442 : vector<8x64xf32>
    %cst_205 = arith.constant 1.000000e+00 : f32
    %444 = vector.broadcast %cst_205 : f32 to vector<8x64xf32>
    %445 = arith.addf %444, %443 : vector<8x64xf32>
    %446 = arith.divf %444, %445 : vector<8x64xf32>
    %447 = vector.extract_strided_slice %432 {offsets = [0, 64], sizes = [8, 64], strides = [1, 1]} : vector<8x192xf32> to vector<8x64xf32>
    %448 = vector.extract_strided_slice %438 {offsets = [0, 64], sizes = [8, 64], strides = [1, 1]} : vector<8x192xf32> to vector<8x64xf32>
    %449 = arith.addf %447, %448 : vector<8x64xf32>
    %450 = arith.negf %449 : vector<8x64xf32>
    %451 = math.exp %450 : vector<8x64xf32>
    %cst_206 = arith.constant 1.000000e+00 : f32
    %452 = vector.broadcast %cst_206 : f32 to vector<8x64xf32>
    %453 = arith.addf %452, %451 : vector<8x64xf32>
    %454 = arith.divf %452, %453 : vector<8x64xf32>
    %455 = vector.extract_strided_slice %432 {offsets = [0, 128], sizes = [8, 64], strides = [1, 1]} : vector<8x192xf32> to vector<8x64xf32>
    %456 = vector.extract_strided_slice %438 {offsets = [0, 128], sizes = [8, 64], strides = [1, 1]} : vector<8x192xf32> to vector<8x64xf32>
    %457 = arith.mulf %446, %456 : vector<8x64xf32>
    %458 = arith.addf %455, %457 : vector<8x64xf32>
    %459 = math.tanh %458 : vector<8x64xf32>
    %cst_207 = arith.constant 1.000000e+00 : f32
    %460 = vector.broadcast %cst_207 : f32 to vector<8x64xf32>
    %461 = arith.subf %460, %454 : vector<8x64xf32>
    %462 = arith.mulf %461, %459 : vector<8x64xf32>
    %463 = arith.mulf %454, %341 : vector<8x64xf32>
    %464 = arith.addf %462, %463 : vector<8x64xf32>
    %465 = arith.truncf %464 : vector<8x64xf32> to vector<8x64xbf16>
    %c0_208 = arith.constant 0 : index
    %c0_209 = arith.constant 0 : index
    %466 = vector.load %arg12[%c0_208, %c0_209] : memref<64x128xbf16, #tpu.memory_space<vmem>>, vector<64x128xbf16>
    %cst_210 = arith.constant dense<0.000000e+00> : vector<8x128xf32>
    %467 = tpu.matmul %465, %466, %cst_210 {dimension_numbers = #tpu.dot_dimension_numbers<[1], [0], [0], [1], [0, 0, 1, 1], [], []>} : vector<8x64xbf16>, vector<64x128xbf16>, vector<8x128xf32> -> vector<8x128xf32>
    %c0_211 = arith.constant 0 : index
    %c0_212 = arith.constant 0 : index
    %468 = vector.load %arg13[%c0_211, %c0_212] : memref<1x128xf32, #tpu.memory_space<vmem>>, vector<1x128xf32>
    %469 = vector.broadcast %468 : vector<1x128xf32> to vector<8x128xf32>
    %470 = arith.addf %467, %469 : vector<8x128xf32>
    %471 = arith.truncf %470 : vector<8x128xf32> to vector<8x128xbf16>
    %c0_213 = arith.constant 0 : index
    %c0_214 = arith.constant 0 : index
    %472 = vector.load %arg14[%c0_213, %c0_214] : memref<128x256xbf16, #tpu.memory_space<vmem>>, vector<128x256xbf16>
    %cst_215 = arith.constant dense<0.000000e+00> : vector<8x256xf32>
    %473 = tpu.matmul %471, %472, %cst_215 {dimension_numbers = #tpu.dot_dimension_numbers<[1], [0], [0], [1], [0, 0, 1, 1], [], []>} : vector<8x128xbf16>, vector<128x256xbf16>, vector<8x256xf32> -> vector<8x256xf32>
    %c0_216 = arith.constant 0 : index
    %c0_217 = arith.constant 0 : index
    %474 = vector.load %arg15[%c0_216, %c0_217] : memref<1x256xf32, #tpu.memory_space<vmem>>, vector<1x256xf32>
    %475 = vector.broadcast %474 : vector<1x256xf32> to vector<8x256xf32>
    %476 = arith.addf %473, %475 : vector<8x256xf32>
    %477 = arith.truncf %476 : vector<8x256xf32> to vector<8x256xbf16>
    %c0_218 = arith.constant 0 : index
    %c0_219 = arith.constant 0 : index
    %478 = vector.load %arg16[%c0_218, %c0_219] : memref<256x128xbf16, #tpu.memory_space<vmem>>, vector<256x128xbf16>
    %cst_220 = arith.constant dense<0.000000e+00> : vector<8x128xf32>
    %479 = tpu.matmul %477, %478, %cst_220 {dimension_numbers = #tpu.dot_dimension_numbers<[1], [0], [0], [1], [0, 0, 1, 1], [], []>} : vector<8x256xbf16>, vector<256x128xbf16>, vector<8x128xf32> -> vector<8x128xf32>
    %c0_221 = arith.constant 0 : index
    %c0_222 = arith.constant 0 : index
    %480 = vector.load %arg17[%c0_221, %c0_222] : memref<1x128xf32, #tpu.memory_space<vmem>>, vector<1x128xf32>
    %481 = vector.broadcast %480 : vector<1x128xf32> to vector<8x128xf32>
    %482 = arith.addf %479, %481 : vector<8x128xf32>
    %c3_223 = arith.constant 3 : index
    %c0_224 = arith.constant 0 : index
    %c0_225 = arith.constant 0 : index
    %483 = vector.load %arg18[%c3_223, %c0_224, %c0_225] : memref<5x8x128xf32, #tpu.memory_space<vmem>>, vector<1x8x128xf32>
    %484 = vector.shape_cast %483 : vector<1x8x128xf32> to vector<8x128xf32>
    %485 = vector.shape_cast %482 : vector<8x128xf32> to vector<1x8x128xf32>
    tpu.vector_store %arg18[%c3_223, %c0_224, %c0_225], %485 {strides = array<i32>} : memref<5x8x128xf32, #tpu.memory_space<vmem>>, vector<1x8x128xf32>,
    %cst_226 = arith.constant dense<0xFF800000> : vector<8xf32>
    %486 = vector.multi_reduction <maximumf>, %482, %cst_226 [1] : vector<8x128xf32> to vector<8xf32>
    %487 = vector.shape_cast %486 : vector<8xf32> to vector<8x1xf32>
    %488 = vector.broadcast %487 : vector<8x1xf32> to vector<8x128xf32>
    %489 = arith.cmpf oeq, %482, %488 : vector<8x128xf32>
    %c2147483647_i32_227 = arith.constant 2147483647 : i32
    %490 = vector.broadcast %c2147483647_i32_227 : i32 to vector<8x128xi32>
    %491 = arith.select %489, %0, %490 : vector<8x128xi1>, vector<8x128xi32>
    %cst_228 = arith.constant dense<2147483647> : vector<8xi32>
    %492 = vector.multi_reduction <minsi>, %491, %cst_228 [1] : vector<8x128xi32> to vector<8xi32>
    %493 = vector.shape_cast %492 : vector<8xi32> to vector<8x1xi32>
    %494 = vector.broadcast %493 : vector<8x1xi32> to vector<8x128xi32>
    %495 = arith.cmpi eq, %0, %494 : vector<8x128xi32>
    %496 = arith.extui %495 : vector<8x128xi1> to vector<8x128xi32>
    %497 = arith.sitofp %496 : vector<8x128xi32> to vector<8x128xf32>
    %c4 = arith.constant 4 : index
    %c0_229 = arith.constant 0 : index
    %c0_230 = arith.constant 0 : index
    %498 = vector.load %arg0[%c4, %c0_229, %c0_230] : memref<5x1x1xf32, #tpu.memory_space<vmem>>, vector<1x1x1xf32>
    %499 = vector.shape_cast %498 : vector<1x1x1xf32> to vector<1x1xf32>
    %c4_231 = arith.constant 4 : index
    %c0_232 = arith.constant 0 : index
    %c0_233 = arith.constant 0 : index
    %500 = vector.load %arg1[%c4_231, %c0_232, %c0_233] : memref<5x8x128xf32, #tpu.memory_space<vmem>>, vector<1x8x128xf32>
    %501 = vector.shape_cast %500 : vector<1x8x128xf32> to vector<8x128xf32>
    %502 = vector.broadcast %499 : vector<1x1xf32> to vector<8x128xf32>
    %503 = arith.mulf %502, %501 : vector<8x128xf32>
    %cst_234 = arith.constant 1.000000e+00 : f32
    %504 = vector.broadcast %cst_234 : f32 to vector<1x1xf32>
    %505 = arith.subf %504, %499 : vector<1x1xf32>
    %506 = vector.broadcast %505 : vector<1x1xf32> to vector<8x128xf32>
    %507 = arith.mulf %506, %497 : vector<8x128xf32>
    %508 = arith.addf %503, %507 : vector<8x128xf32>
    %509 = arith.truncf %508 : vector<8x128xf32> to vector<8x128xbf16>
    %c0_235 = arith.constant 0 : index
    %c0_236 = arith.constant 0 : index
    %510 = vector.load %arg3[%c0_235, %c0_236] : memref<128x16xbf16, #tpu.memory_space<vmem>>, vector<128x16xbf16>
    %cst_237 = arith.constant dense<0.000000e+00> : vector<8x16xf32>
    %511 = tpu.matmul %509, %510, %cst_237 {dimension_numbers = #tpu.dot_dimension_numbers<[1], [0], [0], [1], [0, 0, 1, 1], [], []>} : vector<8x128xbf16>, vector<128x16xbf16>, vector<8x16xf32> -> vector<8x16xf32>
    %512 = arith.truncf %511 : vector<8x16xf32> to vector<8x16xbf16>
    %c0_238 = arith.constant 0 : index
    %c0_239 = arith.constant 0 : index
    %513 = vector.load %arg4[%c0_238, %c0_239] : memref<16x192xbf16, #tpu.memory_space<vmem>>, vector<16x192xbf16>
    %cst_240 = arith.constant dense<0.000000e+00> : vector<8x192xf32>
    %514 = tpu.matmul %512, %513, %cst_240 {dimension_numbers = #tpu.dot_dimension_numbers<[1], [0], [0], [1], [0, 0, 1, 1], [], []>} : vector<8x16xbf16>, vector<16x192xbf16>, vector<8x192xf32> -> vector<8x192xf32>
    %c0_241 = arith.constant 0 : index
    %c0_242 = arith.constant 0 : index
    %515 = vector.load %arg6[%c0_241, %c0_242] : memref<1x192xf32, #tpu.memory_space<vmem>>, vector<1x192xf32>
    %516 = vector.broadcast %515 : vector<1x192xf32> to vector<8x192xf32>
    %517 = arith.addf %514, %516 : vector<8x192xf32>
    %518 = arith.truncf %426 : vector<8x64xf32> to vector<8x64xbf16>
    %c0_243 = arith.constant 0 : index
    %c0_244 = arith.constant 0 : index
    %519 = vector.load %arg5[%c0_243, %c0_244] : memref<64x192xbf16, #tpu.memory_space<vmem>>, vector<64x192xbf16>
    %cst_245 = arith.constant dense<0.000000e+00> : vector<8x192xf32>
    %520 = tpu.matmul %518, %519, %cst_245 {dimension_numbers = #tpu.dot_dimension_numbers<[1], [0], [0], [1], [0, 0, 1, 1], [], []>} : vector<8x64xbf16>, vector<64x192xbf16>, vector<8x192xf32> -> vector<8x192xf32>
    %c0_246 = arith.constant 0 : index
    %c0_247 = arith.constant 0 : index
    %521 = vector.load %arg7[%c0_246, %c0_247] : memref<1x192xf32, #tpu.memory_space<vmem>>, vector<1x192xf32>
    %522 = vector.broadcast %521 : vector<1x192xf32> to vector<8x192xf32>
    %523 = arith.addf %520, %522 : vector<8x192xf32>
    %524 = vector.extract_strided_slice %517 {offsets = [0, 0], sizes = [8, 64], strides = [1, 1]} : vector<8x192xf32> to vector<8x64xf32>
    %525 = vector.extract_strided_slice %523 {offsets = [0, 0], sizes = [8, 64], strides = [1, 1]} : vector<8x192xf32> to vector<8x64xf32>
    %526 = arith.addf %524, %525 : vector<8x64xf32>
    %527 = arith.negf %526 : vector<8x64xf32>
    %528 = math.exp %527 : vector<8x64xf32>
    %cst_248 = arith.constant 1.000000e+00 : f32
    %529 = vector.broadcast %cst_248 : f32 to vector<8x64xf32>
    %530 = arith.addf %529, %528 : vector<8x64xf32>
    %531 = arith.divf %529, %530 : vector<8x64xf32>
    %532 = vector.extract_strided_slice %517 {offsets = [0, 64], sizes = [8, 64], strides = [1, 1]} : vector<8x192xf32> to vector<8x64xf32>
    %533 = vector.extract_strided_slice %523 {offsets = [0, 64], sizes = [8, 64], strides = [1, 1]} : vector<8x192xf32> to vector<8x64xf32>
    %534 = arith.addf %532, %533 : vector<8x64xf32>
    %535 = arith.negf %534 : vector<8x64xf32>
    %536 = math.exp %535 : vector<8x64xf32>
    %cst_249 = arith.constant 1.000000e+00 : f32
    %537 = vector.broadcast %cst_249 : f32 to vector<8x64xf32>
    %538 = arith.addf %537, %536 : vector<8x64xf32>
    %539 = arith.divf %537, %538 : vector<8x64xf32>
    %540 = vector.extract_strided_slice %517 {offsets = [0, 128], sizes = [8, 64], strides = [1, 1]} : vector<8x192xf32> to vector<8x64xf32>
    %541 = vector.extract_strided_slice %523 {offsets = [0, 128], sizes = [8, 64], strides = [1, 1]} : vector<8x192xf32> to vector<8x64xf32>
    %542 = arith.mulf %531, %541 : vector<8x64xf32>
    %543 = arith.addf %540, %542 : vector<8x64xf32>
    %544 = math.tanh %543 : vector<8x64xf32>
    %cst_250 = arith.constant 1.000000e+00 : f32
    %545 = vector.broadcast %cst_250 : f32 to vector<8x64xf32>
    %546 = arith.subf %545, %539 : vector<8x64xf32>
    %547 = arith.mulf %546, %544 : vector<8x64xf32>
    %548 = arith.mulf %539, %426 : vector<8x64xf32>
    %549 = arith.addf %547, %548 : vector<8x64xf32>
    %550 = arith.truncf %549 : vector<8x64xf32> to vector<8x64xbf16>
    %c0_251 = arith.constant 0 : index
    %c0_252 = arith.constant 0 : index
    %551 = vector.load %arg8[%c0_251, %c0_252] : memref<64x192xbf16, #tpu.memory_space<vmem>>, vector<64x192xbf16>
    %cst_253 = arith.constant dense<0.000000e+00> : vector<8x192xf32>
    %552 = tpu.matmul %550, %551, %cst_253 {dimension_numbers = #tpu.dot_dimension_numbers<[1], [0], [0], [1], [0, 0, 1, 1], [], []>} : vector<8x64xbf16>, vector<64x192xbf16>, vector<8x192xf32> -> vector<8x192xf32>
    %c0_254 = arith.constant 0 : index
    %c0_255 = arith.constant 0 : index
    %553 = vector.load %arg10[%c0_254, %c0_255] : memref<1x192xf32, #tpu.memory_space<vmem>>, vector<1x192xf32>
    %554 = vector.broadcast %553 : vector<1x192xf32> to vector<8x192xf32>
    %555 = arith.addf %552, %554 : vector<8x192xf32>
    %556 = arith.truncf %464 : vector<8x64xf32> to vector<8x64xbf16>
    %c0_256 = arith.constant 0 : index
    %c0_257 = arith.constant 0 : index
    %557 = vector.load %arg9[%c0_256, %c0_257] : memref<64x192xbf16, #tpu.memory_space<vmem>>, vector<64x192xbf16>
    %cst_258 = arith.constant dense<0.000000e+00> : vector<8x192xf32>
    %558 = tpu.matmul %556, %557, %cst_258 {dimension_numbers = #tpu.dot_dimension_numbers<[1], [0], [0], [1], [0, 0, 1, 1], [], []>} : vector<8x64xbf16>, vector<64x192xbf16>, vector<8x192xf32> -> vector<8x192xf32>
    %c0_259 = arith.constant 0 : index
    %c0_260 = arith.constant 0 : index
    %559 = vector.load %arg11[%c0_259, %c0_260] : memref<1x192xf32, #tpu.memory_space<vmem>>, vector<1x192xf32>
    %560 = vector.broadcast %559 : vector<1x192xf32> to vector<8x192xf32>
    %561 = arith.addf %558, %560 : vector<8x192xf32>
    %562 = vector.extract_strided_slice %555 {offsets = [0, 0], sizes = [8, 64], strides = [1, 1]} : vector<8x192xf32> to vector<8x64xf32>
    %563 = vector.extract_strided_slice %561 {offsets = [0, 0], sizes = [8, 64], strides = [1, 1]} : vector<8x192xf32> to vector<8x64xf32>
    %564 = arith.addf %562, %563 : vector<8x64xf32>
    %565 = arith.negf %564 : vector<8x64xf32>
    %566 = math.exp %565 : vector<8x64xf32>
    %cst_261 = arith.constant 1.000000e+00 : f32
    %567 = vector.broadcast %cst_261 : f32 to vector<8x64xf32>
    %568 = arith.addf %567, %566 : vector<8x64xf32>
    %569 = arith.divf %567, %568 : vector<8x64xf32>
    %570 = vector.extract_strided_slice %555 {offsets = [0, 64], sizes = [8, 64], strides = [1, 1]} : vector<8x192xf32> to vector<8x64xf32>
    %571 = vector.extract_strided_slice %561 {offsets = [0, 64], sizes = [8, 64], strides = [1, 1]} : vector<8x192xf32> to vector<8x64xf32>
    %572 = arith.addf %570, %571 : vector<8x64xf32>
    %573 = arith.negf %572 : vector<8x64xf32>
    %574 = math.exp %573 : vector<8x64xf32>
    %cst_262 = arith.constant 1.000000e+00 : f32
    %575 = vector.broadcast %cst_262 : f32 to vector<8x64xf32>
    %576 = arith.addf %575, %574 : vector<8x64xf32>
    %577 = arith.divf %575, %576 : vector<8x64xf32>
    %578 = vector.extract_strided_slice %555 {offsets = [0, 128], sizes = [8, 64], strides = [1, 1]} : vector<8x192xf32> to vector<8x64xf32>
    %579 = vector.extract_strided_slice %561 {offsets = [0, 128], sizes = [8, 64], strides = [1, 1]} : vector<8x192xf32> to vector<8x64xf32>
    %580 = arith.mulf %569, %579 : vector<8x64xf32>
    %581 = arith.addf %578, %580 : vector<8x64xf32>
    %582 = math.tanh %581 : vector<8x64xf32>
    %cst_263 = arith.constant 1.000000e+00 : f32
    %583 = vector.broadcast %cst_263 : f32 to vector<8x64xf32>
    %584 = arith.subf %583, %577 : vector<8x64xf32>
    %585 = arith.mulf %584, %582 : vector<8x64xf32>
    %586 = arith.mulf %577, %464 : vector<8x64xf32>
    %587 = arith.addf %585, %586 : vector<8x64xf32>
    %588 = arith.truncf %587 : vector<8x64xf32> to vector<8x64xbf16>
    %c0_264 = arith.constant 0 : index
    %c0_265 = arith.constant 0 : index
    %589 = vector.load %arg12[%c0_264, %c0_265] : memref<64x128xbf16, #tpu.memory_space<vmem>>, vector<64x128xbf16>
    %cst_266 = arith.constant dense<0.000000e+00> : vector<8x128xf32>
    %590 = tpu.matmul %588, %589, %cst_266 {dimension_numbers = #tpu.dot_dimension_numbers<[1], [0], [0], [1], [0, 0, 1, 1], [], []>} : vector<8x64xbf16>, vector<64x128xbf16>, vector<8x128xf32> -> vector<8x128xf32>
    %c0_267 = arith.constant 0 : index
    %c0_268 = arith.constant 0 : index
    %591 = vector.load %arg13[%c0_267, %c0_268] : memref<1x128xf32, #tpu.memory_space<vmem>>, vector<1x128xf32>
    %592 = vector.broadcast %591 : vector<1x128xf32> to vector<8x128xf32>
    %593 = arith.addf %590, %592 : vector<8x128xf32>
    %594 = arith.truncf %593 : vector<8x128xf32> to vector<8x128xbf16>
    %c0_269 = arith.constant 0 : index
    %c0_270 = arith.constant 0 : index
    %595 = vector.load %arg14[%c0_269, %c0_270] : memref<128x256xbf16, #tpu.memory_space<vmem>>, vector<128x256xbf16>
    %cst_271 = arith.constant dense<0.000000e+00> : vector<8x256xf32>
    %596 = tpu.matmul %594, %595, %cst_271 {dimension_numbers = #tpu.dot_dimension_numbers<[1], [0], [0], [1], [0, 0, 1, 1], [], []>} : vector<8x128xbf16>, vector<128x256xbf16>, vector<8x256xf32> -> vector<8x256xf32>
    %c0_272 = arith.constant 0 : index
    %c0_273 = arith.constant 0 : index
    %597 = vector.load %arg15[%c0_272, %c0_273] : memref<1x256xf32, #tpu.memory_space<vmem>>, vector<1x256xf32>
    %598 = vector.broadcast %597 : vector<1x256xf32> to vector<8x256xf32>
    %599 = arith.addf %596, %598 : vector<8x256xf32>
    %600 = arith.truncf %599 : vector<8x256xf32> to vector<8x256xbf16>
    %c0_274 = arith.constant 0 : index
    %c0_275 = arith.constant 0 : index
    %601 = vector.load %arg16[%c0_274, %c0_275] : memref<256x128xbf16, #tpu.memory_space<vmem>>, vector<256x128xbf16>
    %cst_276 = arith.constant dense<0.000000e+00> : vector<8x128xf32>
    %602 = tpu.matmul %600, %601, %cst_276 {dimension_numbers = #tpu.dot_dimension_numbers<[1], [0], [0], [1], [0, 0, 1, 1], [], []>} : vector<8x256xbf16>, vector<256x128xbf16>, vector<8x128xf32> -> vector<8x128xf32>
    %c0_277 = arith.constant 0 : index
    %c0_278 = arith.constant 0 : index
    %603 = vector.load %arg17[%c0_277, %c0_278] : memref<1x128xf32, #tpu.memory_space<vmem>>, vector<1x128xf32>
    %604 = vector.broadcast %603 : vector<1x128xf32> to vector<8x128xf32>
    %605 = arith.addf %602, %604 : vector<8x128xf32>
    %c4_279 = arith.constant 4 : index
    %c0_280 = arith.constant 0 : index
    %c0_281 = arith.constant 0 : index
    %606 = vector.load %arg18[%c4_279, %c0_280, %c0_281] : memref<5x8x128xf32, #tpu.memory_space<vmem>>, vector<1x8x128xf32>
    %607 = vector.shape_cast %606 : vector<1x8x128xf32> to vector<8x128xf32>
    %608 = vector.shape_cast %605 : vector<8x128xf32> to vector<1x8x128xf32>
    tpu.vector_store %arg18[%c4_279, %c0_280, %c0_281], %608 {strides = array<i32>} : memref<5x8x128xf32, #tpu.memory_space<vmem>>, vector<1x8x128xf32>,
    return
  }
}

module attributes {stable_mosaic.version = 11 : i64} {
  func.func @_encoder_kernel(%arg0: memref<64x16xf32, #tpu.memory_space<vmem>>, %arg1: memref<16x256xbf16, #tpu.memory_space<vmem>>, %arg2: memref<1x256xf32, #tpu.memory_space<vmem>>, %arg3: memref<32x96xbf16, #tpu.memory_space<vmem>>, %arg4: memref<1x96xf32, #tpu.memory_space<vmem>>, %arg5: memref<32x96xbf16, #tpu.memory_space<vmem>>, %arg6: memref<1x96xf32, #tpu.memory_space<vmem>>, %arg7: memref<64x256xbf16, #tpu.memory_space<vmem>>, %arg8: memref<1x256xf32, #tpu.memory_space<vmem>>, %arg9: memref<32x96xbf16, #tpu.memory_space<vmem>>, %arg10: memref<1x96xf32, #tpu.memory_space<vmem>>, %arg11: memref<32x96xbf16, #tpu.memory_space<vmem>>, %arg12: memref<1x96xf32, #tpu.memory_space<vmem>>, %arg13: memref<16x64xf32, #tpu.memory_space<vmem>>, %arg14: memref<64x64xf32, #tpu.memory_space<vmem>>, %arg15: memref<64x256xf32, #tpu.memory_space<vmem>>) attributes {dimension_semantics = [], scalar_prefetch = 0 : i64, scratch_operands = 2 : i64, tpu.core_type = #tpu.core_type<tc>} {
    %c0 = arith.constant 0 : index
    %c0_0 = arith.constant 0 : index
    %0 = vector.load %arg0[%c0, %c0_0] : memref<64x16xf32, #tpu.memory_space<vmem>>, vector<64x16xf32>
    %1 = arith.truncf %0 : vector<64x16xf32> to vector<64x16xbf16>
    %c0_1 = arith.constant 0 : index
    %c0_2 = arith.constant 0 : index
    %2 = vector.load %arg1[%c0_1, %c0_2] : memref<16x256xbf16, #tpu.memory_space<vmem>>, vector<16x256xbf16>
    %cst = arith.constant dense<0.000000e+00> : vector<64x256xf32>
    %3 = tpu.matmul %1, %2, %cst {dimension_numbers = #tpu.dot_dimension_numbers<[1], [0], [0], [1], [0, 0, 1, 1], [], []>} : vector<64x16xbf16>, vector<16x256xbf16>, vector<64x256xf32> -> vector<64x256xf32>
    %c0_3 = arith.constant 0 : index
    %c0_4 = arith.constant 0 : index
    %4 = vector.load %arg2[%c0_3, %c0_4] : memref<1x256xf32, #tpu.memory_space<vmem>>, vector<1x256xf32>
    %5 = vector.broadcast %4 : vector<1x256xf32> to vector<64x256xf32>
    %6 = arith.addf %3, %5 : vector<64x256xf32>
    %c0_5 = arith.constant 0 : index
    %c0_6 = arith.constant 0 : index
    %7 = vector.load %arg15[%c0_5, %c0_6] : memref<64x256xf32, #tpu.memory_space<vmem>>, vector<64x256xf32>
    tpu.vector_store %arg15[%c0_5, %c0_6], %6 {strides = array<i32>} : memref<64x256xf32, #tpu.memory_space<vmem>>, vector<64x256xf32>,
    %c0_7 = arith.constant 0 : index
    %c0_8 = arith.constant 0 : index
    %8 = vector.load %arg4[%c0_7, %c0_8] : memref<1x96xf32, #tpu.memory_space<vmem>>, vector<1x96xf32>
    %9 = vector.shape_cast %8 : vector<1x96xf32> to vector<1x96xf32>
    %10 = vector.broadcast %9 : vector<1x96xf32> to vector<8x96xf32>
    %c0_9 = arith.constant 0 : index
    %c0_10 = arith.constant 0 : index
    %11 = vector.load %arg6[%c0_9, %c0_10] : memref<1x96xf32, #tpu.memory_space<vmem>>, vector<1x96xf32>
    %12 = vector.shape_cast %11 : vector<1x96xf32> to vector<1x96xf32>
    %13 = vector.broadcast %12 : vector<1x96xf32> to vector<8x96xf32>
    %cst_11 = arith.constant 0.000000e+00 : f32
    %14 = vector.broadcast %cst_11 : f32 to vector<8x32xf32>
    %c0_12 = arith.constant 0 : index
    %c0_13 = arith.constant 0 : index
    %15 = vector.load %arg15[%c0_12, %c0_13] : memref<64x256xf32, #tpu.memory_space<vmem>>, vector<8x96xf32>
    %16 = arith.truncf %14 : vector<8x32xf32> to vector<8x32xbf16>
    %c0_14 = arith.constant 0 : index
    %c0_15 = arith.constant 0 : index
    %17 = vector.load %arg3[%c0_14, %c0_15] : memref<32x96xbf16, #tpu.memory_space<vmem>>, vector<32x96xbf16>
    %cst_16 = arith.constant dense<0.000000e+00> : vector<8x96xf32>
    %18 = tpu.matmul %16, %17, %cst_16 {dimension_numbers = #tpu.dot_dimension_numbers<[1], [0], [0], [1], [0, 0, 1, 1], [], []>} : vector<8x32xbf16>, vector<32x96xbf16>, vector<8x96xf32> -> vector<8x96xf32>
    %19 = arith.addf %18, %10 : vector<8x96xf32>
    %20 = vector.extract_strided_slice %15 {offsets = [0, 0], sizes = [8, 32], strides = [1, 1]} : vector<8x96xf32> to vector<8x32xf32>
    %21 = vector.extract_strided_slice %19 {offsets = [0, 0], sizes = [8, 32], strides = [1, 1]} : vector<8x96xf32> to vector<8x32xf32>
    %22 = arith.addf %20, %21 : vector<8x32xf32>
    %23 = arith.negf %22 : vector<8x32xf32>
    %24 = math.exp %23 : vector<8x32xf32>
    %cst_17 = arith.constant 1.000000e+00 : f32
    %25 = vector.broadcast %cst_17 : f32 to vector<8x32xf32>
    %26 = arith.addf %25, %24 : vector<8x32xf32>
    %27 = arith.divf %25, %26 : vector<8x32xf32>
    %28 = vector.extract_strided_slice %15 {offsets = [0, 32], sizes = [8, 32], strides = [1, 1]} : vector<8x96xf32> to vector<8x32xf32>
    %29 = vector.extract_strided_slice %19 {offsets = [0, 32], sizes = [8, 32], strides = [1, 1]} : vector<8x96xf32> to vector<8x32xf32>
    %30 = arith.addf %28, %29 : vector<8x32xf32>
    %31 = arith.negf %30 : vector<8x32xf32>
    %32 = math.exp %31 : vector<8x32xf32>
    %cst_18 = arith.constant 1.000000e+00 : f32
    %33 = vector.broadcast %cst_18 : f32 to vector<8x32xf32>
    %34 = arith.addf %33, %32 : vector<8x32xf32>
    %35 = arith.divf %33, %34 : vector<8x32xf32>
    %36 = vector.extract_strided_slice %15 {offsets = [0, 64], sizes = [8, 32], strides = [1, 1]} : vector<8x96xf32> to vector<8x32xf32>
    %37 = vector.extract_strided_slice %19 {offsets = [0, 64], sizes = [8, 32], strides = [1, 1]} : vector<8x96xf32> to vector<8x32xf32>
    %38 = arith.mulf %27, %37 : vector<8x32xf32>
    %39 = arith.addf %36, %38 : vector<8x32xf32>
    %40 = math.tanh %39 : vector<8x32xf32>
    %cst_19 = arith.constant 1.000000e+00 : f32
    %41 = vector.broadcast %cst_19 : f32 to vector<8x32xf32>
    %42 = arith.subf %41, %35 : vector<8x32xf32>
    %43 = arith.mulf %42, %40 : vector<8x32xf32>
    %44 = arith.mulf %35, %14 : vector<8x32xf32>
    %45 = arith.addf %43, %44 : vector<8x32xf32>
    %c0_20 = arith.constant 0 : index
    %c0_21 = arith.constant 0 : index
    %46 = vector.load %arg14[%c0_20, %c0_21] : memref<64x64xf32, #tpu.memory_space<vmem>>, vector<8x32xf32>
    tpu.vector_store %arg14[%c0_20, %c0_21], %45 {strides = array<i32>} : memref<64x64xf32, #tpu.memory_space<vmem>>, vector<8x32xf32>,
    %c8 = arith.constant 8 : index
    %c0_22 = arith.constant 0 : index
    %47 = vector.load %arg15[%c8, %c0_22] : memref<64x256xf32, #tpu.memory_space<vmem>>, vector<8x96xf32>
    %48 = arith.truncf %45 : vector<8x32xf32> to vector<8x32xbf16>
    %c0_23 = arith.constant 0 : index
    %c0_24 = arith.constant 0 : index
    %49 = vector.load %arg3[%c0_23, %c0_24] : memref<32x96xbf16, #tpu.memory_space<vmem>>, vector<32x96xbf16>
    %cst_25 = arith.constant dense<0.000000e+00> : vector<8x96xf32>
    %50 = tpu.matmul %48, %49, %cst_25 {dimension_numbers = #tpu.dot_dimension_numbers<[1], [0], [0], [1], [0, 0, 1, 1], [], []>} : vector<8x32xbf16>, vector<32x96xbf16>, vector<8x96xf32> -> vector<8x96xf32>
    %51 = arith.addf %50, %10 : vector<8x96xf32>
    %52 = vector.extract_strided_slice %47 {offsets = [0, 0], sizes = [8, 32], strides = [1, 1]} : vector<8x96xf32> to vector<8x32xf32>
    %53 = vector.extract_strided_slice %51 {offsets = [0, 0], sizes = [8, 32], strides = [1, 1]} : vector<8x96xf32> to vector<8x32xf32>
    %54 = arith.addf %52, %53 : vector<8x32xf32>
    %55 = arith.negf %54 : vector<8x32xf32>
    %56 = math.exp %55 : vector<8x32xf32>
    %cst_26 = arith.constant 1.000000e+00 : f32
    %57 = vector.broadcast %cst_26 : f32 to vector<8x32xf32>
    %58 = arith.addf %57, %56 : vector<8x32xf32>
    %59 = arith.divf %57, %58 : vector<8x32xf32>
    %60 = vector.extract_strided_slice %47 {offsets = [0, 32], sizes = [8, 32], strides = [1, 1]} : vector<8x96xf32> to vector<8x32xf32>
    %61 = vector.extract_strided_slice %51 {offsets = [0, 32], sizes = [8, 32], strides = [1, 1]} : vector<8x96xf32> to vector<8x32xf32>
    %62 = arith.addf %60, %61 : vector<8x32xf32>
    %63 = arith.negf %62 : vector<8x32xf32>
    %64 = math.exp %63 : vector<8x32xf32>
    %cst_27 = arith.constant 1.000000e+00 : f32
    %65 = vector.broadcast %cst_27 : f32 to vector<8x32xf32>
    %66 = arith.addf %65, %64 : vector<8x32xf32>
    %67 = arith.divf %65, %66 : vector<8x32xf32>
    %68 = vector.extract_strided_slice %47 {offsets = [0, 64], sizes = [8, 32], strides = [1, 1]} : vector<8x96xf32> to vector<8x32xf32>
    %69 = vector.extract_strided_slice %51 {offsets = [0, 64], sizes = [8, 32], strides = [1, 1]} : vector<8x96xf32> to vector<8x32xf32>
    %70 = arith.mulf %59, %69 : vector<8x32xf32>
    %71 = arith.addf %68, %70 : vector<8x32xf32>
    %72 = math.tanh %71 : vector<8x32xf32>
    %cst_28 = arith.constant 1.000000e+00 : f32
    %73 = vector.broadcast %cst_28 : f32 to vector<8x32xf32>
    %74 = arith.subf %73, %67 : vector<8x32xf32>
    %75 = arith.mulf %74, %72 : vector<8x32xf32>
    %76 = arith.mulf %67, %45 : vector<8x32xf32>
    %77 = arith.addf %75, %76 : vector<8x32xf32>
    %c8_29 = arith.constant 8 : index
    %c0_30 = arith.constant 0 : index
    %78 = vector.load %arg14[%c8_29, %c0_30] : memref<64x64xf32, #tpu.memory_space<vmem>>, vector<8x32xf32>
    tpu.vector_store %arg14[%c8_29, %c0_30], %77 {strides = array<i32>} : memref<64x64xf32, #tpu.memory_space<vmem>>, vector<8x32xf32>,
    %c16 = arith.constant 16 : index
    %c0_31 = arith.constant 0 : index
    %79 = vector.load %arg15[%c16, %c0_31] : memref<64x256xf32, #tpu.memory_space<vmem>>, vector<8x96xf32>
    %80 = arith.truncf %77 : vector<8x32xf32> to vector<8x32xbf16>
    %c0_32 = arith.constant 0 : index
    %c0_33 = arith.constant 0 : index
    %81 = vector.load %arg3[%c0_32, %c0_33] : memref<32x96xbf16, #tpu.memory_space<vmem>>, vector<32x96xbf16>
    %cst_34 = arith.constant dense<0.000000e+00> : vector<8x96xf32>
    %82 = tpu.matmul %80, %81, %cst_34 {dimension_numbers = #tpu.dot_dimension_numbers<[1], [0], [0], [1], [0, 0, 1, 1], [], []>} : vector<8x32xbf16>, vector<32x96xbf16>, vector<8x96xf32> -> vector<8x96xf32>
    %83 = arith.addf %82, %10 : vector<8x96xf32>
    %84 = vector.extract_strided_slice %79 {offsets = [0, 0], sizes = [8, 32], strides = [1, 1]} : vector<8x96xf32> to vector<8x32xf32>
    %85 = vector.extract_strided_slice %83 {offsets = [0, 0], sizes = [8, 32], strides = [1, 1]} : vector<8x96xf32> to vector<8x32xf32>
    %86 = arith.addf %84, %85 : vector<8x32xf32>
    %87 = arith.negf %86 : vector<8x32xf32>
    %88 = math.exp %87 : vector<8x32xf32>
    %cst_35 = arith.constant 1.000000e+00 : f32
    %89 = vector.broadcast %cst_35 : f32 to vector<8x32xf32>
    %90 = arith.addf %89, %88 : vector<8x32xf32>
    %91 = arith.divf %89, %90 : vector<8x32xf32>
    %92 = vector.extract_strided_slice %79 {offsets = [0, 32], sizes = [8, 32], strides = [1, 1]} : vector<8x96xf32> to vector<8x32xf32>
    %93 = vector.extract_strided_slice %83 {offsets = [0, 32], sizes = [8, 32], strides = [1, 1]} : vector<8x96xf32> to vector<8x32xf32>
    %94 = arith.addf %92, %93 : vector<8x32xf32>
    %95 = arith.negf %94 : vector<8x32xf32>
    %96 = math.exp %95 : vector<8x32xf32>
    %cst_36 = arith.constant 1.000000e+00 : f32
    %97 = vector.broadcast %cst_36 : f32 to vector<8x32xf32>
    %98 = arith.addf %97, %96 : vector<8x32xf32>
    %99 = arith.divf %97, %98 : vector<8x32xf32>
    %100 = vector.extract_strided_slice %79 {offsets = [0, 64], sizes = [8, 32], strides = [1, 1]} : vector<8x96xf32> to vector<8x32xf32>
    %101 = vector.extract_strided_slice %83 {offsets = [0, 64], sizes = [8, 32], strides = [1, 1]} : vector<8x96xf32> to vector<8x32xf32>
    %102 = arith.mulf %91, %101 : vector<8x32xf32>
    %103 = arith.addf %100, %102 : vector<8x32xf32>
    %104 = math.tanh %103 : vector<8x32xf32>
    %cst_37 = arith.constant 1.000000e+00 : f32
    %105 = vector.broadcast %cst_37 : f32 to vector<8x32xf32>
    %106 = arith.subf %105, %99 : vector<8x32xf32>
    %107 = arith.mulf %106, %104 : vector<8x32xf32>
    %108 = arith.mulf %99, %77 : vector<8x32xf32>
    %109 = arith.addf %107, %108 : vector<8x32xf32>
    %c16_38 = arith.constant 16 : index
    %c0_39 = arith.constant 0 : index
    %110 = vector.load %arg14[%c16_38, %c0_39] : memref<64x64xf32, #tpu.memory_space<vmem>>, vector<8x32xf32>
    tpu.vector_store %arg14[%c16_38, %c0_39], %109 {strides = array<i32>} : memref<64x64xf32, #tpu.memory_space<vmem>>, vector<8x32xf32>,
    %c24 = arith.constant 24 : index
    %c0_40 = arith.constant 0 : index
    %111 = vector.load %arg15[%c24, %c0_40] : memref<64x256xf32, #tpu.memory_space<vmem>>, vector<8x96xf32>
    %112 = arith.truncf %109 : vector<8x32xf32> to vector<8x32xbf16>
    %c0_41 = arith.constant 0 : index
    %c0_42 = arith.constant 0 : index
    %113 = vector.load %arg3[%c0_41, %c0_42] : memref<32x96xbf16, #tpu.memory_space<vmem>>, vector<32x96xbf16>
    %cst_43 = arith.constant dense<0.000000e+00> : vector<8x96xf32>
    %114 = tpu.matmul %112, %113, %cst_43 {dimension_numbers = #tpu.dot_dimension_numbers<[1], [0], [0], [1], [0, 0, 1, 1], [], []>} : vector<8x32xbf16>, vector<32x96xbf16>, vector<8x96xf32> -> vector<8x96xf32>
    %115 = arith.addf %114, %10 : vector<8x96xf32>
    %116 = vector.extract_strided_slice %111 {offsets = [0, 0], sizes = [8, 32], strides = [1, 1]} : vector<8x96xf32> to vector<8x32xf32>
    %117 = vector.extract_strided_slice %115 {offsets = [0, 0], sizes = [8, 32], strides = [1, 1]} : vector<8x96xf32> to vector<8x32xf32>
    %118 = arith.addf %116, %117 : vector<8x32xf32>
    %119 = arith.negf %118 : vector<8x32xf32>
    %120 = math.exp %119 : vector<8x32xf32>
    %cst_44 = arith.constant 1.000000e+00 : f32
    %121 = vector.broadcast %cst_44 : f32 to vector<8x32xf32>
    %122 = arith.addf %121, %120 : vector<8x32xf32>
    %123 = arith.divf %121, %122 : vector<8x32xf32>
    %124 = vector.extract_strided_slice %111 {offsets = [0, 32], sizes = [8, 32], strides = [1, 1]} : vector<8x96xf32> to vector<8x32xf32>
    %125 = vector.extract_strided_slice %115 {offsets = [0, 32], sizes = [8, 32], strides = [1, 1]} : vector<8x96xf32> to vector<8x32xf32>
    %126 = arith.addf %124, %125 : vector<8x32xf32>
    %127 = arith.negf %126 : vector<8x32xf32>
    %128 = math.exp %127 : vector<8x32xf32>
    %cst_45 = arith.constant 1.000000e+00 : f32
    %129 = vector.broadcast %cst_45 : f32 to vector<8x32xf32>
    %130 = arith.addf %129, %128 : vector<8x32xf32>
    %131 = arith.divf %129, %130 : vector<8x32xf32>
    %132 = vector.extract_strided_slice %111 {offsets = [0, 64], sizes = [8, 32], strides = [1, 1]} : vector<8x96xf32> to vector<8x32xf32>
    %133 = vector.extract_strided_slice %115 {offsets = [0, 64], sizes = [8, 32], strides = [1, 1]} : vector<8x96xf32> to vector<8x32xf32>
    %134 = arith.mulf %123, %133 : vector<8x32xf32>
    %135 = arith.addf %132, %134 : vector<8x32xf32>
    %136 = math.tanh %135 : vector<8x32xf32>
    %cst_46 = arith.constant 1.000000e+00 : f32
    %137 = vector.broadcast %cst_46 : f32 to vector<8x32xf32>
    %138 = arith.subf %137, %131 : vector<8x32xf32>
    %139 = arith.mulf %138, %136 : vector<8x32xf32>
    %140 = arith.mulf %131, %109 : vector<8x32xf32>
    %141 = arith.addf %139, %140 : vector<8x32xf32>
    %c24_47 = arith.constant 24 : index
    %c0_48 = arith.constant 0 : index
    %142 = vector.load %arg14[%c24_47, %c0_48] : memref<64x64xf32, #tpu.memory_space<vmem>>, vector<8x32xf32>
    tpu.vector_store %arg14[%c24_47, %c0_48], %141 {strides = array<i32>} : memref<64x64xf32, #tpu.memory_space<vmem>>, vector<8x32xf32>,
    %c32 = arith.constant 32 : index
    %c0_49 = arith.constant 0 : index
    %143 = vector.load %arg15[%c32, %c0_49] : memref<64x256xf32, #tpu.memory_space<vmem>>, vector<8x96xf32>
    %144 = arith.truncf %141 : vector<8x32xf32> to vector<8x32xbf16>
    %c0_50 = arith.constant 0 : index
    %c0_51 = arith.constant 0 : index
    %145 = vector.load %arg3[%c0_50, %c0_51] : memref<32x96xbf16, #tpu.memory_space<vmem>>, vector<32x96xbf16>
    %cst_52 = arith.constant dense<0.000000e+00> : vector<8x96xf32>
    %146 = tpu.matmul %144, %145, %cst_52 {dimension_numbers = #tpu.dot_dimension_numbers<[1], [0], [0], [1], [0, 0, 1, 1], [], []>} : vector<8x32xbf16>, vector<32x96xbf16>, vector<8x96xf32> -> vector<8x96xf32>
    %147 = arith.addf %146, %10 : vector<8x96xf32>
    %148 = vector.extract_strided_slice %143 {offsets = [0, 0], sizes = [8, 32], strides = [1, 1]} : vector<8x96xf32> to vector<8x32xf32>
    %149 = vector.extract_strided_slice %147 {offsets = [0, 0], sizes = [8, 32], strides = [1, 1]} : vector<8x96xf32> to vector<8x32xf32>
    %150 = arith.addf %148, %149 : vector<8x32xf32>
    %151 = arith.negf %150 : vector<8x32xf32>
    %152 = math.exp %151 : vector<8x32xf32>
    %cst_53 = arith.constant 1.000000e+00 : f32
    %153 = vector.broadcast %cst_53 : f32 to vector<8x32xf32>
    %154 = arith.addf %153, %152 : vector<8x32xf32>
    %155 = arith.divf %153, %154 : vector<8x32xf32>
    %156 = vector.extract_strided_slice %143 {offsets = [0, 32], sizes = [8, 32], strides = [1, 1]} : vector<8x96xf32> to vector<8x32xf32>
    %157 = vector.extract_strided_slice %147 {offsets = [0, 32], sizes = [8, 32], strides = [1, 1]} : vector<8x96xf32> to vector<8x32xf32>
    %158 = arith.addf %156, %157 : vector<8x32xf32>
    %159 = arith.negf %158 : vector<8x32xf32>
    %160 = math.exp %159 : vector<8x32xf32>
    %cst_54 = arith.constant 1.000000e+00 : f32
    %161 = vector.broadcast %cst_54 : f32 to vector<8x32xf32>
    %162 = arith.addf %161, %160 : vector<8x32xf32>
    %163 = arith.divf %161, %162 : vector<8x32xf32>
    %164 = vector.extract_strided_slice %143 {offsets = [0, 64], sizes = [8, 32], strides = [1, 1]} : vector<8x96xf32> to vector<8x32xf32>
    %165 = vector.extract_strided_slice %147 {offsets = [0, 64], sizes = [8, 32], strides = [1, 1]} : vector<8x96xf32> to vector<8x32xf32>
    %166 = arith.mulf %155, %165 : vector<8x32xf32>
    %167 = arith.addf %164, %166 : vector<8x32xf32>
    %168 = math.tanh %167 : vector<8x32xf32>
    %cst_55 = arith.constant 1.000000e+00 : f32
    %169 = vector.broadcast %cst_55 : f32 to vector<8x32xf32>
    %170 = arith.subf %169, %163 : vector<8x32xf32>
    %171 = arith.mulf %170, %168 : vector<8x32xf32>
    %172 = arith.mulf %163, %141 : vector<8x32xf32>
    %173 = arith.addf %171, %172 : vector<8x32xf32>
    %c32_56 = arith.constant 32 : index
    %c0_57 = arith.constant 0 : index
    %174 = vector.load %arg14[%c32_56, %c0_57] : memref<64x64xf32, #tpu.memory_space<vmem>>, vector<8x32xf32>
    tpu.vector_store %arg14[%c32_56, %c0_57], %173 {strides = array<i32>} : memref<64x64xf32, #tpu.memory_space<vmem>>, vector<8x32xf32>,
    %c40 = arith.constant 40 : index
    %c0_58 = arith.constant 0 : index
    %175 = vector.load %arg15[%c40, %c0_58] : memref<64x256xf32, #tpu.memory_space<vmem>>, vector<8x96xf32>
    %176 = arith.truncf %173 : vector<8x32xf32> to vector<8x32xbf16>
    %c0_59 = arith.constant 0 : index
    %c0_60 = arith.constant 0 : index
    %177 = vector.load %arg3[%c0_59, %c0_60] : memref<32x96xbf16, #tpu.memory_space<vmem>>, vector<32x96xbf16>
    %cst_61 = arith.constant dense<0.000000e+00> : vector<8x96xf32>
    %178 = tpu.matmul %176, %177, %cst_61 {dimension_numbers = #tpu.dot_dimension_numbers<[1], [0], [0], [1], [0, 0, 1, 1], [], []>} : vector<8x32xbf16>, vector<32x96xbf16>, vector<8x96xf32> -> vector<8x96xf32>
    %179 = arith.addf %178, %10 : vector<8x96xf32>
    %180 = vector.extract_strided_slice %175 {offsets = [0, 0], sizes = [8, 32], strides = [1, 1]} : vector<8x96xf32> to vector<8x32xf32>
    %181 = vector.extract_strided_slice %179 {offsets = [0, 0], sizes = [8, 32], strides = [1, 1]} : vector<8x96xf32> to vector<8x32xf32>
    %182 = arith.addf %180, %181 : vector<8x32xf32>
    %183 = arith.negf %182 : vector<8x32xf32>
    %184 = math.exp %183 : vector<8x32xf32>
    %cst_62 = arith.constant 1.000000e+00 : f32
    %185 = vector.broadcast %cst_62 : f32 to vector<8x32xf32>
    %186 = arith.addf %185, %184 : vector<8x32xf32>
    %187 = arith.divf %185, %186 : vector<8x32xf32>
    %188 = vector.extract_strided_slice %175 {offsets = [0, 32], sizes = [8, 32], strides = [1, 1]} : vector<8x96xf32> to vector<8x32xf32>
    %189 = vector.extract_strided_slice %179 {offsets = [0, 32], sizes = [8, 32], strides = [1, 1]} : vector<8x96xf32> to vector<8x32xf32>
    %190 = arith.addf %188, %189 : vector<8x32xf32>
    %191 = arith.negf %190 : vector<8x32xf32>
    %192 = math.exp %191 : vector<8x32xf32>
    %cst_63 = arith.constant 1.000000e+00 : f32
    %193 = vector.broadcast %cst_63 : f32 to vector<8x32xf32>
    %194 = arith.addf %193, %192 : vector<8x32xf32>
    %195 = arith.divf %193, %194 : vector<8x32xf32>
    %196 = vector.extract_strided_slice %175 {offsets = [0, 64], sizes = [8, 32], strides = [1, 1]} : vector<8x96xf32> to vector<8x32xf32>
    %197 = vector.extract_strided_slice %179 {offsets = [0, 64], sizes = [8, 32], strides = [1, 1]} : vector<8x96xf32> to vector<8x32xf32>
    %198 = arith.mulf %187, %197 : vector<8x32xf32>
    %199 = arith.addf %196, %198 : vector<8x32xf32>
    %200 = math.tanh %199 : vector<8x32xf32>
    %cst_64 = arith.constant 1.000000e+00 : f32
    %201 = vector.broadcast %cst_64 : f32 to vector<8x32xf32>
    %202 = arith.subf %201, %195 : vector<8x32xf32>
    %203 = arith.mulf %202, %200 : vector<8x32xf32>
    %204 = arith.mulf %195, %173 : vector<8x32xf32>
    %205 = arith.addf %203, %204 : vector<8x32xf32>
    %c40_65 = arith.constant 40 : index
    %c0_66 = arith.constant 0 : index
    %206 = vector.load %arg14[%c40_65, %c0_66] : memref<64x64xf32, #tpu.memory_space<vmem>>, vector<8x32xf32>
    tpu.vector_store %arg14[%c40_65, %c0_66], %205 {strides = array<i32>} : memref<64x64xf32, #tpu.memory_space<vmem>>, vector<8x32xf32>,
    %c48 = arith.constant 48 : index
    %c0_67 = arith.constant 0 : index
    %207 = vector.load %arg15[%c48, %c0_67] : memref<64x256xf32, #tpu.memory_space<vmem>>, vector<8x96xf32>
    %208 = arith.truncf %205 : vector<8x32xf32> to vector<8x32xbf16>
    %c0_68 = arith.constant 0 : index
    %c0_69 = arith.constant 0 : index
    %209 = vector.load %arg3[%c0_68, %c0_69] : memref<32x96xbf16, #tpu.memory_space<vmem>>, vector<32x96xbf16>
    %cst_70 = arith.constant dense<0.000000e+00> : vector<8x96xf32>
    %210 = tpu.matmul %208, %209, %cst_70 {dimension_numbers = #tpu.dot_dimension_numbers<[1], [0], [0], [1], [0, 0, 1, 1], [], []>} : vector<8x32xbf16>, vector<32x96xbf16>, vector<8x96xf32> -> vector<8x96xf32>
    %211 = arith.addf %210, %10 : vector<8x96xf32>
    %212 = vector.extract_strided_slice %207 {offsets = [0, 0], sizes = [8, 32], strides = [1, 1]} : vector<8x96xf32> to vector<8x32xf32>
    %213 = vector.extract_strided_slice %211 {offsets = [0, 0], sizes = [8, 32], strides = [1, 1]} : vector<8x96xf32> to vector<8x32xf32>
    %214 = arith.addf %212, %213 : vector<8x32xf32>
    %215 = arith.negf %214 : vector<8x32xf32>
    %216 = math.exp %215 : vector<8x32xf32>
    %cst_71 = arith.constant 1.000000e+00 : f32
    %217 = vector.broadcast %cst_71 : f32 to vector<8x32xf32>
    %218 = arith.addf %217, %216 : vector<8x32xf32>
    %219 = arith.divf %217, %218 : vector<8x32xf32>
    %220 = vector.extract_strided_slice %207 {offsets = [0, 32], sizes = [8, 32], strides = [1, 1]} : vector<8x96xf32> to vector<8x32xf32>
    %221 = vector.extract_strided_slice %211 {offsets = [0, 32], sizes = [8, 32], strides = [1, 1]} : vector<8x96xf32> to vector<8x32xf32>
    %222 = arith.addf %220, %221 : vector<8x32xf32>
    %223 = arith.negf %222 : vector<8x32xf32>
    %224 = math.exp %223 : vector<8x32xf32>
    %cst_72 = arith.constant 1.000000e+00 : f32
    %225 = vector.broadcast %cst_72 : f32 to vector<8x32xf32>
    %226 = arith.addf %225, %224 : vector<8x32xf32>
    %227 = arith.divf %225, %226 : vector<8x32xf32>
    %228 = vector.extract_strided_slice %207 {offsets = [0, 64], sizes = [8, 32], strides = [1, 1]} : vector<8x96xf32> to vector<8x32xf32>
    %229 = vector.extract_strided_slice %211 {offsets = [0, 64], sizes = [8, 32], strides = [1, 1]} : vector<8x96xf32> to vector<8x32xf32>
    %230 = arith.mulf %219, %229 : vector<8x32xf32>
    %231 = arith.addf %228, %230 : vector<8x32xf32>
    %232 = math.tanh %231 : vector<8x32xf32>
    %cst_73 = arith.constant 1.000000e+00 : f32
    %233 = vector.broadcast %cst_73 : f32 to vector<8x32xf32>
    %234 = arith.subf %233, %227 : vector<8x32xf32>
    %235 = arith.mulf %234, %232 : vector<8x32xf32>
    %236 = arith.mulf %227, %205 : vector<8x32xf32>
    %237 = arith.addf %235, %236 : vector<8x32xf32>
    %c48_74 = arith.constant 48 : index
    %c0_75 = arith.constant 0 : index
    %238 = vector.load %arg14[%c48_74, %c0_75] : memref<64x64xf32, #tpu.memory_space<vmem>>, vector<8x32xf32>
    tpu.vector_store %arg14[%c48_74, %c0_75], %237 {strides = array<i32>} : memref<64x64xf32, #tpu.memory_space<vmem>>, vector<8x32xf32>,
    %c56 = arith.constant 56 : index
    %c0_76 = arith.constant 0 : index
    %239 = vector.load %arg15[%c56, %c0_76] : memref<64x256xf32, #tpu.memory_space<vmem>>, vector<8x96xf32>
    %240 = arith.truncf %237 : vector<8x32xf32> to vector<8x32xbf16>
    %c0_77 = arith.constant 0 : index
    %c0_78 = arith.constant 0 : index
    %241 = vector.load %arg3[%c0_77, %c0_78] : memref<32x96xbf16, #tpu.memory_space<vmem>>, vector<32x96xbf16>
    %cst_79 = arith.constant dense<0.000000e+00> : vector<8x96xf32>
    %242 = tpu.matmul %240, %241, %cst_79 {dimension_numbers = #tpu.dot_dimension_numbers<[1], [0], [0], [1], [0, 0, 1, 1], [], []>} : vector<8x32xbf16>, vector<32x96xbf16>, vector<8x96xf32> -> vector<8x96xf32>
    %243 = arith.addf %242, %10 : vector<8x96xf32>
    %244 = vector.extract_strided_slice %239 {offsets = [0, 0], sizes = [8, 32], strides = [1, 1]} : vector<8x96xf32> to vector<8x32xf32>
    %245 = vector.extract_strided_slice %243 {offsets = [0, 0], sizes = [8, 32], strides = [1, 1]} : vector<8x96xf32> to vector<8x32xf32>
    %246 = arith.addf %244, %245 : vector<8x32xf32>
    %247 = arith.negf %246 : vector<8x32xf32>
    %248 = math.exp %247 : vector<8x32xf32>
    %cst_80 = arith.constant 1.000000e+00 : f32
    %249 = vector.broadcast %cst_80 : f32 to vector<8x32xf32>
    %250 = arith.addf %249, %248 : vector<8x32xf32>
    %251 = arith.divf %249, %250 : vector<8x32xf32>
    %252 = vector.extract_strided_slice %239 {offsets = [0, 32], sizes = [8, 32], strides = [1, 1]} : vector<8x96xf32> to vector<8x32xf32>
    %253 = vector.extract_strided_slice %243 {offsets = [0, 32], sizes = [8, 32], strides = [1, 1]} : vector<8x96xf32> to vector<8x32xf32>
    %254 = arith.addf %252, %253 : vector<8x32xf32>
    %255 = arith.negf %254 : vector<8x32xf32>
    %256 = math.exp %255 : vector<8x32xf32>
    %cst_81 = arith.constant 1.000000e+00 : f32
    %257 = vector.broadcast %cst_81 : f32 to vector<8x32xf32>
    %258 = arith.addf %257, %256 : vector<8x32xf32>
    %259 = arith.divf %257, %258 : vector<8x32xf32>
    %260 = vector.extract_strided_slice %239 {offsets = [0, 64], sizes = [8, 32], strides = [1, 1]} : vector<8x96xf32> to vector<8x32xf32>
    %261 = vector.extract_strided_slice %243 {offsets = [0, 64], sizes = [8, 32], strides = [1, 1]} : vector<8x96xf32> to vector<8x32xf32>
    %262 = arith.mulf %251, %261 : vector<8x32xf32>
    %263 = arith.addf %260, %262 : vector<8x32xf32>
    %264 = math.tanh %263 : vector<8x32xf32>
    %cst_82 = arith.constant 1.000000e+00 : f32
    %265 = vector.broadcast %cst_82 : f32 to vector<8x32xf32>
    %266 = arith.subf %265, %259 : vector<8x32xf32>
    %267 = arith.mulf %266, %264 : vector<8x32xf32>
    %268 = arith.mulf %259, %237 : vector<8x32xf32>
    %269 = arith.addf %267, %268 : vector<8x32xf32>
    %c56_83 = arith.constant 56 : index
    %c0_84 = arith.constant 0 : index
    %270 = vector.load %arg14[%c56_83, %c0_84] : memref<64x64xf32, #tpu.memory_space<vmem>>, vector<8x32xf32>
    tpu.vector_store %arg14[%c56_83, %c0_84], %269 {strides = array<i32>} : memref<64x64xf32, #tpu.memory_space<vmem>>, vector<8x32xf32>,
    %cst_85 = arith.constant 0.000000e+00 : f32
    %271 = vector.broadcast %cst_85 : f32 to vector<8x32xf32>
    %c56_86 = arith.constant 56 : index
    %c128 = arith.constant 128 : index
    %272 = vector.load %arg15[%c56_86, %c128] : memref<64x256xf32, #tpu.memory_space<vmem>>, vector<8x96xf32>
    %273 = arith.truncf %271 : vector<8x32xf32> to vector<8x32xbf16>
    %c0_87 = arith.constant 0 : index
    %c0_88 = arith.constant 0 : index
    %274 = vector.load %arg5[%c0_87, %c0_88] : memref<32x96xbf16, #tpu.memory_space<vmem>>, vector<32x96xbf16>
    %cst_89 = arith.constant dense<0.000000e+00> : vector<8x96xf32>
    %275 = tpu.matmul %273, %274, %cst_89 {dimension_numbers = #tpu.dot_dimension_numbers<[1], [0], [0], [1], [0, 0, 1, 1], [], []>} : vector<8x32xbf16>, vector<32x96xbf16>, vector<8x96xf32> -> vector<8x96xf32>
    %276 = arith.addf %275, %13 : vector<8x96xf32>
    %277 = vector.extract_strided_slice %272 {offsets = [0, 0], sizes = [8, 32], strides = [1, 1]} : vector<8x96xf32> to vector<8x32xf32>
    %278 = vector.extract_strided_slice %276 {offsets = [0, 0], sizes = [8, 32], strides = [1, 1]} : vector<8x96xf32> to vector<8x32xf32>
    %279 = arith.addf %277, %278 : vector<8x32xf32>
    %280 = arith.negf %279 : vector<8x32xf32>
    %281 = math.exp %280 : vector<8x32xf32>
    %cst_90 = arith.constant 1.000000e+00 : f32
    %282 = vector.broadcast %cst_90 : f32 to vector<8x32xf32>
    %283 = arith.addf %282, %281 : vector<8x32xf32>
    %284 = arith.divf %282, %283 : vector<8x32xf32>
    %285 = vector.extract_strided_slice %272 {offsets = [0, 32], sizes = [8, 32], strides = [1, 1]} : vector<8x96xf32> to vector<8x32xf32>
    %286 = vector.extract_strided_slice %276 {offsets = [0, 32], sizes = [8, 32], strides = [1, 1]} : vector<8x96xf32> to vector<8x32xf32>
    %287 = arith.addf %285, %286 : vector<8x32xf32>
    %288 = arith.negf %287 : vector<8x32xf32>
    %289 = math.exp %288 : vector<8x32xf32>
    %cst_91 = arith.constant 1.000000e+00 : f32
    %290 = vector.broadcast %cst_91 : f32 to vector<8x32xf32>
    %291 = arith.addf %290, %289 : vector<8x32xf32>
    %292 = arith.divf %290, %291 : vector<8x32xf32>
    %293 = vector.extract_strided_slice %272 {offsets = [0, 64], sizes = [8, 32], strides = [1, 1]} : vector<8x96xf32> to vector<8x32xf32>
    %294 = vector.extract_strided_slice %276 {offsets = [0, 64], sizes = [8, 32], strides = [1, 1]} : vector<8x96xf32> to vector<8x32xf32>
    %295 = arith.mulf %284, %294 : vector<8x32xf32>
    %296 = arith.addf %293, %295 : vector<8x32xf32>
    %297 = math.tanh %296 : vector<8x32xf32>
    %cst_92 = arith.constant 1.000000e+00 : f32
    %298 = vector.broadcast %cst_92 : f32 to vector<8x32xf32>
    %299 = arith.subf %298, %292 : vector<8x32xf32>
    %300 = arith.mulf %299, %297 : vector<8x32xf32>
    %301 = arith.mulf %292, %271 : vector<8x32xf32>
    %302 = arith.addf %300, %301 : vector<8x32xf32>
    %c56_93 = arith.constant 56 : index
    %c32_94 = arith.constant 32 : index
    %303 = vector.load %arg14[%c56_93, %c32_94] : memref<64x64xf32, #tpu.memory_space<vmem>>, vector<8x32xf32>
    tpu.vector_store %arg14[%c56_93, %c32_94], %302 {strides = array<i32>} : memref<64x64xf32, #tpu.memory_space<vmem>>, vector<8x32xf32>,
    %c48_95 = arith.constant 48 : index
    %c128_96 = arith.constant 128 : index
    %304 = vector.load %arg15[%c48_95, %c128_96] : memref<64x256xf32, #tpu.memory_space<vmem>>, vector<8x96xf32>
    %305 = arith.truncf %302 : vector<8x32xf32> to vector<8x32xbf16>
    %c0_97 = arith.constant 0 : index
    %c0_98 = arith.constant 0 : index
    %306 = vector.load %arg5[%c0_97, %c0_98] : memref<32x96xbf16, #tpu.memory_space<vmem>>, vector<32x96xbf16>
    %cst_99 = arith.constant dense<0.000000e+00> : vector<8x96xf32>
    %307 = tpu.matmul %305, %306, %cst_99 {dimension_numbers = #tpu.dot_dimension_numbers<[1], [0], [0], [1], [0, 0, 1, 1], [], []>} : vector<8x32xbf16>, vector<32x96xbf16>, vector<8x96xf32> -> vector<8x96xf32>
    %308 = arith.addf %307, %13 : vector<8x96xf32>
    %309 = vector.extract_strided_slice %304 {offsets = [0, 0], sizes = [8, 32], strides = [1, 1]} : vector<8x96xf32> to vector<8x32xf32>
    %310 = vector.extract_strided_slice %308 {offsets = [0, 0], sizes = [8, 32], strides = [1, 1]} : vector<8x96xf32> to vector<8x32xf32>
    %311 = arith.addf %309, %310 : vector<8x32xf32>
    %312 = arith.negf %311 : vector<8x32xf32>
    %313 = math.exp %312 : vector<8x32xf32>
    %cst_100 = arith.constant 1.000000e+00 : f32
    %314 = vector.broadcast %cst_100 : f32 to vector<8x32xf32>
    %315 = arith.addf %314, %313 : vector<8x32xf32>
    %316 = arith.divf %314, %315 : vector<8x32xf32>
    %317 = vector.extract_strided_slice %304 {offsets = [0, 32], sizes = [8, 32], strides = [1, 1]} : vector<8x96xf32> to vector<8x32xf32>
    %318 = vector.extract_strided_slice %308 {offsets = [0, 32], sizes = [8, 32], strides = [1, 1]} : vector<8x96xf32> to vector<8x32xf32>
    %319 = arith.addf %317, %318 : vector<8x32xf32>
    %320 = arith.negf %319 : vector<8x32xf32>
    %321 = math.exp %320 : vector<8x32xf32>
    %cst_101 = arith.constant 1.000000e+00 : f32
    %322 = vector.broadcast %cst_101 : f32 to vector<8x32xf32>
    %323 = arith.addf %322, %321 : vector<8x32xf32>
    %324 = arith.divf %322, %323 : vector<8x32xf32>
    %325 = vector.extract_strided_slice %304 {offsets = [0, 64], sizes = [8, 32], strides = [1, 1]} : vector<8x96xf32> to vector<8x32xf32>
    %326 = vector.extract_strided_slice %308 {offsets = [0, 64], sizes = [8, 32], strides = [1, 1]} : vector<8x96xf32> to vector<8x32xf32>
    %327 = arith.mulf %316, %326 : vector<8x32xf32>
    %328 = arith.addf %325, %327 : vector<8x32xf32>
    %329 = math.tanh %328 : vector<8x32xf32>
    %cst_102 = arith.constant 1.000000e+00 : f32
    %330 = vector.broadcast %cst_102 : f32 to vector<8x32xf32>
    %331 = arith.subf %330, %324 : vector<8x32xf32>
    %332 = arith.mulf %331, %329 : vector<8x32xf32>
    %333 = arith.mulf %324, %302 : vector<8x32xf32>
    %334 = arith.addf %332, %333 : vector<8x32xf32>
    %c48_103 = arith.constant 48 : index
    %c32_104 = arith.constant 32 : index
    %335 = vector.load %arg14[%c48_103, %c32_104] : memref<64x64xf32, #tpu.memory_space<vmem>>, vector<8x32xf32>
    tpu.vector_store %arg14[%c48_103, %c32_104], %334 {strides = array<i32>} : memref<64x64xf32, #tpu.memory_space<vmem>>, vector<8x32xf32>,
    %c40_105 = arith.constant 40 : index
    %c128_106 = arith.constant 128 : index
    %336 = vector.load %arg15[%c40_105, %c128_106] : memref<64x256xf32, #tpu.memory_space<vmem>>, vector<8x96xf32>
    %337 = arith.truncf %334 : vector<8x32xf32> to vector<8x32xbf16>
    %c0_107 = arith.constant 0 : index
    %c0_108 = arith.constant 0 : index
    %338 = vector.load %arg5[%c0_107, %c0_108] : memref<32x96xbf16, #tpu.memory_space<vmem>>, vector<32x96xbf16>
    %cst_109 = arith.constant dense<0.000000e+00> : vector<8x96xf32>
    %339 = tpu.matmul %337, %338, %cst_109 {dimension_numbers = #tpu.dot_dimension_numbers<[1], [0], [0], [1], [0, 0, 1, 1], [], []>} : vector<8x32xbf16>, vector<32x96xbf16>, vector<8x96xf32> -> vector<8x96xf32>
    %340 = arith.addf %339, %13 : vector<8x96xf32>
    %341 = vector.extract_strided_slice %336 {offsets = [0, 0], sizes = [8, 32], strides = [1, 1]} : vector<8x96xf32> to vector<8x32xf32>
    %342 = vector.extract_strided_slice %340 {offsets = [0, 0], sizes = [8, 32], strides = [1, 1]} : vector<8x96xf32> to vector<8x32xf32>
    %343 = arith.addf %341, %342 : vector<8x32xf32>
    %344 = arith.negf %343 : vector<8x32xf32>
    %345 = math.exp %344 : vector<8x32xf32>
    %cst_110 = arith.constant 1.000000e+00 : f32
    %346 = vector.broadcast %cst_110 : f32 to vector<8x32xf32>
    %347 = arith.addf %346, %345 : vector<8x32xf32>
    %348 = arith.divf %346, %347 : vector<8x32xf32>
    %349 = vector.extract_strided_slice %336 {offsets = [0, 32], sizes = [8, 32], strides = [1, 1]} : vector<8x96xf32> to vector<8x32xf32>
    %350 = vector.extract_strided_slice %340 {offsets = [0, 32], sizes = [8, 32], strides = [1, 1]} : vector<8x96xf32> to vector<8x32xf32>
    %351 = arith.addf %349, %350 : vector<8x32xf32>
    %352 = arith.negf %351 : vector<8x32xf32>
    %353 = math.exp %352 : vector<8x32xf32>
    %cst_111 = arith.constant 1.000000e+00 : f32
    %354 = vector.broadcast %cst_111 : f32 to vector<8x32xf32>
    %355 = arith.addf %354, %353 : vector<8x32xf32>
    %356 = arith.divf %354, %355 : vector<8x32xf32>
    %357 = vector.extract_strided_slice %336 {offsets = [0, 64], sizes = [8, 32], strides = [1, 1]} : vector<8x96xf32> to vector<8x32xf32>
    %358 = vector.extract_strided_slice %340 {offsets = [0, 64], sizes = [8, 32], strides = [1, 1]} : vector<8x96xf32> to vector<8x32xf32>
    %359 = arith.mulf %348, %358 : vector<8x32xf32>
    %360 = arith.addf %357, %359 : vector<8x32xf32>
    %361 = math.tanh %360 : vector<8x32xf32>
    %cst_112 = arith.constant 1.000000e+00 : f32
    %362 = vector.broadcast %cst_112 : f32 to vector<8x32xf32>
    %363 = arith.subf %362, %356 : vector<8x32xf32>
    %364 = arith.mulf %363, %361 : vector<8x32xf32>
    %365 = arith.mulf %356, %334 : vector<8x32xf32>
    %366 = arith.addf %364, %365 : vector<8x32xf32>
    %c40_113 = arith.constant 40 : index
    %c32_114 = arith.constant 32 : index
    %367 = vector.load %arg14[%c40_113, %c32_114] : memref<64x64xf32, #tpu.memory_space<vmem>>, vector<8x32xf32>
    tpu.vector_store %arg14[%c40_113, %c32_114], %366 {strides = array<i32>} : memref<64x64xf32, #tpu.memory_space<vmem>>, vector<8x32xf32>,
    %c32_115 = arith.constant 32 : index
    %c128_116 = arith.constant 128 : index
    %368 = vector.load %arg15[%c32_115, %c128_116] : memref<64x256xf32, #tpu.memory_space<vmem>>, vector<8x96xf32>
    %369 = arith.truncf %366 : vector<8x32xf32> to vector<8x32xbf16>
    %c0_117 = arith.constant 0 : index
    %c0_118 = arith.constant 0 : index
    %370 = vector.load %arg5[%c0_117, %c0_118] : memref<32x96xbf16, #tpu.memory_space<vmem>>, vector<32x96xbf16>
    %cst_119 = arith.constant dense<0.000000e+00> : vector<8x96xf32>
    %371 = tpu.matmul %369, %370, %cst_119 {dimension_numbers = #tpu.dot_dimension_numbers<[1], [0], [0], [1], [0, 0, 1, 1], [], []>} : vector<8x32xbf16>, vector<32x96xbf16>, vector<8x96xf32> -> vector<8x96xf32>
    %372 = arith.addf %371, %13 : vector<8x96xf32>
    %373 = vector.extract_strided_slice %368 {offsets = [0, 0], sizes = [8, 32], strides = [1, 1]} : vector<8x96xf32> to vector<8x32xf32>
    %374 = vector.extract_strided_slice %372 {offsets = [0, 0], sizes = [8, 32], strides = [1, 1]} : vector<8x96xf32> to vector<8x32xf32>
    %375 = arith.addf %373, %374 : vector<8x32xf32>
    %376 = arith.negf %375 : vector<8x32xf32>
    %377 = math.exp %376 : vector<8x32xf32>
    %cst_120 = arith.constant 1.000000e+00 : f32
    %378 = vector.broadcast %cst_120 : f32 to vector<8x32xf32>
    %379 = arith.addf %378, %377 : vector<8x32xf32>
    %380 = arith.divf %378, %379 : vector<8x32xf32>
    %381 = vector.extract_strided_slice %368 {offsets = [0, 32], sizes = [8, 32], strides = [1, 1]} : vector<8x96xf32> to vector<8x32xf32>
    %382 = vector.extract_strided_slice %372 {offsets = [0, 32], sizes = [8, 32], strides = [1, 1]} : vector<8x96xf32> to vector<8x32xf32>
    %383 = arith.addf %381, %382 : vector<8x32xf32>
    %384 = arith.negf %383 : vector<8x32xf32>
    %385 = math.exp %384 : vector<8x32xf32>
    %cst_121 = arith.constant 1.000000e+00 : f32
    %386 = vector.broadcast %cst_121 : f32 to vector<8x32xf32>
    %387 = arith.addf %386, %385 : vector<8x32xf32>
    %388 = arith.divf %386, %387 : vector<8x32xf32>
    %389 = vector.extract_strided_slice %368 {offsets = [0, 64], sizes = [8, 32], strides = [1, 1]} : vector<8x96xf32> to vector<8x32xf32>
    %390 = vector.extract_strided_slice %372 {offsets = [0, 64], sizes = [8, 32], strides = [1, 1]} : vector<8x96xf32> to vector<8x32xf32>
    %391 = arith.mulf %380, %390 : vector<8x32xf32>
    %392 = arith.addf %389, %391 : vector<8x32xf32>
    %393 = math.tanh %392 : vector<8x32xf32>
    %cst_122 = arith.constant 1.000000e+00 : f32
    %394 = vector.broadcast %cst_122 : f32 to vector<8x32xf32>
    %395 = arith.subf %394, %388 : vector<8x32xf32>
    %396 = arith.mulf %395, %393 : vector<8x32xf32>
    %397 = arith.mulf %388, %366 : vector<8x32xf32>
    %398 = arith.addf %396, %397 : vector<8x32xf32>
    %c32_123 = arith.constant 32 : index
    %c32_124 = arith.constant 32 : index
    %399 = vector.load %arg14[%c32_123, %c32_124] : memref<64x64xf32, #tpu.memory_space<vmem>>, vector<8x32xf32>
    tpu.vector_store %arg14[%c32_123, %c32_124], %398 {strides = array<i32>} : memref<64x64xf32, #tpu.memory_space<vmem>>, vector<8x32xf32>,
    %c24_125 = arith.constant 24 : index
    %c128_126 = arith.constant 128 : index
    %400 = vector.load %arg15[%c24_125, %c128_126] : memref<64x256xf32, #tpu.memory_space<vmem>>, vector<8x96xf32>
    %401 = arith.truncf %398 : vector<8x32xf32> to vector<8x32xbf16>
    %c0_127 = arith.constant 0 : index
    %c0_128 = arith.constant 0 : index
    %402 = vector.load %arg5[%c0_127, %c0_128] : memref<32x96xbf16, #tpu.memory_space<vmem>>, vector<32x96xbf16>
    %cst_129 = arith.constant dense<0.000000e+00> : vector<8x96xf32>
    %403 = tpu.matmul %401, %402, %cst_129 {dimension_numbers = #tpu.dot_dimension_numbers<[1], [0], [0], [1], [0, 0, 1, 1], [], []>} : vector<8x32xbf16>, vector<32x96xbf16>, vector<8x96xf32> -> vector<8x96xf32>
    %404 = arith.addf %403, %13 : vector<8x96xf32>
    %405 = vector.extract_strided_slice %400 {offsets = [0, 0], sizes = [8, 32], strides = [1, 1]} : vector<8x96xf32> to vector<8x32xf32>
    %406 = vector.extract_strided_slice %404 {offsets = [0, 0], sizes = [8, 32], strides = [1, 1]} : vector<8x96xf32> to vector<8x32xf32>
    %407 = arith.addf %405, %406 : vector<8x32xf32>
    %408 = arith.negf %407 : vector<8x32xf32>
    %409 = math.exp %408 : vector<8x32xf32>
    %cst_130 = arith.constant 1.000000e+00 : f32
    %410 = vector.broadcast %cst_130 : f32 to vector<8x32xf32>
    %411 = arith.addf %410, %409 : vector<8x32xf32>
    %412 = arith.divf %410, %411 : vector<8x32xf32>
    %413 = vector.extract_strided_slice %400 {offsets = [0, 32], sizes = [8, 32], strides = [1, 1]} : vector<8x96xf32> to vector<8x32xf32>
    %414 = vector.extract_strided_slice %404 {offsets = [0, 32], sizes = [8, 32], strides = [1, 1]} : vector<8x96xf32> to vector<8x32xf32>
    %415 = arith.addf %413, %414 : vector<8x32xf32>
    %416 = arith.negf %415 : vector<8x32xf32>
    %417 = math.exp %416 : vector<8x32xf32>
    %cst_131 = arith.constant 1.000000e+00 : f32
    %418 = vector.broadcast %cst_131 : f32 to vector<8x32xf32>
    %419 = arith.addf %418, %417 : vector<8x32xf32>
    %420 = arith.divf %418, %419 : vector<8x32xf32>
    %421 = vector.extract_strided_slice %400 {offsets = [0, 64], sizes = [8, 32], strides = [1, 1]} : vector<8x96xf32> to vector<8x32xf32>
    %422 = vector.extract_strided_slice %404 {offsets = [0, 64], sizes = [8, 32], strides = [1, 1]} : vector<8x96xf32> to vector<8x32xf32>
    %423 = arith.mulf %412, %422 : vector<8x32xf32>
    %424 = arith.addf %421, %423 : vector<8x32xf32>
    %425 = math.tanh %424 : vector<8x32xf32>
    %cst_132 = arith.constant 1.000000e+00 : f32
    %426 = vector.broadcast %cst_132 : f32 to vector<8x32xf32>
    %427 = arith.subf %426, %420 : vector<8x32xf32>
    %428 = arith.mulf %427, %425 : vector<8x32xf32>
    %429 = arith.mulf %420, %398 : vector<8x32xf32>
    %430 = arith.addf %428, %429 : vector<8x32xf32>
    %c24_133 = arith.constant 24 : index
    %c32_134 = arith.constant 32 : index
    %431 = vector.load %arg14[%c24_133, %c32_134] : memref<64x64xf32, #tpu.memory_space<vmem>>, vector<8x32xf32>
    tpu.vector_store %arg14[%c24_133, %c32_134], %430 {strides = array<i32>} : memref<64x64xf32, #tpu.memory_space<vmem>>, vector<8x32xf32>,
    %c16_135 = arith.constant 16 : index
    %c128_136 = arith.constant 128 : index
    %432 = vector.load %arg15[%c16_135, %c128_136] : memref<64x256xf32, #tpu.memory_space<vmem>>, vector<8x96xf32>
    %433 = arith.truncf %430 : vector<8x32xf32> to vector<8x32xbf16>
    %c0_137 = arith.constant 0 : index
    %c0_138 = arith.constant 0 : index
    %434 = vector.load %arg5[%c0_137, %c0_138] : memref<32x96xbf16, #tpu.memory_space<vmem>>, vector<32x96xbf16>
    %cst_139 = arith.constant dense<0.000000e+00> : vector<8x96xf32>
    %435 = tpu.matmul %433, %434, %cst_139 {dimension_numbers = #tpu.dot_dimension_numbers<[1], [0], [0], [1], [0, 0, 1, 1], [], []>} : vector<8x32xbf16>, vector<32x96xbf16>, vector<8x96xf32> -> vector<8x96xf32>
    %436 = arith.addf %435, %13 : vector<8x96xf32>
    %437 = vector.extract_strided_slice %432 {offsets = [0, 0], sizes = [8, 32], strides = [1, 1]} : vector<8x96xf32> to vector<8x32xf32>
    %438 = vector.extract_strided_slice %436 {offsets = [0, 0], sizes = [8, 32], strides = [1, 1]} : vector<8x96xf32> to vector<8x32xf32>
    %439 = arith.addf %437, %438 : vector<8x32xf32>
    %440 = arith.negf %439 : vector<8x32xf32>
    %441 = math.exp %440 : vector<8x32xf32>
    %cst_140 = arith.constant 1.000000e+00 : f32
    %442 = vector.broadcast %cst_140 : f32 to vector<8x32xf32>
    %443 = arith.addf %442, %441 : vector<8x32xf32>
    %444 = arith.divf %442, %443 : vector<8x32xf32>
    %445 = vector.extract_strided_slice %432 {offsets = [0, 32], sizes = [8, 32], strides = [1, 1]} : vector<8x96xf32> to vector<8x32xf32>
    %446 = vector.extract_strided_slice %436 {offsets = [0, 32], sizes = [8, 32], strides = [1, 1]} : vector<8x96xf32> to vector<8x32xf32>
    %447 = arith.addf %445, %446 : vector<8x32xf32>
    %448 = arith.negf %447 : vector<8x32xf32>
    %449 = math.exp %448 : vector<8x32xf32>
    %cst_141 = arith.constant 1.000000e+00 : f32
    %450 = vector.broadcast %cst_141 : f32 to vector<8x32xf32>
    %451 = arith.addf %450, %449 : vector<8x32xf32>
    %452 = arith.divf %450, %451 : vector<8x32xf32>
    %453 = vector.extract_strided_slice %432 {offsets = [0, 64], sizes = [8, 32], strides = [1, 1]} : vector<8x96xf32> to vector<8x32xf32>
    %454 = vector.extract_strided_slice %436 {offsets = [0, 64], sizes = [8, 32], strides = [1, 1]} : vector<8x96xf32> to vector<8x32xf32>
    %455 = arith.mulf %444, %454 : vector<8x32xf32>
    %456 = arith.addf %453, %455 : vector<8x32xf32>
    %457 = math.tanh %456 : vector<8x32xf32>
    %cst_142 = arith.constant 1.000000e+00 : f32
    %458 = vector.broadcast %cst_142 : f32 to vector<8x32xf32>
    %459 = arith.subf %458, %452 : vector<8x32xf32>
    %460 = arith.mulf %459, %457 : vector<8x32xf32>
    %461 = arith.mulf %452, %430 : vector<8x32xf32>
    %462 = arith.addf %460, %461 : vector<8x32xf32>
    %c16_143 = arith.constant 16 : index
    %c32_144 = arith.constant 32 : index
    %463 = vector.load %arg14[%c16_143, %c32_144] : memref<64x64xf32, #tpu.memory_space<vmem>>, vector<8x32xf32>
    tpu.vector_store %arg14[%c16_143, %c32_144], %462 {strides = array<i32>} : memref<64x64xf32, #tpu.memory_space<vmem>>, vector<8x32xf32>,
    %c8_145 = arith.constant 8 : index
    %c128_146 = arith.constant 128 : index
    %464 = vector.load %arg15[%c8_145, %c128_146] : memref<64x256xf32, #tpu.memory_space<vmem>>, vector<8x96xf32>
    %465 = arith.truncf %462 : vector<8x32xf32> to vector<8x32xbf16>
    %c0_147 = arith.constant 0 : index
    %c0_148 = arith.constant 0 : index
    %466 = vector.load %arg5[%c0_147, %c0_148] : memref<32x96xbf16, #tpu.memory_space<vmem>>, vector<32x96xbf16>
    %cst_149 = arith.constant dense<0.000000e+00> : vector<8x96xf32>
    %467 = tpu.matmul %465, %466, %cst_149 {dimension_numbers = #tpu.dot_dimension_numbers<[1], [0], [0], [1], [0, 0, 1, 1], [], []>} : vector<8x32xbf16>, vector<32x96xbf16>, vector<8x96xf32> -> vector<8x96xf32>
    %468 = arith.addf %467, %13 : vector<8x96xf32>
    %469 = vector.extract_strided_slice %464 {offsets = [0, 0], sizes = [8, 32], strides = [1, 1]} : vector<8x96xf32> to vector<8x32xf32>
    %470 = vector.extract_strided_slice %468 {offsets = [0, 0], sizes = [8, 32], strides = [1, 1]} : vector<8x96xf32> to vector<8x32xf32>
    %471 = arith.addf %469, %470 : vector<8x32xf32>
    %472 = arith.negf %471 : vector<8x32xf32>
    %473 = math.exp %472 : vector<8x32xf32>
    %cst_150 = arith.constant 1.000000e+00 : f32
    %474 = vector.broadcast %cst_150 : f32 to vector<8x32xf32>
    %475 = arith.addf %474, %473 : vector<8x32xf32>
    %476 = arith.divf %474, %475 : vector<8x32xf32>
    %477 = vector.extract_strided_slice %464 {offsets = [0, 32], sizes = [8, 32], strides = [1, 1]} : vector<8x96xf32> to vector<8x32xf32>
    %478 = vector.extract_strided_slice %468 {offsets = [0, 32], sizes = [8, 32], strides = [1, 1]} : vector<8x96xf32> to vector<8x32xf32>
    %479 = arith.addf %477, %478 : vector<8x32xf32>
    %480 = arith.negf %479 : vector<8x32xf32>
    %481 = math.exp %480 : vector<8x32xf32>
    %cst_151 = arith.constant 1.000000e+00 : f32
    %482 = vector.broadcast %cst_151 : f32 to vector<8x32xf32>
    %483 = arith.addf %482, %481 : vector<8x32xf32>
    %484 = arith.divf %482, %483 : vector<8x32xf32>
    %485 = vector.extract_strided_slice %464 {offsets = [0, 64], sizes = [8, 32], strides = [1, 1]} : vector<8x96xf32> to vector<8x32xf32>
    %486 = vector.extract_strided_slice %468 {offsets = [0, 64], sizes = [8, 32], strides = [1, 1]} : vector<8x96xf32> to vector<8x32xf32>
    %487 = arith.mulf %476, %486 : vector<8x32xf32>
    %488 = arith.addf %485, %487 : vector<8x32xf32>
    %489 = math.tanh %488 : vector<8x32xf32>
    %cst_152 = arith.constant 1.000000e+00 : f32
    %490 = vector.broadcast %cst_152 : f32 to vector<8x32xf32>
    %491 = arith.subf %490, %484 : vector<8x32xf32>
    %492 = arith.mulf %491, %489 : vector<8x32xf32>
    %493 = arith.mulf %484, %462 : vector<8x32xf32>
    %494 = arith.addf %492, %493 : vector<8x32xf32>
    %c8_153 = arith.constant 8 : index
    %c32_154 = arith.constant 32 : index
    %495 = vector.load %arg14[%c8_153, %c32_154] : memref<64x64xf32, #tpu.memory_space<vmem>>, vector<8x32xf32>
    tpu.vector_store %arg14[%c8_153, %c32_154], %494 {strides = array<i32>} : memref<64x64xf32, #tpu.memory_space<vmem>>, vector<8x32xf32>,
    %c0_155 = arith.constant 0 : index
    %c128_156 = arith.constant 128 : index
    %496 = vector.load %arg15[%c0_155, %c128_156] : memref<64x256xf32, #tpu.memory_space<vmem>>, vector<8x96xf32>
    %497 = arith.truncf %494 : vector<8x32xf32> to vector<8x32xbf16>
    %c0_157 = arith.constant 0 : index
    %c0_158 = arith.constant 0 : index
    %498 = vector.load %arg5[%c0_157, %c0_158] : memref<32x96xbf16, #tpu.memory_space<vmem>>, vector<32x96xbf16>
    %cst_159 = arith.constant dense<0.000000e+00> : vector<8x96xf32>
    %499 = tpu.matmul %497, %498, %cst_159 {dimension_numbers = #tpu.dot_dimension_numbers<[1], [0], [0], [1], [0, 0, 1, 1], [], []>} : vector<8x32xbf16>, vector<32x96xbf16>, vector<8x96xf32> -> vector<8x96xf32>
    %500 = arith.addf %499, %13 : vector<8x96xf32>
    %501 = vector.extract_strided_slice %496 {offsets = [0, 0], sizes = [8, 32], strides = [1, 1]} : vector<8x96xf32> to vector<8x32xf32>
    %502 = vector.extract_strided_slice %500 {offsets = [0, 0], sizes = [8, 32], strides = [1, 1]} : vector<8x96xf32> to vector<8x32xf32>
    %503 = arith.addf %501, %502 : vector<8x32xf32>
    %504 = arith.negf %503 : vector<8x32xf32>
    %505 = math.exp %504 : vector<8x32xf32>
    %cst_160 = arith.constant 1.000000e+00 : f32
    %506 = vector.broadcast %cst_160 : f32 to vector<8x32xf32>
    %507 = arith.addf %506, %505 : vector<8x32xf32>
    %508 = arith.divf %506, %507 : vector<8x32xf32>
    %509 = vector.extract_strided_slice %496 {offsets = [0, 32], sizes = [8, 32], strides = [1, 1]} : vector<8x96xf32> to vector<8x32xf32>
    %510 = vector.extract_strided_slice %500 {offsets = [0, 32], sizes = [8, 32], strides = [1, 1]} : vector<8x96xf32> to vector<8x32xf32>
    %511 = arith.addf %509, %510 : vector<8x32xf32>
    %512 = arith.negf %511 : vector<8x32xf32>
    %513 = math.exp %512 : vector<8x32xf32>
    %cst_161 = arith.constant 1.000000e+00 : f32
    %514 = vector.broadcast %cst_161 : f32 to vector<8x32xf32>
    %515 = arith.addf %514, %513 : vector<8x32xf32>
    %516 = arith.divf %514, %515 : vector<8x32xf32>
    %517 = vector.extract_strided_slice %496 {offsets = [0, 64], sizes = [8, 32], strides = [1, 1]} : vector<8x96xf32> to vector<8x32xf32>
    %518 = vector.extract_strided_slice %500 {offsets = [0, 64], sizes = [8, 32], strides = [1, 1]} : vector<8x96xf32> to vector<8x32xf32>
    %519 = arith.mulf %508, %518 : vector<8x32xf32>
    %520 = arith.addf %517, %519 : vector<8x32xf32>
    %521 = math.tanh %520 : vector<8x32xf32>
    %cst_162 = arith.constant 1.000000e+00 : f32
    %522 = vector.broadcast %cst_162 : f32 to vector<8x32xf32>
    %523 = arith.subf %522, %516 : vector<8x32xf32>
    %524 = arith.mulf %523, %521 : vector<8x32xf32>
    %525 = arith.mulf %516, %494 : vector<8x32xf32>
    %526 = arith.addf %524, %525 : vector<8x32xf32>
    %c0_163 = arith.constant 0 : index
    %c32_164 = arith.constant 32 : index
    %527 = vector.load %arg14[%c0_163, %c32_164] : memref<64x64xf32, #tpu.memory_space<vmem>>, vector<8x32xf32>
    tpu.vector_store %arg14[%c0_163, %c32_164], %526 {strides = array<i32>} : memref<64x64xf32, #tpu.memory_space<vmem>>, vector<8x32xf32>,
    %c0_165 = arith.constant 0 : index
    %c0_166 = arith.constant 0 : index
    %528 = vector.load %arg13[%c0_165, %c0_166] : memref<16x64xf32, #tpu.memory_space<vmem>>, vector<8x32xf32>
    tpu.vector_store %arg13[%c0_165, %c0_166], %269 {strides = array<i32>} : memref<16x64xf32, #tpu.memory_space<vmem>>, vector<8x32xf32>,
    %c0_167 = arith.constant 0 : index
    %c32_168 = arith.constant 32 : index
    %529 = vector.load %arg13[%c0_167, %c32_168] : memref<16x64xf32, #tpu.memory_space<vmem>>, vector<8x32xf32>
    tpu.vector_store %arg13[%c0_167, %c32_168], %526 {strides = array<i32>} : memref<16x64xf32, #tpu.memory_space<vmem>>, vector<8x32xf32>,
    %c0_169 = arith.constant 0 : index
    %c0_170 = arith.constant 0 : index
    %530 = vector.load %arg14[%c0_169, %c0_170] : memref<64x64xf32, #tpu.memory_space<vmem>>, vector<64x64xf32>
    %531 = arith.truncf %530 : vector<64x64xf32> to vector<64x64xbf16>
    %c0_171 = arith.constant 0 : index
    %c0_172 = arith.constant 0 : index
    %532 = vector.load %arg7[%c0_171, %c0_172] : memref<64x256xbf16, #tpu.memory_space<vmem>>, vector<64x256xbf16>
    %cst_173 = arith.constant dense<0.000000e+00> : vector<64x256xf32>
    %533 = tpu.matmul %531, %532, %cst_173 {dimension_numbers = #tpu.dot_dimension_numbers<[1], [0], [0], [1], [0, 0, 1, 1], [], []>} : vector<64x64xbf16>, vector<64x256xbf16>, vector<64x256xf32> -> vector<64x256xf32>
    %c0_174 = arith.constant 0 : index
    %c0_175 = arith.constant 0 : index
    %534 = vector.load %arg8[%c0_174, %c0_175] : memref<1x256xf32, #tpu.memory_space<vmem>>, vector<1x256xf32>
    %535 = vector.broadcast %534 : vector<1x256xf32> to vector<64x256xf32>
    %536 = arith.addf %533, %535 : vector<64x256xf32>
    %c0_176 = arith.constant 0 : index
    %c0_177 = arith.constant 0 : index
    %537 = vector.load %arg15[%c0_176, %c0_177] : memref<64x256xf32, #tpu.memory_space<vmem>>, vector<64x256xf32>
    tpu.vector_store %arg15[%c0_176, %c0_177], %536 {strides = array<i32>} : memref<64x256xf32, #tpu.memory_space<vmem>>, vector<64x256xf32>,
    %c0_178 = arith.constant 0 : index
    %c0_179 = arith.constant 0 : index
    %538 = vector.load %arg10[%c0_178, %c0_179] : memref<1x96xf32, #tpu.memory_space<vmem>>, vector<1x96xf32>
    %539 = vector.shape_cast %538 : vector<1x96xf32> to vector<1x96xf32>
    %540 = vector.broadcast %539 : vector<1x96xf32> to vector<8x96xf32>
    %c0_180 = arith.constant 0 : index
    %c0_181 = arith.constant 0 : index
    %541 = vector.load %arg12[%c0_180, %c0_181] : memref<1x96xf32, #tpu.memory_space<vmem>>, vector<1x96xf32>
    %542 = vector.shape_cast %541 : vector<1x96xf32> to vector<1x96xf32>
    %543 = vector.broadcast %542 : vector<1x96xf32> to vector<8x96xf32>
    %cst_182 = arith.constant 0.000000e+00 : f32
    %544 = vector.broadcast %cst_182 : f32 to vector<8x32xf32>
    %c0_183 = arith.constant 0 : index
    %c0_184 = arith.constant 0 : index
    %545 = vector.load %arg15[%c0_183, %c0_184] : memref<64x256xf32, #tpu.memory_space<vmem>>, vector<8x96xf32>
    %546 = arith.truncf %544 : vector<8x32xf32> to vector<8x32xbf16>
    %c0_185 = arith.constant 0 : index
    %c0_186 = arith.constant 0 : index
    %547 = vector.load %arg9[%c0_185, %c0_186] : memref<32x96xbf16, #tpu.memory_space<vmem>>, vector<32x96xbf16>
    %cst_187 = arith.constant dense<0.000000e+00> : vector<8x96xf32>
    %548 = tpu.matmul %546, %547, %cst_187 {dimension_numbers = #tpu.dot_dimension_numbers<[1], [0], [0], [1], [0, 0, 1, 1], [], []>} : vector<8x32xbf16>, vector<32x96xbf16>, vector<8x96xf32> -> vector<8x96xf32>
    %549 = arith.addf %548, %540 : vector<8x96xf32>
    %550 = vector.extract_strided_slice %545 {offsets = [0, 0], sizes = [8, 32], strides = [1, 1]} : vector<8x96xf32> to vector<8x32xf32>
    %551 = vector.extract_strided_slice %549 {offsets = [0, 0], sizes = [8, 32], strides = [1, 1]} : vector<8x96xf32> to vector<8x32xf32>
    %552 = arith.addf %550, %551 : vector<8x32xf32>
    %553 = arith.negf %552 : vector<8x32xf32>
    %554 = math.exp %553 : vector<8x32xf32>
    %cst_188 = arith.constant 1.000000e+00 : f32
    %555 = vector.broadcast %cst_188 : f32 to vector<8x32xf32>
    %556 = arith.addf %555, %554 : vector<8x32xf32>
    %557 = arith.divf %555, %556 : vector<8x32xf32>
    %558 = vector.extract_strided_slice %545 {offsets = [0, 32], sizes = [8, 32], strides = [1, 1]} : vector<8x96xf32> to vector<8x32xf32>
    %559 = vector.extract_strided_slice %549 {offsets = [0, 32], sizes = [8, 32], strides = [1, 1]} : vector<8x96xf32> to vector<8x32xf32>
    %560 = arith.addf %558, %559 : vector<8x32xf32>
    %561 = arith.negf %560 : vector<8x32xf32>
    %562 = math.exp %561 : vector<8x32xf32>
    %cst_189 = arith.constant 1.000000e+00 : f32
    %563 = vector.broadcast %cst_189 : f32 to vector<8x32xf32>
    %564 = arith.addf %563, %562 : vector<8x32xf32>
    %565 = arith.divf %563, %564 : vector<8x32xf32>
    %566 = vector.extract_strided_slice %545 {offsets = [0, 64], sizes = [8, 32], strides = [1, 1]} : vector<8x96xf32> to vector<8x32xf32>
    %567 = vector.extract_strided_slice %549 {offsets = [0, 64], sizes = [8, 32], strides = [1, 1]} : vector<8x96xf32> to vector<8x32xf32>
    %568 = arith.mulf %557, %567 : vector<8x32xf32>
    %569 = arith.addf %566, %568 : vector<8x32xf32>
    %570 = math.tanh %569 : vector<8x32xf32>
    %cst_190 = arith.constant 1.000000e+00 : f32
    %571 = vector.broadcast %cst_190 : f32 to vector<8x32xf32>
    %572 = arith.subf %571, %565 : vector<8x32xf32>
    %573 = arith.mulf %572, %570 : vector<8x32xf32>
    %574 = arith.mulf %565, %544 : vector<8x32xf32>
    %575 = arith.addf %573, %574 : vector<8x32xf32>
    %c8_191 = arith.constant 8 : index
    %c0_192 = arith.constant 0 : index
    %576 = vector.load %arg15[%c8_191, %c0_192] : memref<64x256xf32, #tpu.memory_space<vmem>>, vector<8x96xf32>
    %577 = arith.truncf %575 : vector<8x32xf32> to vector<8x32xbf16>
    %c0_193 = arith.constant 0 : index
    %c0_194 = arith.constant 0 : index
    %578 = vector.load %arg9[%c0_193, %c0_194] : memref<32x96xbf16, #tpu.memory_space<vmem>>, vector<32x96xbf16>
    %cst_195 = arith.constant dense<0.000000e+00> : vector<8x96xf32>
    %579 = tpu.matmul %577, %578, %cst_195 {dimension_numbers = #tpu.dot_dimension_numbers<[1], [0], [0], [1], [0, 0, 1, 1], [], []>} : vector<8x32xbf16>, vector<32x96xbf16>, vector<8x96xf32> -> vector<8x96xf32>
    %580 = arith.addf %579, %540 : vector<8x96xf32>
    %581 = vector.extract_strided_slice %576 {offsets = [0, 0], sizes = [8, 32], strides = [1, 1]} : vector<8x96xf32> to vector<8x32xf32>
    %582 = vector.extract_strided_slice %580 {offsets = [0, 0], sizes = [8, 32], strides = [1, 1]} : vector<8x96xf32> to vector<8x32xf32>
    %583 = arith.addf %581, %582 : vector<8x32xf32>
    %584 = arith.negf %583 : vector<8x32xf32>
    %585 = math.exp %584 : vector<8x32xf32>
    %cst_196 = arith.constant 1.000000e+00 : f32
    %586 = vector.broadcast %cst_196 : f32 to vector<8x32xf32>
    %587 = arith.addf %586, %585 : vector<8x32xf32>
    %588 = arith.divf %586, %587 : vector<8x32xf32>
    %589 = vector.extract_strided_slice %576 {offsets = [0, 32], sizes = [8, 32], strides = [1, 1]} : vector<8x96xf32> to vector<8x32xf32>
    %590 = vector.extract_strided_slice %580 {offsets = [0, 32], sizes = [8, 32], strides = [1, 1]} : vector<8x96xf32> to vector<8x32xf32>
    %591 = arith.addf %589, %590 : vector<8x32xf32>
    %592 = arith.negf %591 : vector<8x32xf32>
    %593 = math.exp %592 : vector<8x32xf32>
    %cst_197 = arith.constant 1.000000e+00 : f32
    %594 = vector.broadcast %cst_197 : f32 to vector<8x32xf32>
    %595 = arith.addf %594, %593 : vector<8x32xf32>
    %596 = arith.divf %594, %595 : vector<8x32xf32>
    %597 = vector.extract_strided_slice %576 {offsets = [0, 64], sizes = [8, 32], strides = [1, 1]} : vector<8x96xf32> to vector<8x32xf32>
    %598 = vector.extract_strided_slice %580 {offsets = [0, 64], sizes = [8, 32], strides = [1, 1]} : vector<8x96xf32> to vector<8x32xf32>
    %599 = arith.mulf %588, %598 : vector<8x32xf32>
    %600 = arith.addf %597, %599 : vector<8x32xf32>
    %601 = math.tanh %600 : vector<8x32xf32>
    %cst_198 = arith.constant 1.000000e+00 : f32
    %602 = vector.broadcast %cst_198 : f32 to vector<8x32xf32>
    %603 = arith.subf %602, %596 : vector<8x32xf32>
    %604 = arith.mulf %603, %601 : vector<8x32xf32>
    %605 = arith.mulf %596, %575 : vector<8x32xf32>
    %606 = arith.addf %604, %605 : vector<8x32xf32>
    %c16_199 = arith.constant 16 : index
    %c0_200 = arith.constant 0 : index
    %607 = vector.load %arg15[%c16_199, %c0_200] : memref<64x256xf32, #tpu.memory_space<vmem>>, vector<8x96xf32>
    %608 = arith.truncf %606 : vector<8x32xf32> to vector<8x32xbf16>
    %c0_201 = arith.constant 0 : index
    %c0_202 = arith.constant 0 : index
    %609 = vector.load %arg9[%c0_201, %c0_202] : memref<32x96xbf16, #tpu.memory_space<vmem>>, vector<32x96xbf16>
    %cst_203 = arith.constant dense<0.000000e+00> : vector<8x96xf32>
    %610 = tpu.matmul %608, %609, %cst_203 {dimension_numbers = #tpu.dot_dimension_numbers<[1], [0], [0], [1], [0, 0, 1, 1], [], []>} : vector<8x32xbf16>, vector<32x96xbf16>, vector<8x96xf32> -> vector<8x96xf32>
    %611 = arith.addf %610, %540 : vector<8x96xf32>
    %612 = vector.extract_strided_slice %607 {offsets = [0, 0], sizes = [8, 32], strides = [1, 1]} : vector<8x96xf32> to vector<8x32xf32>
    %613 = vector.extract_strided_slice %611 {offsets = [0, 0], sizes = [8, 32], strides = [1, 1]} : vector<8x96xf32> to vector<8x32xf32>
    %614 = arith.addf %612, %613 : vector<8x32xf32>
    %615 = arith.negf %614 : vector<8x32xf32>
    %616 = math.exp %615 : vector<8x32xf32>
    %cst_204 = arith.constant 1.000000e+00 : f32
    %617 = vector.broadcast %cst_204 : f32 to vector<8x32xf32>
    %618 = arith.addf %617, %616 : vector<8x32xf32>
    %619 = arith.divf %617, %618 : vector<8x32xf32>
    %620 = vector.extract_strided_slice %607 {offsets = [0, 32], sizes = [8, 32], strides = [1, 1]} : vector<8x96xf32> to vector<8x32xf32>
    %621 = vector.extract_strided_slice %611 {offsets = [0, 32], sizes = [8, 32], strides = [1, 1]} : vector<8x96xf32> to vector<8x32xf32>
    %622 = arith.addf %620, %621 : vector<8x32xf32>
    %623 = arith.negf %622 : vector<8x32xf32>
    %624 = math.exp %623 : vector<8x32xf32>
    %cst_205 = arith.constant 1.000000e+00 : f32
    %625 = vector.broadcast %cst_205 : f32 to vector<8x32xf32>
    %626 = arith.addf %625, %624 : vector<8x32xf32>
    %627 = arith.divf %625, %626 : vector<8x32xf32>
    %628 = vector.extract_strided_slice %607 {offsets = [0, 64], sizes = [8, 32], strides = [1, 1]} : vector<8x96xf32> to vector<8x32xf32>
    %629 = vector.extract_strided_slice %611 {offsets = [0, 64], sizes = [8, 32], strides = [1, 1]} : vector<8x96xf32> to vector<8x32xf32>
    %630 = arith.mulf %619, %629 : vector<8x32xf32>
    %631 = arith.addf %628, %630 : vector<8x32xf32>
    %632 = math.tanh %631 : vector<8x32xf32>
    %cst_206 = arith.constant 1.000000e+00 : f32
    %633 = vector.broadcast %cst_206 : f32 to vector<8x32xf32>
    %634 = arith.subf %633, %627 : vector<8x32xf32>
    %635 = arith.mulf %634, %632 : vector<8x32xf32>
    %636 = arith.mulf %627, %606 : vector<8x32xf32>
    %637 = arith.addf %635, %636 : vector<8x32xf32>
    %c24_207 = arith.constant 24 : index
    %c0_208 = arith.constant 0 : index
    %638 = vector.load %arg15[%c24_207, %c0_208] : memref<64x256xf32, #tpu.memory_space<vmem>>, vector<8x96xf32>
    %639 = arith.truncf %637 : vector<8x32xf32> to vector<8x32xbf16>
    %c0_209 = arith.constant 0 : index
    %c0_210 = arith.constant 0 : index
    %640 = vector.load %arg9[%c0_209, %c0_210] : memref<32x96xbf16, #tpu.memory_space<vmem>>, vector<32x96xbf16>
    %cst_211 = arith.constant dense<0.000000e+00> : vector<8x96xf32>
    %641 = tpu.matmul %639, %640, %cst_211 {dimension_numbers = #tpu.dot_dimension_numbers<[1], [0], [0], [1], [0, 0, 1, 1], [], []>} : vector<8x32xbf16>, vector<32x96xbf16>, vector<8x96xf32> -> vector<8x96xf32>
    %642 = arith.addf %641, %540 : vector<8x96xf32>
    %643 = vector.extract_strided_slice %638 {offsets = [0, 0], sizes = [8, 32], strides = [1, 1]} : vector<8x96xf32> to vector<8x32xf32>
    %644 = vector.extract_strided_slice %642 {offsets = [0, 0], sizes = [8, 32], strides = [1, 1]} : vector<8x96xf32> to vector<8x32xf32>
    %645 = arith.addf %643, %644 : vector<8x32xf32>
    %646 = arith.negf %645 : vector<8x32xf32>
    %647 = math.exp %646 : vector<8x32xf32>
    %cst_212 = arith.constant 1.000000e+00 : f32
    %648 = vector.broadcast %cst_212 : f32 to vector<8x32xf32>
    %649 = arith.addf %648, %647 : vector<8x32xf32>
    %650 = arith.divf %648, %649 : vector<8x32xf32>
    %651 = vector.extract_strided_slice %638 {offsets = [0, 32], sizes = [8, 32], strides = [1, 1]} : vector<8x96xf32> to vector<8x32xf32>
    %652 = vector.extract_strided_slice %642 {offsets = [0, 32], sizes = [8, 32], strides = [1, 1]} : vector<8x96xf32> to vector<8x32xf32>
    %653 = arith.addf %651, %652 : vector<8x32xf32>
    %654 = arith.negf %653 : vector<8x32xf32>
    %655 = math.exp %654 : vector<8x32xf32>
    %cst_213 = arith.constant 1.000000e+00 : f32
    %656 = vector.broadcast %cst_213 : f32 to vector<8x32xf32>
    %657 = arith.addf %656, %655 : vector<8x32xf32>
    %658 = arith.divf %656, %657 : vector<8x32xf32>
    %659 = vector.extract_strided_slice %638 {offsets = [0, 64], sizes = [8, 32], strides = [1, 1]} : vector<8x96xf32> to vector<8x32xf32>
    %660 = vector.extract_strided_slice %642 {offsets = [0, 64], sizes = [8, 32], strides = [1, 1]} : vector<8x96xf32> to vector<8x32xf32>
    %661 = arith.mulf %650, %660 : vector<8x32xf32>
    %662 = arith.addf %659, %661 : vector<8x32xf32>
    %663 = math.tanh %662 : vector<8x32xf32>
    %cst_214 = arith.constant 1.000000e+00 : f32
    %664 = vector.broadcast %cst_214 : f32 to vector<8x32xf32>
    %665 = arith.subf %664, %658 : vector<8x32xf32>
    %666 = arith.mulf %665, %663 : vector<8x32xf32>
    %667 = arith.mulf %658, %637 : vector<8x32xf32>
    %668 = arith.addf %666, %667 : vector<8x32xf32>
    %c32_215 = arith.constant 32 : index
    %c0_216 = arith.constant 0 : index
    %669 = vector.load %arg15[%c32_215, %c0_216] : memref<64x256xf32, #tpu.memory_space<vmem>>, vector<8x96xf32>
    %670 = arith.truncf %668 : vector<8x32xf32> to vector<8x32xbf16>
    %c0_217 = arith.constant 0 : index
    %c0_218 = arith.constant 0 : index
    %671 = vector.load %arg9[%c0_217, %c0_218] : memref<32x96xbf16, #tpu.memory_space<vmem>>, vector<32x96xbf16>
    %cst_219 = arith.constant dense<0.000000e+00> : vector<8x96xf32>
    %672 = tpu.matmul %670, %671, %cst_219 {dimension_numbers = #tpu.dot_dimension_numbers<[1], [0], [0], [1], [0, 0, 1, 1], [], []>} : vector<8x32xbf16>, vector<32x96xbf16>, vector<8x96xf32> -> vector<8x96xf32>
    %673 = arith.addf %672, %540 : vector<8x96xf32>
    %674 = vector.extract_strided_slice %669 {offsets = [0, 0], sizes = [8, 32], strides = [1, 1]} : vector<8x96xf32> to vector<8x32xf32>
    %675 = vector.extract_strided_slice %673 {offsets = [0, 0], sizes = [8, 32], strides = [1, 1]} : vector<8x96xf32> to vector<8x32xf32>
    %676 = arith.addf %674, %675 : vector<8x32xf32>
    %677 = arith.negf %676 : vector<8x32xf32>
    %678 = math.exp %677 : vector<8x32xf32>
    %cst_220 = arith.constant 1.000000e+00 : f32
    %679 = vector.broadcast %cst_220 : f32 to vector<8x32xf32>
    %680 = arith.addf %679, %678 : vector<8x32xf32>
    %681 = arith.divf %679, %680 : vector<8x32xf32>
    %682 = vector.extract_strided_slice %669 {offsets = [0, 32], sizes = [8, 32], strides = [1, 1]} : vector<8x96xf32> to vector<8x32xf32>
    %683 = vector.extract_strided_slice %673 {offsets = [0, 32], sizes = [8, 32], strides = [1, 1]} : vector<8x96xf32> to vector<8x32xf32>
    %684 = arith.addf %682, %683 : vector<8x32xf32>
    %685 = arith.negf %684 : vector<8x32xf32>
    %686 = math.exp %685 : vector<8x32xf32>
    %cst_221 = arith.constant 1.000000e+00 : f32
    %687 = vector.broadcast %cst_221 : f32 to vector<8x32xf32>
    %688 = arith.addf %687, %686 : vector<8x32xf32>
    %689 = arith.divf %687, %688 : vector<8x32xf32>
    %690 = vector.extract_strided_slice %669 {offsets = [0, 64], sizes = [8, 32], strides = [1, 1]} : vector<8x96xf32> to vector<8x32xf32>
    %691 = vector.extract_strided_slice %673 {offsets = [0, 64], sizes = [8, 32], strides = [1, 1]} : vector<8x96xf32> to vector<8x32xf32>
    %692 = arith.mulf %681, %691 : vector<8x32xf32>
    %693 = arith.addf %690, %692 : vector<8x32xf32>
    %694 = math.tanh %693 : vector<8x32xf32>
    %cst_222 = arith.constant 1.000000e+00 : f32
    %695 = vector.broadcast %cst_222 : f32 to vector<8x32xf32>
    %696 = arith.subf %695, %689 : vector<8x32xf32>
    %697 = arith.mulf %696, %694 : vector<8x32xf32>
    %698 = arith.mulf %689, %668 : vector<8x32xf32>
    %699 = arith.addf %697, %698 : vector<8x32xf32>
    %c40_223 = arith.constant 40 : index
    %c0_224 = arith.constant 0 : index
    %700 = vector.load %arg15[%c40_223, %c0_224] : memref<64x256xf32, #tpu.memory_space<vmem>>, vector<8x96xf32>
    %701 = arith.truncf %699 : vector<8x32xf32> to vector<8x32xbf16>
    %c0_225 = arith.constant 0 : index
    %c0_226 = arith.constant 0 : index
    %702 = vector.load %arg9[%c0_225, %c0_226] : memref<32x96xbf16, #tpu.memory_space<vmem>>, vector<32x96xbf16>
    %cst_227 = arith.constant dense<0.000000e+00> : vector<8x96xf32>
    %703 = tpu.matmul %701, %702, %cst_227 {dimension_numbers = #tpu.dot_dimension_numbers<[1], [0], [0], [1], [0, 0, 1, 1], [], []>} : vector<8x32xbf16>, vector<32x96xbf16>, vector<8x96xf32> -> vector<8x96xf32>
    %704 = arith.addf %703, %540 : vector<8x96xf32>
    %705 = vector.extract_strided_slice %700 {offsets = [0, 0], sizes = [8, 32], strides = [1, 1]} : vector<8x96xf32> to vector<8x32xf32>
    %706 = vector.extract_strided_slice %704 {offsets = [0, 0], sizes = [8, 32], strides = [1, 1]} : vector<8x96xf32> to vector<8x32xf32>
    %707 = arith.addf %705, %706 : vector<8x32xf32>
    %708 = arith.negf %707 : vector<8x32xf32>
    %709 = math.exp %708 : vector<8x32xf32>
    %cst_228 = arith.constant 1.000000e+00 : f32
    %710 = vector.broadcast %cst_228 : f32 to vector<8x32xf32>
    %711 = arith.addf %710, %709 : vector<8x32xf32>
    %712 = arith.divf %710, %711 : vector<8x32xf32>
    %713 = vector.extract_strided_slice %700 {offsets = [0, 32], sizes = [8, 32], strides = [1, 1]} : vector<8x96xf32> to vector<8x32xf32>
    %714 = vector.extract_strided_slice %704 {offsets = [0, 32], sizes = [8, 32], strides = [1, 1]} : vector<8x96xf32> to vector<8x32xf32>
    %715 = arith.addf %713, %714 : vector<8x32xf32>
    %716 = arith.negf %715 : vector<8x32xf32>
    %717 = math.exp %716 : vector<8x32xf32>
    %cst_229 = arith.constant 1.000000e+00 : f32
    %718 = vector.broadcast %cst_229 : f32 to vector<8x32xf32>
    %719 = arith.addf %718, %717 : vector<8x32xf32>
    %720 = arith.divf %718, %719 : vector<8x32xf32>
    %721 = vector.extract_strided_slice %700 {offsets = [0, 64], sizes = [8, 32], strides = [1, 1]} : vector<8x96xf32> to vector<8x32xf32>
    %722 = vector.extract_strided_slice %704 {offsets = [0, 64], sizes = [8, 32], strides = [1, 1]} : vector<8x96xf32> to vector<8x32xf32>
    %723 = arith.mulf %712, %722 : vector<8x32xf32>
    %724 = arith.addf %721, %723 : vector<8x32xf32>
    %725 = math.tanh %724 : vector<8x32xf32>
    %cst_230 = arith.constant 1.000000e+00 : f32
    %726 = vector.broadcast %cst_230 : f32 to vector<8x32xf32>
    %727 = arith.subf %726, %720 : vector<8x32xf32>
    %728 = arith.mulf %727, %725 : vector<8x32xf32>
    %729 = arith.mulf %720, %699 : vector<8x32xf32>
    %730 = arith.addf %728, %729 : vector<8x32xf32>
    %c48_231 = arith.constant 48 : index
    %c0_232 = arith.constant 0 : index
    %731 = vector.load %arg15[%c48_231, %c0_232] : memref<64x256xf32, #tpu.memory_space<vmem>>, vector<8x96xf32>
    %732 = arith.truncf %730 : vector<8x32xf32> to vector<8x32xbf16>
    %c0_233 = arith.constant 0 : index
    %c0_234 = arith.constant 0 : index
    %733 = vector.load %arg9[%c0_233, %c0_234] : memref<32x96xbf16, #tpu.memory_space<vmem>>, vector<32x96xbf16>
    %cst_235 = arith.constant dense<0.000000e+00> : vector<8x96xf32>
    %734 = tpu.matmul %732, %733, %cst_235 {dimension_numbers = #tpu.dot_dimension_numbers<[1], [0], [0], [1], [0, 0, 1, 1], [], []>} : vector<8x32xbf16>, vector<32x96xbf16>, vector<8x96xf32> -> vector<8x96xf32>
    %735 = arith.addf %734, %540 : vector<8x96xf32>
    %736 = vector.extract_strided_slice %731 {offsets = [0, 0], sizes = [8, 32], strides = [1, 1]} : vector<8x96xf32> to vector<8x32xf32>
    %737 = vector.extract_strided_slice %735 {offsets = [0, 0], sizes = [8, 32], strides = [1, 1]} : vector<8x96xf32> to vector<8x32xf32>
    %738 = arith.addf %736, %737 : vector<8x32xf32>
    %739 = arith.negf %738 : vector<8x32xf32>
    %740 = math.exp %739 : vector<8x32xf32>
    %cst_236 = arith.constant 1.000000e+00 : f32
    %741 = vector.broadcast %cst_236 : f32 to vector<8x32xf32>
    %742 = arith.addf %741, %740 : vector<8x32xf32>
    %743 = arith.divf %741, %742 : vector<8x32xf32>
    %744 = vector.extract_strided_slice %731 {offsets = [0, 32], sizes = [8, 32], strides = [1, 1]} : vector<8x96xf32> to vector<8x32xf32>
    %745 = vector.extract_strided_slice %735 {offsets = [0, 32], sizes = [8, 32], strides = [1, 1]} : vector<8x96xf32> to vector<8x32xf32>
    %746 = arith.addf %744, %745 : vector<8x32xf32>
    %747 = arith.negf %746 : vector<8x32xf32>
    %748 = math.exp %747 : vector<8x32xf32>
    %cst_237 = arith.constant 1.000000e+00 : f32
    %749 = vector.broadcast %cst_237 : f32 to vector<8x32xf32>
    %750 = arith.addf %749, %748 : vector<8x32xf32>
    %751 = arith.divf %749, %750 : vector<8x32xf32>
    %752 = vector.extract_strided_slice %731 {offsets = [0, 64], sizes = [8, 32], strides = [1, 1]} : vector<8x96xf32> to vector<8x32xf32>
    %753 = vector.extract_strided_slice %735 {offsets = [0, 64], sizes = [8, 32], strides = [1, 1]} : vector<8x96xf32> to vector<8x32xf32>
    %754 = arith.mulf %743, %753 : vector<8x32xf32>
    %755 = arith.addf %752, %754 : vector<8x32xf32>
    %756 = math.tanh %755 : vector<8x32xf32>
    %cst_238 = arith.constant 1.000000e+00 : f32
    %757 = vector.broadcast %cst_238 : f32 to vector<8x32xf32>
    %758 = arith.subf %757, %751 : vector<8x32xf32>
    %759 = arith.mulf %758, %756 : vector<8x32xf32>
    %760 = arith.mulf %751, %730 : vector<8x32xf32>
    %761 = arith.addf %759, %760 : vector<8x32xf32>
    %c56_239 = arith.constant 56 : index
    %c0_240 = arith.constant 0 : index
    %762 = vector.load %arg15[%c56_239, %c0_240] : memref<64x256xf32, #tpu.memory_space<vmem>>, vector<8x96xf32>
    %763 = arith.truncf %761 : vector<8x32xf32> to vector<8x32xbf16>
    %c0_241 = arith.constant 0 : index
    %c0_242 = arith.constant 0 : index
    %764 = vector.load %arg9[%c0_241, %c0_242] : memref<32x96xbf16, #tpu.memory_space<vmem>>, vector<32x96xbf16>
    %cst_243 = arith.constant dense<0.000000e+00> : vector<8x96xf32>
    %765 = tpu.matmul %763, %764, %cst_243 {dimension_numbers = #tpu.dot_dimension_numbers<[1], [0], [0], [1], [0, 0, 1, 1], [], []>} : vector<8x32xbf16>, vector<32x96xbf16>, vector<8x96xf32> -> vector<8x96xf32>
    %766 = arith.addf %765, %540 : vector<8x96xf32>
    %767 = vector.extract_strided_slice %762 {offsets = [0, 0], sizes = [8, 32], strides = [1, 1]} : vector<8x96xf32> to vector<8x32xf32>
    %768 = vector.extract_strided_slice %766 {offsets = [0, 0], sizes = [8, 32], strides = [1, 1]} : vector<8x96xf32> to vector<8x32xf32>
    %769 = arith.addf %767, %768 : vector<8x32xf32>
    %770 = arith.negf %769 : vector<8x32xf32>
    %771 = math.exp %770 : vector<8x32xf32>
    %cst_244 = arith.constant 1.000000e+00 : f32
    %772 = vector.broadcast %cst_244 : f32 to vector<8x32xf32>
    %773 = arith.addf %772, %771 : vector<8x32xf32>
    %774 = arith.divf %772, %773 : vector<8x32xf32>
    %775 = vector.extract_strided_slice %762 {offsets = [0, 32], sizes = [8, 32], strides = [1, 1]} : vector<8x96xf32> to vector<8x32xf32>
    %776 = vector.extract_strided_slice %766 {offsets = [0, 32], sizes = [8, 32], strides = [1, 1]} : vector<8x96xf32> to vector<8x32xf32>
    %777 = arith.addf %775, %776 : vector<8x32xf32>
    %778 = arith.negf %777 : vector<8x32xf32>
    %779 = math.exp %778 : vector<8x32xf32>
    %cst_245 = arith.constant 1.000000e+00 : f32
    %780 = vector.broadcast %cst_245 : f32 to vector<8x32xf32>
    %781 = arith.addf %780, %779 : vector<8x32xf32>
    %782 = arith.divf %780, %781 : vector<8x32xf32>
    %783 = vector.extract_strided_slice %762 {offsets = [0, 64], sizes = [8, 32], strides = [1, 1]} : vector<8x96xf32> to vector<8x32xf32>
    %784 = vector.extract_strided_slice %766 {offsets = [0, 64], sizes = [8, 32], strides = [1, 1]} : vector<8x96xf32> to vector<8x32xf32>
    %785 = arith.mulf %774, %784 : vector<8x32xf32>
    %786 = arith.addf %783, %785 : vector<8x32xf32>
    %787 = math.tanh %786 : vector<8x32xf32>
    %cst_246 = arith.constant 1.000000e+00 : f32
    %788 = vector.broadcast %cst_246 : f32 to vector<8x32xf32>
    %789 = arith.subf %788, %782 : vector<8x32xf32>
    %790 = arith.mulf %789, %787 : vector<8x32xf32>
    %791 = arith.mulf %782, %761 : vector<8x32xf32>
    %792 = arith.addf %790, %791 : vector<8x32xf32>
    %cst_247 = arith.constant 0.000000e+00 : f32
    %793 = vector.broadcast %cst_247 : f32 to vector<8x32xf32>
    %c56_248 = arith.constant 56 : index
    %c128_249 = arith.constant 128 : index
    %794 = vector.load %arg15[%c56_248, %c128_249] : memref<64x256xf32, #tpu.memory_space<vmem>>, vector<8x96xf32>
    %795 = arith.truncf %793 : vector<8x32xf32> to vector<8x32xbf16>
    %c0_250 = arith.constant 0 : index
    %c0_251 = arith.constant 0 : index
    %796 = vector.load %arg11[%c0_250, %c0_251] : memref<32x96xbf16, #tpu.memory_space<vmem>>, vector<32x96xbf16>
    %cst_252 = arith.constant dense<0.000000e+00> : vector<8x96xf32>
    %797 = tpu.matmul %795, %796, %cst_252 {dimension_numbers = #tpu.dot_dimension_numbers<[1], [0], [0], [1], [0, 0, 1, 1], [], []>} : vector<8x32xbf16>, vector<32x96xbf16>, vector<8x96xf32> -> vector<8x96xf32>
    %798 = arith.addf %797, %543 : vector<8x96xf32>
    %799 = vector.extract_strided_slice %794 {offsets = [0, 0], sizes = [8, 32], strides = [1, 1]} : vector<8x96xf32> to vector<8x32xf32>
    %800 = vector.extract_strided_slice %798 {offsets = [0, 0], sizes = [8, 32], strides = [1, 1]} : vector<8x96xf32> to vector<8x32xf32>
    %801 = arith.addf %799, %800 : vector<8x32xf32>
    %802 = arith.negf %801 : vector<8x32xf32>
    %803 = math.exp %802 : vector<8x32xf32>
    %cst_253 = arith.constant 1.000000e+00 : f32
    %804 = vector.broadcast %cst_253 : f32 to vector<8x32xf32>
    %805 = arith.addf %804, %803 : vector<8x32xf32>
    %806 = arith.divf %804, %805 : vector<8x32xf32>
    %807 = vector.extract_strided_slice %794 {offsets = [0, 32], sizes = [8, 32], strides = [1, 1]} : vector<8x96xf32> to vector<8x32xf32>
    %808 = vector.extract_strided_slice %798 {offsets = [0, 32], sizes = [8, 32], strides = [1, 1]} : vector<8x96xf32> to vector<8x32xf32>
    %809 = arith.addf %807, %808 : vector<8x32xf32>
    %810 = arith.negf %809 : vector<8x32xf32>
    %811 = math.exp %810 : vector<8x32xf32>
    %cst_254 = arith.constant 1.000000e+00 : f32
    %812 = vector.broadcast %cst_254 : f32 to vector<8x32xf32>
    %813 = arith.addf %812, %811 : vector<8x32xf32>
    %814 = arith.divf %812, %813 : vector<8x32xf32>
    %815 = vector.extract_strided_slice %794 {offsets = [0, 64], sizes = [8, 32], strides = [1, 1]} : vector<8x96xf32> to vector<8x32xf32>
    %816 = vector.extract_strided_slice %798 {offsets = [0, 64], sizes = [8, 32], strides = [1, 1]} : vector<8x96xf32> to vector<8x32xf32>
    %817 = arith.mulf %806, %816 : vector<8x32xf32>
    %818 = arith.addf %815, %817 : vector<8x32xf32>
    %819 = math.tanh %818 : vector<8x32xf32>
    %cst_255 = arith.constant 1.000000e+00 : f32
    %820 = vector.broadcast %cst_255 : f32 to vector<8x32xf32>
    %821 = arith.subf %820, %814 : vector<8x32xf32>
    %822 = arith.mulf %821, %819 : vector<8x32xf32>
    %823 = arith.mulf %814, %793 : vector<8x32xf32>
    %824 = arith.addf %822, %823 : vector<8x32xf32>
    %c48_256 = arith.constant 48 : index
    %c128_257 = arith.constant 128 : index
    %825 = vector.load %arg15[%c48_256, %c128_257] : memref<64x256xf32, #tpu.memory_space<vmem>>, vector<8x96xf32>
    %826 = arith.truncf %824 : vector<8x32xf32> to vector<8x32xbf16>
    %c0_258 = arith.constant 0 : index
    %c0_259 = arith.constant 0 : index
    %827 = vector.load %arg11[%c0_258, %c0_259] : memref<32x96xbf16, #tpu.memory_space<vmem>>, vector<32x96xbf16>
    %cst_260 = arith.constant dense<0.000000e+00> : vector<8x96xf32>
    %828 = tpu.matmul %826, %827, %cst_260 {dimension_numbers = #tpu.dot_dimension_numbers<[1], [0], [0], [1], [0, 0, 1, 1], [], []>} : vector<8x32xbf16>, vector<32x96xbf16>, vector<8x96xf32> -> vector<8x96xf32>
    %829 = arith.addf %828, %543 : vector<8x96xf32>
    %830 = vector.extract_strided_slice %825 {offsets = [0, 0], sizes = [8, 32], strides = [1, 1]} : vector<8x96xf32> to vector<8x32xf32>
    %831 = vector.extract_strided_slice %829 {offsets = [0, 0], sizes = [8, 32], strides = [1, 1]} : vector<8x96xf32> to vector<8x32xf32>
    %832 = arith.addf %830, %831 : vector<8x32xf32>
    %833 = arith.negf %832 : vector<8x32xf32>
    %834 = math.exp %833 : vector<8x32xf32>
    %cst_261 = arith.constant 1.000000e+00 : f32
    %835 = vector.broadcast %cst_261 : f32 to vector<8x32xf32>
    %836 = arith.addf %835, %834 : vector<8x32xf32>
    %837 = arith.divf %835, %836 : vector<8x32xf32>
    %838 = vector.extract_strided_slice %825 {offsets = [0, 32], sizes = [8, 32], strides = [1, 1]} : vector<8x96xf32> to vector<8x32xf32>
    %839 = vector.extract_strided_slice %829 {offsets = [0, 32], sizes = [8, 32], strides = [1, 1]} : vector<8x96xf32> to vector<8x32xf32>
    %840 = arith.addf %838, %839 : vector<8x32xf32>
    %841 = arith.negf %840 : vector<8x32xf32>
    %842 = math.exp %841 : vector<8x32xf32>
    %cst_262 = arith.constant 1.000000e+00 : f32
    %843 = vector.broadcast %cst_262 : f32 to vector<8x32xf32>
    %844 = arith.addf %843, %842 : vector<8x32xf32>
    %845 = arith.divf %843, %844 : vector<8x32xf32>
    %846 = vector.extract_strided_slice %825 {offsets = [0, 64], sizes = [8, 32], strides = [1, 1]} : vector<8x96xf32> to vector<8x32xf32>
    %847 = vector.extract_strided_slice %829 {offsets = [0, 64], sizes = [8, 32], strides = [1, 1]} : vector<8x96xf32> to vector<8x32xf32>
    %848 = arith.mulf %837, %847 : vector<8x32xf32>
    %849 = arith.addf %846, %848 : vector<8x32xf32>
    %850 = math.tanh %849 : vector<8x32xf32>
    %cst_263 = arith.constant 1.000000e+00 : f32
    %851 = vector.broadcast %cst_263 : f32 to vector<8x32xf32>
    %852 = arith.subf %851, %845 : vector<8x32xf32>
    %853 = arith.mulf %852, %850 : vector<8x32xf32>
    %854 = arith.mulf %845, %824 : vector<8x32xf32>
    %855 = arith.addf %853, %854 : vector<8x32xf32>
    %c40_264 = arith.constant 40 : index
    %c128_265 = arith.constant 128 : index
    %856 = vector.load %arg15[%c40_264, %c128_265] : memref<64x256xf32, #tpu.memory_space<vmem>>, vector<8x96xf32>
    %857 = arith.truncf %855 : vector<8x32xf32> to vector<8x32xbf16>
    %c0_266 = arith.constant 0 : index
    %c0_267 = arith.constant 0 : index
    %858 = vector.load %arg11[%c0_266, %c0_267] : memref<32x96xbf16, #tpu.memory_space<vmem>>, vector<32x96xbf16>
    %cst_268 = arith.constant dense<0.000000e+00> : vector<8x96xf32>
    %859 = tpu.matmul %857, %858, %cst_268 {dimension_numbers = #tpu.dot_dimension_numbers<[1], [0], [0], [1], [0, 0, 1, 1], [], []>} : vector<8x32xbf16>, vector<32x96xbf16>, vector<8x96xf32> -> vector<8x96xf32>
    %860 = arith.addf %859, %543 : vector<8x96xf32>
    %861 = vector.extract_strided_slice %856 {offsets = [0, 0], sizes = [8, 32], strides = [1, 1]} : vector<8x96xf32> to vector<8x32xf32>
    %862 = vector.extract_strided_slice %860 {offsets = [0, 0], sizes = [8, 32], strides = [1, 1]} : vector<8x96xf32> to vector<8x32xf32>
    %863 = arith.addf %861, %862 : vector<8x32xf32>
    %864 = arith.negf %863 : vector<8x32xf32>
    %865 = math.exp %864 : vector<8x32xf32>
    %cst_269 = arith.constant 1.000000e+00 : f32
    %866 = vector.broadcast %cst_269 : f32 to vector<8x32xf32>
    %867 = arith.addf %866, %865 : vector<8x32xf32>
    %868 = arith.divf %866, %867 : vector<8x32xf32>
    %869 = vector.extract_strided_slice %856 {offsets = [0, 32], sizes = [8, 32], strides = [1, 1]} : vector<8x96xf32> to vector<8x32xf32>
    %870 = vector.extract_strided_slice %860 {offsets = [0, 32], sizes = [8, 32], strides = [1, 1]} : vector<8x96xf32> to vector<8x32xf32>
    %871 = arith.addf %869, %870 : vector<8x32xf32>
    %872 = arith.negf %871 : vector<8x32xf32>
    %873 = math.exp %872 : vector<8x32xf32>
    %cst_270 = arith.constant 1.000000e+00 : f32
    %874 = vector.broadcast %cst_270 : f32 to vector<8x32xf32>
    %875 = arith.addf %874, %873 : vector<8x32xf32>
    %876 = arith.divf %874, %875 : vector<8x32xf32>
    %877 = vector.extract_strided_slice %856 {offsets = [0, 64], sizes = [8, 32], strides = [1, 1]} : vector<8x96xf32> to vector<8x32xf32>
    %878 = vector.extract_strided_slice %860 {offsets = [0, 64], sizes = [8, 32], strides = [1, 1]} : vector<8x96xf32> to vector<8x32xf32>
    %879 = arith.mulf %868, %878 : vector<8x32xf32>
    %880 = arith.addf %877, %879 : vector<8x32xf32>
    %881 = math.tanh %880 : vector<8x32xf32>
    %cst_271 = arith.constant 1.000000e+00 : f32
    %882 = vector.broadcast %cst_271 : f32 to vector<8x32xf32>
    %883 = arith.subf %882, %876 : vector<8x32xf32>
    %884 = arith.mulf %883, %881 : vector<8x32xf32>
    %885 = arith.mulf %876, %855 : vector<8x32xf32>
    %886 = arith.addf %884, %885 : vector<8x32xf32>
    %c32_272 = arith.constant 32 : index
    %c128_273 = arith.constant 128 : index
    %887 = vector.load %arg15[%c32_272, %c128_273] : memref<64x256xf32, #tpu.memory_space<vmem>>, vector<8x96xf32>
    %888 = arith.truncf %886 : vector<8x32xf32> to vector<8x32xbf16>
    %c0_274 = arith.constant 0 : index
    %c0_275 = arith.constant 0 : index
    %889 = vector.load %arg11[%c0_274, %c0_275] : memref<32x96xbf16, #tpu.memory_space<vmem>>, vector<32x96xbf16>
    %cst_276 = arith.constant dense<0.000000e+00> : vector<8x96xf32>
    %890 = tpu.matmul %888, %889, %cst_276 {dimension_numbers = #tpu.dot_dimension_numbers<[1], [0], [0], [1], [0, 0, 1, 1], [], []>} : vector<8x32xbf16>, vector<32x96xbf16>, vector<8x96xf32> -> vector<8x96xf32>
    %891 = arith.addf %890, %543 : vector<8x96xf32>
    %892 = vector.extract_strided_slice %887 {offsets = [0, 0], sizes = [8, 32], strides = [1, 1]} : vector<8x96xf32> to vector<8x32xf32>
    %893 = vector.extract_strided_slice %891 {offsets = [0, 0], sizes = [8, 32], strides = [1, 1]} : vector<8x96xf32> to vector<8x32xf32>
    %894 = arith.addf %892, %893 : vector<8x32xf32>
    %895 = arith.negf %894 : vector<8x32xf32>
    %896 = math.exp %895 : vector<8x32xf32>
    %cst_277 = arith.constant 1.000000e+00 : f32
    %897 = vector.broadcast %cst_277 : f32 to vector<8x32xf32>
    %898 = arith.addf %897, %896 : vector<8x32xf32>
    %899 = arith.divf %897, %898 : vector<8x32xf32>
    %900 = vector.extract_strided_slice %887 {offsets = [0, 32], sizes = [8, 32], strides = [1, 1]} : vector<8x96xf32> to vector<8x32xf32>
    %901 = vector.extract_strided_slice %891 {offsets = [0, 32], sizes = [8, 32], strides = [1, 1]} : vector<8x96xf32> to vector<8x32xf32>
    %902 = arith.addf %900, %901 : vector<8x32xf32>
    %903 = arith.negf %902 : vector<8x32xf32>
    %904 = math.exp %903 : vector<8x32xf32>
    %cst_278 = arith.constant 1.000000e+00 : f32
    %905 = vector.broadcast %cst_278 : f32 to vector<8x32xf32>
    %906 = arith.addf %905, %904 : vector<8x32xf32>
    %907 = arith.divf %905, %906 : vector<8x32xf32>
    %908 = vector.extract_strided_slice %887 {offsets = [0, 64], sizes = [8, 32], strides = [1, 1]} : vector<8x96xf32> to vector<8x32xf32>
    %909 = vector.extract_strided_slice %891 {offsets = [0, 64], sizes = [8, 32], strides = [1, 1]} : vector<8x96xf32> to vector<8x32xf32>
    %910 = arith.mulf %899, %909 : vector<8x32xf32>
    %911 = arith.addf %908, %910 : vector<8x32xf32>
    %912 = math.tanh %911 : vector<8x32xf32>
    %cst_279 = arith.constant 1.000000e+00 : f32
    %913 = vector.broadcast %cst_279 : f32 to vector<8x32xf32>
    %914 = arith.subf %913, %907 : vector<8x32xf32>
    %915 = arith.mulf %914, %912 : vector<8x32xf32>
    %916 = arith.mulf %907, %886 : vector<8x32xf32>
    %917 = arith.addf %915, %916 : vector<8x32xf32>
    %c24_280 = arith.constant 24 : index
    %c128_281 = arith.constant 128 : index
    %918 = vector.load %arg15[%c24_280, %c128_281] : memref<64x256xf32, #tpu.memory_space<vmem>>, vector<8x96xf32>
    %919 = arith.truncf %917 : vector<8x32xf32> to vector<8x32xbf16>
    %c0_282 = arith.constant 0 : index
    %c0_283 = arith.constant 0 : index
    %920 = vector.load %arg11[%c0_282, %c0_283] : memref<32x96xbf16, #tpu.memory_space<vmem>>, vector<32x96xbf16>
    %cst_284 = arith.constant dense<0.000000e+00> : vector<8x96xf32>
    %921 = tpu.matmul %919, %920, %cst_284 {dimension_numbers = #tpu.dot_dimension_numbers<[1], [0], [0], [1], [0, 0, 1, 1], [], []>} : vector<8x32xbf16>, vector<32x96xbf16>, vector<8x96xf32> -> vector<8x96xf32>
    %922 = arith.addf %921, %543 : vector<8x96xf32>
    %923 = vector.extract_strided_slice %918 {offsets = [0, 0], sizes = [8, 32], strides = [1, 1]} : vector<8x96xf32> to vector<8x32xf32>
    %924 = vector.extract_strided_slice %922 {offsets = [0, 0], sizes = [8, 32], strides = [1, 1]} : vector<8x96xf32> to vector<8x32xf32>
    %925 = arith.addf %923, %924 : vector<8x32xf32>
    %926 = arith.negf %925 : vector<8x32xf32>
    %927 = math.exp %926 : vector<8x32xf32>
    %cst_285 = arith.constant 1.000000e+00 : f32
    %928 = vector.broadcast %cst_285 : f32 to vector<8x32xf32>
    %929 = arith.addf %928, %927 : vector<8x32xf32>
    %930 = arith.divf %928, %929 : vector<8x32xf32>
    %931 = vector.extract_strided_slice %918 {offsets = [0, 32], sizes = [8, 32], strides = [1, 1]} : vector<8x96xf32> to vector<8x32xf32>
    %932 = vector.extract_strided_slice %922 {offsets = [0, 32], sizes = [8, 32], strides = [1, 1]} : vector<8x96xf32> to vector<8x32xf32>
    %933 = arith.addf %931, %932 : vector<8x32xf32>
    %934 = arith.negf %933 : vector<8x32xf32>
    %935 = math.exp %934 : vector<8x32xf32>
    %cst_286 = arith.constant 1.000000e+00 : f32
    %936 = vector.broadcast %cst_286 : f32 to vector<8x32xf32>
    %937 = arith.addf %936, %935 : vector<8x32xf32>
    %938 = arith.divf %936, %937 : vector<8x32xf32>
    %939 = vector.extract_strided_slice %918 {offsets = [0, 64], sizes = [8, 32], strides = [1, 1]} : vector<8x96xf32> to vector<8x32xf32>
    %940 = vector.extract_strided_slice %922 {offsets = [0, 64], sizes = [8, 32], strides = [1, 1]} : vector<8x96xf32> to vector<8x32xf32>
    %941 = arith.mulf %930, %940 : vector<8x32xf32>
    %942 = arith.addf %939, %941 : vector<8x32xf32>
    %943 = math.tanh %942 : vector<8x32xf32>
    %cst_287 = arith.constant 1.000000e+00 : f32
    %944 = vector.broadcast %cst_287 : f32 to vector<8x32xf32>
    %945 = arith.subf %944, %938 : vector<8x32xf32>
    %946 = arith.mulf %945, %943 : vector<8x32xf32>
    %947 = arith.mulf %938, %917 : vector<8x32xf32>
    %948 = arith.addf %946, %947 : vector<8x32xf32>
    %c16_288 = arith.constant 16 : index
    %c128_289 = arith.constant 128 : index
    %949 = vector.load %arg15[%c16_288, %c128_289] : memref<64x256xf32, #tpu.memory_space<vmem>>, vector<8x96xf32>
    %950 = arith.truncf %948 : vector<8x32xf32> to vector<8x32xbf16>
    %c0_290 = arith.constant 0 : index
    %c0_291 = arith.constant 0 : index
    %951 = vector.load %arg11[%c0_290, %c0_291] : memref<32x96xbf16, #tpu.memory_space<vmem>>, vector<32x96xbf16>
    %cst_292 = arith.constant dense<0.000000e+00> : vector<8x96xf32>
    %952 = tpu.matmul %950, %951, %cst_292 {dimension_numbers = #tpu.dot_dimension_numbers<[1], [0], [0], [1], [0, 0, 1, 1], [], []>} : vector<8x32xbf16>, vector<32x96xbf16>, vector<8x96xf32> -> vector<8x96xf32>
    %953 = arith.addf %952, %543 : vector<8x96xf32>
    %954 = vector.extract_strided_slice %949 {offsets = [0, 0], sizes = [8, 32], strides = [1, 1]} : vector<8x96xf32> to vector<8x32xf32>
    %955 = vector.extract_strided_slice %953 {offsets = [0, 0], sizes = [8, 32], strides = [1, 1]} : vector<8x96xf32> to vector<8x32xf32>
    %956 = arith.addf %954, %955 : vector<8x32xf32>
    %957 = arith.negf %956 : vector<8x32xf32>
    %958 = math.exp %957 : vector<8x32xf32>
    %cst_293 = arith.constant 1.000000e+00 : f32
    %959 = vector.broadcast %cst_293 : f32 to vector<8x32xf32>
    %960 = arith.addf %959, %958 : vector<8x32xf32>
    %961 = arith.divf %959, %960 : vector<8x32xf32>
    %962 = vector.extract_strided_slice %949 {offsets = [0, 32], sizes = [8, 32], strides = [1, 1]} : vector<8x96xf32> to vector<8x32xf32>
    %963 = vector.extract_strided_slice %953 {offsets = [0, 32], sizes = [8, 32], strides = [1, 1]} : vector<8x96xf32> to vector<8x32xf32>
    %964 = arith.addf %962, %963 : vector<8x32xf32>
    %965 = arith.negf %964 : vector<8x32xf32>
    %966 = math.exp %965 : vector<8x32xf32>
    %cst_294 = arith.constant 1.000000e+00 : f32
    %967 = vector.broadcast %cst_294 : f32 to vector<8x32xf32>
    %968 = arith.addf %967, %966 : vector<8x32xf32>
    %969 = arith.divf %967, %968 : vector<8x32xf32>
    %970 = vector.extract_strided_slice %949 {offsets = [0, 64], sizes = [8, 32], strides = [1, 1]} : vector<8x96xf32> to vector<8x32xf32>
    %971 = vector.extract_strided_slice %953 {offsets = [0, 64], sizes = [8, 32], strides = [1, 1]} : vector<8x96xf32> to vector<8x32xf32>
    %972 = arith.mulf %961, %971 : vector<8x32xf32>
    %973 = arith.addf %970, %972 : vector<8x32xf32>
    %974 = math.tanh %973 : vector<8x32xf32>
    %cst_295 = arith.constant 1.000000e+00 : f32
    %975 = vector.broadcast %cst_295 : f32 to vector<8x32xf32>
    %976 = arith.subf %975, %969 : vector<8x32xf32>
    %977 = arith.mulf %976, %974 : vector<8x32xf32>
    %978 = arith.mulf %969, %948 : vector<8x32xf32>
    %979 = arith.addf %977, %978 : vector<8x32xf32>
    %c8_296 = arith.constant 8 : index
    %c128_297 = arith.constant 128 : index
    %980 = vector.load %arg15[%c8_296, %c128_297] : memref<64x256xf32, #tpu.memory_space<vmem>>, vector<8x96xf32>
    %981 = arith.truncf %979 : vector<8x32xf32> to vector<8x32xbf16>
    %c0_298 = arith.constant 0 : index
    %c0_299 = arith.constant 0 : index
    %982 = vector.load %arg11[%c0_298, %c0_299] : memref<32x96xbf16, #tpu.memory_space<vmem>>, vector<32x96xbf16>
    %cst_300 = arith.constant dense<0.000000e+00> : vector<8x96xf32>
    %983 = tpu.matmul %981, %982, %cst_300 {dimension_numbers = #tpu.dot_dimension_numbers<[1], [0], [0], [1], [0, 0, 1, 1], [], []>} : vector<8x32xbf16>, vector<32x96xbf16>, vector<8x96xf32> -> vector<8x96xf32>
    %984 = arith.addf %983, %543 : vector<8x96xf32>
    %985 = vector.extract_strided_slice %980 {offsets = [0, 0], sizes = [8, 32], strides = [1, 1]} : vector<8x96xf32> to vector<8x32xf32>
    %986 = vector.extract_strided_slice %984 {offsets = [0, 0], sizes = [8, 32], strides = [1, 1]} : vector<8x96xf32> to vector<8x32xf32>
    %987 = arith.addf %985, %986 : vector<8x32xf32>
    %988 = arith.negf %987 : vector<8x32xf32>
    %989 = math.exp %988 : vector<8x32xf32>
    %cst_301 = arith.constant 1.000000e+00 : f32
    %990 = vector.broadcast %cst_301 : f32 to vector<8x32xf32>
    %991 = arith.addf %990, %989 : vector<8x32xf32>
    %992 = arith.divf %990, %991 : vector<8x32xf32>
    %993 = vector.extract_strided_slice %980 {offsets = [0, 32], sizes = [8, 32], strides = [1, 1]} : vector<8x96xf32> to vector<8x32xf32>
    %994 = vector.extract_strided_slice %984 {offsets = [0, 32], sizes = [8, 32], strides = [1, 1]} : vector<8x96xf32> to vector<8x32xf32>
    %995 = arith.addf %993, %994 : vector<8x32xf32>
    %996 = arith.negf %995 : vector<8x32xf32>
    %997 = math.exp %996 : vector<8x32xf32>
    %cst_302 = arith.constant 1.000000e+00 : f32
    %998 = vector.broadcast %cst_302 : f32 to vector<8x32xf32>
    %999 = arith.addf %998, %997 : vector<8x32xf32>
    %1000 = arith.divf %998, %999 : vector<8x32xf32>
    %1001 = vector.extract_strided_slice %980 {offsets = [0, 64], sizes = [8, 32], strides = [1, 1]} : vector<8x96xf32> to vector<8x32xf32>
    %1002 = vector.extract_strided_slice %984 {offsets = [0, 64], sizes = [8, 32], strides = [1, 1]} : vector<8x96xf32> to vector<8x32xf32>
    %1003 = arith.mulf %992, %1002 : vector<8x32xf32>
    %1004 = arith.addf %1001, %1003 : vector<8x32xf32>
    %1005 = math.tanh %1004 : vector<8x32xf32>
    %cst_303 = arith.constant 1.000000e+00 : f32
    %1006 = vector.broadcast %cst_303 : f32 to vector<8x32xf32>
    %1007 = arith.subf %1006, %1000 : vector<8x32xf32>
    %1008 = arith.mulf %1007, %1005 : vector<8x32xf32>
    %1009 = arith.mulf %1000, %979 : vector<8x32xf32>
    %1010 = arith.addf %1008, %1009 : vector<8x32xf32>
    %c0_304 = arith.constant 0 : index
    %c128_305 = arith.constant 128 : index
    %1011 = vector.load %arg15[%c0_304, %c128_305] : memref<64x256xf32, #tpu.memory_space<vmem>>, vector<8x96xf32>
    %1012 = arith.truncf %1010 : vector<8x32xf32> to vector<8x32xbf16>
    %c0_306 = arith.constant 0 : index
    %c0_307 = arith.constant 0 : index
    %1013 = vector.load %arg11[%c0_306, %c0_307] : memref<32x96xbf16, #tpu.memory_space<vmem>>, vector<32x96xbf16>
    %cst_308 = arith.constant dense<0.000000e+00> : vector<8x96xf32>
    %1014 = tpu.matmul %1012, %1013, %cst_308 {dimension_numbers = #tpu.dot_dimension_numbers<[1], [0], [0], [1], [0, 0, 1, 1], [], []>} : vector<8x32xbf16>, vector<32x96xbf16>, vector<8x96xf32> -> vector<8x96xf32>
    %1015 = arith.addf %1014, %543 : vector<8x96xf32>
    %1016 = vector.extract_strided_slice %1011 {offsets = [0, 0], sizes = [8, 32], strides = [1, 1]} : vector<8x96xf32> to vector<8x32xf32>
    %1017 = vector.extract_strided_slice %1015 {offsets = [0, 0], sizes = [8, 32], strides = [1, 1]} : vector<8x96xf32> to vector<8x32xf32>
    %1018 = arith.addf %1016, %1017 : vector<8x32xf32>
    %1019 = arith.negf %1018 : vector<8x32xf32>
    %1020 = math.exp %1019 : vector<8x32xf32>
    %cst_309 = arith.constant 1.000000e+00 : f32
    %1021 = vector.broadcast %cst_309 : f32 to vector<8x32xf32>
    %1022 = arith.addf %1021, %1020 : vector<8x32xf32>
    %1023 = arith.divf %1021, %1022 : vector<8x32xf32>
    %1024 = vector.extract_strided_slice %1011 {offsets = [0, 32], sizes = [8, 32], strides = [1, 1]} : vector<8x96xf32> to vector<8x32xf32>
    %1025 = vector.extract_strided_slice %1015 {offsets = [0, 32], sizes = [8, 32], strides = [1, 1]} : vector<8x96xf32> to vector<8x32xf32>
    %1026 = arith.addf %1024, %1025 : vector<8x32xf32>
    %1027 = arith.negf %1026 : vector<8x32xf32>
    %1028 = math.exp %1027 : vector<8x32xf32>
    %cst_310 = arith.constant 1.000000e+00 : f32
    %1029 = vector.broadcast %cst_310 : f32 to vector<8x32xf32>
    %1030 = arith.addf %1029, %1028 : vector<8x32xf32>
    %1031 = arith.divf %1029, %1030 : vector<8x32xf32>
    %1032 = vector.extract_strided_slice %1011 {offsets = [0, 64], sizes = [8, 32], strides = [1, 1]} : vector<8x96xf32> to vector<8x32xf32>
    %1033 = vector.extract_strided_slice %1015 {offsets = [0, 64], sizes = [8, 32], strides = [1, 1]} : vector<8x96xf32> to vector<8x32xf32>
    %1034 = arith.mulf %1023, %1033 : vector<8x32xf32>
    %1035 = arith.addf %1032, %1034 : vector<8x32xf32>
    %1036 = math.tanh %1035 : vector<8x32xf32>
    %cst_311 = arith.constant 1.000000e+00 : f32
    %1037 = vector.broadcast %cst_311 : f32 to vector<8x32xf32>
    %1038 = arith.subf %1037, %1031 : vector<8x32xf32>
    %1039 = arith.mulf %1038, %1036 : vector<8x32xf32>
    %1040 = arith.mulf %1031, %1010 : vector<8x32xf32>
    %1041 = arith.addf %1039, %1040 : vector<8x32xf32>
    %c8_312 = arith.constant 8 : index
    %c0_313 = arith.constant 0 : index
    %1042 = vector.load %arg13[%c8_312, %c0_313] : memref<16x64xf32, #tpu.memory_space<vmem>>, vector<8x32xf32>
    tpu.vector_store %arg13[%c8_312, %c0_313], %792 {strides = array<i32>} : memref<16x64xf32, #tpu.memory_space<vmem>>, vector<8x32xf32>,
    %c8_314 = arith.constant 8 : index
    %c32_315 = arith.constant 32 : index
    %1043 = vector.load %arg13[%c8_314, %c32_315] : memref<16x64xf32, #tpu.memory_space<vmem>>, vector<8x32xf32>
    tpu.vector_store %arg13[%c8_314, %c32_315], %1041 {strides = array<i32>} : memref<16x64xf32, #tpu.memory_space<vmem>>, vector<8x32xf32>,
    return
  }
}

</mosaic_0001>

<bundles_post_ra>
// kernel: _forward_impl.2
= control target key start
LH: loop header
LB: loop body
LE: loop exit
PB: predicated region body
PF: predicated region fallthrough
CT: control target
= control target key end

     0   :  { %v3798_v0 = vmov 0.0   ;;  %v3799_v2 = vmov 0   ;;  %vm3800_vm0 = vmmov 0   ;;  %vm81_vm1 = vcmask 130048   ;;  %s3801_s21 = smov 64   ;;  %s3802_s27 = smov 96   ;;  %s4707_s3 = inlined_call_operand.vmem [shape: bf16[32,96], index: 3, kind: input, shape index: {}]   ;;  %s4708_s1 = inlined_call_operand.vmem [shape: bf16[16,256], index: 1, kind: input, shape index: {}]   ;;  %s4709_s0 = inlined_call_operand.vmem [shape: f32[64,16], index: 0, kind: input, shape index: {}]   ;;  %s4710_s4 = inlined_call_operand.vmem [shape: f32[1,96], index: 4, kind: input, shape index: {}]   ;;  %s4711_s2 = inlined_call_operand.vmem [shape: f32[1,256], index: 2, kind: input, shape index: {}]   ;;  %s4712_s5 = inlined_call_operand.vmem [shape: bf16[32,96], index: 5, kind: input, shape index: {}]   ;;  %s4713_s6 = inlined_call_operand.vmem [shape: f32[1,96], index: 6, kind: input, shape index: {}]   ;;  %s4714_s9 = inlined_call_operand.vmem [shape: bf16[32,96], index: 9, kind: input, shape index: {}]   ;;  %s4715_s7 = inlined_call_operand.vmem [shape: bf16[64,256], index: 7, kind: input, shape index: {}]   ;;  %s4716_s10 = inlined_call_operand.vmem [shape: f32[1,96], index: 10, kind: input, shape index: {}]   ;;  %s4717_s8 = inlined_call_operand.vmem [shape: f32[1,256], index: 8, kind: input, shape index: {}]   ;;  %s4718_s13 = inlined_call_operand.vmem [shape: f32[16,64], index: 13, kind: output, shape index: {}]   ;;  %s4719_s11 = inlined_call_operand.vmem [shape: bf16[32,96], index: 11, kind: input, shape index: {}]   ;;  %s4720_s12 = inlined_call_operand.vmem [shape: f32[1,96], index: 12, kind: input, shape index: {}]  }
   0x1   :  { %3292 = vmatprep.subr.bf16.mxu1 %v3798_v0  ;;  %v3553_v1 = vld [vmem:[%s4707_s3 + $0x8] sm:$0xff]   ;;  %126 = vmatprep.mubr.bf16.mxu0 %v3799_v2  ;;  %v3557_v5 = vld [vmem:[%s4707_s3] sm:$0xff]   ;;  %v61_v15 = vlaneseq  ;;  %vm214_vm2 = vcmask 261120   ;;  %v47_v61 = vld [vmem:[%s4709_s0 + $0x10] sm:$0xff]  ;;  %vm1037_vm3 = vcmask 523520   ;;  %vm1750_vm4 = vcmask 523264  }
   0x2   :  { %v3554_v3 = vld [vmem:[%s4708_s1 + $0x4] ss:$8 sps:$4 sm:$0xff]   ;;  %3296 = vmatprep.mubr.msk.bf16.mxu1 %vm3800_vm0, %v3798_v0  ;;  %3293 = vmatpush3.bf16.msra.mxu1 %v3553_v1  ;;  %v3556_v4 = vld [vmem:[%s4708_s1] ss:$8 sps:$4 sm:$0xff]   ;;  %v48_v62 = vld [vmem:[%s4709_s0 + $0x18] sm:$0xff] }
   0x3   :  { %108 = vmatprep.subr.bf16.mxu0 %v3554_v3  ;;  %3294 = vmatprep.subr.bf16.mxu1 %v3798_v0  ;;  %v45_v6 = vld [vmem:[%s4709_s0] sm:$0xff]  ;;  %v46_v7 = vld [vmem:[%s4709_s0 + $0x8] sm:$0xff]  ;;  %v3910_v16 = vshrl.u32 %v61_v15, 7  ;;  %v54_v63 = vpack.c.bf16 %v48_v62, %v47_v61 }
   0x4   :  { %109 = vmatpush1.bf16.msra.mxu0 %v3556_v4  ;;  %v53_v8 = vpack.c.bf16 %v46_v7, %v45_v6  ;;  %v3906_v9 = vld [vmem:[%s4710_s4] ss:$0 sm:$0xff]  ;;  %v3558_v31 = vld [vmem:[%s4707_s3 + $0x8] sm:$0xff]  }
   0x5   :  { %3324 = vmatprep.subr.bf16.mxu0 %v3798_v0  ;;  %v63_v17 = vsub.s32 0, %v3910_v16  ;;  %v3916_v18 = vld [vmem:[%s4711_s2] sm:$0x3]  ;;  %v3560_v58 = vld [vmem:[%s4707_s3 + $0x8] sm:$0xff]  }
   0x6   :  { %3295 = vmatpush3.bf16.msra.mxu1 %v3557_v5  ;;  %v3559_v32 = vld [vmem:[%s4707_s3] sm:$0xff]   ;;  %v50_v62 = vld [vmem:[%s4709_s0 + $0x28] sm:$0xff] }
   0x7   :  { %3080 = vmatmul.mubr.msk.bf16.vlgmr.msra.gmra.mxu0 %vm81_vm1, %v53_v8  ;;  %3300 = vmatprep.subr.bf16.mxu1 %v3798_v0  ;;  %v3921_v19 = vrot.slane %v3916_v18, %v63_v17  ;;  %v3561_v59 = vld [vmem:[%s4707_s3] sm:$0xff]  }
   0x8   :  { %136 = vmatprep.mubr.bf16.mxu0 %v3799_v2  ;;  %v49_v61 = vld [vmem:[%s4709_s0 + $0x20] sm:$0xff] }
   0x9   :  { %3297 = vmatmul.mubr.bf16.vlgmr.msra.gmra.mxu1 %v3799_v2 }
   0xa   :  { %3304 = vmatprep.mubr.msk.bf16.mxu1 %vm3800_vm0, %v3798_v0  ;;  %3301 = vmatpush3.bf16.msra.mxu1 %v3558_v31  ;;  %v3562_v31 = vld [vmem:[%s4707_s3 + $0x8] sm:$0xff]  }
   0xb   :  { %3302 = vmatprep.subr.bf16.mxu1 %v3798_v0 }
   0xe   :  { %3303 = vmatpush3.bf16.msra.mxu1 %v3559_v32  ;;  %v3563_v32 = vld [vmem:[%s4707_s3] sm:$0xff]  }
   0xf   :  { %3308 = vmatprep.subr.bf16.mxu1 %v3798_v0  ;;  %3081 = vmatmul.mubr.msk.bf16.gmra.mxu0 %vm81_vm1, %v54_v63  ;;  %v55_v63 = vpack.c.bf16 %v50_v62, %v49_v61 }
  0x10   :  { %146 = vmatprep.mubr.bf16.mxu0 %v3799_v2 }
  0x17   :  { %3082 = vmatmul.mubr.msk.bf16.gmra.mxu0 %vm81_vm1, %v55_v63 }
  0x18   :  { %156 = vmatprep.mubr.bf16.mxu0 %v3799_v2 }
  0xc7   :  { %v128_v20 = vpop.f32.mrf.mxu0 }
  0xc8   :  { %v129_v21 = vadd.f32 %v128_v20, %v3921_v19 }
  0xc9   :  { %v252_v10 = vpop.f32.mrf.mxu1  ;;  %v3944_v46 = vpop.f32.mrf.mxu0 }
  0xca   :  { %v253_v11 = vadd.f32 %v3906_v9, %v252_v10 }
  0xcb   :  { %v3298_v12 = vpop.f32.mrf.mxu1  ;;  %v132_v47 = vpop.f32.mrf.mxu0 }
  0xcc   :  { %266 = vrot.lane.b32.xlu0 %v253_v11, %s3801_s21  ;;  %v258_v22 = vadd.f32 %v253_v11, %v129_v21  ;;  %v133_v48 = vadd.f32 %v132_v47, %v3921_v19 }
  0xcd   :  { %v255_v13 = vpop.f32.mrf.mxu1  ;;  %v3976_v15 = vpop.f32.mrf.mxu0 }
  0xce   :  { %v3088_v23 = vmul.f32 -1.442695, %v258_v22 }
  0xcf   :  { %v3299_v14 = vpop.f32.mrf.mxu1  ;;  %v138_v20 = vpop.f32.mrf.mxu0 }
  0xd0   :  { %3604 = vpow2.f32 %v3088_v23 }
  0xdd   :  { %v3605_v24 = vpop.eup %3604 }
  0xde   :  { %v262_v25 = vadd.f32 1.0, %v3605_v24 }
  0xe0   :  { %3606 = vrcp.f32 %v262_v25 }
  0xed   :  { %v3607_v26 = vpop.eup %3606 }
  0xee   :  { %v276_v34 = vsub.f32 1.0, %v3607_v26  ;;  %v282_v36 = vmul.f32 0.0, %v3607_v26 }
 0x13e   :  { %v267_v27 = vpop.permute.xlu0 %266 }
 0x13f   :  { %v269_v28 = vmul.f32 %v3607_v26, %v267_v27 }
 0x141   :  { %271 = vrot.lane.b32.xlu0 %v269_v28, %s3801_s21 }
 0x1b3   :  { %v272_v29 = vpop.permute.xlu0 %271 }
 0x1b4   :  { %v274_v30 = vadd.f32 %v272_v29, %v129_v21  ;;  %v139_v21 = vadd.f32 %v138_v20, %v3921_v19 }
 0x1b6   :  { %3608 = vtanh.f32 %v274_v30 }
 0x1c3   :  { %v3609_v33 = vpop.eup %3608 }
 0x1c4   :  { %278 = vrot.lane.b32.xlu1 %v3609_v33, %s3802_s27 }
 0x236   :  { %v279_v35 = vpop.permute.xlu1 %278 }
 0x237   :  { %v281_v37 = vmul.f32 %v279_v35, %v276_v34 }
 0x239   :  { %v3934_v38 = vadd.f32 %v282_v36, %v281_v37 }
 0x23b   :  { %v290_v39 = vpack.c.bf16 %v3934_v38, %v3934_v38 }
 0x23d   :  { %296 = vrot.lane.b32.xlu1 %v290_v39, %s3802_s27 }
 0x2af   :  { %v297_v40 = vpop.permute.xlu1 %296 }
 0x2b0   :  { %3305 = vmatmul.mubr.msk.bf16.vlgmr.msra.gmra.mxu1 %vm214_vm2, %v297_v40 }
 0x2b1   :  { %3312 = vmatprep.mubr.msk.bf16.mxu1 %vm3800_vm0, %v3798_v0  ;;  %3309 = vmatpush3.bf16.msra.mxu1 %v3560_v58 }
 0x2b2   :  { %3310 = vmatprep.subr.bf16.mxu1 %v3798_v0 }
 0x2b5   :  { %3311 = vmatpush3.bf16.msra.mxu1 %v3561_v59 }
 0x2b6   :  { %3316 = vmatprep.subr.bf16.mxu1 %v3798_v0 }
 0x370   :  { %v347_v41 = vpop.f32.mrf.mxu1 }
 0x371   :  { %v348_v42 = vadd.f32 %v3906_v9, %v347_v41 }
 0x372   :  { %v3306_v43 = vpop.f32.mrf.mxu1 }
 0x373   :  { %361 = vrot.lane.b32.xlu0 %v348_v42, %s3801_s21  ;;  %v353_v49 = vadd.f32 %v348_v42, %v133_v48 }
 0x374   :  { %v350_v44 = vpop.f32.mrf.mxu1 }
 0x375   :  { %v3092_v50 = vmul.f32 -1.442695, %v353_v49 }
 0x376   :  { %v3307_v45 = vpop.f32.mrf.mxu1 }
 0x377   :  { %3610 = vpow2.f32 %v3092_v50 }
 0x384   :  { %v3611_v51 = vpop.eup %3610 }
 0x385   :  { %v357_v52 = vadd.f32 1.0, %v3611_v51 }
 0x387   :  { %3612 = vrcp.f32 %v357_v52 }
 0x394   :  { %v3613_v53 = vpop.eup %3612 }
 0x395   :  { %v371_v1 = vsub.f32 1.0, %v3613_v53  ;;  %v377_v4 = vmul.f32 %v3613_v53, %v3934_v38 }
 0x3e5   :  { %v362_v54 = vpop.permute.xlu0 %361 }
 0x3e6   :  { %v364_v55 = vmul.f32 %v3613_v53, %v362_v54 }
 0x3e8   :  { %366 = vrot.lane.b32.xlu1 %v364_v55, %s3801_s21 }
 0x45a   :  { %v367_v56 = vpop.permute.xlu1 %366 }
 0x45b   :  { %v369_v57 = vadd.f32 %v367_v56, %v133_v48  ;;  %v4000_v48 = vpop.f32.mrf.mxu0 }
 0x45d   :  { %3614 = vtanh.f32 %v369_v57  ;;  %v142_v49 = vpop.f32.mrf.mxu0 }
 0x45e   :  { %v143_v50 = vadd.f32 %v142_v49, %v3921_v19  ;;  %v3566_v49 = vld [vmem:[%s4707_s3 + $0x8] sm:$0xff]  }
 0x46a   :  { %v3615_v60 = vpop.eup %3614 }
 0x46b   :  { %373 = vrot.lane.b32.xlu0 %v3615_v60, %s3802_s27  ;;  %v3564_v60 = vld [vmem:[%s4707_s3 + $0x8] sm:$0xff]  }
 0x46c   :  { %3325 = vmatpush3.bf16.msra.mxu0 %v3564_v60 }
 0x46d   :  { %3326 = vmatprep.subr.bf16.mxu0 %v3798_v0 }
 0x4dd   :  { %v374_v3 = vpop.permute.xlu0 %373 }
 0x4de   :  { %v376_v5 = vmul.f32 %v374_v3, %v371_v1  ;;  %v3565_v1 = vld [vmem:[%s4707_s3] sm:$0xff]   ;;  %v51_v3 = vld [vmem:[%s4709_s0 + $0x30] sm:$0xff] }
 0x4df   :  { %3327 = vmatpush3.bf16.msra.mxu0 %v3565_v1 }
 0x4e0   :  { %v3966_v6 = vadd.f32 %v377_v4, %v376_v5  ;;  %v52_v4 = vld [vmem:[%s4709_s0 + $0x38] sm:$0xff]  ;;  %3340 = vmatprep.subr.bf16.mxu0 %v3798_v0 }
 0x4e2   :  { %v385_v7 = vpack.c.bf16 %v3966_v6, %v3966_v6 }
 0x4e4   :  { %391 = vrot.lane.b32.xlu1 %v385_v7, %s3802_s27  ;;  %v56_v7 = vpack.c.bf16 %v52_v4, %v51_v3 }
 0x4e6   :  { %3083 = vmatmul.mubr.msk.bf16.gmra.mxu0 %vm81_vm1, %v56_v7 }
 0x4e7   :  { %3328 = vmatprep.mubr.msk.bf16.mxu0 %vm3800_vm0, %v3798_v0 }
 0x556   :  { %v392_v8 = vpop.permute.xlu1 %391 }
 0x557   :  { %3313 = vmatmul.mubr.msk.bf16.vlgmr.msra.gmra.mxu1 %vm214_vm2, %v392_v8 }
 0x558   :  { %3320 = vmatprep.mubr.msk.bf16.mxu1 %vm3800_vm0, %v3798_v0  ;;  %3317 = vmatpush3.bf16.msra.mxu1 %v3562_v31 }
 0x559   :  { %3318 = vmatprep.subr.bf16.mxu1 %v3798_v0 }
 0x55c   :  { %3319 = vmatpush3.bf16.msra.mxu1 %v3563_v32 }
 0x55d   :  { %3332 = vmatprep.subr.bf16.mxu1 %v3798_v0 }
 0x617   :  { %v442_v10 = vpop.f32.mrf.mxu1 }
 0x618   :  { %v443_v11 = vadd.f32 %v3906_v9, %v442_v10 }
 0x619   :  { %v3314_v12 = vpop.f32.mrf.mxu1 }
 0x61a   :  { %456 = vrot.lane.b32.xlu0 %v443_v11, %s3801_s21  ;;  %v448_v22 = vadd.f32 %v443_v11, %v139_v21 }
 0x61b   :  { %v445_v13 = vpop.f32.mrf.mxu1 }
 0x61c   :  { %v3096_v23 = vmul.f32 -1.442695, %v448_v22 }
 0x61d   :  { %v3315_v14 = vpop.f32.mrf.mxu1 }
 0x61e   :  { %3616 = vpow2.f32 %v3096_v23 }
 0x62b   :  { %v3617_v24 = vpop.eup %3616 }
 0x62c   :  { %v452_v25 = vadd.f32 1.0, %v3617_v24 }
 0x62e   :  { %3618 = vrcp.f32 %v452_v25 }
 0x63b   :  { %v3619_v26 = vpop.eup %3618 }
 0x63c   :  { %v466_v34 = vsub.f32 1.0, %v3619_v26  ;;  %v472_v36 = vmul.f32 %v3619_v26, %v3966_v6 }
 0x68c   :  { %v457_v27 = vpop.permute.xlu0 %456 }
 0x68d   :  { %v459_v28 = vmul.f32 %v3619_v26, %v457_v27 }
 0x68f   :  { %461 = vrot.lane.b32.xlu1 %v459_v28, %s3801_s21 }
 0x701   :  { %v462_v29 = vpop.permute.xlu1 %461 }
 0x702   :  { %v464_v30 = vadd.f32 %v462_v29, %v139_v21  ;;  %v4039_v21 = vpop.f32.mrf.mxu0 }
 0x704   :  { %3620 = vtanh.f32 %v464_v30  ;;  %v148_v22 = vpop.f32.mrf.mxu0 }
 0x706   :  { %v4041_v23 = vpop.f32.mrf.mxu0 }
 0x708   :  { %v152_v24 = vpop.f32.mrf.mxu0 }
 0x709   :  { %v153_v1 = vadd.f32 %v152_v24, %v3921_v19 }
 0x70a   :  { %v4043_v25 = vpop.f32.mrf.mxu0 }
 0x70c   :  { %v4045_v26 = vpop.f32.mrf.mxu0 }
 0x70e   :  { %v4047_v27 = vpop.f32.mrf.mxu0 }
 0x710   :  { %v4049_v28 = vpop.f32.mrf.mxu0 }
 0x711   :  { %v3621_v33 = vpop.eup %3620 }
 0x712   :  { %468 = vrot.lane.b32.xlu0 %v3621_v33, %s3802_s27  ;;  %v4051_v29 = vpop.f32.mrf.mxu0 }
 0x784   :  { %v469_v35 = vpop.permute.xlu0 %468 }
 0x785   :  { %v471_v37 = vmul.f32 %v469_v35, %v466_v34  ;;  %v149_v35 = vadd.f32 %v148_v22, %v3921_v19  ;;  %v3569_v22 = vld [vmem:[%s4707_s3] sm:$0xff]  }
 0x787   :  { %v3990_v39 = vadd.f32 %v472_v36, %v471_v37 }
 0x789   :  { %v480_v40 = vpack.c.bf16 %v3990_v39, %v3990_v39 }
 0x78b   :  { %486 = vrot.lane.b32.xlu1 %v480_v40, %s3802_s27 }
 0x7fd   :  { %v487_v41 = vpop.permute.xlu1 %486 }
 0x7fe   :  { %3321 = vmatmul.mubr.msk.bf16.vlgmr.msra.gmra.mxu1 %vm214_vm2, %v487_v41 }
 0x7ff   :  { %3336 = vmatprep.mubr.msk.bf16.mxu1 %vm3800_vm0, %v3798_v0  ;;  %3333 = vmatpush3.bf16.msra.mxu1 %v3566_v49 }
 0x800   :  { %3334 = vmatprep.subr.bf16.mxu1 %v3798_v0 }
 0x8be   :  { %v537_v42 = vpop.f32.mrf.mxu1 }
 0x8bf   :  { %v538_v43 = vadd.f32 %v3906_v9, %v537_v42 }
 0x8c0   :  { %v3322_v44 = vpop.f32.mrf.mxu1 }
 0x8c1   :  { %551 = vrot.lane.b32.xlu0 %v538_v43, %s3801_s21  ;;  %v543_v51 = vadd.f32 %v538_v43, %v143_v50 }
 0x8c2   :  { %v540_v45 = vpop.f32.mrf.mxu1 }
 0x8c3   :  { %v3100_v52 = vmul.f32 -1.442695, %v543_v51 }
 0x8c4   :  { %v3323_v47 = vpop.f32.mrf.mxu1 }
 0x8c5   :  { %3622 = vpow2.f32 %v3100_v52 }
 0x8d2   :  { %v3623_v53 = vpop.eup %3622 }
 0x8d3   :  { %v547_v54 = vadd.f32 1.0, %v3623_v53 }
 0x8d5   :  { %3624 = vrcp.f32 %v547_v54 }
 0x8e2   :  { %v3625_v55 = vpop.eup %3624 }
 0x8e3   :  { %v561_v8 = vsub.f32 1.0, %v3625_v55  ;;  %v567_v11 = vmul.f32 %v3625_v55, %v3990_v39 }
 0x933   :  { %v552_v56 = vpop.permute.xlu0 %551 }
 0x934   :  { %v554_v57 = vmul.f32 %v3625_v55, %v552_v56 }
 0x936   :  { %556 = vrot.lane.b32.xlu1 %v554_v57, %s3801_s21 }
 0x9a8   :  { %v557_v58 = vpop.permute.xlu1 %556 }
 0x9a9   :  { %v559_v59 = vadd.f32 %v557_v58, %v143_v50  ;;  %v3567_v50 = vld [vmem:[%s4707_s3] sm:$0xff]  }
 0x9aa   :  { %3335 = vmatpush3.bf16.msra.mxu1 %v3567_v50 }
 0x9ab   :  { %3626 = vtanh.f32 %v559_v59  ;;  %3348 = vmatprep.subr.bf16.mxu1 %v3798_v0 }
 0x9b8   :  { %v3627_v5 = vpop.eup %3626 }
 0x9b9   :  { %563 = vrot.lane.b32.xlu0 %v3627_v5, %s3802_s27 }
 0xa2b   :  { %v564_v10 = vpop.permute.xlu0 %563 }
 0xa2c   :  { %v566_v12 = vmul.f32 %v564_v10, %v561_v8 }
 0xa2e   :  { %v4031_v13 = vadd.f32 %v567_v11, %v566_v12 }
 0xa30   :  { %v575_v14 = vpack.c.bf16 %v4031_v13, %v4031_v13 }
 0xa32   :  { %581 = vrot.lane.b32.xlu1 %v575_v14, %s3802_s27 }
 0xaa4   :  { %v582_v20 = vpop.permute.xlu1 %581 }
 0xaa5   :  { %3329 = vmatmul.mubr.msk.bf16.vlgmr.msra.gmra.mxu0 %vm214_vm2, %v582_v20  ;;  %v3568_v20 = vld [vmem:[%s4707_s3 + $0x8] sm:$0xff]  }
 0xaa6   :  { %3344 = vmatprep.mubr.msk.bf16.mxu0 %vm3800_vm0, %v3798_v0  ;;  %3341 = vmatpush3.bf16.msra.mxu0 %v3568_v20  ;;  %v3572_v20 = vld [vmem:[%s4707_s3 + $0x8] sm:$0xff]  }
 0xaa7   :  { %3342 = vmatprep.subr.bf16.mxu0 %v3798_v0 }
 0xaaa   :  { %3343 = vmatpush3.bf16.msra.mxu0 %v3569_v22  ;;  %v3573_v22 = vld [vmem:[%s4707_s3] sm:$0xff]  }
 0xaab   :  { %3356 = vmatprep.subr.bf16.mxu0 %v3798_v0 }
 0xb65   :  { %v632_v30 = vpop.f32.mrf.mxu0 }
 0xb66   :  { %v633_v31 = vadd.f32 %v3906_v9, %v632_v30 }
 0xb67   :  { %v3330_v32 = vpop.f32.mrf.mxu0 }
 0xb68   :  { %646 = vrot.lane.b32.xlu0 %v633_v31, %s3801_s21  ;;  %v638_v36 = vadd.f32 %v633_v31, %v149_v35 }
 0xb69   :  { %v635_v33 = vpop.f32.mrf.mxu0 }
 0xb6a   :  { %v3104_v37 = vmul.f32 -1.442695, %v638_v36  ;;  %v3570_v36 = vld [vmem:[%s4712_s5 + $0x8] sm:$0xff]  }
 0xb6b   :  { %v3331_v34 = vpop.f32.mrf.mxu0 }
 0xb6c   :  { %3628 = vpow2.f32 %v3104_v37 }
 0xb79   :  { %v3629_v40 = vpop.eup %3628 }
 0xb7a   :  { %v642_v41 = vadd.f32 1.0, %v3629_v40  ;;  %v3571_v40 = vld [vmem:[%s4712_s5] sm:$0xff]  }
 0xb7c   :  { %3630 = vrcp.f32 %v642_v41 }
 0xb89   :  { %v3631_v42 = vpop.eup %3630 }
 0xb8a   :  { %v656_v52 = vsub.f32 1.0, %v3631_v42  ;;  %v662_v54 = vmul.f32 %v3631_v42, %v4031_v13 }
 0xbda   :  { %v647_v43 = vpop.permute.xlu0 %646 }
 0xbdb   :  { %v649_v44 = vmul.f32 %v3631_v42, %v647_v43 }
 0xbdd   :  { %651 = vrot.lane.b32.xlu1 %v649_v44, %s3801_s21 }
 0xc4f   :  { %v652_v45 = vpop.permute.xlu1 %651 }
 0xc50   :  { %v654_v47 = vadd.f32 %v652_v45, %v149_v35 }
 0xc52   :  { %3632 = vtanh.f32 %v654_v47  ;;  %v4113_v47 = vld [vmem:[%s4713_s6] ss:$0 sm:$0xff] }
 0xc5f   :  { %v3633_v51 = vpop.eup %3632 }
 0xc60   :  { %658 = vrot.lane.b32.xlu0 %v3633_v51, %s3802_s27 }
 0xcd2   :  { %v659_v53 = vpop.permute.xlu0 %658 }
 0xcd3   :  { %v661_v55 = vmul.f32 %v659_v53, %v656_v52 }
 0xcd5   :  { %v4067_v56 = vadd.f32 %v662_v54, %v661_v55  ;;  %v67_v54 = vsub.s32 1, %v3910_v16 }
 0xcd7   :  { %v670_v57 = vpack.c.bf16 %v4067_v56, %v4067_v56 }
 0xcd9   :  { %676 = vrot.lane.b32.xlu1 %v670_v57, %s3802_s27  ;;  %v4123_v57 = vrot.slane %v3916_v18, %v67_v54 }
 0xd4b   :  { %v677_v58 = vpop.permute.xlu1 %676 }
 0xd4c   :  { %3337 = vmatmul.mubr.msk.bf16.vlgmr.msra.gmra.mxu1 %vm214_vm2, %v677_v58 }
 0xd4d   :  { %3352 = vmatprep.mubr.msk.bf16.mxu1 %vm3800_vm0, %v3798_v0  ;;  %3349 = vmatpush3.bf16.msra.mxu1 %v3572_v20 }
 0xd4e   :  { %3350 = vmatprep.subr.bf16.mxu1 %v3798_v0 }
 0xd51   :  { %3351 = vmatpush3.bf16.msra.mxu1 %v3573_v22 }
 0xd52   :  { %3364 = vmatprep.subr.bf16.mxu1 %v3798_v0 }
 0xe0c   :  { %v727_v59 = vpop.f32.mrf.mxu1 }
 0xe0d   :  { %v728_v60 = vadd.f32 %v3906_v9, %v727_v59  ;;  %v165_v59 = vadd.f32 %v4051_v29, %v4123_v57 }
 0xe0e   :  { %v3338_v61 = vpop.f32.mrf.mxu1 }
 0xe0f   :  { %741 = vrot.lane.b32.xlu0 %v728_v60, %s3801_s21  ;;  %v733_v3 = vadd.f32 %v728_v60, %v153_v1 }
 0xe10   :  { %v730_v62 = vpop.f32.mrf.mxu1 }
 0xe11   :  { %v3108_v4 = vmul.f32 -1.442695, %v733_v3 }
 0xe12   :  { %v3339_v63 = vpop.f32.mrf.mxu1 }
 0xe13   :  { %3634 = vpow2.f32 %v3108_v4 }
 0xe20   :  { %v3635_v5 = vpop.eup %3634 }
 0xe21   :  { %v737_v7 = vadd.f32 1.0, %v3635_v5 }
 0xe23   :  { %3636 = vrcp.f32 %v737_v7 }
 0xe30   :  { %v3637_v8 = vpop.eup %3636 }
 0xe31   :  { %v751_v30 = vsub.f32 1.0, %v3637_v8  ;;  %v757_v32 = vmul.f32 %v3637_v8, %v4067_v56 }
 0xe81   :  { %v742_v10 = vpop.permute.xlu0 %741 }
 0xe82   :  { %v744_v11 = vmul.f32 %v3637_v8, %v742_v10 }
 0xe84   :  { %746 = vrot.lane.b32.xlu1 %v744_v11, %s3801_s21 }
 0xef6   :  { %v747_v12 = vpop.permute.xlu1 %746 }
 0xef7   :  { %v749_v14 = vadd.f32 %v747_v12, %v153_v1 }
 0xef9   :  { %3638 = vtanh.f32 %v749_v14 }
 0xf06   :  { %v3639_v24 = vpop.eup %3638 }
 0xf07   :  { %753 = vrot.lane.b32.xlu0 %v3639_v24, %s3802_s27 }
 0xf79   :  { %v754_v31 = vpop.permute.xlu0 %753 }
 0xf7a   :  { %v756_v33 = vmul.f32 %v754_v31, %v751_v30 }
 0xf7c   :  { %v4089_v34 = vadd.f32 %v757_v32, %v756_v33 }
 0xf7e   :  { %v765_v35 = vpack.c.bf16 %v4089_v34, %v4089_v34 }
 0xf80   :  { %771 = vrot.lane.b32.xlu1 %v765_v35, %s3802_s27 }
 0xff2   :  { %v772_v37 = vpop.permute.xlu1 %771 }
 0xff3   :  { %3345 = vmatmul.mubr.msk.bf16.vlgmr.msra.gmra.mxu0 %vm214_vm2, %v772_v37 }
 0xff4   :  { %3357 = vmatpush3.bf16.msra.mxu0 %v3570_v36  ;;  %3360 = vmatprep.mubr.msk.bf16.mxu0 %vm3800_vm0, %v3798_v0 }
 0xff5   :  { %3358 = vmatprep.subr.bf16.mxu0 %v3798_v0 }
 0xff8   :  { %3359 = vmatpush3.bf16.msra.mxu0 %v3571_v40 }
 0xff9   :  { %3372 = vmatprep.subr.bf16.mxu0 %v3798_v0 }
 0xffb   :  { %3361 = vmatmul.mubr.bf16.vlgmr.msra.gmra.mxu0 %v3799_v2 }
 0xffc   :  { %3376 = vmatprep.mubr.msk.bf16.mxu0 %vm3800_vm0, %v3798_v0 }
0x10b3   :  { %v822_v41 = vpop.f32.mrf.mxu0 }
0x10b4   :  { %v823_v42 = vadd.f32 %v3906_v9, %v822_v41  ;;  %v159_v9 = vadd.f32 %v4045_v26, %v3921_v19 }
0x10b5   :  { %v3346_v43 = vpop.f32.mrf.mxu0 }
0x10b6   :  { %836 = vrot.lane.b32.xlu0 %v823_v42, %s3801_s21  ;;  %v828_v55 = vadd.f32 %v823_v42, %v159_v9 }
0x10b7   :  { %v825_v44 = vpop.f32.mrf.mxu0 }
0x10b8   :  { %v3112_v58 = vmul.f32 -1.442695, %v828_v55 }
0x10b9   :  { %v3347_v45 = vpop.f32.mrf.mxu0 }
0x10ba   :  { %3640 = vpow2.f32 %v3112_v58  ;;  %v3574_v45 = vld [vmem:[%s4712_s5 + $0x8] sm:$0xff]  }
0x10bb   :  { %v1005_v49 = vpop.f32.mrf.mxu0 }
0x10bc   :  { %v1006_v50 = vadd.f32 %v4113_v47, %v1005_v49 }
0x10bd   :  { %v3362_v51 = vpop.f32.mrf.mxu0 }
0x10be   :  { %1019 = vrot.lane.b32.xlu1 %v1006_v50, %s3801_s21  ;;  %v1011_v60 = vadd.f32 %v1006_v50, %v165_v59  ;;  %v3575_v50 = vld [vmem:[%s4712_s5] sm:$0xff]  }
0x10bf   :  { %v1008_v52 = vpop.f32.mrf.mxu0 }
0x10c0   :  { %v3119_v61 = vmul.f32 -1.442695, %v1011_v60 }
0x10c1   :  { %v3363_v53 = vpop.f32.mrf.mxu0 }
0x10c2   :  { %3642 = vpow2.f32 %v3119_v61 }
0x10c7   :  { %v3641_v62 = vpop.eup %3640 }
0x10c8   :  { %v832_v63 = vadd.f32 1.0, %v3641_v62 }
0x10ca   :  { %3644 = vrcp.f32 %v832_v63  ;;  %v161_v63 = vadd.f32 %v4047_v27, %v4123_v57  ;;  %v3577_v27 = vld [vmem:[%s4712_s5] sm:$0xff]  }
0x10cf   :  { %v3643_v26 = vpop.eup %3642 }
0x10d0   :  { %v1015_v1 = vadd.f32 1.0, %v3643_v26 }
0x10d2   :  { %3646 = vrcp.f32 %v1015_v1 }
0x10d7   :  { %v3645_v3 = vpop.eup %3644 }
0x10d8   :  { %v846_v30 = vsub.f32 1.0, %v3645_v3  ;;  %v852_v32 = vmul.f32 %v3645_v3, %v4089_v34 }
0x10df   :  { %v3647_v18 = vpop.eup %3646 }
0x10e0   :  { %v1029_v37 = vsub.f32 1.0, %v3647_v18  ;;  %v1035_v41 = vmul.f32 0.0, %v3647_v18 }
0x1128   :  { %v837_v4 = vpop.permute.xlu0 %836 }
0x1129   :  { %v839_v5 = vmul.f32 %v3645_v3, %v837_v4 }
0x112b   :  { %841 = vrot.lane.b32.xlu0 %v839_v5, %s3801_s21 }
0x1130   :  { %v1020_v7 = vpop.permute.xlu1 %1019 }
0x1131   :  { %v1022_v8 = vmul.f32 %v3647_v18, %v1020_v7 }
0x1133   :  { %1024 = vrot.lane.b32.xlu1 %v1022_v8, %s3801_s21 }
0x119d   :  { %v842_v29 = vpop.permute.xlu0 %841 }
0x119e   :  { %v844_v10 = vadd.f32 %v842_v29, %v159_v9 }
0x11a0   :  { %3648 = vtanh.f32 %v844_v10  ;;  %v3576_v10 = vld [vmem:[%s4712_s5 + $0x8] sm:$0xff]  }
0x11a1   :  { %3373 = vmatpush3.bf16.msra.mxu0 %v3576_v10 }
0x11a2   :  { %3374 = vmatprep.subr.bf16.mxu0 %v3798_v0 }
0x11a5   :  { %v1025_v11 = vpop.permute.xlu1 %1024  ;;  %3375 = vmatpush3.bf16.msra.mxu0 %v3577_v27 }
0x11a6   :  { %v1027_v12 = vadd.f32 %v1025_v11, %v165_v59  ;;  %3388 = vmatprep.subr.bf16.mxu0 %v3798_v0 }
0x11a8   :  { %3650 = vtanh.f32 %v1027_v12 }
0x11ad   :  { %v3649_v14 = vpop.eup %3648 }
0x11ae   :  { %848 = vrot.lane.b32.xlu0 %v3649_v14, %s3802_s27 }
0x11b5   :  { %v3651_v24 = vpop.eup %3650 }
0x11b6   :  { %1031 = vrot.lane.b32.xlu1 %v3651_v24, %s3802_s27 }
0x1220   :  { %v849_v31 = vpop.permute.xlu0 %848 }
0x1221   :  { %v851_v33 = vmul.f32 %v849_v31, %v846_v30 }
0x1223   :  { %v4140_v35 = vadd.f32 %v852_v32, %v851_v33 }
0x1225   :  { %v860_v36 = vpack.c.bf16 %v4140_v35, %v4140_v35 }
0x1227   :  { %866 = vrot.lane.b32.xlu0 %v860_v36, %s3802_s27 }
0x1228   :  { %v1032_v40 = vpop.permute.xlu1 %1031 }
0x1229   :  { %v1034_v42 = vmul.f32 %v1032_v40, %v1029_v37 }
0x122b   :  { %v4145_v43 = vadd.f32 %v1035_v41, %v1034_v42  ;;  %v155_v41 = vadd.f32 %v4043_v25, %v4123_v57  ;;  %v3579_v25 = vld [vmem:[%s4712_s5] sm:$0xff]  }
0x122d   :  { %v1040_v44 = vpack.c.bf16 %v4145_v43, %v4145_v43 }
0x122f   :  { %1046 = vrot.lane.b32.xlu1 %v1040_v44, %s3802_s27 }
0x1299   :  { %v867_v49 = vpop.permute.xlu0 %866 }
0x129a   :  { %3353 = vmatmul.mubr.msk.bf16.vlgmr.msra.gmra.mxu1 %vm214_vm2, %v867_v49 }
0x129b   :  { %3365 = vmatpush3.bf16.msra.mxu1 %v3574_v45  ;;  %3368 = vmatprep.mubr.msk.bf16.mxu1 %vm3800_vm0, %v3798_v0 }
0x129c   :  { %3366 = vmatprep.subr.bf16.mxu1 %v3798_v0 }
0x129f   :  { %3367 = vmatpush3.bf16.msra.mxu1 %v3575_v50 }
0x12a0   :  { %3380 = vmatprep.subr.bf16.mxu1 %v3798_v0 }
0x12a1   :  { %v1047_v51 = vpop.permute.xlu1 %1046 }
0x12a2   :  { %3369 = vmatmul.mubr.msk.bf16.vlgmr.msra.gmra.mxu1 %vm214_vm2, %v1047_v51 }
0x12a3   :  { %3384 = vmatprep.mubr.msk.bf16.mxu1 %vm3800_vm0, %v3798_v0 }
0x135a   :  { %v4164_v52 = vpop.f32.mrf.mxu1 }
0x135c   :  { %v3354_v53 = vpop.f32.mrf.mxu1 }
0x135e   :  { %v920_v9 = vpop.f32.mrf.mxu1 }
0x1360   :  { %v3355_v55 = vpop.f32.mrf.mxu1 }
0x1362   :  { %v1097_v58 = vpop.f32.mrf.mxu1 }
0x1363   :  { %v1098_v59 = vadd.f32 %v4113_v47, %v1097_v58  ;;  %v3578_v58 = vld [vmem:[%s4712_s5 + $0x8] sm:$0xff]  }
0x1364   :  { %v3370_v60 = vpop.f32.mrf.mxu1  ;;  %3381 = vmatpush3.bf16.msra.mxu1 %v3578_v58 }
0x1365   :  { %1111 = vrot.lane.b32.xlu0 %v1098_v59, %s3801_s21  ;;  %v1103_v26 = vadd.f32 %v1098_v59, %v161_v63  ;;  %3382 = vmatprep.subr.bf16.mxu1 %v3798_v0 }
0x1366   :  { %v1100_v61 = vpop.f32.mrf.mxu1 }
0x1367   :  { %v3123_v1 = vmul.f32 -1.442695, %v1103_v26 }
0x1368   :  { %v3371_v62 = vpop.f32.mrf.mxu1  ;;  %3383 = vmatpush3.bf16.msra.mxu1 %v3579_v25 }
0x1369   :  { %3652 = vpow2.f32 %v3123_v1  ;;  %3396 = vmatprep.subr.bf16.mxu1 %v3798_v0 }
0x1376   :  { %v3653_v3 = vpop.eup %3652 }
0x1377   :  { %v1107_v4 = vadd.f32 1.0, %v3653_v3 }
0x1379   :  { %3654 = vrcp.f32 %v1107_v4 }
0x1386   :  { %v3655_v5 = vpop.eup %3654 }
0x1387   :  { %v1121_v12 = vsub.f32 1.0, %v3655_v5  ;;  %v1127_v20 = vmul.f32 %v3655_v5, %v4145_v43 }
0x13d7   :  { %v1112_v18 = vpop.permute.xlu0 %1111 }
0x13d8   :  { %v1114_v7 = vmul.f32 %v3655_v5, %v1112_v18 }
0x13da   :  { %1116 = vrot.lane.b32.xlu1 %v1114_v7, %s3801_s21 }
0x144c   :  { %v1117_v8 = vpop.permute.xlu1 %1116 }
0x144d   :  { %v1119_v29 = vadd.f32 %v1117_v8, %v161_v63 }
0x144f   :  { %3656 = vtanh.f32 %v1119_v29  ;;  %v151_v29 = vadd.f32 %v4041_v23, %v4123_v57  ;;  %v3581_v23 = vld [vmem:[%s4712_s5] sm:$0xff]  }
0x145c   :  { %v3657_v11 = vpop.eup %3656 }
0x145d   :  { %1123 = vrot.lane.b32.xlu0 %v3657_v11, %s3802_s27 }
0x14cf   :  { %v1124_v14 = vpop.permute.xlu0 %1123 }
0x14d0   :  { %v1126_v22 = vmul.f32 %v1124_v14, %v1121_v12 }
0x14d2   :  { %v4181_v24 = vadd.f32 %v1127_v20, %v1126_v22 }
0x14d4   :  { %v1131_v30 = vpack.c.bf16 %v4181_v24, %v4181_v24 }
0x14d6   :  { %1137 = vrot.lane.b32.xlu1 %v1131_v30, %s3802_s27 }
0x1548   :  { %v1138_v31 = vpop.permute.xlu1 %1137 }
0x1549   :  { %3377 = vmatmul.mubr.msk.bf16.vlgmr.msra.gmra.mxu0 %vm214_vm2, %v1138_v31 }
0x154a   :  { %3392 = vmatprep.mubr.msk.bf16.mxu0 %vm3800_vm0, %v3798_v0 }
0x1609   :  { %v1188_v32 = vpop.f32.mrf.mxu0 }
0x160a   :  { %v1189_v33 = vadd.f32 %v4113_v47, %v1188_v32  ;;  %v3580_v32 = vld [vmem:[%s4712_s5 + $0x8] sm:$0xff]  }
0x160b   :  { %v3378_v36 = vpop.f32.mrf.mxu0  ;;  %3389 = vmatpush3.bf16.msra.mxu0 %v3580_v32 }
0x160c   :  { %1202 = vrot.lane.b32.xlu0 %v1189_v33, %s3801_s21  ;;  %v1194_v42 = vadd.f32 %v1189_v33, %v155_v41  ;;  %3390 = vmatprep.subr.bf16.mxu0 %v3798_v0 }
0x160d   :  { %v1191_v37 = vpop.f32.mrf.mxu0 }
0x160e   :  { %v3127_v44 = vmul.f32 -1.442695, %v1194_v42 }
0x160f   :  { %v3379_v40 = vpop.f32.mrf.mxu0  ;;  %3391 = vmatpush3.bf16.msra.mxu0 %v3581_v23 }
0x1610   :  { %3658 = vpow2.f32 %v3127_v44  ;;  %3404 = vmatprep.subr.bf16.mxu0 %v3798_v0 }
0x161d   :  { %v3659_v45 = vpop.eup %3658 }
0x161e   :  { %v1198_v49 = vadd.f32 1.0, %v3659_v45 }
0x1620   :  { %3660 = vrcp.f32 %v1198_v49 }
0x162d   :  { %v3661_v50 = vpop.eup %3660 }
0x162e   :  { %v1212_v60 = vsub.f32 1.0, %v3661_v50  ;;  %v1218_v62 = vmul.f32 %v3661_v50, %v4181_v24 }
0x167e   :  { %v1203_v51 = vpop.permute.xlu0 %1202 }
0x167f   :  { %v1205_v53 = vmul.f32 %v3661_v50, %v1203_v51 }
0x1681   :  { %1207 = vrot.lane.b32.xlu1 %v1205_v53, %s3801_s21 }
0x16f3   :  { %v1208_v9 = vpop.permute.xlu1 %1207 }
0x16f4   :  { %v1210_v55 = vadd.f32 %v1208_v9, %v155_v41 }
0x16f6   :  { %3662 = vtanh.f32 %v1210_v55  ;;  %v145_v55 = vadd.f32 %v4039_v21, %v4123_v57  ;;  %v3583_v21 = vld [vmem:[%s4712_s5] sm:$0xff]  }
0x1703   :  { %v3663_v59 = vpop.eup %3662 }
0x1704   :  { %1214 = vrot.lane.b32.xlu0 %v3663_v59, %s3802_s27 }
0x1776   :  { %v1215_v61 = vpop.permute.xlu0 %1214 }
0x1777   :  { %v1217_v63 = vmul.f32 %v1215_v61, %v1212_v60 }
0x1779   :  { %v4204_v26 = vadd.f32 %v1218_v62, %v1217_v63 }
0x177b   :  { %v1222_v1 = vpack.c.bf16 %v4204_v26, %v4204_v26 }
0x177d   :  { %1228 = vrot.lane.b32.xlu1 %v1222_v1, %s3802_s27 }
0x17ef   :  { %v1229_v3 = vpop.permute.xlu1 %1228 }
0x17f0   :  { %3385 = vmatmul.mubr.msk.bf16.vlgmr.msra.gmra.mxu1 %vm214_vm2, %v1229_v3 }
0x17f1   :  { %3400 = vmatprep.mubr.msk.bf16.mxu1 %vm3800_vm0, %v3798_v0 }
0x18b0   :  { %v1279_v4 = vpop.f32.mrf.mxu1 }
0x18b1   :  { %v1280_v5 = vadd.f32 %v4113_v47, %v1279_v4  ;;  %v3582_v4 = vld [vmem:[%s4712_s5 + $0x8] sm:$0xff]  }
0x18b2   :  { %v3386_v18 = vpop.f32.mrf.mxu1  ;;  %3397 = vmatpush3.bf16.msra.mxu1 %v3582_v4 }
0x18b3   :  { %1293 = vrot.lane.b32.xlu0 %v1280_v5, %s3801_s21  ;;  %v1285_v10 = vadd.f32 %v1280_v5, %v151_v29  ;;  %3398 = vmatprep.subr.bf16.mxu1 %v3798_v0 }
0x18b4   :  { %v1282_v7 = vpop.f32.mrf.mxu1 }
0x18b5   :  { %v3131_v27 = vmul.f32 -1.442695, %v1285_v10 }
0x18b6   :  { %v3387_v8 = vpop.f32.mrf.mxu1  ;;  %3399 = vmatpush3.bf16.msra.mxu1 %v3583_v21 }
0x18b7   :  { %3664 = vpow2.f32 %v3131_v27  ;;  %3412 = vmatprep.subr.bf16.mxu1 %v3798_v0 }
0x18c4   :  { %v3665_v11 = vpop.eup %3664 }
0x18c5   :  { %v1289_v12 = vadd.f32 1.0, %v3665_v11 }
0x18c7   :  { %3666 = vrcp.f32 %v1289_v12 }
0x18d4   :  { %v3667_v14 = vpop.eup %3666 }
0x18d5   :  { %v1303_v36 = vsub.f32 1.0, %v3667_v14  ;;  %v1309_v40 = vmul.f32 %v3667_v14, %v4204_v26 }
0x1925   :  { %v1294_v20 = vpop.permute.xlu0 %1293 }
0x1926   :  { %v1296_v22 = vmul.f32 %v3667_v14, %v1294_v20 }
0x1928   :  { %1298 = vrot.lane.b32.xlu1 %v1296_v22, %s3801_s21 }
0x199a   :  { %v1299_v30 = vpop.permute.xlu1 %1298 }
0x199b   :  { %v1301_v31 = vadd.f32 %v1299_v30, %v151_v29 }
0x199d   :  { %3668 = vtanh.f32 %v1301_v31  ;;  %v141_v31 = vadd.f32 %v4000_v48, %v4123_v57  ;;  %v3585_v48 = vld [vmem:[%s4712_s5] sm:$0xff]  }
0x19aa   :  { %v3669_v33 = vpop.eup %3668 }
0x19ab   :  { %1305 = vrot.lane.b32.xlu0 %v3669_v33, %s3802_s27 }
0x1a1d   :  { %v1306_v37 = vpop.permute.xlu0 %1305 }
0x1a1e   :  { %v1308_v41 = vmul.f32 %v1306_v37, %v1303_v36 }
0x1a20   :  { %v4227_v42 = vadd.f32 %v1309_v40, %v1308_v41 }
0x1a22   :  { %v1313_v44 = vpack.c.bf16 %v4227_v42, %v4227_v42 }
0x1a24   :  { %1319 = vrot.lane.b32.xlu1 %v1313_v44, %s3802_s27 }
0x1a96   :  { %v1320_v45 = vpop.permute.xlu1 %1319 }
0x1a97   :  { %3393 = vmatmul.mubr.msk.bf16.vlgmr.msra.gmra.mxu0 %vm214_vm2, %v1320_v45 }
0x1a98   :  { %3408 = vmatprep.mubr.msk.bf16.mxu0 %vm3800_vm0, %v3798_v0 }
0x1b57   :  { %v1370_v49 = vpop.f32.mrf.mxu0 }
0x1b58   :  { %v1371_v50 = vadd.f32 %v4113_v47, %v1370_v49  ;;  %v3584_v49 = vld [vmem:[%s4712_s5 + $0x8] sm:$0xff]  }
0x1b59   :  { %v3394_v51 = vpop.f32.mrf.mxu0  ;;  %3405 = vmatpush3.bf16.msra.mxu0 %v3584_v49 }
0x1b5a   :  { %1384 = vrot.lane.b32.xlu0 %v1371_v50, %s3801_s21  ;;  %v1376_v58 = vadd.f32 %v1371_v50, %v145_v55  ;;  %3406 = vmatprep.subr.bf16.mxu0 %v3798_v0 }
0x1b5b   :  { %v1373_v53 = vpop.f32.mrf.mxu0 }
0x1b5c   :  { %v3135_v25 = vmul.f32 -1.442695, %v1376_v58 }
0x1b5d   :  { %v3395_v9 = vpop.f32.mrf.mxu0  ;;  %3407 = vmatpush3.bf16.msra.mxu0 %v3585_v48 }
0x1b5e   :  { %3670 = vpow2.f32 %v3135_v25 }
0x1b6b   :  { %v3671_v59 = vpop.eup %3670 }
0x1b6c   :  { %v1380_v60 = vadd.f32 1.0, %v3671_v59 }
0x1b6e   :  { %3672 = vrcp.f32 %v1380_v60 }
0x1b7b   :  { %v3673_v61 = vpop.eup %3672 }
0x1b7c   :  { %v1394_v18 = vsub.f32 1.0, %v3673_v61  ;;  %v1400_v8 = vmul.f32 %v3673_v61, %v4227_v42 }
0x1bcc   :  { %v1385_v62 = vpop.permute.xlu0 %1384 }
0x1bcd   :  { %v1387_v63 = vmul.f32 %v3673_v61, %v1385_v62 }
0x1bcf   :  { %1389 = vrot.lane.b32.xlu1 %v1387_v63, %s3801_s21 }
0x1c41   :  { %v1390_v1 = vpop.permute.xlu1 %1389 }
0x1c42   :  { %v1392_v3 = vadd.f32 %v1390_v1, %v145_v55 }
0x1c44   :  { %3674 = vtanh.f32 %v1392_v3  ;;  %v135_v3 = vadd.f32 %v3976_v15, %v4123_v57  ;;  %v3587_v15 = vld [vmem:[%s4712_s5] sm:$0xff]  }
0x1c51   :  { %v3675_v5 = vpop.eup %3674 }
0x1c52   :  { %1396 = vrot.lane.b32.xlu0 %v3675_v5, %s3802_s27 }
0x1cc4   :  { %v1397_v7 = vpop.permute.xlu0 %1396 }
0x1cc5   :  { %v1399_v29 = vmul.f32 %v1397_v7, %v1394_v18 }
0x1cc7   :  { %v4250_v10 = vadd.f32 %v1400_v8, %v1399_v29 }
0x1cc9   :  { %v1404_v27 = vpack.c.bf16 %v4250_v10, %v4250_v10 }
0x1ccb   :  { %1410 = vrot.lane.b32.xlu1 %v1404_v27, %s3802_s27 }
0x1d3d   :  { %v1411_v11 = vpop.permute.xlu1 %1410 }
0x1d3e   :  { %3401 = vmatmul.mubr.msk.bf16.vlgmr.msra.gmra.mxu1 %vm214_vm2, %v1411_v11 }
0x1d3f   :  { %3416 = vmatprep.mubr.msk.bf16.mxu1 %vm3800_vm0, %v3798_v0 }
0x1dfe   :  { %v1461_v12 = vpop.f32.mrf.mxu1 }
0x1dff   :  { %v1462_v14 = vadd.f32 %v4113_v47, %v1461_v12  ;;  %v3586_v12 = vld [vmem:[%s4712_s5 + $0x8] sm:$0xff]  }
0x1e00   :  { %v3402_v20 = vpop.f32.mrf.mxu1  ;;  %3413 = vmatpush3.bf16.msra.mxu1 %v3586_v12 }
0x1e01   :  { %1475 = vrot.lane.b32.xlu0 %v1462_v14, %s3801_s21  ;;  %v1467_v32 = vadd.f32 %v1462_v14, %v141_v31  ;;  %3414 = vmatprep.subr.bf16.mxu1 %v3798_v0 }
0x1e02   :  { %v1464_v22 = vpop.f32.mrf.mxu1 }
0x1e03   :  { %v3139_v23 = vmul.f32 -1.442695, %v1467_v32 }
0x1e04   :  { %v3403_v30 = vpop.f32.mrf.mxu1  ;;  %3415 = vmatpush3.bf16.msra.mxu1 %v3587_v15 }
0x1e05   :  { %3676 = vpow2.f32 %v3139_v23  ;;  %3420 = vmatprep.subr.bf16.mxu1 %v3798_v0 }
0x1e12   :  { %v3677_v33 = vpop.eup %3676 }
0x1e13   :  { %v1471_v36 = vadd.f32 1.0, %v3677_v33 }
0x1e15   :  { %3678 = vrcp.f32 %v1471_v36 }
0x1e22   :  { %v3679_v37 = vpop.eup %3678 }
0x1e23   :  { %v1485_v51 = vsub.f32 1.0, %v3679_v37  ;;  %v1491_v9 = vmul.f32 %v3679_v37, %v4250_v10 }
0x1e73   :  { %v1476_v40 = vpop.permute.xlu0 %1475 }
0x1e74   :  { %v1478_v41 = vmul.f32 %v3679_v37, %v1476_v40 }
0x1e76   :  { %1480 = vrot.lane.b32.xlu1 %v1478_v41, %s3801_s21 }
0x1ee8   :  { %v1481_v44 = vpop.permute.xlu1 %1480 }
0x1ee9   :  { %v1483_v45 = vadd.f32 %v1481_v44, %v141_v31 }
0x1eeb   :  { %3680 = vtanh.f32 %v1483_v45  ;;  %v131_v45 = vadd.f32 %v3944_v46, %v4123_v57  ;;  %v4317_v46 = vld [vmem:[%s4714_s9] sm:$0xff]   ;;  %v3590_v57 = vld [vmem:[%s4715_s7 + $0x30] ss:$8 sps:$4 sm:$0xff]  }
0x1ef8   :  { %v3681_v50 = vpop.eup %3680 }
0x1ef9   :  { %1487 = vrot.lane.b32.xlu0 %v3681_v50, %s3802_s27 }
0x1f6b   :  { %v1488_v53 = vpop.permute.xlu0 %1487 }
0x1f6c   :  { %v1490_v55 = vmul.f32 %v1488_v53, %v1485_v51 }
0x1f6e   :  { %v4272_v58 = vadd.f32 %v1491_v9, %v1490_v55 }
0x1f70   :  { %v1495_v25 = vpack.c.bf16 %v4272_v58, %v4272_v58 }
0x1f72   :  { %1501 = vrot.lane.b32.xlu1 %v1495_v25, %s3802_s27 }
0x1fe4   :  { %v1502_v59 = vpop.permute.xlu1 %1501 }
0x1fe5   :  { %3409 = vmatmul.mubr.msk.bf16.vlgmr.msra.gmra.mxu0 %vm214_vm2, %v1502_v59 }
0x1fe6   :  { %1795 = vmatprep.mubr.bf16.mxu0 %v3799_v2 }
0x20a5   :  { %v1552_v60 = vpop.f32.mrf.mxu0 }
0x20a6   :  { %v1553_v61 = vadd.f32 %v4113_v47, %v1552_v60 }
0x20a7   :  { %v3410_v62 = vpop.f32.mrf.mxu0 }
0x20a8   :  { %1566 = vrot.lane.b32.xlu0 %v1553_v61, %s3801_s21  ;;  %v1558_v4 = vadd.f32 %v1553_v61, %v135_v3  ;;  %v3595_v61 = vld [vmem:[%s4715_s7 + $0x24] ss:$8 sps:$4 sm:$0xff]   ;;  %v3593_v62 = vld [vmem:[%s4715_s7 + $0x20] ss:$8 sps:$4 sm:$0xff]  }
0x20a9   :  { %v1555_v63 = vpop.f32.mrf.mxu0 }
0x20aa   :  { %v3143_v21 = vmul.f32 -1.442695, %v1558_v4  ;;  %v3596_v63 = vld [vmem:[%s4715_s7 + $0x10] ss:$8 sps:$4 sm:$0xff]   ;;  %v3599_v4 = vld [vmem:[%s4715_s7] ss:$8 sps:$4 sm:$0xff]  }
0x20ab   :  { %v3411_v1 = vpop.f32.mrf.mxu0 }
0x20ac   :  { %3682 = vpow2.f32 %v3143_v21  ;;  %v3598_v1 = vld [vmem:[%s4715_s7 + $0x14] ss:$8 sps:$4 sm:$0xff]  }
0x20b9   :  { %v3683_v5 = vpop.eup %3682 }
0x20ba   :  { %v1562_v18 = vadd.f32 1.0, %v3683_v5  ;;  %v4362_v5 = vld [vmem:[%s4716_s10] ss:$0 sm:$0xff] }
0x20bc   :  { %3684 = vrcp.f32 %v1562_v18 }
0x20c9   :  { %v3685_v7 = vpop.eup %3684 }
0x20ca   :  { %v1576_v20 = vsub.f32 1.0, %v3685_v7  ;;  %v1582_v30 = vmul.f32 %v3685_v7, %v4272_v58 }
0x211a   :  { %v1567_v8 = vpop.permute.xlu0 %1566 }
0x211b   :  { %v1569_v29 = vmul.f32 %v3685_v7, %v1567_v8 }
0x211d   :  { %1571 = vrot.lane.b32.xlu1 %v1569_v29, %s3801_s21 }
0x218f   :  { %v1572_v27 = vpop.permute.xlu1 %1571 }
0x2190   :  { %v1574_v11 = vadd.f32 %v1572_v27, %v135_v3  ;;  %v3601_v3 = vld [vmem:[%s4715_s7 + $0x4] ss:$8 sps:$4 sm:$0xff]  }
0x2192   :  { %3686 = vtanh.f32 %v1574_v11 }
0x219f   :  { %v3687_v14 = vpop.eup %3686 }
0x21a0   :  { %1578 = vrot.lane.b32.xlu0 %v3687_v14, %s3802_s27 }
0x2212   :  { %v1579_v22 = vpop.permute.xlu0 %1578 }
0x2213   :  { %v1581_v31 = vmul.f32 %v1579_v22, %v1576_v20 }
0x2215   :  { %v4294_v32 = vadd.f32 %v1582_v30, %v1581_v31 }
0x2217   :  { %v1586_v23 = vpack.c.bf16 %v4294_v32, %v4294_v32 }
0x2219   :  { %1592 = vrot.lane.b32.xlu1 %v1586_v23, %s3802_s27 }
0x228b   :  { %v1593_v33 = vpop.permute.xlu1 %1592 }
0x228c   :  { %3417 = vmatmul.mubr.msk.bf16.vlgmr.msra.gmra.mxu1 %vm214_vm2, %v1593_v33 }
0x228d   :  { %3424 = vmatprep.mubr.msk.bf16.mxu1 %vm3800_vm0, %v3798_v0 }
0x234c   :  { %v1643_v36 = vpop.f32.mrf.mxu1 }
0x234d   :  { %v1644_v37 = vadd.f32 %v4113_v47, %v1643_v36  ;;  %v4312_v47 = vld [vmem:[%s4714_s9 + $0x8] sm:$0xff]  }
0x234e   :  { %v3418_v40 = vpop.f32.mrf.mxu1  ;;  %3421 = vmatpush3.bf16.msra.mxu1 %v4312_v47 }
0x234f   :  { %1657 = vrot.lane.b32.xlu0 %v1644_v37, %s3801_s21  ;;  %v1649_v49 = vadd.f32 %v1644_v37, %v131_v45  ;;  %3422 = vmatprep.subr.bf16.mxu1 %v3798_v0 }
0x2350   :  { %v1646_v41 = vpop.f32.mrf.mxu1 }
0x2351   :  { %v3147_v48 = vmul.f32 -1.442695, %v1649_v49 }
0x2352   :  { %v3419_v44 = vpop.f32.mrf.mxu1  ;;  %3423 = vmatpush3.bf16.msra.mxu1 %v4317_v46 }
0x2353   :  { %3688 = vpow2.f32 %v3147_v48  ;;  %3428 = vmatprep.subr.bf16.mxu1 %v3798_v0 }
0x2355   :  { %3425 = vmatmul.mubr.bf16.vlgmr.msra.gmra.mxu1 %v3799_v2 }
0x2356   :  { %3429 = vmatpush3.bf16.msra.mxu1 %v4312_v47  ;;  %3432 = vmatprep.mubr.msk.bf16.mxu1 %vm3800_vm0, %v3798_v0 }
0x2357   :  { %3430 = vmatprep.subr.bf16.mxu1 %v3798_v0 }
0x235a   :  { %3431 = vmatpush3.bf16.msra.mxu1 %v4317_v46 }
0x235b   :  { %3436 = vmatprep.subr.bf16.mxu1 %v3798_v0 }
0x2360   :  { %v3689_v50 = vpop.eup %3688 }
0x2361   :  { %v1653_v51 = vadd.f32 1.0, %v3689_v50 }
0x2363   :  { %3690 = vrcp.f32 %v1653_v51 }
0x2370   :  { %v3691_v53 = vpop.eup %3690 }
0x2371   :  { %v1667_v11 = vsub.f32 1.0, %v3691_v53  ;;  %v1673_v15 = vmul.f32 %v3691_v53, %v4294_v32 }
0x23c1   :  { %v1658_v9 = vpop.permute.xlu0 %1657 }
0x23c2   :  { %v1660_v55 = vmul.f32 %v3691_v53, %v1658_v9 }
0x23c4   :  { %1662 = vrot.lane.b32.xlu1 %v1660_v55, %s3801_s21 }
0x23c8   :  { %285 = vrot.lane.b32.xlu1 %v3934_v38, %s3802_s27  ;;  %v3592_v38 = vld [vmem:[%s4715_s7 + $0x34] ss:$8 sps:$4 sm:$0xff]  }
0x23c9   :  { %1771 = vmatprep.subr.bf16.mxu0 %v3592_v38 }
0x23ca   :  { %1772 = vmatpush1.bf16.msra.mxu0 %v3590_v57 }
0x23cb   :  { %1773 = vmatprep.subr.bf16.mxu0 %v3595_v61 }
0x23ce   :  { %1774 = vmatpush1.bf16.msra.mxu0 %v3593_v62 }
0x23cf   :  { %1775 = vmatprep.subr.bf16.mxu0 %v3598_v1 }
0x23d2   :  { %1776 = vmatpush1.bf16.msra.mxu0 %v3596_v63 }
0x23d3   :  { %1777 = vmatprep.subr.bf16.mxu0 %v3601_v3 }
0x23d6   :  { %1778 = vmatpush1.bf16.msra.mxu0 %v3599_v4 }
0x23d7   :  { %3460 = vmatprep.subr.bf16.mxu0 %v3798_v0 }
0x2415   :  { %v1917_v18 = vpop.f32.mrf.mxu1 }
0x2416   :  { %v1918_v7 = vadd.f32 %v4362_v5, %v1917_v18 }
0x2417   :  { %v3426_v8 = vpop.f32.mrf.mxu1 }
0x2418   :  { %1931 = vrot.lane.b32.xlu1 %v1918_v7, %s3801_s21 }
0x2419   :  { %v1920_v29 = vpop.f32.mrf.mxu1 }
0x241b   :  { %v3427_v27 = vpop.f32.mrf.mxu1 }
0x2436   :  { %v1663_v25 = vpop.permute.xlu1 %1662 }
0x2437   :  { %v1665_v59 = vadd.f32 %v1663_v25, %v131_v45 }
0x2439   :  { %3692 = vtanh.f32 %v1665_v59 }
0x243a   :  { %v286_v60 = vpop.permute.xlu1 %285 }
0x243b   :  { %288 = vst.msk [vmem:[#allocation2] sm:$0xff] %vm214_vm2, %v286_v60 }
0x2446   :  { %v3693_v21 = vpop.eup %3692 }
0x2447   :  { %1669 = vrot.lane.b32.xlu0 %v3693_v21, %s3802_s27 }
0x244b   :  { %380 = vrot.lane.b32.xlu0 %v3966_v6, %s3802_s27 }
0x248a   :  { %v1932_v45 = vpop.permute.xlu1 %1931 }
0x24b9   :  { %v1670_v12 = vpop.permute.xlu0 %1669 }
0x24ba   :  { %v1672_v14 = vmul.f32 %v1670_v12, %v1667_v11 }
0x24bc   :  { %v4367_v6 = vadd.f32 %v1673_v15, %v1672_v14 }
0x24bd   :  { %v381_v20 = vpop.permute.xlu0 %380 }
0x24be   :  { %1675 = vst.msk [vmem:[#allocation2] sm:$0xff] %vm1037_vm3, %v4367_v6 }
0x24bf   :  { %383 = vst.msk [vmem:[#allocation2 + $0x8] sm:$0xff] %vm214_vm2, %v381_v20 }
0x24c0   :  { %1584 = vst.msk [vmem:[#allocation2 + $0x8] sm:$0xff] %vm1037_vm3, %v4294_v32  ;;  %v4383_v32 = vld [vmem:[%s4717_s8] sm:$0x3] }
0x24c1   :  { %v4388_v23 = vrot.slane %v4383_v32, %v63_v17 }
0x24c5   :  { %v1678_v22 = vld [vmem:[#allocation2] sm:$0xff] }
0x24c7   :  { %v1679_v30 = vld [vmem:[#allocation2 + $0x8] sm:$0xff] }
0x24c8   :  { %v1686_v31 = vpack.c.bf16 %v1679_v30, %v1678_v22 }
0x24ca   :  { %3156 = vmatmul.mubr.msk.bf16.vlgmr.msra.gmra.mxu0 %vm1750_vm4, %v1686_v31 }
0x24cb   :  { %1805 = vmatprep.mubr.bf16.mxu0 %v3799_v2  ;;  %3461 = vmatpush3.bf16.msra.mxu0 %v4312_v47 }
0x24cc   :  { %3462 = vmatprep.subr.bf16.mxu0 %v3798_v0 }
0x24cf   :  { %3463 = vmatpush3.bf16.msra.mxu0 %v4317_v46 }
0x24d0   :  { %3476 = vmatprep.subr.bf16.mxu0 %v3798_v0 }
0x258a   :  { %v1797_v33 = vpop.f32.mrf.mxu0 }
0x258b   :  { %v1798_v36 = vadd.f32 %v1797_v33, %v4388_v23 }
0x258c   :  { %v4403_v3 = vpop.f32.mrf.mxu0 }
0x258d   :  { %v1923_v37 = vadd.f32 %v1918_v7, %v1798_v36 }
0x258e   :  { %v1801_v4 = vpop.f32.mrf.mxu0 }
0x258f   :  { %v3164_v40 = vmul.f32 -1.442695, %v1923_v37  ;;  %v1802_v21 = vadd.f32 %v1801_v4, %v4388_v23 }
0x2591   :  { %3694 = vpow2.f32 %v3164_v40 }
0x259e   :  { %v3695_v41 = vpop.eup %3694 }
0x259f   :  { %v1927_v44 = vadd.f32 1.0, %v3695_v41 }
0x25a1   :  { %3696 = vrcp.f32 %v1927_v44 }
0x25ae   :  { %v3697_v49 = vpop.eup %3696 }
0x25af   :  { %v1934_v48 = vmul.f32 %v3697_v49, %v1932_v45  ;;  %v1941_v17 = vsub.f32 1.0, %v3697_v49  ;;  %v1947_v55 = vmul.f32 0.0, %v3697_v49 }
0x25b1   :  { %1936 = vrot.lane.b32.xlu0 %v1934_v48, %s3801_s21 }
0x2623   :  { %v1937_v50 = vpop.permute.xlu0 %1936 }
0x2624   :  { %v1939_v51 = vadd.f32 %v1937_v50, %v1798_v36 }
0x2626   :  { %3698 = vtanh.f32 %v1939_v51 }
0x2633   :  { %v3699_v53 = vpop.eup %3698 }
0x2634   :  { %1943 = vrot.lane.b32.xlu1 %v3699_v53, %s3802_s27 }
0x26a6   :  { %v1944_v9 = vpop.permute.xlu1 %1943 }
0x26a7   :  { %v1946_v57 = vmul.f32 %v1944_v9, %v1941_v17 }
0x26a9   :  { %v1948_v38 = vadd.f32 %v1947_v55, %v1946_v57 }
0x26ab   :  { %v1950_v25 = vpack.c.bf16 %v1948_v38, %v1948_v38 }
0x26ad   :  { %1952 = vrot.lane.b32.xlu0 %v1950_v25, %s3802_s27 }
0x271f   :  { %v1953_v59 = vpop.permute.xlu0 %1952 }
0x2720   :  { %3433 = vmatmul.mubr.msk.bf16.vlgmr.msra.gmra.mxu1 %vm214_vm2, %v1953_v59 }
0x2721   :  { %3437 = vmatpush3.bf16.msra.mxu1 %v4312_v47  ;;  %3440 = vmatprep.mubr.msk.bf16.mxu1 %vm3800_vm0, %v3798_v0 }
0x2722   :  { %3438 = vmatprep.subr.bf16.mxu1 %v3798_v0 }
0x2725   :  { %3439 = vmatpush3.bf16.msra.mxu1 %v4317_v46 }
0x2726   :  { %3444 = vmatprep.subr.bf16.mxu1 %v3798_v0 }
0x27e0   :  { %v1991_v60 = vpop.f32.mrf.mxu1 }
0x27e1   :  { %v1992_v61 = vadd.f32 %v4362_v5, %v1991_v60 }
0x27e2   :  { %v3434_v62 = vpop.f32.mrf.mxu1 }
0x27e3   :  { %2005 = vrot.lane.b32.xlu1 %v1992_v61, %s3801_s21  ;;  %v1997_v18 = vadd.f32 %v1992_v61, %v1802_v21 }
0x27e4   :  { %v1994_v63 = vpop.f32.mrf.mxu1 }
0x27e5   :  { %v3166_v7 = vmul.f32 -1.442695, %v1997_v18 }
0x27e6   :  { %v3435_v1 = vpop.f32.mrf.mxu1 }
0x27e7   :  { %3700 = vpow2.f32 %v3166_v7 }
0x27f4   :  { %v3701_v8 = vpop.eup %3700 }
0x27f5   :  { %v2001_v29 = vadd.f32 1.0, %v3701_v8 }
0x27f7   :  { %3702 = vrcp.f32 %v2001_v29 }
0x2804   :  { %v3703_v27 = vpop.eup %3702 }
0x2805   :  { %v2015_v22 = vsub.f32 1.0, %v3703_v27  ;;  %v2021_v31 = vmul.f32 %v3703_v27, %v1948_v38 }
0x2855   :  { %v2006_v11 = vpop.permute.xlu1 %2005 }
0x2856   :  { %v2008_v12 = vmul.f32 %v3703_v27, %v2006_v11 }
0x2858   :  { %2010 = vrot.lane.b32.xlu0 %v2008_v12, %s3801_s21 }
0x28ca   :  { %v2011_v15 = vpop.permute.xlu0 %2010 }
0x28cb   :  { %v2013_v14 = vadd.f32 %v2011_v15, %v1802_v21 }
0x28cd   :  { %3704 = vtanh.f32 %v2013_v14 }
0x28da   :  { %v3705_v20 = vpop.eup %3704 }
0x28db   :  { %2017 = vrot.lane.b32.xlu1 %v3705_v20, %s3802_s27 }
0x28df   :  { %475 = vrot.lane.b32.xlu1 %v3990_v39, %s3802_s27 }
0x294d   :  { %v2018_v30 = vpop.permute.xlu1 %2017 }
0x294e   :  { %v2020_v33 = vmul.f32 %v2018_v30, %v2015_v22 }
0x2950   :  { %v2022_v36 = vadd.f32 %v2021_v31, %v2020_v33 }
0x2951   :  { %v476_v37 = vpop.permute.xlu1 %475 }
0x2952   :  { %478 = vst.msk [vmem:[#allocation2 + $0x10] sm:$0xff] %vm214_vm2, %v476_v37  ;;  %v2024_v40 = vpack.c.bf16 %v2022_v36, %v2022_v36 }
0x2953   :  { %1493 = vst.msk [vmem:[#allocation2 + $0x10] sm:$0xff] %vm1037_vm3, %v4272_v58 }
0x2954   :  { %2026 = vrot.lane.b32.xlu0 %v2024_v40, %s3802_s27 }
0x2958   :  { %570 = vrot.lane.b32.xlu0 %v4031_v13, %s3802_s27 }
0x295a   :  { %v1680_v13 = vld [vmem:[#allocation2 + $0x10] sm:$0xff] }
0x29c6   :  { %v2027_v41 = vpop.permute.xlu0 %2026 }
0x29c7   :  { %3441 = vmatmul.mubr.msk.bf16.vlgmr.msra.gmra.mxu1 %vm214_vm2, %v2027_v41 }
0x29c8   :  { %3445 = vmatpush3.bf16.msra.mxu1 %v4312_v47  ;;  %3448 = vmatprep.mubr.msk.bf16.mxu1 %vm3800_vm0, %v3798_v0 }
0x29c9   :  { %3446 = vmatprep.subr.bf16.mxu1 %v3798_v0 }
0x29ca   :  { %v571_v39 = vpop.permute.xlu0 %570 }
0x29cb   :  { %573 = vst.msk [vmem:[#allocation2 + $0x18] sm:$0xff] %vm214_vm2, %v571_v39 }
0x29cc   :  { %1402 = vst.msk [vmem:[#allocation2 + $0x18] sm:$0xff] %vm1037_vm3, %v4250_v10  ;;  %3447 = vmatpush3.bf16.msra.mxu1 %v4317_v46  ;;  %v4430_v10 = vpop.f32.mrf.mxu0 }
0x29cd   :  { %3452 = vmatprep.subr.bf16.mxu1 %v3798_v0 }
0x29d3   :  { %v1681_v58 = vld [vmem:[#allocation2 + $0x18] sm:$0xff] }
0x29d4   :  { %v1687_v44 = vpack.c.bf16 %v1681_v58, %v1680_v13 }
0x29d6   :  { %3157 = vmatmul.mubr.msk.bf16.gmra.mxu0 %vm1750_vm4, %v1687_v44 }
0x29d7   :  { %1815 = vmatprep.mubr.bf16.mxu0 %v3799_v2 }
0x2a87   :  { %v2065_v45 = vpop.f32.mrf.mxu1 }
0x2a88   :  { %v2066_v49 = vadd.f32 %v4362_v5, %v2065_v45  ;;  %v3796_v45 = vld [vmem:[%s4710_s4] ss:$0 sm:$0xff] }
0x2a89   :  { %v3442_v48 = vpop.f32.mrf.mxu1 }
0x2a8a   :  { %2079 = vrot.lane.b32.xlu1 %v2066_v49, %s3801_s21  ;;  %v163_v48 = vadd.f32 %v4049_v28, %v3921_v19 }
0x2a8b   :  { %v2068_v50 = vpop.f32.mrf.mxu1 }
0x2a8d   :  { %v3443_v51 = vpop.f32.mrf.mxu1 }
0x2a96   :  { %v1807_v53 = vpop.f32.mrf.mxu0 }
0x2a97   :  { %v1808_v17 = vadd.f32 %v1807_v53, %v4388_v23 }
0x2a98   :  { %v4445_v20 = vpop.f32.mrf.mxu0 }
0x2a99   :  { %v2071_v9 = vadd.f32 %v2066_v49, %v1808_v17  ;;  %v918_v49 = vadd.f32 %v3796_v45, %v4164_v52 }
0x2a9a   :  { %v1811_v22 = vpop.f32.mrf.mxu0 }
0x2a9b   :  { %v3168_v55 = vmul.f32 -1.442695, %v2071_v9  ;;  %v1812_v30 = vadd.f32 %v1811_v22, %v4388_v23  ;;  %v923_v50 = vadd.f32 %v918_v49, %v163_v48 }
0x2a9d   :  { %3706 = vpow2.f32 %v3168_v55  ;;  %v3116_v51 = vmul.f32 -1.442695, %v923_v50 }
0x2aaa   :  { %v3707_v57 = vpop.eup %3706 }
0x2aab   :  { %v2075_v38 = vadd.f32 1.0, %v3707_v57 }
0x2aad   :  { %3708 = vrcp.f32 %v2075_v38 }
0x2aba   :  { %v3709_v25 = vpop.eup %3708 }
0x2abb   :  { %v2089_v1 = vsub.f32 1.0, %v3709_v25  ;;  %v2095_v21 = vmul.f32 %v3709_v25, %v2022_v36 }
0x2afc   :  { %v2080_v59 = vpop.permute.xlu1 %2079 }
0x2afd   :  { %v2082_v60 = vmul.f32 %v3709_v25, %v2080_v59 }
0x2aff   :  { %2084 = vrot.lane.b32.xlu0 %v2082_v60, %s3801_s21 }
0x2b71   :  { %v2085_v61 = vpop.permute.xlu0 %2084 }
0x2b72   :  { %v2087_v62 = vadd.f32 %v2085_v61, %v1808_v17 }
0x2b74   :  { %3710 = vtanh.f32 %v2087_v62 }
0x2b81   :  { %v3711_v63 = vpop.eup %3710 }
0x2b82   :  { %2091 = vrot.lane.b32.xlu1 %v3711_v63, %s3802_s27 }
0x2bf4   :  { %v2092_v4 = vpop.permute.xlu1 %2091 }
0x2bf5   :  { %v2094_v18 = vmul.f32 %v2092_v4, %v2089_v1 }
0x2bf7   :  { %v2096_v7 = vadd.f32 %v2095_v21, %v2094_v18 }
0x2bf9   :  { %v2098_v8 = vpack.c.bf16 %v2096_v7, %v2096_v7 }
0x2bfb   :  { %2100 = vrot.lane.b32.xlu0 %v2098_v8, %s3802_s27 }
0x2c6d   :  { %v2101_v29 = vpop.permute.xlu0 %2100 }
0x2c6e   :  { %3449 = vmatmul.mubr.msk.bf16.vlgmr.msra.gmra.mxu1 %vm214_vm2, %v2101_v29 }
0x2c6f   :  { %3453 = vmatpush3.bf16.msra.mxu1 %v4312_v47  ;;  %3456 = vmatprep.mubr.msk.bf16.mxu1 %vm3800_vm0, %v3798_v0 }
0x2c70   :  { %3454 = vmatprep.subr.bf16.mxu1 %v3798_v0 }
0x2c73   :  { %3455 = vmatpush3.bf16.msra.mxu1 %v4317_v46 }
0x2c74   :  { %3468 = vmatprep.subr.bf16.mxu1 %v3798_v0 }
0x2d2e   :  { %v2139_v27 = vpop.f32.mrf.mxu1 }
0x2d2f   :  { %v2140_v11 = vadd.f32 %v4362_v5, %v2139_v27 }
0x2d30   :  { %v3450_v12 = vpop.f32.mrf.mxu1 }
0x2d31   :  { %2153 = vrot.lane.b32.xlu1 %v2140_v11, %s3801_s21  ;;  %v2145_v31 = vadd.f32 %v2140_v11, %v1812_v30  ;;  %v4490_v11 = vpop.f32.mrf.mxu0 }
0x2d32   :  { %v2142_v15 = vpop.f32.mrf.mxu1 }
0x2d33   :  { %v3170_v33 = vmul.f32 -1.442695, %v2145_v31 }
0x2d34   :  { %v3451_v14 = vpop.f32.mrf.mxu1 }
0x2d35   :  { %3712 = vpow2.f32 %v3170_v33 }
0x2d42   :  { %v3713_v36 = vpop.eup %3712 }
0x2d43   :  { %v2149_v37 = vadd.f32 1.0, %v3713_v36 }
0x2d45   :  { %3714 = vrcp.f32 %v2149_v37 }
0x2d52   :  { %v3715_v40 = vpop.eup %3714 }
0x2d53   :  { %v2163_v9 = vsub.f32 1.0, %v3715_v40 }
0x2da3   :  { %v2154_v41 = vpop.permute.xlu1 %2153 }
0x2da4   :  { %v2156_v39 = vmul.f32 %v3715_v40, %v2154_v41 }
0x2da6   :  { %2158 = vrot.lane.b32.xlu0 %v2156_v39, %s3801_s21 }
0x2e18   :  { %v2159_v13 = vpop.permute.xlu0 %2158 }
0x2e19   :  { %v2161_v58 = vadd.f32 %v2159_v13, %v1812_v30 }
0x2e1b   :  { %3716 = vtanh.f32 %v2161_v58 }
0x2e1c   :  { %3718 = vpow2.f32 %v3116_v51 }
0x2e28   :  { %v3717_v44 = vpop.eup %3716 }
0x2e29   :  { %2165 = vrot.lane.b32.xlu1 %v3717_v44, %s3802_s27  ;;  %v3719_v53 = vpop.eup %3718 }
0x2e2a   :  { %v927_v17 = vadd.f32 1.0, %v3719_v53 }
0x2e2c   :  { %3720 = vrcp.f32 %v927_v17 }
0x2e2d   :  { %665 = vrot.lane.b32.xlu1 %v4067_v56, %s3802_s27  ;;  %v2169_v56 = vmul.f32 %v3715_v40, %v2096_v7 }
0x2e31   :  { %931 = vrot.lane.b32.xlu1 %v918_v49, %s3801_s21 }
0x2e39   :  { %v3721_v19 = vpop.eup %3720 }
0x2e3a   :  { %v941_v41 = vsub.f32 1.0, %v3721_v19  ;;  %v947_v58 = vmul.f32 %v3721_v19, %v4140_v35 }
0x2e9b   :  { %v2166_v55 = vpop.permute.xlu1 %2165 }
0x2e9c   :  { %v2168_v57 = vmul.f32 %v2166_v55, %v2163_v9 }
0x2e9e   :  { %v4459_v38 = vadd.f32 %v2169_v56, %v2168_v57 }
0x2e9f   :  { %v666_v25 = vpop.permute.xlu1 %665 }
0x2ea0   :  { %668 = vst.msk [vmem:[#allocation2 + $0x20] sm:$0xff] %vm214_vm2, %v666_v25  ;;  %v2172_v52 = vpack.c.bf16 %v4459_v38, %v4459_v38 }
0x2ea1   :  { %1311 = vst.msk [vmem:[#allocation2 + $0x20] sm:$0xff] %vm1037_vm3, %v4227_v42 }
0x2ea2   :  { %2174 = vrot.lane.b32.xlu0 %v2172_v52, %s3802_s27 }
0x2ea3   :  { %v932_v28 = vpop.permute.xlu1 %931 }
0x2ea4   :  { %v934_v59 = vmul.f32 %v3721_v19, %v932_v28 }
0x2ea6   :  { %760 = vrot.lane.b32.xlu0 %v4089_v34, %s3802_s27  ;;  %936 = vrot.lane.b32.xlu1 %v934_v59, %s3801_s21 }
0x2ea8   :  { %v1682_v34 = vld [vmem:[#allocation2 + $0x20] sm:$0xff] }
0x2f14   :  { %v2175_v60 = vpop.permute.xlu0 %2174 }
0x2f15   :  { %3457 = vmatmul.mubr.msk.bf16.vlgmr.msra.gmra.mxu1 %vm214_vm2, %v2175_v60 }
0x2f16   :  { %3469 = vmatpush3.bf16.msra.mxu1 %v4312_v47  ;;  %3472 = vmatprep.mubr.msk.bf16.mxu1 %vm3800_vm0, %v3798_v0 }
0x2f17   :  { %3470 = vmatprep.subr.bf16.mxu1 %v3798_v0 }
0x2f18   :  { %v761_v42 = vpop.permute.xlu0 %760  ;;  %v937_v61 = vpop.permute.xlu1 %936 }
0x2f19   :  { %763 = vst.msk [vmem:[#allocation2 + $0x28] sm:$0xff] %vm214_vm2, %v761_v42  ;;  %v939_v62 = vadd.f32 %v937_v61, %v163_v48 }
0x2f1a   :  { %1220 = vst.msk [vmem:[#allocation2 + $0x28] sm:$0xff] %vm1037_vm3, %v4204_v26  ;;  %3471 = vmatpush3.bf16.msra.mxu1 %v4317_v46 }
0x2f1b   :  { %3722 = vtanh.f32 %v939_v62  ;;  %3484 = vmatprep.subr.bf16.mxu1 %v3798_v0 }
0x2f21   :  { %v1683_v63 = vld [vmem:[#allocation2 + $0x28] sm:$0xff] }
0x2f22   :  { %v1688_v1 = vpack.c.bf16 %v1683_v63, %v1682_v34 }
0x2f24   :  { %3158 = vmatmul.mubr.msk.bf16.gmra.mxu0 %vm1750_vm4, %v1688_v1 }
0x2f25   :  { %1825 = vmatprep.mubr.bf16.mxu0 %v3799_v2 }
0x2f28   :  { %v3723_v4 = vpop.eup %3722 }
0x2f29   :  { %943 = vrot.lane.b32.xlu1 %v3723_v4, %s3802_s27 }
0x2f2d   :  { %855 = vrot.lane.b32.xlu1 %v4140_v35, %s3802_s27 }
0x2f9b   :  { %v944_v21 = vpop.permute.xlu1 %943 }
0x2f9c   :  { %v946_v39 = vmul.f32 %v944_v21, %v941_v41 }
0x2f9e   :  { %v948_v44 = vadd.f32 %v947_v58, %v946_v39 }
0x2f9f   :  { %v856_v26 = vpop.permute.xlu1 %855 }
0x2fa0   :  { %858 = vst.msk [vmem:[#allocation2 + $0x30] sm:$0xff] %vm214_vm2, %v856_v26 }
0x2fa1   :  { %1129 = vst.msk [vmem:[#allocation2 + $0x30] sm:$0xff] %vm1037_vm3, %v4181_v24 }
0x2fa8   :  { %v1684_v17 = vld [vmem:[#allocation2 + $0x30] sm:$0xff] }
0x2fd5   :  { %v2213_v18 = vpop.f32.mrf.mxu1 }
0x2fd6   :  { %v2214_v7 = vadd.f32 %v4362_v5, %v2213_v18 }
0x2fd7   :  { %v3458_v8 = vpop.f32.mrf.mxu1 }
0x2fd8   :  { %2227 = vrot.lane.b32.xlu0 %v2214_v7, %s3801_s21 }
0x2fd9   :  { %v2216_v29 = vpop.f32.mrf.mxu1 }
0x2fdb   :  { %v3459_v27 = vpop.f32.mrf.mxu1 }
0x2fe4   :  { %v1817_v12 = vpop.f32.mrf.mxu0 }
0x2fe5   :  { %v1818_v15 = vadd.f32 %v1817_v12, %v4388_v23 }
0x2fe7   :  { %v2219_v14 = vadd.f32 %v2214_v7, %v1818_v15 }
0x2fe9   :  { %v3172_v22 = vmul.f32 -1.442695, %v2219_v14 }
0x2feb   :  { %3724 = vpow2.f32 %v3172_v22  ;;  %v4546_v22 = vld [vmem:[%s4719_s11 + $0x8] sm:$0xff]  }
0x2ff8   :  { %v3725_v30 = vpop.eup %3724 }
0x2ff9   :  { %v2223_v31 = vadd.f32 1.0, %v3725_v30 }
0x2ffb   :  { %3726 = vrcp.f32 %v2223_v31  ;;  %v4553_v31 = vld [vmem:[%s4719_s11] sm:$0xff]  }
0x3008   :  { %v3727_v24 = vpop.eup %3726 }
0x3009   :  { %v2237_v45 = vsub.f32 1.0, %v3727_v24  ;;  %v2243_v48 = vmul.f32 %v3727_v24, %v4459_v38 }
0x304a   :  { %v2228_v33 = vpop.permute.xlu0 %2227 }
0x304b   :  { %v2230_v36 = vmul.f32 %v3727_v24, %v2228_v33 }
0x304d   :  { %2232 = vrot.lane.b32.xlu0 %v2230_v36, %s3801_s21 }
0x30bf   :  { %v2233_v37 = vpop.permute.xlu0 %2232 }
0x30c0   :  { %v2235_v40 = vadd.f32 %v2233_v37, %v1818_v15 }
0x30c2   :  { %3728 = vtanh.f32 %v2235_v40 }
0x30cf   :  { %v3729_v13 = vpop.eup %3728 }
0x30d0   :  { %2239 = vrot.lane.b32.xlu0 %v3729_v13, %s3802_s27 }
0x30d4   :  { %950 = vrot.lane.b32.xlu0 %v948_v44, %s3802_s27 }
0x3142   :  { %v2240_v49 = vpop.permute.xlu0 %2239 }
0x3143   :  { %v2242_v50 = vmul.f32 %v2240_v49, %v2237_v45  ;;  %v4581_v49 = vrot.slane %v4383_v32, %v67_v54 }
0x3145   :  { %v2244_v51 = vadd.f32 %v2243_v48, %v2242_v50 }
0x3146   :  { %v951_v53 = vpop.permute.xlu0 %950 }
0x3147   :  { %953 = vst.msk [vmem:[#allocation2 + $0x38] sm:$0xff] %vm214_vm2, %v951_v53  ;;  %1676 = vst.msk [vmem:[%s4718_s13] sm:$0xff] %vm214_vm2, %v951_v53  ;;  %v2246_v35 = vpack.c.bf16 %v2244_v51, %v2244_v51 }
0x3148   :  { %1038 = vst.msk [vmem:[#allocation2 + $0x38] sm:$0xff] %vm1037_vm3, %v4145_v43  ;;  %1677 = vst.msk [vmem:[%s4718_s13] sm:$0xff] %vm1037_vm3, %v4367_v6  ;;  %v4521_v43 = vpop.f32.mrf.mxu0 }
0x3149   :  { %2248 = vrot.lane.b32.xlu1 %v2246_v35, %s3802_s27 }
0x314a   :  { %v1821_v6 = vpop.f32.mrf.mxu0 }
0x314b   :  { %v1822_v42 = vadd.f32 %v1821_v6, %v4388_v23 }
0x314c   :  { %v4523_v57 = vpop.f32.mrf.mxu0 }
0x314f   :  { %v1685_v9 = vld [vmem:[#allocation2 + $0x38] sm:$0xff] }
0x3150   :  { %v1689_v55 = vpack.c.bf16 %v1685_v9, %v1684_v17 }
0x3152   :  { %3159 = vmatmul.mubr.msk.bf16.gmra.mxu0 %vm1750_vm4, %v1689_v55 }
0x3153   :  { %3464 = vmatprep.mubr.msk.bf16.mxu0 %vm3800_vm0, %v3798_v0 }
0x31bb   :  { %v2249_v56 = vpop.permute.xlu1 %2248 }
0x31bc   :  { %3465 = vmatmul.mubr.msk.bf16.vlgmr.msra.gmra.mxu0 %vm214_vm2, %v2249_v56 }
0x31bd   :  { %3477 = vmatpush3.bf16.msra.mxu0 %v4312_v47  ;;  %3480 = vmatprep.mubr.msk.bf16.mxu0 %vm3800_vm0, %v3798_v0 }
0x31be   :  { %3478 = vmatprep.subr.bf16.mxu0 %v3798_v0 }
0x31c1   :  { %3479 = vmatpush3.bf16.msra.mxu0 %v4317_v46 }
0x31c2   :  { %3492 = vmatprep.subr.bf16.mxu0 %v3798_v0 }
0x3212   :  { %v4525_v38 = vpop.f32.mrf.mxu0 }
0x3214   :  { %v4527_v25 = vpop.f32.mrf.mxu0 }
0x3216   :  { %v4529_v52 = vpop.f32.mrf.mxu0 }
0x3218   :  { %v4531_v47 = vpop.f32.mrf.mxu0 }
0x3219   :  { %v1834_v50 = vadd.f32 %v4531_v47, %v4581_v49 }
0x327c   :  { %v2287_v19 = vpop.f32.mrf.mxu0 }
0x327d   :  { %v2288_v28 = vadd.f32 %v4362_v5, %v2287_v19 }
0x327e   :  { %v3466_v59 = vpop.f32.mrf.mxu0 }
0x327f   :  { %2301 = vrot.lane.b32.xlu0 %v2288_v28, %s3801_s21  ;;  %v2293_v61 = vadd.f32 %v2288_v28, %v1822_v42 }
0x3280   :  { %v2290_v46 = vpop.f32.mrf.mxu0 }
0x3281   :  { %v3174_v62 = vmul.f32 -1.442695, %v2293_v61 }
0x3282   :  { %v3467_v60 = vpop.f32.mrf.mxu0 }
0x3283   :  { %3730 = vpow2.f32 %v3174_v62 }
0x3290   :  { %v3731_v34 = vpop.eup %3730 }
0x3291   :  { %v2297_v63 = vadd.f32 1.0, %v3731_v34 }
0x3293   :  { %3732 = vrcp.f32 %v2297_v63 }
0x32a0   :  { %v3733_v1 = vpop.eup %3732 }
0x32a1   :  { %v2311_v8 = vsub.f32 1.0, %v3733_v1  ;;  %v2317_v27 = vmul.f32 %v3733_v1, %v2244_v51 }
0x32f1   :  { %v2302_v4 = vpop.permute.xlu0 %2301 }
0x32f2   :  { %v2304_v21 = vmul.f32 %v3733_v1, %v2302_v4 }
0x32f4   :  { %2306 = vrot.lane.b32.xlu1 %v2304_v21, %s3801_s21 }
0x3366   :  { %v2307_v26 = vpop.permute.xlu1 %2306 }
0x3367   :  { %v2309_v18 = vadd.f32 %v2307_v26, %v1822_v42 }
0x3369   :  { %3734 = vtanh.f32 %v2309_v18 }
0x3376   :  { %v3735_v7 = vpop.eup %3734 }
0x3377   :  { %2313 = vrot.lane.b32.xlu0 %v3735_v7, %s3802_s27 }
0x33e9   :  { %v2314_v29 = vpop.permute.xlu0 %2313 }
0x33ea   :  { %v2316_v12 = vmul.f32 %v2314_v29, %v2311_v8 }
0x33ec   :  { %v4538_v15 = vadd.f32 %v2317_v27, %v2316_v12 }
0x33ee   :  { %v2320_v14 = vpack.c.bf16 %v4538_v15, %v4538_v15 }
0x33f0   :  { %2322 = vrot.lane.b32.xlu1 %v2320_v14, %s3802_s27 }
0x3462   :  { %v2323_v30 = vpop.permute.xlu1 %2322 }
0x3463   :  { %3473 = vmatmul.mubr.msk.bf16.vlgmr.msra.gmra.mxu1 %vm214_vm2, %v2323_v30 }
0x3464   :  { %3485 = vmatpush3.bf16.msra.mxu1 %v4546_v22  ;;  %3488 = vmatprep.mubr.msk.bf16.mxu1 %vm3800_vm0, %v3798_v0 }
0x3465   :  { %3486 = vmatprep.subr.bf16.mxu1 %v3798_v0 }
0x3468   :  { %3487 = vmatpush3.bf16.msra.mxu1 %v4553_v31 }
0x3469   :  { %3500 = vmatprep.subr.bf16.mxu1 %v3798_v0 }
0x346b   :  { %3489 = vmatmul.mubr.bf16.vlgmr.msra.gmra.mxu1 %v3799_v2  ;;  %v4572_v2 = vld [vmem:[%s4720_s12] ss:$0 sm:$0xff] }
0x346c   :  { %3501 = vmatpush3.bf16.msra.mxu1 %v4546_v22  ;;  %3504 = vmatprep.mubr.msk.bf16.mxu1 %vm3800_vm0, %v3798_v0 }
0x346d   :  { %3502 = vmatprep.subr.bf16.mxu1 %v3798_v0 }
0x3470   :  { %3503 = vmatpush3.bf16.msra.mxu1 %v4553_v31 }
0x3471   :  { %3516 = vmatprep.subr.bf16.mxu1 %v3798_v0 }
0x3523   :  { %v2361_v24 = vpop.f32.mrf.mxu1 }
0x3524   :  { %v2362_v33 = vadd.f32 %v4362_v5, %v2361_v24  ;;  %v1828_v5 = vadd.f32 %v4525_v38, %v4388_v23 }
0x3525   :  { %v3474_v36 = vpop.f32.mrf.mxu1 }
0x3526   :  { %2375 = vrot.lane.b32.xlu0 %v2362_v33, %s3801_s21  ;;  %v2367_v45 = vadd.f32 %v2362_v33, %v1828_v5 }
0x3527   :  { %v2364_v37 = vpop.f32.mrf.mxu1 }
0x3528   :  { %v3176_v48 = vmul.f32 -1.442695, %v2367_v45 }
0x3529   :  { %v3475_v40 = vpop.f32.mrf.mxu1 }
0x352a   :  { %3736 = vpow2.f32 %v3176_v48 }
0x352b   :  { %v2518_v41 = vpop.f32.mrf.mxu1 }
0x352c   :  { %v2519_v39 = vadd.f32 %v4572_v2, %v2518_v41  ;;  %v1830_v41 = vadd.f32 %v4527_v25, %v4581_v49 }
0x352d   :  { %v3490_v13 = vpop.f32.mrf.mxu1 }
0x352e   :  { %2532 = vrot.lane.b32.xlu1 %v2519_v39, %s3801_s21  ;;  %v2524_v51 = vadd.f32 %v2519_v39, %v1834_v50 }
0x352f   :  { %v2521_v58 = vpop.f32.mrf.mxu1 }
0x3530   :  { %v3181_v53 = vmul.f32 -1.442695, %v2524_v51 }
0x3531   :  { %v3491_v44 = vpop.f32.mrf.mxu1 }
0x3532   :  { %3738 = vpow2.f32 %v3181_v53 }
0x3537   :  { %v3737_v35 = vpop.eup %3736 }
0x3538   :  { %v2371_v17 = vadd.f32 1.0, %v3737_v35 }
0x353a   :  { %3740 = vrcp.f32 %v2371_v17 }
0x353f   :  { %v3739_v9 = vpop.eup %3738 }
0x3540   :  { %v2528_v55 = vadd.f32 1.0, %v3739_v9 }
0x3542   :  { %3742 = vrcp.f32 %v2528_v55 }
0x3547   :  { %v3741_v56 = vpop.eup %3740 }
0x3548   :  { %v2385_v42 = vsub.f32 1.0, %v3741_v56  ;;  %v2391_v62 = vmul.f32 %v3741_v56, %v4538_v15 }
0x354f   :  { %v3743_v54 = vpop.eup %3742 }
0x3550   :  { %v2542_v4 = vsub.f32 1.0, %v3743_v54  ;;  %v2548_v26 = vmul.f32 0.0, %v3743_v54 }
0x3598   :  { %v2376_v6 = vpop.permute.xlu0 %2375 }
0x3599   :  { %v2378_v16 = vmul.f32 %v3741_v56, %v2376_v6 }
0x359b   :  { %2380 = vrot.lane.b32.xlu0 %v2378_v16, %s3801_s21 }
0x35a0   :  { %v2533_v32 = vpop.permute.xlu1 %2532 }
0x35a1   :  { %v2535_v38 = vmul.f32 %v3743_v54, %v2533_v32 }
0x35a3   :  { %2537 = vrot.lane.b32.xlu1 %v2535_v38, %s3801_s21 }
0x360d   :  { %v2381_v47 = vpop.permute.xlu0 %2380 }
0x360e   :  { %v2383_v19 = vadd.f32 %v2381_v47, %v1828_v5 }
0x3610   :  { %3744 = vtanh.f32 %v2383_v19  ;;  %v1824_v19 = vadd.f32 %v4523_v57, %v4581_v49 }
0x3615   :  { %v2538_v28 = vpop.permute.xlu1 %2537 }
0x3616   :  { %v2540_v59 = vadd.f32 %v2538_v28, %v1834_v50 }
0x3618   :  { %3746 = vtanh.f32 %v2540_v59 }
0x361d   :  { %v3745_v46 = vpop.eup %3744 }
0x361e   :  { %2387 = vrot.lane.b32.xlu0 %v3745_v46, %s3802_s27 }
0x3625   :  { %v3747_v60 = vpop.eup %3746 }
0x3626   :  { %2544 = vrot.lane.b32.xlu1 %v3747_v60, %s3802_s27 }
0x3690   :  { %v2388_v61 = vpop.permute.xlu0 %2387 }
0x3691   :  { %v2390_v34 = vmul.f32 %v2388_v61, %v2385_v42 }
0x3693   :  { %v4590_v63 = vadd.f32 %v2391_v62, %v2390_v34 }
0x3695   :  { %v2394_v1 = vpack.c.bf16 %v4590_v63, %v4590_v63 }
0x3697   :  { %2396 = vrot.lane.b32.xlu0 %v2394_v1, %s3802_s27 }
0x3698   :  { %v2545_v21 = vpop.permute.xlu1 %2544 }
0x3699   :  { %v2547_v18 = vmul.f32 %v2545_v21, %v2542_v4 }
0x369b   :  { %v2549_v7 = vadd.f32 %v2548_v26, %v2547_v18 }
0x369d   :  { %v2551_v8 = vpack.c.bf16 %v2549_v7, %v2549_v7 }
0x369f   :  { %2553 = vrot.lane.b32.xlu1 %v2551_v8, %s3802_s27 }
0x3709   :  { %v2397_v29 = vpop.permute.xlu0 %2396 }
0x370a   :  { %3481 = vmatmul.mubr.msk.bf16.vlgmr.msra.gmra.mxu0 %vm214_vm2, %v2397_v29 }
0x370b   :  { %3493 = vmatpush3.bf16.msra.mxu0 %v4546_v22  ;;  %3496 = vmatprep.mubr.msk.bf16.mxu0 %vm3800_vm0, %v3798_v0 }
0x370c   :  { %3494 = vmatprep.subr.bf16.mxu0 %v3798_v0 }
0x370f   :  { %3495 = vmatpush3.bf16.msra.mxu0 %v4553_v31 }
0x3710   :  { %3508 = vmatprep.subr.bf16.mxu0 %v3798_v0 }
0x3711   :  { %v2554_v27 = vpop.permute.xlu1 %2553 }
0x3712   :  { %3497 = vmatmul.mubr.msk.bf16.vlgmr.msra.gmra.mxu0 %vm214_vm2, %v2554_v27 }
0x3713   :  { %3509 = vmatpush3.bf16.msra.mxu0 %v4546_v22  ;;  %3512 = vmatprep.mubr.msk.bf16.mxu0 %vm3800_vm0, %v3798_v0 }
0x3714   :  { %3510 = vmatprep.subr.bf16.mxu0 %v3798_v0 }
0x3717   :  { %3511 = vmatpush3.bf16.msra.mxu0 %v4553_v31 }
0x3718   :  { %3524 = vmatprep.subr.bf16.mxu0 %v3798_v0 }
0x37ca   :  { %v4610_v12 = vpop.f32.mrf.mxu0 }
0x37cc   :  { %v3482_v15 = vpop.f32.mrf.mxu0 }
0x37ce   :  { %v2438_v14 = vpop.f32.mrf.mxu0 }
0x37d0   :  { %v3483_v30 = vpop.f32.mrf.mxu0 }
0x37d2   :  { %v2592_v24 = vpop.f32.mrf.mxu0 }
0x37d3   :  { %v2593_v33 = vadd.f32 %v4572_v2, %v2592_v24 }
0x37d4   :  { %v3498_v36 = vpop.f32.mrf.mxu0 }
0x37d5   :  { %2606 = vrot.lane.b32.xlu0 %v2593_v33, %s3801_s21  ;;  %v2598_v39 = vadd.f32 %v2593_v33, %v1830_v41  ;;  %v1820_v33 = vadd.f32 %v4521_v43, %v4581_v49 }
0x37d6   :  { %v2595_v37 = vpop.f32.mrf.mxu0 }
0x37d7   :  { %v3183_v13 = vmul.f32 -1.442695, %v2598_v39 }
0x37d8   :  { %v3499_v40 = vpop.f32.mrf.mxu0 }
0x37d9   :  { %3748 = vpow2.f32 %v3183_v13 }
0x37e6   :  { %v3749_v58 = vpop.eup %3748 }
0x37e7   :  { %v2602_v44 = vadd.f32 1.0, %v3749_v58 }
0x37e9   :  { %3750 = vrcp.f32 %v2602_v44 }
0x37f6   :  { %v3751_v5 = vpop.eup %3750 }
0x37f7   :  { %v2616_v35 = vsub.f32 1.0, %v3751_v5  ;;  %v2622_v25 = vmul.f32 %v3751_v5, %v2549_v7 }
0x3847   :  { %v2607_v45 = vpop.permute.xlu0 %2606 }
0x3848   :  { %v2609_v48 = vmul.f32 %v3751_v5, %v2607_v45 }
0x384a   :  { %2611 = vrot.lane.b32.xlu1 %v2609_v48, %s3801_s21 }
0x38bc   :  { %v2612_v50 = vpop.permute.xlu1 %2611 }
0x38bd   :  { %v2614_v51 = vadd.f32 %v2612_v50, %v1830_v41 }
0x38bf   :  { %3752 = vtanh.f32 %v2614_v51 }
0x38cc   :  { %v3753_v53 = vpop.eup %3752 }
0x38cd   :  { %2618 = vrot.lane.b32.xlu0 %v3753_v53, %s3802_s27 }
0x393f   :  { %v2619_v17 = vpop.permute.xlu0 %2618 }
0x3940   :  { %v2621_v9 = vmul.f32 %v2619_v17, %v2616_v35 }
0x3942   :  { %v2623_v55 = vadd.f32 %v2622_v25, %v2621_v9 }
0x3944   :  { %v2625_v56 = vpack.c.bf16 %v2623_v55, %v2623_v55 }
0x3946   :  { %2627 = vrot.lane.b32.xlu1 %v2625_v56, %s3802_s27 }
0x39b8   :  { %v2628_v6 = vpop.permute.xlu1 %2627 }
0x39b9   :  { %3505 = vmatmul.mubr.msk.bf16.vlgmr.msra.gmra.mxu1 %vm214_vm2, %v2628_v6 }
0x39ba   :  { %3517 = vmatpush3.bf16.msra.mxu1 %v4546_v22  ;;  %3520 = vmatprep.mubr.msk.bf16.mxu1 %vm3800_vm0, %v3798_v0 }
0x39bb   :  { %3518 = vmatprep.subr.bf16.mxu1 %v3798_v0 }
0x39be   :  { %3519 = vmatpush3.bf16.msra.mxu1 %v4553_v31 }
0x39bf   :  { %3532 = vmatprep.subr.bf16.mxu1 %v3798_v0 }
0x3a79   :  { %v2666_v16 = vpop.f32.mrf.mxu1 }
0x3a7a   :  { %v2667_v54 = vadd.f32 %v4572_v2, %v2666_v16  ;;  %v1814_v16 = vadd.f32 %v4490_v11, %v4581_v49 }
0x3a7b   :  { %v3506_v32 = vpop.f32.mrf.mxu1 }
0x3a7c   :  { %2680 = vrot.lane.b32.xlu0 %v2667_v54, %s3801_s21  ;;  %v2672_v28 = vadd.f32 %v2667_v54, %v1824_v19 }
0x3a7d   :  { %v2669_v38 = vpop.f32.mrf.mxu1 }
0x3a7e   :  { %v3185_v59 = vmul.f32 -1.442695, %v2672_v28 }
0x3a7f   :  { %v3507_v47 = vpop.f32.mrf.mxu1 }
0x3a80   :  { %3754 = vpow2.f32 %v3185_v59 }
0x3a8d   :  { %v3755_v46 = vpop.eup %3754 }
0x3a8e   :  { %v2676_v60 = vadd.f32 1.0, %v3755_v46 }
0x3a90   :  { %3756 = vrcp.f32 %v2676_v60 }
0x3a9d   :  { %v3757_v42 = vpop.eup %3756 }
0x3a9e   :  { %v2690_v21 = vsub.f32 1.0, %v3757_v42  ;;  %v2696_v57 = vmul.f32 %v3757_v42, %v2623_v55 }
0x3aee   :  { %v2681_v61 = vpop.permute.xlu0 %2680 }
0x3aef   :  { %v2683_v62 = vmul.f32 %v3757_v42, %v2681_v61 }
0x3af1   :  { %2685 = vrot.lane.b32.xlu1 %v2683_v62, %s3801_s21 }
0x3b63   :  { %v2686_v34 = vpop.permute.xlu1 %2685 }
0x3b64   :  { %v2688_v1 = vadd.f32 %v2686_v34, %v1824_v19 }
0x3b66   :  { %3758 = vtanh.f32 %v2688_v1 }
0x3b73   :  { %v3759_v4 = vpop.eup %3758 }
0x3b74   :  { %2692 = vrot.lane.b32.xlu0 %v3759_v4, %s3802_s27 }
0x3be6   :  { %v2693_v26 = vpop.permute.xlu0 %2692 }
0x3be7   :  { %v2695_v18 = vmul.f32 %v2693_v26, %v2690_v21 }
0x3be9   :  { %v2697_v7 = vadd.f32 %v2696_v57, %v2695_v18 }
0x3beb   :  { %v2699_v8 = vpack.c.bf16 %v2697_v7, %v2697_v7 }
0x3bed   :  { %2701 = vrot.lane.b32.xlu1 %v2699_v8, %s3802_s27 }
0x3c5f   :  { %v2702_v29 = vpop.permute.xlu1 %2701 }
0x3c60   :  { %3513 = vmatmul.mubr.msk.bf16.vlgmr.msra.gmra.mxu0 %vm214_vm2, %v2702_v29  ;;  %v1810_v29 = vadd.f32 %v4445_v20, %v4581_v49 }
0x3c61   :  { %3525 = vmatpush3.bf16.msra.mxu0 %v4546_v22  ;;  %3528 = vmatprep.mubr.msk.bf16.mxu0 %vm3800_vm0, %v3798_v0 }
0x3c62   :  { %3526 = vmatprep.subr.bf16.mxu0 %v3798_v0 }
0x3c65   :  { %3527 = vmatpush3.bf16.msra.mxu0 %v4553_v31 }
0x3c66   :  { %3540 = vmatprep.subr.bf16.mxu0 %v3798_v0 }
0x3d20   :  { %v2740_v27 = vpop.f32.mrf.mxu0 }
0x3d21   :  { %v2741_v15 = vadd.f32 %v4572_v2, %v2740_v27 }
0x3d22   :  { %v3514_v14 = vpop.f32.mrf.mxu0 }
0x3d23   :  { %2754 = vrot.lane.b32.xlu0 %v2741_v15, %s3801_s21  ;;  %v2746_v36 = vadd.f32 %v2741_v15, %v1820_v33 }
0x3d24   :  { %v2743_v30 = vpop.f32.mrf.mxu0 }
0x3d25   :  { %v3187_v37 = vmul.f32 -1.442695, %v2746_v36 }
0x3d26   :  { %v3515_v24 = vpop.f32.mrf.mxu0 }
0x3d27   :  { %3760 = vpow2.f32 %v3187_v37 }
0x3d34   :  { %v3761_v40 = vpop.eup %3760 }
0x3d35   :  { %v2750_v41 = vadd.f32 1.0, %v3761_v40 }
0x3d37   :  { %3762 = vrcp.f32 %v2750_v41 }
0x3d44   :  { %v3763_v39 = vpop.eup %3762 }
0x3d45   :  { %v2764_v48 = vsub.f32 1.0, %v3763_v39  ;;  %v2770_v43 = vmul.f32 %v3763_v39, %v2697_v7 }
0x3d95   :  { %v2755_v13 = vpop.permute.xlu0 %2754 }
0x3d96   :  { %v2757_v58 = vmul.f32 %v3763_v39, %v2755_v13 }
0x3d98   :  { %2759 = vrot.lane.b32.xlu1 %v2757_v58, %s3801_s21 }
0x3e0a   :  { %v2760_v44 = vpop.permute.xlu1 %2759 }
0x3e0b   :  { %v2762_v5 = vadd.f32 %v2760_v44, %v1820_v33 }
0x3e0d   :  { %3764 = vtanh.f32 %v2762_v5 }
0x3e1a   :  { %v3765_v45 = vpop.eup %3764 }
0x3e1b   :  { %2766 = vrot.lane.b32.xlu0 %v3765_v45, %s3802_s27 }
0x3e8d   :  { %v2767_v50 = vpop.permute.xlu0 %2766 }
0x3e8e   :  { %v2769_v51 = vmul.f32 %v2767_v50, %v2764_v48 }
0x3e90   :  { %v2771_v53 = vadd.f32 %v2770_v43, %v2769_v51  ;;  %v1804_v43 = vadd.f32 %v4430_v10, %v4581_v49  ;;  %v3797_v10 = vld [vmem:[%s4716_s10] ss:$0 sm:$0xff] }
0x3e92   :  { %v2773_v35 = vpack.c.bf16 %v2771_v53, %v2771_v53 }
0x3e94   :  { %2775 = vrot.lane.b32.xlu1 %v2773_v35, %s3802_s27 }
0x3f06   :  { %v2776_v17 = vpop.permute.xlu1 %2775 }
0x3f07   :  { %3521 = vmatmul.mubr.msk.bf16.vlgmr.msra.gmra.mxu1 %vm214_vm2, %v2776_v17 }
0x3f08   :  { %3533 = vmatpush3.bf16.msra.mxu1 %v4546_v22  ;;  %3536 = vmatprep.mubr.msk.bf16.mxu1 %vm3800_vm0, %v3798_v0 }
0x3f09   :  { %3534 = vmatprep.subr.bf16.mxu1 %v3798_v0 }
0x3f0c   :  { %3535 = vmatpush3.bf16.msra.mxu1 %v4553_v31 }
0x3fc7   :  { %v2814_v25 = vpop.f32.mrf.mxu1 }
0x3fc8   :  { %v2815_v9 = vadd.f32 %v4572_v2, %v2814_v25 }
0x3fc9   :  { %v3522_v55 = vpop.f32.mrf.mxu1 }
0x3fca   :  { %2828 = vrot.lane.b32.xlu0 %v2815_v9, %s3801_s21  ;;  %v2820_v54 = vadd.f32 %v2815_v9, %v1814_v16 }
0x3fcb   :  { %v2817_v56 = vpop.f32.mrf.mxu1 }
0x3fcc   :  { %v3189_v32 = vmul.f32 -1.442695, %v2820_v54  ;;  %v2436_v54 = vadd.f32 %v3797_v10, %v4610_v12 }
0x3fcd   :  { %v3523_v6 = vpop.f32.mrf.mxu1 }
0x3fce   :  { %3766 = vpow2.f32 %v3189_v32  ;;  %v1832_v32 = vadd.f32 %v4529_v52, %v4388_v23 }
0x3fdb   :  { %v3767_v38 = vpop.eup %3766 }
0x3fdc   :  { %v2824_v47 = vadd.f32 1.0, %v3767_v38  ;;  %v2441_v38 = vadd.f32 %v2436_v54, %v1832_v32 }
0x3fde   :  { %3768 = vrcp.f32 %v2824_v47  ;;  %v3178_v47 = vmul.f32 -1.442695, %v2441_v38 }
0x3feb   :  { %v3769_v19 = vpop.eup %3768 }
0x3fec   :  { %v2838_v61 = vsub.f32 1.0, %v3769_v19  ;;  %v2844_v11 = vmul.f32 %v3769_v19, %v2771_v53 }
0x403c   :  { %v2829_v28 = vpop.permute.xlu0 %2828 }
0x403d   :  { %v2831_v59 = vmul.f32 %v3769_v19, %v2829_v28 }
0x403f   :  { %2833 = vrot.lane.b32.xlu1 %v2831_v59, %s3801_s21 }
0x40b1   :  { %v2834_v46 = vpop.permute.xlu1 %2833 }
0x40b2   :  { %v2836_v60 = vadd.f32 %v2834_v46, %v1814_v16 }
0x40b4   :  { %3770 = vtanh.f32 %v2836_v60 }
0x40c1   :  { %v3771_v42 = vpop.eup %3770 }
0x40c2   :  { %2840 = vrot.lane.b32.xlu0 %v3771_v42, %s3802_s27 }
0x4134   :  { %v2841_v62 = vpop.permute.xlu0 %2840 }
0x4135   :  { %v2843_v34 = vmul.f32 %v2841_v62, %v2838_v61 }
0x4137   :  { %v2845_v1 = vadd.f32 %v2844_v11, %v2843_v34 }
0x4139   :  { %v2847_v4 = vpack.c.bf16 %v2845_v1, %v2845_v1 }
0x413b   :  { %2849 = vrot.lane.b32.xlu1 %v2847_v4, %s3802_s27 }
0x41ad   :  { %v2850_v21 = vpop.permute.xlu1 %2849 }
0x41ae   :  { %3529 = vmatmul.mubr.msk.bf16.vlgmr.msra.gmra.mxu0 %vm214_vm2, %v2850_v21 }
0x41af   :  { %3541 = vmatpush3.bf16.msra.mxu0 %v4546_v22  ;;  %3544 = vmatprep.mubr.msk.bf16.mxu0 %vm3800_vm0, %v3798_v0 }
0x41b0   :  { %3542 = vmatprep.subr.bf16.mxu0 %v3798_v0 }
0x41b3   :  { %3543 = vmatpush3.bf16.msra.mxu0 %v4553_v31 }
0x426e   :  { %v2888_v26 = vpop.f32.mrf.mxu0 }
0x426f   :  { %v2889_v57 = vadd.f32 %v4572_v2, %v2888_v26 }
0x4270   :  { %v3530_v18 = vpop.f32.mrf.mxu0 }
0x4271   :  { %2902 = vrot.lane.b32.xlu0 %v2889_v57, %s3801_s21  ;;  %v2894_v27 = vadd.f32 %v2889_v57, %v1810_v29 }
0x4272   :  { %v2891_v7 = vpop.f32.mrf.mxu0 }
0x4273   :  { %v3191_v22 = vmul.f32 -1.442695, %v2894_v27 }
0x4274   :  { %v3531_v8 = vpop.f32.mrf.mxu0 }
0x4275   :  { %3772 = vpow2.f32 %v3191_v22 }
0x4282   :  { %v3773_v15 = vpop.eup %3772 }
0x4283   :  { %v2898_v14 = vadd.f32 1.0, %v3773_v15 }
0x4285   :  { %3774 = vrcp.f32 %v2898_v14 }
0x4292   :  { %v3775_v0 = vpop.eup %3774 }
0x4293   :  { %v2912_v37 = vsub.f32 1.0, %v3775_v0  ;;  %v2918_v20 = vmul.f32 %v3775_v0, %v2845_v1 }
0x42e3   :  { %v2903_v30 = vpop.permute.xlu0 %2902 }
0x42e4   :  { %v2905_v31 = vmul.f32 %v3775_v0, %v2903_v30 }
0x42e6   :  { %2907 = vrot.lane.b32.xlu1 %v2905_v31, %s3801_s21 }
0x4358   :  { %v2908_v24 = vpop.permute.xlu1 %2907 }
0x4359   :  { %v2910_v33 = vadd.f32 %v2908_v24, %v1810_v29 }
0x435b   :  { %3776 = vtanh.f32 %v2910_v33 }
0x4368   :  { %v3777_v36 = vpop.eup %3776 }
0x4369   :  { %2914 = vrot.lane.b32.xlu0 %v3777_v36, %s3802_s27 }
0x43db   :  { %v2915_v40 = vpop.permute.xlu0 %2914 }
0x43dc   :  { %v2917_v41 = vmul.f32 %v2915_v40, %v2912_v37 }
0x43de   :  { %v2919_v39 = vadd.f32 %v2918_v20, %v2917_v41 }
0x43e0   :  { %v2921_v13 = vpack.c.bf16 %v2919_v39, %v2919_v39 }
0x43e2   :  { %2923 = vrot.lane.b32.xlu1 %v2921_v13, %s3802_s27 }
0x4454   :  { %v2924_v58 = vpop.permute.xlu1 %2923 }
0x4455   :  { %3537 = vmatmul.mubr.msk.bf16.vlgmr.msra.gmra.mxu1 %vm214_vm2, %v2924_v58 }
0x4515   :  { %v2962_v44 = vpop.f32.mrf.mxu1 }
0x4516   :  { %v2963_v5 = vadd.f32 %v4572_v2, %v2962_v44 }
0x4517   :  { %v3538_v45 = vpop.f32.mrf.mxu1 }
0x4518   :  { %2976 = vrot.lane.b32.xlu0 %v2963_v5, %s3801_s21  ;;  %v2968_v51 = vadd.f32 %v2963_v5, %v1804_v43 }
0x4519   :  { %v2965_v48 = vpop.f32.mrf.mxu1 }
0x451a   :  { %v3193_v53 = vmul.f32 -1.442695, %v2968_v51 }
0x451b   :  { %v3539_v50 = vpop.f32.mrf.mxu1 }
0x451c   :  { %3778 = vpow2.f32 %v3193_v53 }
0x4529   :  { %v3779_v35 = vpop.eup %3778 }
0x452a   :  { %v2972_v17 = vadd.f32 1.0, %v3779_v35 }
0x452c   :  { %3780 = vrcp.f32 %v2972_v17 }
0x4539   :  { %v3781_v25 = vpop.eup %3780 }
0x453a   :  { %v2986_v59 = vsub.f32 1.0, %v3781_v25  ;;  %v2992_v60 = vmul.f32 %v3781_v25, %v2919_v39 }
0x458a   :  { %v2977_v9 = vpop.permute.xlu0 %2976 }
0x458b   :  { %v2979_v55 = vmul.f32 %v3781_v25, %v2977_v9 }
0x458d   :  { %2981 = vrot.lane.b32.xlu1 %v2979_v55, %s3801_s21 }
0x45ff   :  { %v2982_v56 = vpop.permute.xlu1 %2981 }
0x4600   :  { %v2984_v6 = vadd.f32 %v2982_v56, %v1804_v43 }
0x4602   :  { %3782 = vtanh.f32 %v2984_v6 }
0x4603   :  { %3784 = vpow2.f32 %v3178_v47 }
0x460f   :  { %v3783_v16 = vpop.eup %3782 }
0x4610   :  { %2988 = vrot.lane.b32.xlu0 %v3783_v16, %s3802_s27  ;;  %v3785_v19 = vpop.eup %3784 }
0x4611   :  { %v2445_v28 = vadd.f32 1.0, %v3785_v19 }
0x4613   :  { %3786 = vrcp.f32 %v2445_v28 }
0x4614   :  { %2449 = vrot.lane.b32.xlu0 %v2436_v54, %s3801_s21 }
0x4620   :  { %v3787_v62 = vpop.eup %3786 }
0x4621   :  { %v2459_v21 = vsub.f32 1.0, %v3787_v62  ;;  %v2465_v57 = vmul.f32 %v3787_v62, %v4590_v63  ;;  %v1800_v63 = vadd.f32 %v4403_v3, %v4581_v49 }
0x4682   :  { %v2989_v46 = vpop.permute.xlu0 %2988 }
0x4683   :  { %v2991_v42 = vmul.f32 %v2989_v46, %v2986_v59 }
0x4685   :  { %v2993_v61 = vadd.f32 %v2992_v60, %v2991_v42 }
0x4686   :  { %v2450_v11 = vpop.permute.xlu0 %2449 }
0x4687   :  { %v2995_v34 = vpack.c.bf16 %v2993_v61, %v2993_v61  ;;  %v2452_v12 = vmul.f32 %v3787_v62, %v2450_v11 }
0x4689   :  { %2997 = vrot.lane.b32.xlu1 %v2995_v34, %s3802_s27  ;;  %2454 = vrot.lane.b32.xlu0 %v2452_v12, %s3801_s21 }
0x46fb   :  { %v2998_v23 = vpop.permute.xlu1 %2997  ;;  %v2455_v52 = vpop.permute.xlu0 %2454 }
0x46fc   :  { %v2457_v1 = vadd.f32 %v2455_v52, %v1832_v32  ;;  %3545 = vmatmul.mubr.msk.bf16.vlgmr.msra.gmra.mxu0 %vm214_vm2, %v2998_v23 }
0x46fe   :  { %3788 = vtanh.f32 %v2457_v1 }
0x470b   :  { %v3789_v4 = vpop.eup %3788 }
0x470c   :  { %2461 = vrot.lane.b32.xlu0 %v3789_v4, %s3802_s27 }
0x477e   :  { %v2462_v26 = vpop.permute.xlu0 %2461 }
0x477f   :  { %v2464_v18 = vmul.f32 %v2462_v26, %v2459_v21 }
0x4781   :  { %v2466_v7 = vadd.f32 %v2465_v57, %v2464_v18 }
0x4783   :  { %3069 = vrot.lane.b32.xlu0 %v2466_v7, %s3802_s27 }
0x47bc   :  { %v3036_v8 = vpop.f32.mrf.mxu0 }
0x47bd   :  { %v3037_v29 = vadd.f32 %v4572_v2, %v3036_v8 }
0x47be   :  { %v3546_v27 = vpop.f32.mrf.mxu0 }
0x47bf   :  { %3050 = vrot.lane.b32.xlu1 %v3037_v29, %s3801_s21  ;;  %v3042_v0 = vadd.f32 %v3037_v29, %v1800_v63 }
0x47c0   :  { %v3039_v22 = vpop.f32.mrf.mxu0 }
0x47c1   :  { %v3195_v30 = vmul.f32 -1.442695, %v3042_v0 }
0x47c2   :  { %v3547_v15 = vpop.f32.mrf.mxu0 }
0x47c3   :  { %3790 = vpow2.f32 %v3195_v30 }
0x47d0   :  { %v3791_v31 = vpop.eup %3790 }
0x47d1   :  { %v3046_v24 = vadd.f32 1.0, %v3791_v31 }
0x47d3   :  { %3792 = vrcp.f32 %v3046_v24 }
0x47e0   :  { %v3793_v2 = vpop.eup %3792 }
0x47e1   :  { %v3060_v41 = vsub.f32 1.0, %v3793_v2  ;;  %v3066_v3 = vmul.f32 %v3793_v2, %v2993_v61 }
0x47f5   :  { %v3070_v14 = vpop.permute.xlu0 %3069 }
0x47f6   :  { %3072 = vst.msk [vmem:[%s4718_s13 + $0x8] sm:$0xff] %vm214_vm2, %v3070_v14 }
0x4831   :  { %v3051_v33 = vpop.permute.xlu1 %3050 }
0x4832   :  { %v3053_v36 = vmul.f32 %v3793_v2, %v3051_v33 }
0x4834   :  { %3055 = vrot.lane.b32.xlu1 %v3053_v36, %s3801_s21 }
0x48a6   :  { %v3056_v37 = vpop.permute.xlu1 %3055 }
0x48a7   :  { %v3058_v40 = vadd.f32 %v3056_v37, %v1800_v63 }
0x48a9   :  { %3794 = vtanh.f32 %v3058_v40 }
0x48b6   :  { %v3795_v20 = vpop.eup %3794 }
0x48b7   :  { %3062 = vrot.lane.b32.xlu1 %v3795_v20, %s3802_s27 }
0x4929   :  { %v3063_v39 = vpop.permute.xlu1 %3062 }
0x492a   :  { %v3065_v49 = vmul.f32 %v3063_v39, %v3060_v41 }
0x492c   :  { %v3067_v13 = vadd.f32 %v3066_v3, %v3065_v49 }
0x492e   :  { %3073 = vst.msk [vmem:[%s4718_s13 + $0x8] sm:$0xff] %vm1037_vm3, %v3067_v13 }

// kernel: _forward_impl.3
= control target key start
LH: loop header
LB: loop body
LE: loop exit
PB: predicated region body
PF: predicated region fallthrough
CT: control target
= control target key end

     0   :  { %v60_v0 = vlaneseq  ;;  %v6146_v1 = vmov 0   ;;  %v7863_v3 = vmov 0.0   ;;  %vm6148_vm0 = vmmov 0   ;;  %s6149_s30 = smov 64   ;;  %s7841_s0 = inlined_call_operand.vmem [shape: f32[5,1,1], index: 0, kind: input, shape index: {}]   ;;  %s7842_s3 = inlined_call_operand.vmem [shape: bf16[128,16], index: 3, kind: input, shape index: {}]   ;;  %s7843_s4 = inlined_call_operand.vmem [shape: bf16[16,192], index: 4, kind: input, shape index: {}]   ;;  %s7844_s1 = inlined_call_operand.vmem [shape: f32[5,8,128], index: 1, kind: input, shape index: {}]   ;;  %s7845_s5 = inlined_call_operand.vmem [shape: bf16[64,192], index: 5, kind: input, shape index: {}]   ;;  %s7846_s2 = inlined_call_operand.vmem [shape: f32[2,8,64], index: 2, kind: input, shape index: {}]   ;;  %s7847_s6 = inlined_call_operand.vmem [shape: f32[1,192], index: 6, kind: input, shape index: {}]   ;;  %s7848_s7 = inlined_call_operand.vmem [shape: f32[1,192], index: 7, kind: input, shape index: {}]   ;;  %s7849_s9 = inlined_call_operand.vmem [shape: bf16[64,192], index: 9, kind: input, shape index: {}]   ;;  %s7850_s8 = inlined_call_operand.vmem [shape: bf16[64,192], index: 8, kind: input, shape index: {}]   ;;  %s7851_s11 = inlined_call_operand.vmem [shape: f32[1,192], index: 11, kind: input, shape index: {}]   ;;  %s7852_s10 = inlined_call_operand.vmem [shape: f32[1,192], index: 10, kind: input, shape index: {}]   ;;  %s7853_s12 = inlined_call_operand.vmem [shape: bf16[64,128], index: 12, kind: input, shape index: {}]   ;;  %s7854_s14 = inlined_call_operand.vmem [shape: bf16[128,256], index: 14, kind: input, shape index: {}]   ;;  %s7855_s16 = inlined_call_operand.vmem [shape: bf16[256,128], index: 16, kind: input, shape index: {}]   ;;  %s7856_s13 = inlined_call_operand.vmem [shape: f32[1,128], index: 13, kind: input, shape index: {}]   ;;  %s7857_s15 = inlined_call_operand.vmem [shape: f32[1,256], index: 15, kind: input, shape index: {}]   ;;  %s7858_s17 = inlined_call_operand.vmem [shape: f32[1,128], index: 17, kind: input, shape index: {}]   ;;  %s7859_s18 = inlined_call_operand.vmem [shape: f32[5,8,128], index: 18, kind: output, shape index: {}]  }
   0x1   :  { %7865 = sst [smem:[#allocation2_spill]] %s7841_s0  ;;  %5729 = vset.pattern.permute.xlu0 %v6146_v1  ;;  %5565 = vmatprep.subr.bf16.mxu0 %v7863_v3  ;;  %v66_v20 = vld [vmem:[%s7844_s1] sm:$0xff]  ;;  %v5744_v26 = vld [vmem:[%s7845_s5 + $0x34] ss:$8 sps:$4 sm:$0xff]   ;;  %v5742_v28 = vld [vmem:[%s7845_s5 + $0x30] ss:$8 sps:$4 sm:$0xff]  }
   0x2   :  { %7866 = sst [smem:[#allocation3_spill]] %s7842_s3  ;;  %v6251_v4 = vshrl.u32 %v60_v0, 7  ;;  %255 = vmatprep.mubr.bf16.mxu1 %v6146_v1  ;;  %5730 = vset.pattern.permute.xlu1 %v6146_v1  ;;  %vm219_vm1 = vcmask 130048   ;;  %v5747_v30 = vld [vmem:[%s7845_s5 + $0x24] ss:$8 sps:$4 sm:$0xff]   ;;  %vm325_vm2 = vcmask 523264  }
   0x3   :  { %7867 = sst [smem:[#allocation4_spill]] %s7843_s4  ;;  %5581 = vmatprep.mubr.msk.bf16.mxu0 %vm6148_vm0, %v7863_v3  ;;  %v5745_v33 = vld [vmem:[%s7845_s5 + $0x20] ss:$8 sps:$4 sm:$0xff]   ;;  %v5750_v34 = vld [vmem:[%s7845_s5 + $0x14] ss:$8 sps:$4 sm:$0xff]  }
   0x4   :  { %s7868_s29 = sld [smem:[#allocation2_spill]]  ;;  %v6259_v7 = vsub.s32 0, %v6251_v4  ;;  %v5748_v36 = vld [vmem:[%s7845_s5 + $0x10] ss:$8 sps:$4 sm:$0xff]   ;;  %v5753_v37 = vld [vmem:[%s7845_s5 + $0x4] ss:$8 sps:$4 sm:$0xff]  }
   0x5   :  { %s7869_s19 = sld [smem:[#allocation3_spill]]  ;;  %v5751_v38 = vld [vmem:[%s7845_s5] ss:$8 sps:$4 sm:$0xff]   ;;  %v6343_v59 = vsub.s32 1, %v6251_v4  ;;  %v5756_v4 = vld [vmem:[%s7849_s9 + $0x34] ss:$8 sps:$4 sm:$0xff]  }
   0x6   :  { %s7870_s28 = sld [smem:[#allocation4_spill]]  ;;  %v62_v39 = vld [vmem:[%s7846_s2] sm:$0xff] }
   0x7   :  { %v264_v40 = vpack.c.bf16 %v62_v39, %v62_v39  ;;  %v197_v45 = vld [vmem:[%s7847_s6] sm:$0x3] }
   0x8   :  { %v273_v46 = vld [vmem:[%s7848_s7] sm:$0x3]  ;;  %v202_v47 = vrot.slane %v197_v45, %v6259_v7  ;;  %v206_v61 = vrot.slane %v197_v45, %v6343_v59 }
   0x9   :  { %v278_v48 = vrot.slane %v273_v46, %v6259_v7  ;;  %v282_v60 = vrot.slane %v273_v46, %v6343_v59 }
   0xa   :  { %v65_v2 = vld [vmem:[%s7868_s29] sm:$0x1] }
   0xb   :  { %v77_v5 = vsub.f32 1.0, %v65_v2  ;;  %v5731_v6 = vld [vmem:[%s7869_s19 + $0x38] sm:$0xff]   ;;  %v5732_v8 = vld [vmem:[%s7869_s19 + $0x30] sm:$0xff]   ;;  %v71_v9 = vrot.slane %v65_v2, %v6259_v7  ;;  %v5733_v11 = vld [vmem:[%s7869_s19 + $0x28] sm:$0xff]  }
   0xc   :  { %5566 = vmatpush3.bf16.msra.mxu0 %v5731_v6  ;;  %v5734_v12 = vld [vmem:[%s7869_s19 + $0x20] sm:$0xff]   ;;  %v5735_v13 = vld [vmem:[%s7869_s19 + $0x18] sm:$0xff]   ;;  %v5736_v16 = vld [vmem:[%s7869_s19 + $0x10] sm:$0xff]  }
   0xd   :  { %5567 = vmatprep.subr.bf16.mxu0 %v7863_v3  ;;  %73 = vperm.xlu0 %5729, %v71_v9   ;;  %v82_v10 = vrot.slane %v77_v5, %v6259_v7  ;;  %v5739_v14 = vld [vmem:[%s7870_s28 + $0x4] ss:$8 sps:$4 sm:$0xff]   ;;  %v5741_v15 = vld [vmem:[%s7870_s28] ss:$8 sps:$4 sm:$0xff]  }
   0xe   :  { %237 = vmatprep.subr.bf16.mxu1 %v5739_v14  ;;  %v5737_v17 = vld [vmem:[%s7869_s19 + $0x8] sm:$0xff]   ;;  %v5738_v18 = vld [vmem:[%s7869_s19] sm:$0xff]   ;;  %v5765_v14 = vld [vmem:[%s7849_s9 + $0x14] ss:$8 sps:$4 sm:$0xff]  }
   0xf   :  { %238 = vmatpush1.bf16.msra.mxu1 %v5741_v15  ;;  %v5766_v15 = vld [vmem:[%s7850_s8 + $0x20] ss:$8 sps:$4 sm:$0xff]  }
  0x10   :  { %5568 = vmatpush3.bf16.msra.mxu0 %v5732_v8  ;;  %337 = vmatprep.subr.bf16.mxu1 %v5744_v26  ;;  %v5754_v8 = vld [vmem:[%s7849_s9 + $0x30] ss:$8 sps:$4 sm:$0xff]  }
  0x11   :  { %5569 = vmatprep.subr.bf16.mxu0 %v7863_v3  ;;  %84 = vperm.xlu0 %5729, %v82_v10   ;;  %v5759_v10 = vld [vmem:[%s7849_s9 + $0x24] ss:$8 sps:$4 sm:$0xff]  }
  0x14   :  { %5570 = vmatpush3.bf16.msra.mxu0 %v5733_v11  ;;  %v5760_v11 = vld [vmem:[%s7850_s8 + $0x30] ss:$8 sps:$4 sm:$0xff]  }
  0x15   :  { %5571 = vmatprep.subr.bf16.mxu0 %v7863_v3 }
  0x18   :  { %5572 = vmatpush3.bf16.msra.mxu0 %v5734_v12  ;;  %v5762_v12 = vld [vmem:[%s7850_s8 + $0x34] ss:$8 sps:$4 sm:$0xff]  }
  0x19   :  { %5573 = vmatprep.subr.bf16.mxu0 %v7863_v3 }
  0x1c   :  { %5574 = vmatpush3.bf16.msra.mxu0 %v5735_v13  ;;  %v5757_v13 = vld [vmem:[%s7849_s9 + $0x20] ss:$8 sps:$4 sm:$0xff]  }
  0x1d   :  { %5575 = vmatprep.subr.bf16.mxu0 %v7863_v3 }
  0x20   :  { %5576 = vmatpush3.bf16.msra.mxu0 %v5736_v16  ;;  %v5768_v16 = vld [vmem:[%s7850_s8 + $0x24] ss:$8 sps:$4 sm:$0xff]  }
  0x21   :  { %5577 = vmatprep.subr.bf16.mxu0 %v7863_v3 }
  0x24   :  { %5578 = vmatpush3.bf16.msra.mxu0 %v5737_v17  ;;  %v5763_v17 = vld [vmem:[%s7849_s9 + $0x10] ss:$8 sps:$4 sm:$0xff]  }
  0x25   :  { %5579 = vmatprep.subr.bf16.mxu0 %v7863_v3 }
  0x28   :  { %5580 = vmatpush3.bf16.msra.mxu0 %v5738_v18  ;;  %v5771_v18 = vld [vmem:[%s7849_s9 + $0x4] ss:$8 sps:$4 sm:$0xff]  }
  0x29   :  { %572 = vmatprep.subr.bf16.mxu0 %v5756_v4 }
  0x88   :  { %v74_v19 = vpop.permute.xlu0 %73 }
  0x89   :  { %v76_v22 = vmul.f32 %v74_v19, %v66_v20  ;;  %v5774_v19 = vld [vmem:[%s7850_s8 + $0x14] ss:$8 sps:$4 sm:$0xff]   ;;  %v5769_v20 = vld [vmem:[%s7849_s9] ss:$8 sps:$4 sm:$0xff]  }
  0x8c   :  { %v85_v21 = vpop.permute.xlu0 %84 }
  0x8d   :  { %v87_v23 = vmul.f32 0.0, %v85_v21  ;;  %v5772_v21 = vld [vmem:[%s7850_s8 + $0x10] ss:$8 sps:$4 sm:$0xff]  }
  0x8f   :  { %v88_v24 = vadd.f32 %v87_v23, %v76_v22  ;;  %v4973_v22 = vld [vmem:[%s7846_s2 + $0x8] sm:$0xff] }
  0x90   :  { %v5777_v23 = vld [vmem:[%s7850_s8 + $0x4] ss:$8 sps:$4 sm:$0xff]  }
  0x91   :  { %v89_v25 = vpack.c.bf16 %v88_v24, %v88_v24  ;;  %v5775_v24 = vld [vmem:[%s7850_s8] ss:$8 sps:$4 sm:$0xff]  }
  0x93   :  { %5582 = vmatmul.mubr.bf16.vlgmr.msra.gmra.mxu0 %v89_v25  ;;  %v500_v25 = vpack.c.bf16 %v4973_v22, %v4973_v22 }
  0x94   :  { %596 = vmatprep.mubr.bf16.mxu0 %v6146_v1  ;;  %573 = vmatpush1.bf16.msra.mxu0 %v5754_v8  ;;  %v6454_v8 = vld [vmem:[%s7854_s14 + $0x64] ss:$8 sps:$4 sm:$0xff]  }
  0x95   :  { %574 = vmatprep.subr.bf16.mxu0 %v5759_v10  ;;  %v6461_v10 = vld [vmem:[%s7854_s14 + $0x60] ss:$8 sps:$4 sm:$0xff]  }
  0x98   :  { %575 = vmatpush1.bf16.msra.mxu0 %v5757_v13 }
  0x99   :  { %576 = vmatprep.subr.bf16.mxu0 %v5765_v14 }
  0x9c   :  { %577 = vmatpush1.bf16.msra.mxu0 %v5763_v17  ;;  %v6481_v17 = vld [vmem:[%s7854_s14 + $0x44] ss:$8 sps:$4 sm:$0xff]  }
  0x9d   :  { %578 = vmatprep.subr.bf16.mxu0 %v5771_v18 }
  0xa0   :  { %579 = vmatpush1.bf16.msra.mxu0 %v5769_v20  ;;  %v6493_v20 = vld [vmem:[%s7854_s14 + $0x34] ss:$8 sps:$4 sm:$0xff]  }
  0xa3   :  { %5012 = vmatmul.mubr.msk.bf16.vlgmr.msra.gmra.mxu0 %vm325_vm2, %v500_v25  ;;  %v6526_v25 = vld [vmem:[%s7854_s14 + $0x10] ss:$8 sps:$4 sm:$0xff]  }
  0xa4   :  { %854 = vmatprep.mubr.bf16.mxu0 %v6146_v1 }
 0x153   :  { %v188_v27 = vpop.f32.mrf.mxu0 }
 0x154   :  { %v194_v29 = vpack.c.bf16 %v188_v27, %v188_v27 }
 0x155   :  { %v5583_v31 = vpop.f32.mrf.mxu0 }
 0x156   :  { %4984 = vmatmul.mubr.msk.bf16.vlgmr.msra.gmra.mxu1 %vm219_vm1, %v194_v29 }
 0x157   :  { %338 = vmatpush1.bf16.msra.mxu1 %v5742_v28  ;;  %v191_v32 = vpop.f32.mrf.mxu0  ;;  %361 = vmatprep.mubr.bf16.mxu1 %v6146_v1 }
 0x158   :  { %339 = vmatprep.subr.bf16.mxu1 %v5747_v30 }
 0x159   :  { %v5584_v35 = vpop.f32.mrf.mxu0 }
 0x15b   :  { %340 = vmatpush1.bf16.msra.mxu1 %v5745_v33 }
 0x15c   :  { %341 = vmatprep.subr.bf16.mxu1 %v5750_v34 }
 0x15f   :  { %342 = vmatpush1.bf16.msra.mxu1 %v5748_v36 }
 0x160   :  { %343 = vmatprep.subr.bf16.mxu1 %v5753_v37 }
 0x163   :  { %344 = vmatpush1.bf16.msra.mxu1 %v5751_v38  ;;  %v598_v33 = vpop.f32.mrf.mxu0  ;;  %v509_v38 = vld [vmem:[%s7851_s11] sm:$0x3] }
 0x164   :  { %467 = vmatprep.subr.bf16.mxu1 %v5762_v12  ;;  %v6467_v12 = vld [vmem:[%s7854_s14 + $0x54] ss:$8 sps:$4 sm:$0xff]  }
 0x165   :  { %v600_v34 = vpop.f32.mrf.mxu0 }
 0x166   :  { %4993 = vmatmul.mubr.msk.bf16.vlgmr.msra.gmra.mxu1 %vm325_vm2, %v264_v40  ;;  %v514_v40 = vrot.slane %v509_v38, %v6259_v7 }
 0x167   :  { %491 = vmatprep.mubr.bf16.mxu1 %v6146_v1  ;;  %468 = vmatpush1.bf16.msra.mxu1 %v5760_v11  ;;  %v602_v35 = vpop.f32.mrf.mxu0 }
 0x168   :  { %469 = vmatprep.subr.bf16.mxu1 %v5768_v16  ;;  %v6475_v16 = vld [vmem:[%s7854_s14 + $0x50] ss:$8 sps:$4 sm:$0xff]   ;;  %v5811_v35 = vld [vmem:[%s7855_s16 + $0x28] sm:$0xff]  }
 0x169   :  { %v603_v36 = vpop.f32.mrf.mxu0 }
 0x16a   :  { %v5812_v36 = vld [vmem:[%s7855_s16 + $0x60] sm:$0xff]  }
 0x16b   :  { %470 = vmatpush1.bf16.msra.mxu1 %v5766_v15 }
 0x16c   :  { %471 = vmatprep.subr.bf16.mxu1 %v5774_v19  ;;  %v6488_v19 = vld [vmem:[%s7854_s14 + $0x40] ss:$8 sps:$4 sm:$0xff]  }
 0x16f   :  { %472 = vmatpush1.bf16.msra.mxu1 %v5772_v21  ;;  %v6501_v21 = vld [vmem:[%s7854_s14 + $0x30] ss:$8 sps:$4 sm:$0xff]  }
 0x170   :  { %473 = vmatprep.subr.bf16.mxu1 %v5777_v23  ;;  %v6513_v23 = vld [vmem:[%s7854_s14 + $0x20] ss:$8 sps:$4 sm:$0xff]  }
 0x173   :  { %474 = vmatpush1.bf16.msra.mxu1 %v5775_v24  ;;  %v6520_v24 = vld [vmem:[%s7854_s14 + $0x14] ss:$8 sps:$4 sm:$0xff]  }
 0x174   :  { %5585 = vmatprep.subr.bf16.mxu1 %v7863_v3 }
 0x216   :  { %v257_v41 = vpop.f32.mrf.mxu1 }
 0x217   :  { %v258_v50 = vadd.f32 %v257_v41, %v202_v47 }
 0x218   :  { %v259_v42 = vpop.f32.mrf.mxu1 }
 0x219   :  { %v260_v2 = vadd.f32 %v259_v42, %v206_v61  ;;  %v599_v42 = vadd.f32 %v598_v33, %v514_v40  ;;  %v5779_v61 = vld [vmem:[%s7853_s12 + $0x10] sm:$0xff]   ;;  %v5815_v40 = vld [vmem:[%s7855_s16 + $0x18] sm:$0xff]  }
 0x21a   :  { %v261_v43 = vpop.f32.mrf.mxu1  ;;  %v5809_v33 = vld [vmem:[%s7855_s16 + $0x30] sm:$0xff]  }
 0x21c   :  { %v262_v44 = vpop.f32.mrf.mxu1 }
 0x226   :  { %v363_v49 = vpop.f32.mrf.mxu1 }
 0x227   :  { %v364_v51 = vadd.f32 %v363_v49, %v278_v48 }
 0x228   :  { %v365_v52 = vpop.f32.mrf.mxu1 }
 0x229   :  { %v370_v53 = vadd.f32 %v364_v51, %v258_v50  ;;  %v366_v62 = vadd.f32 %v365_v52, %v282_v60  ;;  %v518_v52 = vrot.slane %v509_v38, %v6343_v59  ;;  %v5778_v60 = vld [vmem:[%s7853_s12 + $0x18] sm:$0xff]   ;;  %v5813_v38 = vld [vmem:[%s7855_s16 + $0x20] sm:$0xff]  }
 0x22a   :  { %v367_v54 = vpop.f32.mrf.mxu1 }
 0x22b   :  { %v4994_v55 = vmul.f32 -1.442695, %v370_v53  ;;  %v601_v54 = vadd.f32 %v600_v34, %v518_v52  ;;  %v5810_v34 = vld [vmem:[%s7855_s16 + $0x68] sm:$0xff]   ;;  %v5820_v52 = vld [vmem:[%s7855_s16 + $0x40] sm:$0xff]  }
 0x22c   :  { %v368_v56 = vpop.f32.mrf.mxu1 }
 0x22d   :  { %6060 = vpow2.f32 %v4994_v55 }
 0x23a   :  { %v6061_v57 = vpop.eup %6060 }
 0x23b   :  { %v374_v58 = vadd.f32 1.0, %v6061_v57 }
 0x23d   :  { %6062 = vrcp.f32 %v374_v58 }
 0x24a   :  { %v6063_v63 = vpop.eup %6062 }
 0x24b   :  { %v377_v5 = vmul.f32 %v6063_v63, %v366_v62  ;;  %v380_v27 = vsub.f32 1.0, %v6063_v63  ;;  %v5780_v62 = vld [vmem:[%s7853_s12 + $0x8] sm:$0xff]  }
 0x24d   :  { %v378_v6 = vadd.f32 %v377_v5, %v260_v2  ;;  %v5781_v2 = vld [vmem:[%s7853_s12] sm:$0xff]   ;;  %v6444_v5 = vld [vmem:[%s7854_s14 + $0x70] ss:$8 sps:$4 sm:$0xff]  }
 0x24f   :  { %6064 = vtanh.f32 %v378_v6  ;;  %v6449_v6 = vld [vmem:[%s7854_s14 + $0x74] ss:$8 sps:$4 sm:$0xff]  }
 0x250   :  { %822 = vmatprep.subr.bf16.mxu0 %v6449_v6 }
 0x251   :  { %823 = vmatpush1.bf16.msra.mxu0 %v6444_v5 }
 0x252   :  { %824 = vmatprep.subr.bf16.mxu0 %v6454_v8 }
 0x255   :  { %825 = vmatpush1.bf16.msra.mxu0 %v6461_v10 }
 0x256   :  { %826 = vmatprep.subr.bf16.mxu0 %v6467_v12 }
 0x259   :  { %827 = vmatpush1.bf16.msra.mxu0 %v6475_v16 }
 0x25a   :  { %828 = vmatprep.subr.bf16.mxu0 %v6481_v17 }
 0x25c   :  { %v6065_v9 = vpop.eup %6064 }
 0x25d   :  { %382 = vrot.lane.b32.xlu1 %v6065_v9, %s6149_s30  ;;  %829 = vmatpush1.bf16.msra.mxu0 %v6488_v19 }
 0x25e   :  { %830 = vmatprep.subr.bf16.mxu0 %v6493_v20 }
 0x261   :  { %387 = vrot.lane.b32.xlu1 %v62_v39, %s6149_s30  ;;  %v401_v39 = vld [vmem:[%s7852_s10] sm:$0x3]  ;;  %831 = vmatpush1.bf16.msra.mxu0 %v6501_v21 }
 0x262   :  { %v406_v41 = vrot.slane %v401_v39, %v6259_v7  ;;  %v410_v53 = vrot.slane %v401_v39, %v6343_v59  ;;  %v5814_v39 = vld [vmem:[%s7855_s16 + $0x58] sm:$0xff]  }
 0x2cf   :  { %v383_v26 = vpop.permute.xlu1 %382 }
 0x2d0   :  { %v385_v29 = vmul.f32 %v383_v26, %v380_v27  ;;  %v6537_v27 = vld [vmem:[%s7854_s14 + $0x4] ss:$8 sps:$4 sm:$0xff]  }
 0x2d3   :  { %v388_v28 = vpop.permute.xlu1 %387 }
 0x2d4   :  { %v390_v30 = vmul.f32 %v6063_v63, %v388_v28  ;;  %v6542_v28 = vld [vmem:[%s7854_s14] ss:$8 sps:$4 sm:$0xff]  }
 0x2d6   :  { %v6403_v31 = vadd.f32 %v390_v30, %v385_v29  ;;  %v5806_v29 = vld [vmem:[%s7855_s16 + $0x78] sm:$0xff]  }
 0x2d7   :  { %v5807_v30 = vld [vmem:[%s7855_s16 + $0x38] sm:$0xff]  }
 0x2d8   :  { %v392_v32 = vpack.c.bf16 %v6403_v31, %v6403_v31 }
 0x2da   :  { %414 = vrot.lane.b32.xlu0 %v392_v32, %s6149_s30  ;;  %v5808_v32 = vld [vmem:[%s7855_s16 + $0x70] sm:$0xff]  }
 0x2de   :  { %622 = vrot.lane.b32.xlu0 %v4973_v22, %s6149_s30  ;;  %v6506_v22 = vld [vmem:[%s7854_s14 + $0x24] ss:$8 sps:$4 sm:$0xff]  }
 0x2df   :  { %832 = vmatprep.subr.bf16.mxu0 %v6506_v22 }
 0x2e0   :  { %833 = vmatpush1.bf16.msra.mxu0 %v6513_v23 }
 0x2e1   :  { %834 = vmatprep.subr.bf16.mxu0 %v6520_v24 }
 0x2e4   :  { %835 = vmatpush1.bf16.msra.mxu0 %v6526_v25 }
 0x2e5   :  { %836 = vmatprep.subr.bf16.mxu0 %v6537_v27 }
 0x2e8   :  { %837 = vmatpush1.bf16.msra.mxu0 %v6542_v28 }
 0x2e9   :  { %5597 = vmatprep.subr.bf16.mxu0 %v7863_v3 }
 0x34c   :  { %v6409_v37 = vpop.permute.xlu0 %414 }
 0x34d   :  { %5003 = vmatmul.mubr.msk.bf16.vlgmr.msra.gmra.mxu1 %vm325_vm2, %v6409_v37 }
 0x34e   :  { %5593 = vmatprep.mubr.msk.bf16.mxu1 %vm6148_vm0, %v7863_v3  ;;  %5586 = vmatpush3.bf16.msra.mxu1 %v5778_v60 }
 0x34f   :  { %5587 = vmatprep.subr.bf16.mxu1 %v7863_v3 }
 0x350   :  { %v623_v9 = vpop.permute.xlu0 %622 }
 0x352   :  { %5588 = vmatpush3.bf16.msra.mxu1 %v5779_v61 }
 0x353   :  { %5589 = vmatprep.subr.bf16.mxu1 %v7863_v3 }
 0x356   :  { %5590 = vmatpush3.bf16.msra.mxu1 %v5780_v62 }
 0x357   :  { %5591 = vmatprep.subr.bf16.mxu1 %v7863_v3 }
 0x35a   :  { %5592 = vmatpush3.bf16.msra.mxu1 %v5781_v2 }
 0x35b   :  { %5399 = vmatprep.subr.bf16.mxu1 %v5806_v29 }
 0x40d   :  { %v493_v43 = vpop.f32.mrf.mxu1 }
 0x40e   :  { %v494_v44 = vadd.f32 %v493_v43, %v406_v41  ;;  %v5816_v41 = vld [vmem:[%s7855_s16 + $0x50] sm:$0xff]   ;;  %v6586_v43 = vld [vmem:[%s7856_s13] ss:$0 sm:$0xff] }
 0x40f   :  { %v495_v45 = vpop.f32.mrf.mxu1 }
 0x410   :  { %v605_v46 = vadd.f32 %v599_v42, %v494_v44  ;;  %v496_v56 = vadd.f32 %v495_v45, %v410_v53  ;;  %v5817_v42 = vld [vmem:[%s7855_s16 + $0x10] sm:$0xff]   ;;  %v5821_v53 = vld [vmem:[%s7855_s16] sm:$0xff]  }
 0x411   :  { %v497_v47 = vpop.f32.mrf.mxu1 }
 0x412   :  { %v5013_v48 = vmul.f32 -1.442695, %v605_v46 }
 0x413   :  { %v498_v49 = vpop.f32.mrf.mxu1 }
 0x414   :  { %6066 = vpow2.f32 %v5013_v48 }
 0x421   :  { %v6067_v50 = vpop.eup %6066 }
 0x422   :  { %v609_v51 = vadd.f32 1.0, %v6067_v50  ;;  %v5818_v50 = vld [vmem:[%s7855_s16 + $0x48] sm:$0xff]  }
 0x424   :  { %6068 = vrcp.f32 %v609_v51  ;;  %v5819_v51 = vld [vmem:[%s7855_s16 + $0x8] sm:$0xff]  }
 0x431   :  { %v6069_v55 = vpop.eup %6068 }
 0x432   :  { %v612_v57 = vmul.f32 %v6069_v55, %v601_v54  ;;  %v615_v4 = vsub.f32 1.0, %v6069_v55  ;;  %v625_v13 = vmul.f32 %v6069_v55, %v623_v9  ;;  %v6120_v54 = vld [vmem:[%s7870_s28 + $0x4] ss:$8 sps:$4 sm:$0xff]   ;;  %v730_v55 = vld [vmem:[%s7857_s15] sm:$0x3] }
 0x434   :  { %v613_v58 = vadd.f32 %v612_v57, %v496_v56  ;;  %v735_v56 = vrot.slane %v730_v55, %v6259_v7  ;;  %v739_v57 = vrot.slane %v730_v55, %v6343_v59 }
 0x436   :  { %6070 = vtanh.f32 %v613_v58 }
 0x443   :  { %v6071_v63 = vpop.eup %6070 }
 0x444   :  { %617 = vrot.lane.b32.xlu1 %v6071_v63, %s6149_s30 }
 0x4b6   :  { %v618_v11 = vpop.permute.xlu1 %617 }
 0x4b7   :  { %v620_v14 = vmul.f32 %v618_v11, %v615_v4  ;;  %v6121_v11 = vld [vmem:[%s7870_s28] ss:$8 sps:$4 sm:$0xff]  }
 0x4b9   :  { %v6469_v15 = vadd.f32 %v625_v13, %v620_v14  ;;  %v6122_v13 = vld [vmem:[%s7845_s5 + $0x34] ss:$8 sps:$4 sm:$0xff]  }
 0x4bb   :  { %v627_v18 = vpack.c.bf16 %v6469_v15, %v6469_v15 }
 0x4bd   :  { %644 = vrot.lane.b32.xlu1 %v627_v18, %s6149_s30  ;;  %v6621_v18 = vld [vmem:[%s7858_s17] ss:$0 sm:$0xff] }
 0x52f   :  { %v6530_v26 = vpop.permute.xlu1 %644 }
 0x530   :  { %5594 = vmatmul.mubr.msk.bf16.vlgmr.msra.gmra.mxu1 %vm325_vm2, %v6530_v26 }
 0x531   :  { %5400 = vmatpush3.bf16.msra.mxu1 %v5807_v30 }
 0x532   :  { %5401 = vmatprep.subr.bf16.mxu1 %v5808_v32 }
 0x535   :  { %5402 = vmatpush3.bf16.msra.mxu1 %v5809_v33 }
 0x536   :  { %5403 = vmatprep.subr.bf16.mxu1 %v5810_v34 }
 0x539   :  { %5404 = vmatpush3.bf16.msra.mxu1 %v5811_v35  ;;  %v6628_v35 = vand.u32 127, %v60_v0  ;;  %v5822_v0 = vld [vmem:[%s7869_s19 + $0x38] sm:$0xff]  }
 0x53a   :  { %5405 = vmatprep.subr.bf16.mxu1 %v5812_v36 }
 0x53d   :  { %5406 = vmatpush3.bf16.msra.mxu1 %v5813_v38 }
 0x53e   :  { %5407 = vmatprep.subr.bf16.mxu1 %v5814_v39 }
 0x541   :  { %5408 = vmatpush3.bf16.msra.mxu1 %v5815_v40 }
 0x542   :  { %5409 = vmatprep.subr.bf16.mxu1 %v5816_v41  ;;  %v5054_v41 = vld [vmem:[%s7868_s29 + $0x1] sm:$0x1] }
 0x543   :  { %v1070_v55 = vrot.slane %v5054_v41, %v6259_v7 }
 0x545   :  { %5410 = vmatpush3.bf16.msra.mxu1 %v5817_v42  ;;  %v1076_v42 = vsub.f32 1.0, %v5054_v41  ;;  %v6140_v41 = vld [vmem:[%s7850_s8 + $0x24] ss:$8 sps:$4 sm:$0xff]  }
 0x546   :  { %5411 = vmatprep.subr.bf16.mxu1 %v5818_v50 }
 0x549   :  { %5412 = vmatpush3.bf16.msra.mxu1 %v5819_v51 }
 0x54a   :  { %5413 = vmatprep.subr.bf16.mxu1 %v5820_v52 }
 0x54d   :  { %5414 = vmatpush3.bf16.msra.mxu1 %v5821_v53  ;;  %v5827_v53 = vld [vmem:[%s7869_s19 + $0x10] sm:$0xff]  }
 0x54e   :  { %1235 = vmatprep.subr.bf16.mxu1 %v6120_v54  ;;  %v5828_v54 = vld [vmem:[%s7869_s19 + $0x8] sm:$0xff]  }
 0x5f0   :  { %v707_v44 = vpop.f32.mrf.mxu1 }
 0x5f1   :  { %v708_v45 = vadd.f32 %v6586_v43, %v707_v44  ;;  %v1081_v44 = vrot.slane %v1076_v42, %v6259_v7 }
 0x5f2   :  { %v5595_v46 = vpop.f32.mrf.mxu1 }
 0x5f3   :  { %v713_v47 = vpack.c.bf16 %v708_v45, %v708_v45  ;;  %v5823_v45 = vld [vmem:[%s7869_s19 + $0x30] sm:$0xff]   ;;  %v5824_v46 = vld [vmem:[%s7869_s19 + $0x28] sm:$0xff]  }
 0x5f4   :  { %v710_v48 = vpop.f32.mrf.mxu1 }
 0x5f5   :  { %855 = vmatmul.mubr.bf16.vlgmr.msra.gmra.mxu0 %v713_v47  ;;  %v5825_v47 = vld [vmem:[%s7869_s19 + $0x20] sm:$0xff]   ;;  %v5826_v48 = vld [vmem:[%s7869_s19 + $0x18] sm:$0xff]  }
 0x5f6   :  { %v5596_v49 = vpop.f32.mrf.mxu1  ;;  %5613 = vmatprep.mubr.msk.bf16.mxu0 %vm6148_vm0, %v7863_v3  ;;  %5598 = vmatpush3.bf16.msra.mxu0 %v5822_v0  ;;  %v6143_v0 = vld [vmem:[%s7850_s8 + $0x10] ss:$8 sps:$4 sm:$0xff]  }
 0x5f7   :  { %5599 = vmatprep.subr.bf16.mxu0 %v7863_v3 }
 0x5fa   :  { %5600 = vmatpush3.bf16.msra.mxu0 %v5823_v45  ;;  %v6144_v45 = vld [vmem:[%s7850_s8 + $0x4] ss:$8 sps:$4 sm:$0xff]  }
 0x5fb   :  { %5601 = vmatprep.subr.bf16.mxu0 %v7863_v3 }
 0x5fe   :  { %5602 = vmatpush3.bf16.msra.mxu0 %v5824_v46  ;;  %v6145_v46 = vld [vmem:[%s7850_s8] ss:$8 sps:$4 sm:$0xff]  }
 0x5ff   :  { %5603 = vmatprep.subr.bf16.mxu0 %v7863_v3 }
 0x602   :  { %5604 = vmatpush3.bf16.msra.mxu0 %v5825_v47 }
 0x603   :  { %5605 = vmatprep.subr.bf16.mxu0 %v7863_v3 }
 0x606   :  { %5606 = vmatpush3.bf16.msra.mxu0 %v5826_v48 }
 0x607   :  { %5607 = vmatprep.subr.bf16.mxu0 %v7863_v3 }
 0x60a   :  { %5608 = vmatpush3.bf16.msra.mxu0 %v5827_v53 }
 0x60b   :  { %5609 = vmatprep.subr.bf16.mxu0 %v7863_v3 }
 0x60e   :  { %5610 = vmatpush3.bf16.msra.mxu0 %v5828_v54 }
 0x60f   :  { %5611 = vmatprep.subr.bf16.mxu0 %v7863_v3 }
 0x6b5   :  { %v856_v58 = vpop.f32.mrf.mxu0 }
 0x6b6   :  { %v857_v60 = vadd.f32 %v856_v58, %v735_v56  ;;  %v5829_v56 = vld [vmem:[%s7869_s19] sm:$0xff]  }
 0x6b7   :  { %v858_v61 = vpop.f32.mrf.mxu0  ;;  %5612 = vmatpush3.bf16.msra.mxu0 %v5829_v56 }
 0x6b8   :  { %v859_v62 = vadd.f32 %v858_v61, %v739_v57  ;;  %v863_v9 = vpack.c.bf16 %v857_v60, %v857_v60  ;;  %v6123_v57 = vld [vmem:[%s7849_s9 + $0x34] ss:$8 sps:$4 sm:$0xff]  }
 0x6b9   :  { %v860_v63 = vpop.f32.mrf.mxu0  ;;  %1557 = vmatprep.subr.bf16.mxu0 %v6123_v57 }
 0x6ba   :  { %v864_v2 = vpack.c.bf16 %v859_v62, %v859_v62 }
 0x6bb   :  { %v861_v4 = vpop.f32.mrf.mxu0 }
 0x6bc   :  { %1032 = vmatprep.mubr.bf16.mxu1 %v864_v2  ;;  %v5055_v4 = vld [vmem:[%s7844_s1 + $0x8] sm:$0xff] }
 0x6bd   :  { %1033 = vmatmul.mubr.bf16.vlgmr.msra.gmra.mxu1 %v863_v9 }
 0x6be   :  { %1236 = vmatpush1.bf16.msra.mxu1 %v6121_v11  ;;  %1253 = vmatprep.mubr.bf16.mxu1 %v6146_v1 }
 0x6bf   :  { %1330 = vmatprep.subr.bf16.mxu1 %v6122_v13 }
 0x77d   :  { %v5415_v14 = vpop.f32.mrf.mxu1 }
 0x77f   :  { %v5416_v29 = vpop.f32.mrf.mxu1 }
 0x780   :  { %v5417_v30 = vadd.f32 %v5416_v29, %v5415_v14 }
 0x781   :  { %v5418_v32 = vpop.f32.mrf.mxu1 }
 0x782   :  { %v1035_v33 = vadd.f32 %v5417_v30, %v6621_v18  ;;  %v6124_v32 = vld [vmem:[%s7849_s9 + $0x30] ss:$8 sps:$4 sm:$0xff]  }
 0x783   :  { %v5419_v34 = vpop.f32.mrf.mxu1 }
 0x784   :  { %1040 = vst [vmem:[%s7859_s18] sm:$0xff] %v1035_v33  ;;  %1041 = vmax.xlane.f32.xlu0 %v1035_v33  ;;  %v6126_v34 = vld [vmem:[%s7849_s9 + $0x20] ss:$8 sps:$4 sm:$0xff]  }
 0x80d   :  { %v1042_v36 = vpop.xlane.xlu0 %1041 }
 0x80e   :  { %vm1043_vm3 = vcmp.eq.f32.partialorder %v1035_v33, %v1042_v36  ;;  %v6125_v33 = vld [vmem:[%s7849_s9 + $0x24] ss:$8 sps:$4 sm:$0xff]   ;;  %v6127_v36 = vld [vmem:[%s7849_s9 + $0x14] ss:$8 sps:$4 sm:$0xff]  }
 0x80f   :  { %v1044_v38 = vsel %vm1043_vm3, %v6628_v35, 2147483647 }
 0x810   :  { %v1046_v39 = vshra.s32 %v1044_v38, 16  ;;  %v1045_v49 = vand.u32 65535, %v1044_v38  ;;  %v6128_v38 = vld [vmem:[%s7849_s9 + $0x10] ss:$8 sps:$4 sm:$0xff]  }
 0x812   :  { %v1048_v40 = vcvt.s32.f32 %v1046_v39  ;;  %v1047_v51 = vcvt.s32.f32 %v1045_v49  ;;  %v6129_v39 = vld [vmem:[%s7849_s9 + $0x4] ss:$8 sps:$4 sm:$0xff]  }
 0x814   :  { %1049 = vmin.xlane.f32.xlu1 %v1048_v40 }
 0x825   :  { %1083 = vperm.xlu1 %5730, %v1081_v44   ;;  %v6141_v44 = vld [vmem:[%s7850_s8 + $0x20] ss:$8 sps:$4 sm:$0xff]  }
 0x89d   :  { %v1050_v50 = vpop.xlane.xlu1 %1049 }
 0x89e   :  { %vm1051_vm4 = vcmp.eq.f32.partialorder %v1048_v40, %v1050_v50  ;;  %v1056_v58 = vcvt.f32.s32 %v1050_v50  ;;  %v6130_v40 = vld [vmem:[%s7849_s9] ss:$8 sps:$4 sm:$0xff]  }
 0x89f   :  { %v1052_v52 = vsel %vm1051_vm4, %v1047_v51, inf  ;;  %v1196_v51 = vld [vmem:[%s7847_s6] sm:$0x3] }
 0x8a0   :  { %1053 = vmin.xlane.f32.xlu0 %v1052_v52  ;;  %v1057_v61 = vshll.u32 %v1056_v58, 16  ;;  %v1270_v52 = vld [vmem:[%s7848_s7] sm:$0x3]  ;;  %v1201_v53 = vrot.slane %v1196_v51, %v6259_v7 }
 0x8a1   :  { %v1084_v2 = vpop.permute.xlu1 %1083  ;;  %v1275_v54 = vrot.slane %v1270_v52, %v6259_v7 }
 0x8b6   :  { %1072 = vperm.xlu0 %5729, %v1070_v55  }
 0x929   :  { %v1054_v60 = vpop.xlane.xlu0 %1053 }
 0x92a   :  { %v1055_v62 = vcvt.f32.s32 %v1054_v60 }
 0x92c   :  { %v1058_v63 = vadd.s32 %v1057_v61, %v1055_v62 }
 0x92e   :  { %vm1059_vm5 = vcmp.eq.s32.totalorder %v6628_v35, %v1058_v63 }
 0x92f   :  { %v5053_v9 = vsel %vm1059_vm5, 1.0, %v7863_v3 }
 0x930   :  { %v1086_v13 = vmul.f32 %v5053_v9, %v1084_v2 }
 0x931   :  { %v1073_v11 = vpop.permute.xlu0 %1072 }
 0x932   :  { %v1075_v14 = vmul.f32 %v5055_v4, %v1073_v11  ;;  %v1279_v4 = vrot.slane %v1270_v52, %v6343_v59  ;;  %v1205_v11 = vrot.slane %v1196_v51, %v6343_v59 }
 0x934   :  { %v1087_v29 = vadd.f32 %v1086_v13, %v1075_v14 }
 0x936   :  { %v1088_v30 = vpack.c.bf16 %v1087_v29, %v1087_v29 }
 0x938   :  { %5614 = vmatmul.mubr.bf16.vlgmr.msra.gmra.mxu0 %v1088_v30 }
 0x939   :  { %1558 = vmatpush1.bf16.msra.mxu0 %v6124_v32  ;;  %1581 = vmatprep.mubr.bf16.mxu0 %v6146_v1 }
 0x93a   :  { %1559 = vmatprep.subr.bf16.mxu0 %v6125_v33 }
 0x93d   :  { %1560 = vmatpush1.bf16.msra.mxu0 %v6126_v34 }
 0x93e   :  { %1561 = vmatprep.subr.bf16.mxu0 %v6127_v36 }
 0x941   :  { %1562 = vmatpush1.bf16.msra.mxu0 %v6128_v38 }
 0x942   :  { %1563 = vmatprep.subr.bf16.mxu0 %v6129_v39 }
 0x945   :  { %1564 = vmatpush1.bf16.msra.mxu0 %v6130_v40 }
 0x946   :  { %1803 = vmatprep.subr.bf16.mxu0 %v6449_v6 }
 0x948   :  { %5094 = vmatmul.mubr.msk.bf16.vlgmr.msra.gmra.mxu0 %vm325_vm2, %v6530_v26 }
 0x949   :  { %1804 = vmatpush1.bf16.msra.mxu0 %v6444_v5  ;;  %1835 = vmatprep.mubr.bf16.mxu0 %v6146_v1 }
 0x94a   :  { %1805 = vmatprep.subr.bf16.mxu0 %v6454_v8 }
 0x94d   :  { %1806 = vmatpush1.bf16.msra.mxu0 %v6461_v10  ;;  %v6131_v10 = vld [vmem:[%s7845_s5 + $0x30] ss:$8 sps:$4 sm:$0xff]  }
 0x94e   :  { %1807 = vmatprep.subr.bf16.mxu0 %v6467_v12 }
 0x951   :  { %1808 = vmatpush1.bf16.msra.mxu0 %v6475_v16  ;;  %v6132_v16 = vld [vmem:[%s7845_s5 + $0x24] ss:$8 sps:$4 sm:$0xff]  }
 0x952   :  { %1809 = vmatprep.subr.bf16.mxu0 %v6481_v17 }
 0x955   :  { %1810 = vmatpush1.bf16.msra.mxu0 %v6488_v19  ;;  %v6133_v19 = vld [vmem:[%s7845_s5 + $0x20] ss:$8 sps:$4 sm:$0xff]  }
 0x956   :  { %1811 = vmatprep.subr.bf16.mxu0 %v6493_v20  ;;  %v6134_v20 = vld [vmem:[%s7845_s5 + $0x14] ss:$8 sps:$4 sm:$0xff]  }
 0x959   :  { %1812 = vmatpush1.bf16.msra.mxu0 %v6501_v21  ;;  %v6135_v21 = vld [vmem:[%s7845_s5 + $0x10] ss:$8 sps:$4 sm:$0xff]  }
 0x95a   :  { %1813 = vmatprep.subr.bf16.mxu0 %v6506_v22  ;;  %v6136_v22 = vld [vmem:[%s7845_s5 + $0x4] ss:$8 sps:$4 sm:$0xff]  }
 0x95d   :  { %1814 = vmatpush1.bf16.msra.mxu0 %v6513_v23  ;;  %v6137_v23 = vld [vmem:[%s7845_s5] ss:$8 sps:$4 sm:$0xff]  }
 0x95e   :  { %1815 = vmatprep.subr.bf16.mxu0 %v6520_v24 }
 0x961   :  { %1816 = vmatpush1.bf16.msra.mxu0 %v6526_v25  ;;  %v6138_v25 = vld [vmem:[%s7850_s8 + $0x34] ss:$8 sps:$4 sm:$0xff]  }
 0x962   :  { %1817 = vmatprep.subr.bf16.mxu0 %v6537_v27 }
 0x965   :  { %1818 = vmatpush1.bf16.msra.mxu0 %v6542_v28  ;;  %v6139_v28 = vld [vmem:[%s7850_s8 + $0x30] ss:$8 sps:$4 sm:$0xff]  }
 0x966   :  { %5629 = vmatprep.subr.bf16.mxu0 %v7863_v3 }
 0x9f8   :  { %v1187_v5 = vpop.f32.mrf.mxu0 }
 0x9f9   :  { %v1193_v6 = vpack.c.bf16 %v1187_v5, %v1187_v5 }
 0x9fa   :  { %v5615_v8 = vpop.f32.mrf.mxu0 }
 0x9fb   :  { %5066 = vmatmul.mubr.msk.bf16.vlgmr.msra.gmra.mxu1 %vm219_vm1, %v1193_v6  ;;  %v1390_v8 = vld [vmem:[%s7852_s10] sm:$0x3] }
 0x9fc   :  { %1331 = vmatpush1.bf16.msra.mxu1 %v6131_v10  ;;  %v1190_v12 = vpop.f32.mrf.mxu0  ;;  %1354 = vmatprep.mubr.bf16.mxu1 %v6146_v1 }
 0x9fd   :  { %1332 = vmatprep.subr.bf16.mxu1 %v6132_v16  ;;  %v1395_v12 = vrot.slane %v1390_v8, %v6259_v7 }
 0x9fe   :  { %v5616_v17 = vpop.f32.mrf.mxu0 }
 0xa00   :  { %1333 = vmatpush1.bf16.msra.mxu1 %v6133_v19 }
 0xa01   :  { %1334 = vmatprep.subr.bf16.mxu1 %v6134_v20 }
 0xa04   :  { %1335 = vmatpush1.bf16.msra.mxu1 %v6135_v21 }
 0xa05   :  { %1336 = vmatprep.subr.bf16.mxu1 %v6136_v22 }
 0xa08   :  { %1337 = vmatpush1.bf16.msra.mxu1 %v6137_v23  ;;  %v6740_v24 = vpop.f32.mrf.mxu0 }
 0xa09   :  { %1456 = vmatprep.subr.bf16.mxu1 %v6138_v25 }
 0xa0a   :  { %v6745_v26 = vpop.f32.mrf.mxu0 }
 0xa0b   :  { %5075 = vmatmul.mubr.msk.bf16.vlgmr.msra.gmra.mxu1 %vm325_vm2, %v6409_v37  ;;  %v6142_v37 = vld [vmem:[%s7850_s8 + $0x14] ss:$8 sps:$4 sm:$0xff]  }
 0xa0c   :  { %v1587_v27 = vpop.f32.mrf.mxu0  ;;  %1457 = vmatpush1.bf16.msra.mxu1 %v6139_v28  ;;  %1480 = vmatprep.mubr.bf16.mxu1 %v6146_v1 }
 0xa0d   :  { %1458 = vmatprep.subr.bf16.mxu1 %v6140_v41 }
 0xa0e   :  { %v1588_v42 = vpop.f32.mrf.mxu0 }
 0xa0f   :  { %v1399_v42 = vrot.slane %v1390_v8, %v6343_v59 }
 0xa10   :  { %1459 = vmatpush1.bf16.msra.mxu1 %v6141_v44 }
 0xa11   :  { %1460 = vmatprep.subr.bf16.mxu1 %v6142_v37 }
 0xa14   :  { %1461 = vmatpush1.bf16.msra.mxu1 %v6143_v0 }
 0xa15   :  { %1462 = vmatprep.subr.bf16.mxu1 %v6144_v45 }
 0xa18   :  { %1463 = vmatpush1.bf16.msra.mxu1 %v6145_v46  ;;  %v5830_v46 = vld [vmem:[%s7853_s12 + $0x18] sm:$0xff]  }
 0xa19   :  { %5617 = vmatprep.subr.bf16.mxu1 %v7863_v3 }
 0xabb   :  { %v1255_v47 = vpop.f32.mrf.mxu1 }
 0xabc   :  { %v1256_v56 = vadd.f32 %v1255_v47, %v1201_v53  ;;  %v5831_v47 = vld [vmem:[%s7853_s12 + $0x10] sm:$0xff]  }
 0xabd   :  { %v1257_v48 = vpop.f32.mrf.mxu1 }
 0xabe   :  { %v1258_v29 = vadd.f32 %v1257_v48, %v1205_v11  ;;  %v5844_v11 = vld [vmem:[%s7855_s16 + $0x50] sm:$0xff]  }
 0xabf   :  { %v1259_v49 = vpop.f32.mrf.mxu1 }
 0xac0   :  { %v5833_v49 = vld [vmem:[%s7853_s12] sm:$0xff]  }
 0xac1   :  { %v1260_v50 = vpop.f32.mrf.mxu1 }
 0xacb   :  { %v1356_v55 = vpop.f32.mrf.mxu1 }
 0xacc   :  { %v1357_v57 = vadd.f32 %v1356_v55, %v1275_v54 }
 0xacd   :  { %v1358_v58 = vpop.f32.mrf.mxu1 }
 0xace   :  { %v1363_v60 = vadd.f32 %v1357_v57, %v1256_v56  ;;  %v1359_v13 = vadd.f32 %v1358_v58, %v1279_v4  ;;  %v5834_v57 = vld [vmem:[%s7855_s16 + $0x78] sm:$0xff]   ;;  %v5836_v58 = vld [vmem:[%s7855_s16 + $0x70] sm:$0xff]  }
 0xacf   :  { %v1360_v61 = vpop.f32.mrf.mxu1  ;;  %v5843_v4 = vld [vmem:[%s7855_s16 + $0x18] sm:$0xff]  }
 0xad0   :  { %v5076_v62 = vmul.f32 -1.442695, %v1363_v60  ;;  %v5837_v60 = vld [vmem:[%s7855_s16 + $0x30] sm:$0xff]   ;;  %v5838_v61 = vld [vmem:[%s7855_s16 + $0x68] sm:$0xff]  }
 0xad1   :  { %v1361_v63 = vpop.f32.mrf.mxu1 }
 0xad2   :  { %6072 = vpow2.f32 %v5076_v62  ;;  %v5839_v62 = vld [vmem:[%s7855_s16 + $0x28] sm:$0xff]   ;;  %v5840_v63 = vld [vmem:[%s7855_s16 + $0x60] sm:$0xff]  }
 0xadf   :  { %v6073_v2 = vpop.eup %6072 }
 0xae0   :  { %v1367_v9 = vadd.f32 1.0, %v6073_v2  ;;  %v5841_v2 = vld [vmem:[%s7855_s16 + $0x20] sm:$0xff]  }
 0xae2   :  { %6074 = vrcp.f32 %v1367_v9  ;;  %v5842_v9 = vld [vmem:[%s7855_s16 + $0x58] sm:$0xff]  }
 0xaef   :  { %v6075_v14 = vpop.eup %6074 }
 0xaf0   :  { %v1370_v30 = vmul.f32 %v6075_v14, %v1359_v13  ;;  %v1373_v34 = vsub.f32 1.0, %v6075_v14  ;;  %v1379_v38 = vmul.f32 %v6075_v14, %v6403_v31  ;;  %v1497_v31 = vld [vmem:[%s7851_s11] sm:$0x3]  ;;  %v5845_v13 = vld [vmem:[%s7855_s16 + $0x10] sm:$0xff]  }
 0xaf1   :  { %v1502_v10 = vrot.slane %v1497_v31, %v6259_v7  ;;  %v1506_v41 = vrot.slane %v1497_v31, %v6343_v59 }
 0xaf2   :  { %v1371_v32 = vadd.f32 %v1370_v30, %v1258_v29 }
 0xaf3   :  { %v1584_v17 = vadd.f32 %v6740_v24, %v1502_v10  ;;  %v1586_v44 = vadd.f32 %v6745_v26, %v1506_v41  ;;  %v5832_v26 = vld [vmem:[%s7853_s12 + $0x8] sm:$0xff]  }
 0xaf4   :  { %6076 = vtanh.f32 %v1371_v32 }
 0xb01   :  { %v6077_v33 = vpop.eup %6076 }
 0xb02   :  { %1375 = vrot.lane.b32.xlu1 %v6077_v33, %s6149_s30 }
 0xb74   :  { %v1376_v36 = vpop.permute.xlu1 %1375 }
 0xb75   :  { %v1378_v39 = vmul.f32 %v1376_v36, %v1373_v34  ;;  %v5846_v36 = vld [vmem:[%s7855_s16 + $0x48] sm:$0xff]  }
 0xb77   :  { %v6784_v40 = vadd.f32 %v1379_v38, %v1378_v39  ;;  %v5847_v38 = vld [vmem:[%s7855_s16 + $0x8] sm:$0xff]   ;;  %v5849_v39 = vld [vmem:[%s7855_s16] sm:$0xff]  }
 0xb79   :  { %v1381_v5 = vpack.c.bf16 %v6784_v40, %v6784_v40 }
 0xb7b   :  { %1403 = vrot.lane.b32.xlu0 %v1381_v5, %s6149_s30  ;;  %v1711_v5 = vld [vmem:[%s7857_s15] sm:$0x3] }
 0xb7c   :  { %v1716_v31 = vrot.slane %v1711_v5, %v6259_v7  ;;  %v1720_v8 = vrot.slane %v1711_v5, %v6343_v59 }
 0xbed   :  { %v6789_v6 = vpop.permute.xlu0 %1403 }
 0xbee   :  { %5085 = vmatmul.mubr.msk.bf16.vlgmr.msra.gmra.mxu1 %vm325_vm2, %v6789_v6 }
 0xbef   :  { %5625 = vmatprep.mubr.msk.bf16.mxu1 %vm6148_vm0, %v7863_v3  ;;  %5618 = vmatpush3.bf16.msra.mxu1 %v5830_v46 }
 0xbf0   :  { %5619 = vmatprep.subr.bf16.mxu1 %v7863_v3 }
 0xbf3   :  { %5620 = vmatpush3.bf16.msra.mxu1 %v5831_v47  ;;  %v5851_v47 = vld [vmem:[%s7869_s19 + $0x30] sm:$0xff]  }
 0xbf4   :  { %5621 = vmatprep.subr.bf16.mxu1 %v7863_v3 }
 0xbf7   :  { %5622 = vmatpush3.bf16.msra.mxu1 %v5832_v26  ;;  %v5853_v26 = vld [vmem:[%s7869_s19 + $0x20] sm:$0xff]  }
 0xbf8   :  { %5623 = vmatprep.subr.bf16.mxu1 %v7863_v3 }
 0xbfb   :  { %5624 = vmatpush3.bf16.msra.mxu1 %v5833_v49  ;;  %v5854_v49 = vld [vmem:[%s7869_s19 + $0x18] sm:$0xff]  }
 0xbfc   :  { %5435 = vmatprep.subr.bf16.mxu1 %v5834_v57  ;;  %v5856_v57 = vld [vmem:[%s7869_s19 + $0x8] sm:$0xff]  }
 0xcae   :  { %v1482_v16 = vpop.f32.mrf.mxu1 }
 0xcaf   :  { %v1483_v19 = vadd.f32 %v1482_v16, %v1395_v12 }
 0xcb0   :  { %v1484_v20 = vpop.f32.mrf.mxu1 }
 0xcb1   :  { %v1590_v21 = vadd.f32 %v1584_v17, %v1483_v19  ;;  %v1485_v0 = vadd.f32 %v1484_v20, %v1399_v42 }
 0xcb2   :  { %v1486_v22 = vpop.f32.mrf.mxu1 }
 0xcb3   :  { %v5095_v23 = vmul.f32 -1.442695, %v1590_v21 }
 0xcb4   :  { %v1487_v25 = vpop.f32.mrf.mxu1 }
 0xcb5   :  { %6078 = vpow2.f32 %v5095_v23 }
 0xcc2   :  { %v6079_v27 = vpop.eup %6078 }
 0xcc3   :  { %v1594_v28 = vadd.f32 1.0, %v6079_v27 }
 0xcc5   :  { %6080 = vrcp.f32 %v1594_v28 }
 0xcd2   :  { %v6081_v37 = vpop.eup %6080 }
 0xcd3   :  { %v1597_v45 = vmul.f32 %v6081_v37, %v1586_v44  ;;  %v1600_v50 = vsub.f32 1.0, %v6081_v37  ;;  %v1606_v52 = vmul.f32 %v6081_v37, %v6469_v15  ;;  %v5835_v15 = vld [vmem:[%s7855_s16 + $0x38] sm:$0xff]   ;;  %v5137_v44 = vld [vmem:[%s7868_s29 + $0x2] sm:$0x1] }
 0xcd4   :  { %v2052_v37 = vrot.slane %v5137_v44, %v6259_v7 }
 0xcd5   :  { %v1598_v24 = vadd.f32 %v1597_v45, %v1485_v0 }
 0xcd7   :  { %6082 = vtanh.f32 %v1598_v24 }
 0xce4   :  { %v6083_v48 = vpop.eup %6082 }
 0xce5   :  { %1602 = vrot.lane.b32.xlu1 %v6083_v48, %s6149_s30  ;;  %v5852_v48 = vld [vmem:[%s7869_s19 + $0x28] sm:$0xff]  }
 0xd57   :  { %v1603_v51 = vpop.permute.xlu1 %1602 }
 0xd58   :  { %v1605_v53 = vmul.f32 %v1603_v51, %v1600_v50 }
 0xd5a   :  { %v6824_v54 = vadd.f32 %v1606_v52, %v1605_v53 }
 0xd5c   :  { %v1608_v55 = vpack.c.bf16 %v6824_v54, %v6824_v54 }
 0xd5e   :  { %1625 = vrot.lane.b32.xlu0 %v1608_v55, %s6149_s30  ;;  %v5855_v55 = vld [vmem:[%s7869_s19 + $0x10] sm:$0xff]  }
 0xdd0   :  { %v6829_v56 = vpop.permute.xlu0 %1625 }
 0xdd1   :  { %5626 = vmatmul.mubr.msk.bf16.vlgmr.msra.gmra.mxu1 %vm325_vm2, %v6829_v56 }
 0xdd2   :  { %5436 = vmatpush3.bf16.msra.mxu1 %v5835_v15  ;;  %v2058_v15 = vsub.f32 1.0, %v5137_v44 }
 0xdd3   :  { %5437 = vmatprep.subr.bf16.mxu1 %v5836_v58 }
 0xdd4   :  { %v2063_v58 = vrot.slane %v2058_v15, %v6259_v7 }
 0xdd6   :  { %5438 = vmatpush3.bf16.msra.mxu1 %v5837_v60  ;;  %v5857_v60 = vld [vmem:[%s7869_s19] sm:$0xff]  }
 0xdd7   :  { %5439 = vmatprep.subr.bf16.mxu1 %v5838_v61  ;;  %v6934_v61 = vld [vmem:[%s7870_s28] ss:$8 sps:$4 sm:$0xff]  }
 0xdda   :  { %5440 = vmatpush3.bf16.msra.mxu1 %v5839_v62  ;;  %v6939_v62 = vld [vmem:[%s7870_s28 + $0x4] ss:$8 sps:$4 sm:$0xff]  }
 0xddb   :  { %5441 = vmatprep.subr.bf16.mxu1 %v5840_v63 }
 0xdde   :  { %5442 = vmatpush3.bf16.msra.mxu1 %v5841_v2 }
 0xddf   :  { %5443 = vmatprep.subr.bf16.mxu1 %v5842_v9 }
 0xde2   :  { %5444 = vmatpush3.bf16.msra.mxu1 %v5843_v4 }
 0xde3   :  { %5445 = vmatprep.subr.bf16.mxu1 %v5844_v11 }
 0xde6   :  { %5446 = vmatpush3.bf16.msra.mxu1 %v5845_v13  ;;  %v5138_v13 = vld [vmem:[%s7844_s1 + $0x10] sm:$0xff] }
 0xde7   :  { %5447 = vmatprep.subr.bf16.mxu1 %v5846_v36 }
 0xdea   :  { %5448 = vmatpush3.bf16.msra.mxu1 %v5847_v38  ;;  %v6952_v38 = vld [vmem:[%s7845_s5 + $0x34] ss:$8 sps:$4 sm:$0xff]  }
 0xe91   :  { %v1688_v14 = vpop.f32.mrf.mxu1 }
 0xe92   :  { %v1689_v29 = vadd.f32 %v6586_v43, %v1688_v14  ;;  %v5848_v43 = vld [vmem:[%s7855_s16 + $0x40] sm:$0xff]  }
 0xe93   :  { %v5627_v30 = vpop.f32.mrf.mxu1  ;;  %5449 = vmatprep.subr.bf16.mxu1 %v5848_v43 }
 0xe94   :  { %v1694_v32 = vpack.c.bf16 %v1689_v29, %v1689_v29  ;;  %5450 = vmatpush3.bf16.msra.mxu1 %v5849_v39  ;;  %v6958_v39 = vld [vmem:[%s7845_s5 + $0x30] ss:$8 sps:$4 sm:$0xff]  }
 0xe95   :  { %v1691_v33 = vpop.f32.mrf.mxu1  ;;  %2217 = vmatprep.subr.bf16.mxu1 %v6939_v62 }
 0xe96   :  { %1836 = vmatmul.mubr.bf16.vlgmr.msra.gmra.mxu0 %v1694_v32 }
 0xe97   :  { %v5628_v34 = vpop.f32.mrf.mxu1  ;;  %5645 = vmatprep.mubr.msk.bf16.mxu0 %vm6148_vm0, %v7863_v3 }
 0xf56   :  { %v1837_v10 = vpop.f32.mrf.mxu0 }
 0xf57   :  { %v1838_v12 = vadd.f32 %v1837_v10, %v1716_v31  ;;  %v6963_v31 = vld [vmem:[%s7845_s5 + $0x24] ss:$8 sps:$4 sm:$0xff]  }
 0xf58   :  { %v1839_v16 = vpop.f32.mrf.mxu0 }
 0xf59   :  { %v1840_v17 = vadd.f32 %v1839_v16, %v1720_v8  ;;  %v1844_v21 = vpack.c.bf16 %v1838_v12, %v1838_v12  ;;  %v6970_v12 = vld [vmem:[%s7845_s5 + $0x20] ss:$8 sps:$4 sm:$0xff]   ;;  %v6977_v16 = vld [vmem:[%s7845_s5 + $0x14] ss:$8 sps:$4 sm:$0xff]  }
 0xf5a   :  { %v1841_v19 = vpop.f32.mrf.mxu0 }
 0xf5b   :  { %v1845_v20 = vpack.c.bf16 %v1840_v17, %v1840_v17  ;;  %v6983_v19 = vld [vmem:[%s7845_s5 + $0x10] ss:$8 sps:$4 sm:$0xff]  }
 0xf5c   :  { %v1842_v22 = vpop.f32.mrf.mxu0 }
 0xf5d   :  { %2013 = vmatprep.mubr.bf16.mxu1 %v1845_v20  ;;  %v6989_v20 = vld [vmem:[%s7845_s5 + $0x4] ss:$8 sps:$4 sm:$0xff]   ;;  %v7001_v22 = vld [vmem:[%s7849_s9 + $0x34] ss:$8 sps:$4 sm:$0xff]  }
 0xf5e   :  { %2014 = vmatmul.mubr.bf16.vlgmr.msra.gmra.mxu1 %v1844_v21  ;;  %v6995_v21 = vld [vmem:[%s7845_s5] ss:$8 sps:$4 sm:$0xff]  }
 0xf5f   :  { %2235 = vmatprep.mubr.bf16.mxu1 %v6146_v1  ;;  %2218 = vmatpush1.bf16.msra.mxu1 %v6934_v61 }
 0xf60   :  { %2312 = vmatprep.subr.bf16.mxu1 %v6952_v38 }
0x101e   :  { %v5451_v23 = vpop.f32.mrf.mxu1 }
0x1020   :  { %v5452_v25 = vpop.f32.mrf.mxu1 }
0x1021   :  { %v5453_v27 = vadd.f32 %v5452_v25, %v5451_v23  ;;  %v7007_v23 = vld [vmem:[%s7849_s9 + $0x30] ss:$8 sps:$4 sm:$0xff]   ;;  %v7013_v25 = vld [vmem:[%s7849_s9 + $0x24] ss:$8 sps:$4 sm:$0xff]  }
0x1022   :  { %v5454_v28 = vpop.f32.mrf.mxu1 }
0x1023   :  { %v2016_v41 = vadd.f32 %v5453_v27, %v6621_v18  ;;  %v5850_v18 = vld [vmem:[%s7869_s19 + $0x38] sm:$0xff]   ;;  %v7021_v27 = vld [vmem:[%s7849_s9 + $0x20] ss:$8 sps:$4 sm:$0xff]  }
0x1024   :  { %v5455_v42 = vpop.f32.mrf.mxu1  ;;  %5630 = vmatpush3.bf16.msra.mxu0 %v5850_v18  ;;  %v7028_v28 = vld [vmem:[%s7849_s9 + $0x14] ss:$8 sps:$4 sm:$0xff]  }
0x1025   :  { %5135 = vst [vmem:[%s7859_s18 + $0x8] sm:$0xff] %v2016_v41  ;;  %2023 = vmax.xlane.f32.xlu1 %v2016_v41  ;;  %5631 = vmatprep.subr.bf16.mxu0 %v7863_v3  ;;  %v7046_v42 = vld [vmem:[%s7849_s9] ss:$8 sps:$4 sm:$0xff]  }
0x1028   :  { %5632 = vmatpush3.bf16.msra.mxu0 %v5851_v47 }
0x1029   :  { %5633 = vmatprep.subr.bf16.mxu0 %v7863_v3 }
0x102c   :  { %5634 = vmatpush3.bf16.msra.mxu0 %v5852_v48 }
0x102d   :  { %5635 = vmatprep.subr.bf16.mxu0 %v7863_v3 }
0x1030   :  { %5636 = vmatpush3.bf16.msra.mxu0 %v5853_v26 }
0x1031   :  { %5637 = vmatprep.subr.bf16.mxu0 %v7863_v3 }
0x1034   :  { %5638 = vmatpush3.bf16.msra.mxu0 %v5854_v49 }
0x1035   :  { %5639 = vmatprep.subr.bf16.mxu0 %v7863_v3 }
0x1036   :  { %2054 = vperm.xlu1 %5730, %v2052_v37  }
0x1038   :  { %5640 = vmatpush3.bf16.msra.mxu0 %v5855_v55 }
0x1039   :  { %5641 = vmatprep.subr.bf16.mxu0 %v7863_v3 }
0x103c   :  { %5642 = vmatpush3.bf16.msra.mxu0 %v5856_v57 }
0x103d   :  { %5643 = vmatprep.subr.bf16.mxu0 %v7863_v3 }
0x1040   :  { %5644 = vmatpush3.bf16.msra.mxu0 %v5857_v60 }
0x10ae   :  { %v2024_v0 = vpop.xlane.xlu1 %2023 }
0x10af   :  { %vm2025_vm6 = vcmp.eq.f32.partialorder %v2016_v41, %v2024_v0  ;;  %v7040_v41 = vld [vmem:[%s7849_s9 + $0x4] ss:$8 sps:$4 sm:$0xff]  }
0x10b0   :  { %v2026_v45 = vsel %vm2025_vm6, %v6628_v35, 2147483647 }
0x10b1   :  { %v2028_v24 = vshra.s32 %v2026_v45, 16  ;;  %v2027_v50 = vand.u32 65535, %v2026_v45 }
0x10b2   :  { %v2055_v14 = vpop.permute.xlu1 %2054 }
0x10b3   :  { %v2030_v46 = vcvt.s32.f32 %v2028_v24  ;;  %v2029_v52 = vcvt.s32.f32 %v2027_v50  ;;  %v2057_v32 = vmul.f32 %v5138_v13, %v2055_v14  ;;  %v2178_v24 = vld [vmem:[%s7847_s6] sm:$0x3] }
0x10b4   :  { %v2183_v18 = vrot.slane %v2178_v24, %v6259_v7 }
0x10b5   :  { %2031 = vmin.xlane.f32.xlu0 %v2030_v46 }
0x113e   :  { %v2032_v51 = vpop.xlane.xlu0 %2031 }
0x113f   :  { %vm2033_vm7 = vcmp.eq.f32.partialorder %v2030_v46, %v2032_v51  ;;  %v2038_v63 = vcvt.f32.s32 %v2032_v51  ;;  %v2252_v46 = vld [vmem:[%s7848_s7] sm:$0x3] }
0x1140   :  { %v2034_v53 = vsel %vm2033_vm7, %v2029_v52, inf  ;;  %v2257_v47 = vrot.slane %v2252_v46, %v6259_v7 }
0x1141   :  { %2035 = vmin.xlane.f32.xlu0 %v2034_v53  ;;  %v2039_v9 = vshll.u32 %v2038_v63, 16 }
0x1157   :  { %2065 = vperm.xlu0 %5729, %v2063_v58  }
0x11ca   :  { %v2036_v2 = vpop.xlane.xlu0 %2035 }
0x11cb   :  { %v2037_v4 = vcvt.f32.s32 %v2036_v2  ;;  %v2261_v2 = vrot.slane %v2252_v46, %v6343_v59 }
0x11cd   :  { %v2040_v11 = vadd.s32 %v2039_v9, %v2037_v4  ;;  %v2187_v9 = vrot.slane %v2178_v24, %v6343_v59 }
0x11cf   :  { %vm2041_vm8 = vcmp.eq.s32.totalorder %v6628_v35, %v2040_v11 }
0x11d0   :  { %v5136_v29 = vsel %vm2041_vm8, 1.0, %v7863_v3 }
0x11d2   :  { %v2066_v30 = vpop.permute.xlu0 %2065 }
0x11d3   :  { %v2068_v33 = vmul.f32 %v5136_v29, %v2066_v30  ;;  %v7066_v30 = vld [vmem:[%s7850_s8 + $0x30] ss:$8 sps:$4 sm:$0xff]  }
0x11d5   :  { %v2069_v34 = vadd.f32 %v2068_v33, %v2057_v32  ;;  %v7071_v32 = vld [vmem:[%s7850_s8 + $0x34] ss:$8 sps:$4 sm:$0xff]   ;;  %v7076_v33 = vld [vmem:[%s7850_s8 + $0x24] ss:$8 sps:$4 sm:$0xff]  }
0x11d6   :  { %2438 = vmatprep.subr.bf16.mxu0 %v7071_v32 }
0x11d7   :  { %v2070_v36 = vpack.c.bf16 %v2069_v34, %v2069_v34  ;;  %v7083_v34 = vld [vmem:[%s7850_s8 + $0x20] ss:$8 sps:$4 sm:$0xff]  }
0x11d9   :  { %5646 = vmatmul.mubr.bf16.vlgmr.msra.gmra.mxu0 %v2070_v36  ;;  %v7089_v36 = vld [vmem:[%s7850_s8 + $0x14] ss:$8 sps:$4 sm:$0xff]  }
0x11da   :  { %2462 = vmatprep.mubr.bf16.mxu0 %v6146_v1  ;;  %2439 = vmatpush1.bf16.msra.mxu0 %v7066_v30 }
0x11db   :  { %2440 = vmatprep.subr.bf16.mxu0 %v7076_v33 }
0x11de   :  { %2441 = vmatpush1.bf16.msra.mxu0 %v7083_v34 }
0x11df   :  { %2442 = vmatprep.subr.bf16.mxu0 %v7089_v36 }
0x1299   :  { %v2169_v43 = vpop.f32.mrf.mxu0 }
0x129a   :  { %v2175_v5 = vpack.c.bf16 %v2169_v43, %v2169_v43 }
0x129b   :  { %v5647_v8 = vpop.f32.mrf.mxu0 }
0x129c   :  { %5149 = vmatmul.mubr.msk.bf16.vlgmr.msra.gmra.mxu1 %vm219_vm1, %v2175_v5  ;;  %v7096_v5 = vld [vmem:[%s7850_s8 + $0x10] ss:$8 sps:$4 sm:$0xff]   ;;  %v7102_v8 = vld [vmem:[%s7850_s8 + $0x4] ss:$8 sps:$4 sm:$0xff]  }
0x129d   :  { %2313 = vmatpush1.bf16.msra.mxu1 %v6958_v39  ;;  %v2172_v10 = vpop.f32.mrf.mxu0  ;;  %2336 = vmatprep.mubr.bf16.mxu1 %v6146_v1 }
0x129e   :  { %2314 = vmatprep.subr.bf16.mxu1 %v6963_v31  ;;  %2443 = vmatpush1.bf16.msra.mxu0 %v7096_v5  ;;  %v7108_v10 = vld [vmem:[%s7850_s8] ss:$8 sps:$4 sm:$0xff]  }
0x129f   :  { %v5648_v17 = vpop.f32.mrf.mxu0  ;;  %2444 = vmatprep.subr.bf16.mxu0 %v7102_v8 }
0x12a1   :  { %2315 = vmatpush1.bf16.msra.mxu1 %v6970_v12 }
0x12a2   :  { %2316 = vmatprep.subr.bf16.mxu1 %v6977_v16  ;;  %2445 = vmatpush1.bf16.msra.mxu0 %v7108_v10 }
0x12a3   :  { %5649 = vmatprep.subr.bf16.mxu0 %v7863_v3 }
0x12a5   :  { %2317 = vmatpush1.bf16.msra.mxu1 %v6983_v19 }
0x12a6   :  { %2318 = vmatprep.subr.bf16.mxu1 %v6989_v20 }
0x12a9   :  { %2319 = vmatpush1.bf16.msra.mxu1 %v6995_v21 }
0x12aa   :  { %2539 = vmatprep.subr.bf16.mxu1 %v7001_v22 }
0x12ac   :  { %5158 = vmatmul.mubr.msk.bf16.vlgmr.msra.gmra.mxu1 %vm325_vm2, %v6789_v6  ;;  %v7034_v6 = vld [vmem:[%s7849_s9 + $0x10] ss:$8 sps:$4 sm:$0xff]  }
0x12ad   :  { %2540 = vmatpush1.bf16.msra.mxu1 %v7007_v23  ;;  %2563 = vmatprep.mubr.bf16.mxu1 %v6146_v1 }
0x12ae   :  { %2541 = vmatprep.subr.bf16.mxu1 %v7013_v25 }
0x12b1   :  { %2542 = vmatpush1.bf16.msra.mxu1 %v7021_v27 }
0x12b2   :  { %2543 = vmatprep.subr.bf16.mxu1 %v7028_v28 }
0x12b5   :  { %2544 = vmatpush1.bf16.msra.mxu1 %v7034_v6 }
0x12b6   :  { %2545 = vmatprep.subr.bf16.mxu1 %v7040_v41 }
0x12b9   :  { %2546 = vmatpush1.bf16.msra.mxu1 %v7046_v42 }
0x12bc   :  { %5177 = vmatmul.mubr.msk.bf16.vlgmr.msra.gmra.mxu1 %vm325_vm2, %v6829_v56 }
0x12bd   :  { %2817 = vmatprep.mubr.bf16.mxu1 %v6146_v1 }
0x135c   :  { %v2237_v44 = vpop.f32.mrf.mxu1 }
0x135d   :  { %v2238_v56 = vadd.f32 %v2237_v44, %v2183_v18  ;;  %v2372_v18 = vld [vmem:[%s7852_s10] sm:$0x3] }
0x135e   :  { %v2239_v37 = vpop.f32.mrf.mxu1 }
0x135f   :  { %v2240_v13 = vadd.f32 %v2239_v37, %v2187_v9 }
0x1360   :  { %v2241_v0 = vpop.f32.mrf.mxu1 }
0x1362   :  { %v2242_v45 = vpop.f32.mrf.mxu1 }
0x136c   :  { %v2338_v48 = vpop.f32.mrf.mxu1 }
0x136d   :  { %v2339_v26 = vadd.f32 %v2338_v48, %v2257_v47  ;;  %v2377_v48 = vrot.slane %v2372_v18, %v6259_v7 }
0x136e   :  { %v2340_v49 = vpop.f32.mrf.mxu1 }
0x136f   :  { %v2345_v50 = vadd.f32 %v2339_v26, %v2238_v56  ;;  %v2341_v4 = vadd.f32 %v2340_v49, %v2261_v2  ;;  %v2381_v2 = vrot.slane %v2372_v18, %v6343_v59 }
0x1370   :  { %v2342_v51 = vpop.f32.mrf.mxu1 }
0x1371   :  { %v5159_v52 = vmul.f32 -1.442695, %v2345_v50 }
0x1372   :  { %v2343_v53 = vpop.f32.mrf.mxu1 }
0x1373   :  { %6084 = vpow2.f32 %v5159_v52 }
0x137c   :  { %v2565_v55 = vpop.f32.mrf.mxu1 }
0x137e   :  { %v2567_v57 = vpop.f32.mrf.mxu1 }
0x1380   :  { %v6085_v15 = vpop.eup %6084  ;;  %v2569_v58 = vpop.f32.mrf.mxu1 }
0x1381   :  { %v2349_v60 = vadd.f32 1.0, %v6085_v15 }
0x1382   :  { %v2570_v63 = vpop.f32.mrf.mxu1 }
0x1383   :  { %6086 = vrcp.f32 %v2349_v60 }
0x1390   :  { %v6087_v11 = vpop.eup %6086 }
0x1391   :  { %v2352_v14 = vmul.f32 %v6087_v11, %v2341_v4  ;;  %v2355_v17 = vsub.f32 1.0, %v6087_v11  ;;  %v2361_v37 = vmul.f32 %v6087_v11, %v6784_v40  ;;  %v2479_v40 = vld [vmem:[%s7851_s11] sm:$0x3] }
0x1392   :  { %v2484_v47 = vrot.slane %v2479_v40, %v6259_v7  ;;  %v2488_v63 = vrot.slane %v2479_v40, %v6343_v59  ;;  %v7177_v40 = vld [vmem:[%s7854_s14 + $0x54] ss:$8 sps:$4 sm:$0xff]  }
0x1393   :  { %v2353_v29 = vadd.f32 %v2352_v14, %v2240_v13 }
0x1394   :  { %v2566_v26 = vadd.f32 %v2565_v55, %v2484_v47  ;;  %v2568_v9 = vadd.f32 %v2567_v57, %v2488_v63  ;;  %v5897_v55 = vld [vmem:[%s7853_s12 + $0x18] sm:$0xff]   ;;  %v5899_v57 = vld [vmem:[%s7853_s12 + $0x8] sm:$0xff]  }
0x1395   :  { %6088 = vtanh.f32 %v2353_v29  ;;  %v5898_v29 = vld [vmem:[%s7853_s12 + $0x10] sm:$0xff]  }
0x1396   :  { %v7237_v63 = vld [vmem:[%s7854_s14 + $0x10] ss:$8 sps:$4 sm:$0xff]  }
0x13a2   :  { %v6089_v43 = vpop.eup %6088 }
0x13a3   :  { %2357 = vrot.lane.b32.xlu1 %v6089_v43, %s6149_s30 }
0x1415   :  { %v2358_v44 = vpop.permute.xlu1 %2357 }
0x1416   :  { %v2360_v0 = vmul.f32 %v2358_v44, %v2355_v17  ;;  %v5900_v17 = vld [vmem:[%s7853_s12] sm:$0xff]   ;;  %v7154_v44 = vld [vmem:[%s7854_s14 + $0x70] ss:$8 sps:$4 sm:$0xff]  }
0x1418   :  { %v7114_v45 = vadd.f32 %v2361_v37, %v2360_v0  ;;  %v7159_v37 = vld [vmem:[%s7854_s14 + $0x74] ss:$8 sps:$4 sm:$0xff]   ;;  %v7164_v0 = vld [vmem:[%s7854_s14 + $0x64] ss:$8 sps:$4 sm:$0xff]  }
0x1419   :  { %2785 = vmatprep.subr.bf16.mxu1 %v7159_v37 }
0x141a   :  { %v2363_v24 = vpack.c.bf16 %v7114_v45, %v7114_v45  ;;  %2786 = vmatpush1.bf16.msra.mxu1 %v7154_v44 }
0x141b   :  { %2787 = vmatprep.subr.bf16.mxu1 %v7164_v0 }
0x141c   :  { %2385 = vrot.lane.b32.xlu1 %v2363_v24, %s6149_s30  ;;  %v7171_v24 = vld [vmem:[%s7854_s14 + $0x60] ss:$8 sps:$4 sm:$0xff]  }
0x141e   :  { %2788 = vmatpush1.bf16.msra.mxu1 %v7171_v24 }
0x141f   :  { %2789 = vmatprep.subr.bf16.mxu1 %v7177_v40 }
0x148e   :  { %v7119_v46 = vpop.permute.xlu1 %2385 }
0x148f   :  { %5168 = vmatmul.mubr.msk.bf16.vlgmr.msra.gmra.mxu0 %vm325_vm2, %v7119_v46 }
0x1490   :  { %5657 = vmatprep.mubr.msk.bf16.mxu0 %vm6148_vm0, %v7863_v3  ;;  %5650 = vmatpush3.bf16.msra.mxu0 %v5897_v55  ;;  %v5928_v55 = vld [vmem:[%s7855_s16 + $0x30] sm:$0xff]  }
0x1491   :  { %5651 = vmatprep.subr.bf16.mxu0 %v7863_v3 }
0x1494   :  { %5652 = vmatpush3.bf16.msra.mxu0 %v5898_v29  ;;  %v5929_v29 = vld [vmem:[%s7855_s16 + $0x68] sm:$0xff]  }
0x1495   :  { %5653 = vmatprep.subr.bf16.mxu0 %v7863_v3 }
0x1498   :  { %5654 = vmatpush3.bf16.msra.mxu0 %v5899_v57  ;;  %v5931_v57 = vld [vmem:[%s7855_s16 + $0x60] sm:$0xff]  }
0x1499   :  { %5655 = vmatprep.subr.bf16.mxu0 %v7863_v3 }
0x149c   :  { %5656 = vmatpush3.bf16.msra.mxu0 %v5900_v17  ;;  %v5932_v17 = vld [vmem:[%s7855_s16 + $0x20] sm:$0xff]  }
0x154f   :  { %v2464_v56 = vpop.f32.mrf.mxu0 }
0x1550   :  { %v2465_v49 = vadd.f32 %v2464_v56, %v2377_v48 }
0x1551   :  { %v2466_v50 = vpop.f32.mrf.mxu0 }
0x1552   :  { %v2572_v51 = vadd.f32 %v2566_v26, %v2465_v49  ;;  %v2467_v11 = vadd.f32 %v2466_v50, %v2381_v2  ;;  %v7184_v26 = vld [vmem:[%s7854_s14 + $0x50] ss:$8 sps:$4 sm:$0xff]   ;;  %v7190_v49 = vld [vmem:[%s7854_s14 + $0x44] ss:$8 sps:$4 sm:$0xff]  }
0x1553   :  { %v2468_v52 = vpop.f32.mrf.mxu0  ;;  %2790 = vmatpush1.bf16.msra.mxu1 %v7184_v26 }
0x1554   :  { %v5178_v53 = vmul.f32 -1.442695, %v2572_v51  ;;  %v7200_v51 = vld [vmem:[%s7854_s14 + $0x40] ss:$8 sps:$4 sm:$0xff]   ;;  %2791 = vmatprep.subr.bf16.mxu1 %v7190_v49  ;;  %v7206_v52 = vld [vmem:[%s7854_s14 + $0x34] ss:$8 sps:$4 sm:$0xff]  }
0x1555   :  { %v2469_v15 = vpop.f32.mrf.mxu0 }
0x1556   :  { %6090 = vpow2.f32 %v5178_v53  ;;  %v7213_v53 = vld [vmem:[%s7854_s14 + $0x30] ss:$8 sps:$4 sm:$0xff]   ;;  %v7219_v15 = vld [vmem:[%s7854_s14 + $0x24] ss:$8 sps:$4 sm:$0xff]  }
0x1557   :  { %2792 = vmatpush1.bf16.msra.mxu1 %v7200_v51 }
0x1558   :  { %2793 = vmatprep.subr.bf16.mxu1 %v7206_v52 }
0x155b   :  { %2794 = vmatpush1.bf16.msra.mxu1 %v7213_v53 }
0x155c   :  { %2795 = vmatprep.subr.bf16.mxu1 %v7219_v15 }
0x1563   :  { %v6091_v58 = vpop.eup %6090 }
0x1564   :  { %v2576_v60 = vadd.f32 1.0, %v6091_v58  ;;  %v7225_v58 = vld [vmem:[%s7854_s14 + $0x20] ss:$8 sps:$4 sm:$0xff]  }
0x1565   :  { %2796 = vmatpush1.bf16.msra.mxu1 %v7225_v58 }
0x1566   :  { %6092 = vrcp.f32 %v2576_v60  ;;  %v7231_v60 = vld [vmem:[%s7854_s14 + $0x14] ss:$8 sps:$4 sm:$0xff]  }
0x1567   :  { %2797 = vmatprep.subr.bf16.mxu1 %v7231_v60 }
0x1569   :  { %2798 = vmatpush1.bf16.msra.mxu1 %v7237_v63 }
0x1573   :  { %v6093_v4 = vpop.eup %6092 }
0x1574   :  { %v2579_v13 = vmul.f32 %v6093_v4, %v2568_v9  ;;  %v2582_v18 = vsub.f32 1.0, %v6093_v4  ;;  %v2588_v48 = vmul.f32 %v6093_v4, %v6824_v54  ;;  %v7248_v9 = vld [vmem:[%s7854_s14 + $0x4] ss:$8 sps:$4 sm:$0xff]   ;;  %v7253_v4 = vld [vmem:[%s7854_s14] ss:$8 sps:$4 sm:$0xff]  }
0x1575   :  { %2799 = vmatprep.subr.bf16.mxu1 %v7248_v9 }
0x1576   :  { %v2580_v14 = vadd.f32 %v2579_v13, %v2467_v11  ;;  %2800 = vmatpush1.bf16.msra.mxu1 %v7253_v4  ;;  %v5925_v11 = vld [vmem:[%s7855_s16 + $0x78] sm:$0xff]  }
0x1577   :  { %5661 = vmatprep.subr.bf16.mxu1 %v7863_v3  ;;  %v5926_v13 = vld [vmem:[%s7855_s16 + $0x38] sm:$0xff]   ;;  %5471 = vmatprep.subr.bf16.mxu0 %v5925_v11  ;;  %v7300_v11 = vld [vmem:[%s7856_s13] ss:$0 sm:$0xff] }
0x1578   :  { %6094 = vtanh.f32 %v2580_v14  ;;  %v5927_v14 = vld [vmem:[%s7855_s16 + $0x70] sm:$0xff]  }
0x1585   :  { %v6095_v43 = vpop.eup %6094 }
0x1586   :  { %2584 = vrot.lane.b32.xlu0 %v6095_v43, %s6149_s30  ;;  %v5930_v43 = vld [vmem:[%s7855_s16 + $0x28] sm:$0xff]  }
0x15f8   :  { %v2585_v47 = vpop.permute.xlu0 %2584 }
0x15f9   :  { %v2587_v56 = vmul.f32 %v2585_v47, %v2582_v18  ;;  %v5933_v18 = vld [vmem:[%s7855_s16 + $0x58] sm:$0xff]  }
0x15fa   :  { %v5934_v47 = vld [vmem:[%s7855_s16 + $0x18] sm:$0xff]  }
0x15fb   :  { %v7192_v50 = vadd.f32 %v2588_v48, %v2587_v56  ;;  %v5935_v48 = vld [vmem:[%s7855_s16 + $0x50] sm:$0xff]  }
0x15fc   :  { %v5936_v56 = vld [vmem:[%s7855_s16 + $0x10] sm:$0xff]  }
0x15fd   :  { %v2590_v54 = vpack.c.bf16 %v7192_v50, %v7192_v50 }
0x15ff   :  { %2607 = vrot.lane.b32.xlu1 %v2590_v54, %s6149_s30  ;;  %v5937_v54 = vld [vmem:[%s7855_s16 + $0x48] sm:$0xff]  }
0x1671   :  { %v7241_v2 = vpop.permute.xlu1 %2607 }
0x1672   :  { %5658 = vmatmul.mubr.msk.bf16.vlgmr.msra.gmra.mxu0 %vm325_vm2, %v7241_v2 }
0x1673   :  { %5472 = vmatpush3.bf16.msra.mxu0 %v5926_v13 }
0x1674   :  { %5473 = vmatprep.subr.bf16.mxu0 %v5927_v14 }
0x1677   :  { %5474 = vmatpush3.bf16.msra.mxu0 %v5928_v55 }
0x1678   :  { %5475 = vmatprep.subr.bf16.mxu0 %v5929_v29 }
0x167b   :  { %5476 = vmatpush3.bf16.msra.mxu0 %v5930_v43 }
0x167c   :  { %5477 = vmatprep.subr.bf16.mxu0 %v5931_v57 }
0x167f   :  { %5478 = vmatpush3.bf16.msra.mxu0 %v5932_v17  ;;  %v5938_v17 = vld [vmem:[%s7855_s16 + $0x8] sm:$0xff]  }
0x1680   :  { %5479 = vmatprep.subr.bf16.mxu0 %v5933_v18  ;;  %v5939_v18 = vld [vmem:[%s7855_s16 + $0x40] sm:$0xff]  }
0x1683   :  { %5480 = vmatpush3.bf16.msra.mxu0 %v5934_v47  ;;  %v5940_v47 = vld [vmem:[%s7855_s16] sm:$0xff]  }
0x1684   :  { %5481 = vmatprep.subr.bf16.mxu0 %v5935_v48  ;;  %v2693_v48 = vld [vmem:[%s7857_s15] sm:$0x3] }
0x1687   :  { %5482 = vmatpush3.bf16.msra.mxu0 %v5936_v56  ;;  %v2698_v56 = vrot.slane %v2693_v48, %v6259_v7 }
0x1688   :  { %5483 = vmatprep.subr.bf16.mxu0 %v5937_v54  ;;  %v2702_v54 = vrot.slane %v2693_v48, %v6343_v59 }
0x168b   :  { %5484 = vmatpush3.bf16.msra.mxu0 %v5938_v17 }
0x168c   :  { %5485 = vmatprep.subr.bf16.mxu0 %v5939_v18  ;;  %v5948_v18 = vld [vmem:[%s7869_s19] sm:$0xff]  }
0x168f   :  { %5486 = vmatpush3.bf16.msra.mxu0 %v5940_v47 }
0x1690   :  { %3294 = vmatprep.subr.bf16.mxu0 %v6952_v38 }
0x1732   :  { %v2670_v13 = vpop.f32.mrf.mxu0 }
0x1733   :  { %v2671_v14 = vadd.f32 %v7300_v11, %v2670_v13 }
0x1734   :  { %v5659_v55 = vpop.f32.mrf.mxu0 }
0x1735   :  { %v2676_v29 = vpack.c.bf16 %v2671_v14, %v2671_v14 }
0x1736   :  { %v2673_v43 = vpop.f32.mrf.mxu0 }
0x1737   :  { %2818 = vmatmul.mubr.bf16.vlgmr.msra.gmra.mxu1 %v2676_v29 }
0x1738   :  { %v5660_v57 = vpop.f32.mrf.mxu0  ;;  %5677 = vmatprep.mubr.msk.bf16.mxu1 %vm6148_vm0, %v7863_v3 }
0x17f7   :  { %v2819_v13 = vpop.f32.mrf.mxu1 }
0x17f8   :  { %v2820_v14 = vadd.f32 %v2819_v13, %v2698_v56 }
0x17f9   :  { %v2821_v55 = vpop.f32.mrf.mxu1 }
0x17fa   :  { %v2822_v29 = vadd.f32 %v2821_v55, %v2702_v54  ;;  %v2826_v17 = vpack.c.bf16 %v2820_v14, %v2820_v14  ;;  %v5221_v55 = vld [vmem:[%s7844_s1 + $0x18] sm:$0xff] }
0x17fb   :  { %v2823_v43 = vpop.f32.mrf.mxu1 }
0x17fc   :  { %v2827_v57 = vpack.c.bf16 %v2822_v29, %v2822_v29 }
0x17fd   :  { %v2824_v3 = vpop.f32.mrf.mxu1 }
0x17fe   :  { %2995 = vmatprep.mubr.bf16.mxu0 %v2827_v57  ;;  %v7871_v3 = vmov 0.0  }
0x17ff   :  { %2996 = vmatmul.mubr.bf16.vlgmr.msra.gmra.mxu0 %v2826_v17 }
0x1800   :  { %3295 = vmatpush1.bf16.msra.mxu0 %v6958_v39  ;;  %3318 = vmatprep.mubr.bf16.mxu0 %v6146_v1  ;;  %v7362_v39 = vld [vmem:[%s7858_s17] ss:$0 sm:$0xff] }
0x1801   :  { %3296 = vmatprep.subr.bf16.mxu0 %v6963_v31 }
0x1804   :  { %3297 = vmatpush1.bf16.msra.mxu0 %v6970_v12 }
0x1805   :  { %3298 = vmatprep.subr.bf16.mxu0 %v6977_v16 }
0x1808   :  { %3299 = vmatpush1.bf16.msra.mxu0 %v6983_v19 }
0x1809   :  { %3300 = vmatprep.subr.bf16.mxu0 %v6989_v20 }
0x180c   :  { %3301 = vmatpush1.bf16.msra.mxu0 %v6995_v21 }
0x180d   :  { %3521 = vmatprep.subr.bf16.mxu0 %v7001_v22 }
0x180f   :  { %5241 = vmatmul.mubr.msk.bf16.vlgmr.msra.gmra.mxu0 %vm325_vm2, %v7119_v46 }
0x1810   :  { %3522 = vmatpush1.bf16.msra.mxu0 %v7007_v23  ;;  %3545 = vmatprep.mubr.bf16.mxu0 %v6146_v1 }
0x1811   :  { %3523 = vmatprep.subr.bf16.mxu0 %v7013_v25 }
0x1814   :  { %3524 = vmatpush1.bf16.msra.mxu0 %v7021_v27 }
0x1815   :  { %3525 = vmatprep.subr.bf16.mxu0 %v7028_v28 }
0x1818   :  { %3526 = vmatpush1.bf16.msra.mxu0 %v7034_v6 }
0x1819   :  { %3527 = vmatprep.subr.bf16.mxu0 %v7040_v41 }
0x181c   :  { %3528 = vmatpush1.bf16.msra.mxu0 %v7046_v42 }
0x181d   :  { %3767 = vmatprep.subr.bf16.mxu0 %v7159_v37 }
0x181f   :  { %5260 = vmatmul.mubr.msk.bf16.vlgmr.msra.gmra.mxu0 %vm325_vm2, %v7241_v2  ;;  %v5946_v2 = vld [vmem:[%s7869_s19 + $0x10] sm:$0xff]  }
0x1820   :  { %3768 = vmatpush1.bf16.msra.mxu0 %v7154_v44  ;;  %3799 = vmatprep.mubr.bf16.mxu0 %v6146_v1 }
0x1821   :  { %3769 = vmatprep.subr.bf16.mxu0 %v7164_v0  ;;  %v5220_v0 = vld [vmem:[%s7868_s29 + $0x3] sm:$0x1] }
0x1824   :  { %3770 = vmatpush1.bf16.msra.mxu0 %v7171_v24  ;;  %v3040_v24 = vsub.f32 1.0, %v5220_v0 }
0x1825   :  { %3771 = vmatprep.subr.bf16.mxu0 %v7177_v40 }
0x1826   :  { %v3045_v40 = vrot.slane %v3040_v24, %v6259_v7 }
0x1828   :  { %3772 = vmatpush1.bf16.msra.mxu0 %v7184_v26  ;;  %v5941_v26 = vld [vmem:[%s7869_s19 + $0x38] sm:$0xff]  }
0x1829   :  { %3773 = vmatprep.subr.bf16.mxu0 %v7190_v49  ;;  %5662 = vmatpush3.bf16.msra.mxu1 %v5941_v26  ;;  %v5942_v49 = vld [vmem:[%s7869_s19 + $0x30] sm:$0xff]  }
0x182a   :  { %5663 = vmatprep.subr.bf16.mxu1 %v7871_v3 }
0x182c   :  { %3774 = vmatpush1.bf16.msra.mxu0 %v7200_v51  ;;  %v5943_v51 = vld [vmem:[%s7869_s19 + $0x28] sm:$0xff]  }
0x182d   :  { %3775 = vmatprep.subr.bf16.mxu0 %v7206_v52  ;;  %5664 = vmatpush3.bf16.msra.mxu1 %v5942_v49  ;;  %v5944_v52 = vld [vmem:[%s7869_s19 + $0x20] sm:$0xff]  }
0x182e   :  { %5665 = vmatprep.subr.bf16.mxu1 %v7871_v3 }
0x1830   :  { %3776 = vmatpush1.bf16.msra.mxu0 %v7213_v53  ;;  %v5945_v53 = vld [vmem:[%s7869_s19 + $0x18] sm:$0xff]  }
0x1831   :  { %3777 = vmatprep.subr.bf16.mxu0 %v7219_v15  ;;  %5666 = vmatpush3.bf16.msra.mxu1 %v5943_v51 }
0x1832   :  { %5667 = vmatprep.subr.bf16.mxu1 %v7871_v3 }
0x1834   :  { %3778 = vmatpush1.bf16.msra.mxu0 %v7225_v58 }
0x1835   :  { %3779 = vmatprep.subr.bf16.mxu0 %v7231_v60  ;;  %5668 = vmatpush3.bf16.msra.mxu1 %v5944_v52 }
0x1836   :  { %5669 = vmatprep.subr.bf16.mxu1 %v7871_v3 }
0x1838   :  { %3780 = vmatpush1.bf16.msra.mxu0 %v7237_v63 }
0x1839   :  { %3781 = vmatprep.subr.bf16.mxu0 %v7248_v9  ;;  %5670 = vmatpush3.bf16.msra.mxu1 %v5945_v53  ;;  %v5947_v9 = vld [vmem:[%s7869_s19 + $0x8] sm:$0xff]  }
0x183a   :  { %5671 = vmatprep.subr.bf16.mxu1 %v7871_v3 }
0x183c   :  { %3782 = vmatpush1.bf16.msra.mxu0 %v7253_v4  ;;  %v3034_v4 = vrot.slane %v5220_v0, %v6259_v7 }
0x183d   :  { %5693 = vmatprep.subr.bf16.mxu0 %v7871_v3  ;;  %5672 = vmatpush3.bf16.msra.mxu1 %v5946_v2 }
0x183e   :  { %5673 = vmatprep.subr.bf16.mxu1 %v7871_v3 }
0x1841   :  { %5674 = vmatpush3.bf16.msra.mxu1 %v5947_v9 }
0x1842   :  { %5675 = vmatprep.subr.bf16.mxu1 %v7871_v3 }
0x1845   :  { %5676 = vmatpush3.bf16.msra.mxu1 %v5948_v18 }
0x1846   :  { %3199 = vmatprep.subr.bf16.mxu1 %v6939_v62 }
0x18bf   :  { %v5487_v38 = vpop.f32.mrf.mxu0 }
0x18c1   :  { %v5488_v31 = vpop.f32.mrf.mxu0 }
0x18c2   :  { %v5489_v12 = vadd.f32 %v5488_v31, %v5487_v38 }
0x18c3   :  { %v5490_v16 = vpop.f32.mrf.mxu0 }
0x18c4   :  { %v2998_v19 = vadd.f32 %v5489_v12, %v7362_v39 }
0x18c5   :  { %v5491_v20 = vpop.f32.mrf.mxu0 }
0x18c6   :  { %5218 = vst [vmem:[%s7859_s18 + $0x10] sm:$0xff] %v2998_v19  ;;  %3005 = vmax.xlane.f32.xlu0 %v2998_v19 }
0x18cf   :  { %v7368_v21 = vpop.f32.mrf.mxu0 }
0x18d1   :  { %v7370_v22 = vpop.f32.mrf.mxu0 }
0x18d3   :  { %v3324_v23 = vpop.f32.mrf.mxu0 }
0x18d5   :  { %v3325_v25 = vpop.f32.mrf.mxu0 }
0x18df   :  { %v7372_v27 = vpop.f32.mrf.mxu0 }
0x18e1   :  { %v7374_v28 = vpop.f32.mrf.mxu0 }
0x18e3   :  { %v3551_v6 = vpop.f32.mrf.mxu0 }
0x18e5   :  { %v3552_v41 = vpop.f32.mrf.mxu0 }
0x194f   :  { %v3006_v42 = vpop.xlane.xlu0 %3005 }
0x1950   :  { %vm3007_vm9 = vcmp.eq.f32.partialorder %v2998_v19, %v3006_v42 }
0x1951   :  { %v3008_v46 = vsel %vm3007_vm9, %v6628_v35, 2147483647 }
0x1952   :  { %v3010_v44 = vshra.s32 %v3008_v46, 16  ;;  %v3009_v15 = vand.u32 65535, %v3008_v46 }
0x1954   :  { %v3012_v37 = vcvt.s32.f32 %v3010_v44  ;;  %v3011_v60 = vcvt.s32.f32 %v3009_v15 }
0x1956   :  { %3013 = vmin.xlane.f32.xlu1 %v3012_v37 }
0x1967   :  { %3047 = vperm.xlu1 %5730, %v3045_v40  }
0x19df   :  { %v3014_v58 = vpop.xlane.xlu1 %3013 }
0x19e0   :  { %vm3015_vm10 = vcmp.eq.f32.partialorder %v3012_v37, %v3014_v58  ;;  %v3020_v47 = vcvt.f32.s32 %v3014_v58 }
0x19e1   :  { %v3016_v63 = vsel %vm3015_vm10, %v3011_v60, inf  ;;  %v3354_v60 = vld [vmem:[%s7852_s10] sm:$0x3] }
0x19e2   :  { %3017 = vmin.xlane.f32.xlu0 %v3016_v63  ;;  %v3021_v56 = vshll.u32 %v3020_v47, 16  ;;  %v3359_v2 = vrot.slane %v3354_v60, %v6259_v7 }
0x19e3   :  { %v3048_v29 = vpop.permute.xlu1 %3047 }
0x19f8   :  { %3036 = vperm.xlu0 %5729, %v3034_v4  }
0x1a6b   :  { %v3018_v48 = vpop.xlane.xlu0 %3017 }
0x1a6c   :  { %v3019_v54 = vcvt.f32.s32 %v3018_v48 }
0x1a6e   :  { %v3022_v13 = vadd.s32 %v3021_v56, %v3019_v54 }
0x1a70   :  { %vm3023_vm11 = vcmp.eq.s32.totalorder %v6628_v35, %v3022_v13 }
0x1a71   :  { %v5219_v14 = vsel %vm3023_vm11, 1.0, %v7871_v3 }
0x1a72   :  { %v3050_v57 = vmul.f32 %v5219_v14, %v3048_v29 }
0x1a73   :  { %v3037_v43 = vpop.permute.xlu0 %3036 }
0x1a74   :  { %v3039_v17 = vmul.f32 %v5221_v55, %v3037_v43  ;;  %v3363_v43 = vrot.slane %v3354_v60, %v6343_v59 }
0x1a76   :  { %v3051_v38 = vadd.f32 %v3050_v57, %v3039_v17 }
0x1a78   :  { %v3052_v31 = vpack.c.bf16 %v3051_v38, %v3051_v38 }
0x1a7a   :  { %5678 = vmatmul.mubr.bf16.vlgmr.msra.gmra.mxu1 %v3052_v31 }
0x1a7b   :  { %3200 = vmatpush1.bf16.msra.mxu1 %v6934_v61  ;;  %3217 = vmatprep.mubr.bf16.mxu1 %v6146_v1  ;;  %v3234_v61 = vld [vmem:[%s7848_s7] sm:$0x3] }
0x1a7c   :  { %3420 = vmatprep.subr.bf16.mxu1 %v7071_v32  ;;  %v3239_v32 = vrot.slane %v3234_v61, %v6259_v7  ;;  %v3243_v46 = vrot.slane %v3234_v61, %v6343_v59 }
0x1a7e   :  { %v3323_v37 = vadd.f32 %v7370_v22, %v3243_v46  ;;  %v5962_v46 = vld [vmem:[%s7855_s16 + $0x18] sm:$0xff]  }
0x1b3a   :  { %v3151_v62 = vpop.f32.mrf.mxu1 }
0x1b3b   :  { %v3157_v12 = vpack.c.bf16 %v3151_v62, %v3151_v62  ;;  %v5949_v62 = vld [vmem:[%s7853_s12 + $0x18] sm:$0xff]  }
0x1b3c   :  { %v5679_v16 = vpop.f32.mrf.mxu1 }
0x1b3d   :  { %5232 = vmatmul.mubr.msk.bf16.vlgmr.msra.gmra.mxu1 %vm219_vm1, %v3157_v12  ;;  %v5950_v12 = vld [vmem:[%s7853_s12 + $0x10] sm:$0xff]  }
0x1b3e   :  { %v3154_v19 = vpop.f32.mrf.mxu1  ;;  %3421 = vmatpush1.bf16.msra.mxu1 %v7066_v30  ;;  %3444 = vmatprep.mubr.bf16.mxu1 %v6146_v1  ;;  %v3160_v30 = vld [vmem:[%s7847_s6] sm:$0x3] }
0x1b3f   :  { %3422 = vmatprep.subr.bf16.mxu1 %v7076_v33  ;;  %v3165_v33 = vrot.slane %v3160_v30, %v6259_v7  ;;  %v3169_v44 = vrot.slane %v3160_v30, %v6343_v59  ;;  %v5952_v19 = vld [vmem:[%s7853_s12] sm:$0xff]  }
0x1b40   :  { %v5680_v20 = vpop.f32.mrf.mxu1 }
0x1b42   :  { %3423 = vmatpush1.bf16.msra.mxu1 %v7083_v34 }
0x1b43   :  { %3424 = vmatprep.subr.bf16.mxu1 %v7089_v36  ;;  %v3321_v36 = vadd.f32 %v7368_v21, %v3239_v32 }
0x1b46   :  { %3425 = vmatpush1.bf16.msra.mxu1 %v7096_v5 }
0x1b47   :  { %3426 = vmatprep.subr.bf16.mxu1 %v7102_v8 }
0x1b4a   :  { %3427 = vmatpush1.bf16.msra.mxu1 %v7108_v10 }
0x1b4b   :  { %5681 = vmatprep.subr.bf16.mxu1 %v7871_v3 }
0x1bfd   :  { %v3219_v34 = vpop.f32.mrf.mxu1 }
0x1bfe   :  { %v3220_v5 = vadd.f32 %v3219_v34, %v3165_v33 }
0x1bff   :  { %v3221_v8 = vpop.f32.mrf.mxu1 }
0x1c00   :  { %v3327_v10 = vadd.f32 %v3321_v36, %v3220_v5  ;;  %v3222_v24 = vadd.f32 %v3221_v8, %v3169_v44  ;;  %v5953_v5 = vld [vmem:[%s7855_s16 + $0x78] sm:$0xff]   ;;  %v5955_v8 = vld [vmem:[%s7855_s16 + $0x70] sm:$0xff]  }
0x1c01   :  { %v3223_v23 = vpop.f32.mrf.mxu1  ;;  %v5963_v44 = vld [vmem:[%s7855_s16 + $0x50] sm:$0xff]  }
0x1c02   :  { %v5242_v25 = vmul.f32 -1.442695, %v3327_v10  ;;  %v5956_v10 = vld [vmem:[%s7855_s16 + $0x30] sm:$0xff]   ;;  %v5957_v23 = vld [vmem:[%s7855_s16 + $0x68] sm:$0xff]  }
0x1c03   :  { %v3224_v6 = vpop.f32.mrf.mxu1 }
0x1c04   :  { %6096 = vpow2.f32 %v5242_v25  ;;  %v5958_v25 = vld [vmem:[%s7855_s16 + $0x28] sm:$0xff]   ;;  %v5959_v6 = vld [vmem:[%s7855_s16 + $0x60] sm:$0xff]  }
0x1c11   :  { %v6097_v41 = vpop.eup %6096 }
0x1c12   :  { %v3331_v42 = vadd.f32 1.0, %v6097_v41  ;;  %v5960_v41 = vld [vmem:[%s7855_s16 + $0x20] sm:$0xff]  }
0x1c14   :  { %6098 = vrcp.f32 %v3331_v42  ;;  %v5961_v42 = vld [vmem:[%s7855_s16 + $0x58] sm:$0xff]  }
0x1c21   :  { %v6099_v0 = vpop.eup %6098 }
0x1c22   :  { %v3334_v40 = vmul.f32 %v6099_v0, %v3323_v37  ;;  %v3337_v49 = vsub.f32 1.0, %v6099_v0  ;;  %v3343_v52 = vmul.f32 %v6099_v0, %v7114_v45  ;;  %v3461_v45 = vld [vmem:[%s7851_s11] sm:$0x3]  ;;  %v5964_v37 = vld [vmem:[%s7855_s16 + $0x10] sm:$0xff]  }
0x1c23   :  { %v3466_v63 = vrot.slane %v3461_v45, %v6259_v7  ;;  %v3470_v29 = vrot.slane %v3461_v45, %v6343_v59 }
0x1c24   :  { %v3335_v21 = vadd.f32 %v3334_v40, %v3222_v24 }
0x1c25   :  { %v3548_v4 = vadd.f32 %v7372_v27, %v3466_v63  ;;  %v3550_v57 = vadd.f32 %v7374_v28, %v3470_v29  ;;  %v5951_v28 = vld [vmem:[%s7853_s12 + $0x8] sm:$0xff]  }
0x1c26   :  { %6100 = vtanh.f32 %v3335_v21 }
0x1c33   :  { %v6101_v26 = vpop.eup %6100 }
0x1c34   :  { %3339 = vrot.lane.b32.xlu1 %v6101_v26, %s6149_s30 }
0x1ca6   :  { %v3340_v51 = vpop.permute.xlu1 %3339 }
0x1ca7   :  { %v3342_v53 = vmul.f32 %v3340_v51, %v3337_v49  ;;  %v5965_v51 = vld [vmem:[%s7855_s16 + $0x48] sm:$0xff]  }
0x1ca9   :  { %v7446_v15 = vadd.f32 %v3343_v52, %v3342_v53  ;;  %v5966_v52 = vld [vmem:[%s7855_s16 + $0x8] sm:$0xff]   ;;  %v5968_v53 = vld [vmem:[%s7855_s16] sm:$0xff]  }
0x1cab   :  { %v3345_v58 = vpack.c.bf16 %v7446_v15, %v7446_v15 }
0x1cad   :  { %3367 = vrot.lane.b32.xlu0 %v3345_v58, %s6149_s30  ;;  %v3675_v58 = vld [vmem:[%s7857_s15] sm:$0x3] }
0x1cae   :  { %v3680_v45 = vrot.slane %v3675_v58, %v6259_v7  ;;  %v3684_v60 = vrot.slane %v3675_v58, %v6343_v59  ;;  %v5985_v58 = vld [vmem:[%s7845_s5 + $0x24] ss:$8 sps:$4 sm:$0xff]  }
0x1d1f   :  { %v7451_v22 = vpop.permute.xlu0 %3367 }
0x1d20   :  { %5251 = vmatmul.mubr.msk.bf16.vlgmr.msra.gmra.mxu1 %vm325_vm2, %v7451_v22 }
0x1d21   :  { %5689 = vmatprep.mubr.msk.bf16.mxu1 %vm6148_vm0, %v7871_v3  ;;  %5682 = vmatpush3.bf16.msra.mxu1 %v5949_v62 }
0x1d22   :  { %5683 = vmatprep.subr.bf16.mxu1 %v7871_v3 }
0x1d25   :  { %5684 = vmatpush3.bf16.msra.mxu1 %v5950_v12  ;;  %v5970_v12 = vld [vmem:[%s7869_s19 + $0x30] sm:$0xff]  }
0x1d26   :  { %5685 = vmatprep.subr.bf16.mxu1 %v7871_v3 }
0x1d29   :  { %5686 = vmatpush3.bf16.msra.mxu1 %v5951_v28  ;;  %v5972_v28 = vld [vmem:[%s7869_s19 + $0x20] sm:$0xff]  }
0x1d2a   :  { %5687 = vmatprep.subr.bf16.mxu1 %v7871_v3 }
0x1d2d   :  { %5688 = vmatpush3.bf16.msra.mxu1 %v5952_v19  ;;  %v5973_v19 = vld [vmem:[%s7869_s19 + $0x18] sm:$0xff]  }
0x1d2e   :  { %5507 = vmatprep.subr.bf16.mxu1 %v5953_v5 }
0x1de0   :  { %v3446_v9 = vpop.f32.mrf.mxu1 }
0x1de1   :  { %v3447_v18 = vadd.f32 %v3446_v9, %v3359_v2 }
0x1de2   :  { %v3448_v47 = vpop.f32.mrf.mxu1 }
0x1de3   :  { %v3554_v48 = vadd.f32 %v3548_v4, %v3447_v18  ;;  %v3449_v38 = vadd.f32 %v3448_v47, %v3363_v43 }
0x1de4   :  { %v3450_v56 = vpop.f32.mrf.mxu1 }
0x1de5   :  { %v5261_v54 = vmul.f32 -1.442695, %v3554_v48 }
0x1de6   :  { %v3451_v13 = vpop.f32.mrf.mxu1 }
0x1de7   :  { %6102 = vpow2.f32 %v5261_v54 }
0x1df4   :  { %v6103_v14 = vpop.eup %6102 }
0x1df5   :  { %v3558_v55 = vadd.f32 1.0, %v6103_v14 }
0x1df7   :  { %6104 = vrcp.f32 %v3558_v55 }
0x1e04   :  { %v6105_v17 = vpop.eup %6104 }
0x1e05   :  { %v3561_v31 = vmul.f32 %v6105_v17, %v3550_v57  ;;  %v3564_v20 = vsub.f32 1.0, %v6105_v17  ;;  %v3570_v30 = vmul.f32 %v6105_v17, %v7192_v50  ;;  %v5954_v50 = vld [vmem:[%s7855_s16 + $0x38] sm:$0xff]   ;;  %v5303_v57 = vld [vmem:[%s7868_s29 + $0x4] sm:$0x1] }
0x1e06   :  { %v4016_v17 = vrot.slane %v5303_v57, %v6259_v7  ;;  %v4022_v5 = vsub.f32 1.0, %v5303_v57 }
0x1e07   :  { %v3562_v27 = vadd.f32 %v3561_v31, %v3449_v38 }
0x1e09   :  { %6106 = vtanh.f32 %v3562_v27 }
0x1e16   :  { %v6107_v16 = vpop.eup %6106 }
0x1e17   :  { %3566 = vrot.lane.b32.xlu1 %v6107_v16, %s6149_s30  ;;  %v5971_v16 = vld [vmem:[%s7869_s19 + $0x28] sm:$0xff]  }
0x1e89   :  { %v3567_v61 = vpop.permute.xlu1 %3566 }
0x1e8a   :  { %v3569_v32 = vmul.f32 %v3567_v61, %v3564_v20 }
0x1e8c   :  { %v7486_v33 = vadd.f32 %v3570_v30, %v3569_v32 }
0x1e8e   :  { %v3572_v34 = vpack.c.bf16 %v7486_v33, %v7486_v33 }
0x1e90   :  { %3589 = vrot.lane.b32.xlu0 %v3572_v34, %s6149_s30  ;;  %v5974_v34 = vld [vmem:[%s7869_s19 + $0x10] sm:$0xff]  }
0x1f02   :  { %v7491_v36 = vpop.permute.xlu0 %3589 }
0x1f03   :  { %5690 = vmatmul.mubr.msk.bf16.vlgmr.msra.gmra.mxu1 %vm325_vm2, %v7491_v36 }
0x1f04   :  { %5508 = vmatpush3.bf16.msra.mxu1 %v5954_v50  ;;  %v5975_v50 = vld [vmem:[%s7869_s19 + $0x8] sm:$0xff]  }
0x1f05   :  { %5509 = vmatprep.subr.bf16.mxu1 %v5955_v8  ;;  %v4027_v8 = vrot.slane %v4022_v5, %v6259_v7 }
0x1f08   :  { %5510 = vmatpush3.bf16.msra.mxu1 %v5956_v10  ;;  %v5976_v10 = vld [vmem:[%s7869_s19] sm:$0xff]  }
0x1f09   :  { %5511 = vmatprep.subr.bf16.mxu1 %v5957_v23  ;;  %v5977_v23 = vld [vmem:[%s7870_s28] ss:$8 sps:$4 sm:$0xff]  }
0x1f0c   :  { %5512 = vmatpush3.bf16.msra.mxu1 %v5958_v25  ;;  %v5979_v25 = vld [vmem:[%s7870_s28 + $0x4] ss:$8 sps:$4 sm:$0xff]  }
0x1f0d   :  { %5513 = vmatprep.subr.bf16.mxu1 %v5959_v6 }
0x1f10   :  { %5514 = vmatpush3.bf16.msra.mxu1 %v5960_v41 }
0x1f11   :  { %5515 = vmatprep.subr.bf16.mxu1 %v5961_v42 }
0x1f14   :  { %5516 = vmatpush3.bf16.msra.mxu1 %v5962_v46 }
0x1f15   :  { %5517 = vmatprep.subr.bf16.mxu1 %v5963_v44 }
0x1f18   :  { %5518 = vmatpush3.bf16.msra.mxu1 %v5964_v37  ;;  %v5304_v37 = vld [vmem:[%s7844_s1 + $0x20] sm:$0xff] }
0x1f19   :  { %5519 = vmatprep.subr.bf16.mxu1 %v5965_v51 }
0x1f1c   :  { %5520 = vmatpush3.bf16.msra.mxu1 %v5966_v52  ;;  %v5982_v52 = vld [vmem:[%s7845_s5 + $0x34] ss:$8 sps:$4 sm:$0xff]  }
0x1fc3   :  { %v3652_v0 = vpop.f32.mrf.mxu1 }
0x1fc4   :  { %v3653_v24 = vadd.f32 %v7300_v11, %v3652_v0  ;;  %v5967_v11 = vld [vmem:[%s7855_s16 + $0x40] sm:$0xff]  }
0x1fc5   :  { %v5691_v40 = vpop.f32.mrf.mxu1  ;;  %5521 = vmatprep.subr.bf16.mxu1 %v5967_v11  ;;  %v5980_v11 = vld [vmem:[%s7845_s5 + $0x30] ss:$8 sps:$4 sm:$0xff]  }
0x1fc6   :  { %v3658_v21 = vpack.c.bf16 %v3653_v24, %v3653_v24  ;;  %5522 = vmatpush3.bf16.msra.mxu1 %v5968_v53 }
0x1fc7   :  { %v3655_v26 = vpop.f32.mrf.mxu1  ;;  %4181 = vmatprep.subr.bf16.mxu1 %v5979_v25 }
0x1fc8   :  { %3800 = vmatmul.mubr.bf16.vlgmr.msra.gmra.mxu0 %v3658_v21 }
0x1fc9   :  { %v5692_v49 = vpop.f32.mrf.mxu1  ;;  %5709 = vmatprep.mubr.msk.bf16.mxu0 %vm6148_vm0, %v7871_v3 }
0x2088   :  { %v3801_v63 = vpop.f32.mrf.mxu0 }
0x2089   :  { %v3802_v2 = vadd.f32 %v3801_v63, %v3680_v45  ;;  %v5983_v63 = vld [vmem:[%s7845_s5 + $0x20] ss:$8 sps:$4 sm:$0xff]  }
0x208a   :  { %v3803_v9 = vpop.f32.mrf.mxu0 }
0x208b   :  { %v3804_v4 = vadd.f32 %v3803_v9, %v3684_v60  ;;  %v3808_v48 = vpack.c.bf16 %v3802_v2, %v3802_v2  ;;  %v5988_v2 = vld [vmem:[%s7845_s5 + $0x14] ss:$8 sps:$4 sm:$0xff]  }
0x208c   :  { %v3805_v18 = vpop.f32.mrf.mxu0 }
0x208d   :  { %v3809_v47 = vpack.c.bf16 %v3804_v4, %v3804_v4  ;;  %v5986_v4 = vld [vmem:[%s7845_s5 + $0x10] ss:$8 sps:$4 sm:$0xff]   ;;  %v5991_v18 = vld [vmem:[%s7845_s5 + $0x4] ss:$8 sps:$4 sm:$0xff]  }
0x208e   :  { %v3806_v56 = vpop.f32.mrf.mxu0 }
0x208f   :  { %3977 = vmatprep.mubr.bf16.mxu1 %v3809_v47  ;;  %v5989_v47 = vld [vmem:[%s7845_s5] ss:$8 sps:$4 sm:$0xff]   ;;  %v5992_v56 = vld [vmem:[%s7849_s9 + $0x30] ss:$8 sps:$4 sm:$0xff]  }
0x2090   :  { %3978 = vmatmul.mubr.bf16.vlgmr.msra.gmra.mxu1 %v3808_v48  ;;  %v5994_v48 = vld [vmem:[%s7849_s9 + $0x34] ss:$8 sps:$4 sm:$0xff]  }
0x2091   :  { %4199 = vmatprep.mubr.bf16.mxu1 %v6146_v1  ;;  %4182 = vmatpush1.bf16.msra.mxu1 %v5977_v23 }
0x2092   :  { %4276 = vmatprep.subr.bf16.mxu1 %v5982_v52 }
0x2150   :  { %v5523_v54 = vpop.f32.mrf.mxu1 }
0x2152   :  { %v5524_v13 = vpop.f32.mrf.mxu1 }
0x2153   :  { %v5525_v14 = vadd.f32 %v5524_v13, %v5523_v54  ;;  %v5997_v54 = vld [vmem:[%s7849_s9 + $0x24] ss:$8 sps:$4 sm:$0xff]   ;;  %v5995_v13 = vld [vmem:[%s7849_s9 + $0x20] ss:$8 sps:$4 sm:$0xff]  }
0x2154   :  { %v5526_v55 = vpop.f32.mrf.mxu1 }
0x2155   :  { %v3980_v29 = vadd.f32 %v5525_v14, %v7362_v39  ;;  %v5969_v39 = vld [vmem:[%s7869_s19 + $0x38] sm:$0xff]  }
0x2156   :  { %v5527_v43 = vpop.f32.mrf.mxu1  ;;  %5694 = vmatpush3.bf16.msra.mxu0 %v5969_v39  ;;  %v6000_v14 = vld [vmem:[%s7849_s9 + $0x14] ss:$8 sps:$4 sm:$0xff]   ;;  %v5998_v55 = vld [vmem:[%s7849_s9 + $0x10] ss:$8 sps:$4 sm:$0xff]  }
0x2157   :  { %5301 = vst [vmem:[%s7859_s18 + $0x18] sm:$0xff] %v3980_v29  ;;  %3987 = vmax.xlane.f32.xlu1 %v3980_v29  ;;  %5695 = vmatprep.subr.bf16.mxu0 %v7871_v3 }
0x215a   :  { %5696 = vmatpush3.bf16.msra.mxu0 %v5970_v12 }
0x215b   :  { %5697 = vmatprep.subr.bf16.mxu0 %v7871_v3 }
0x215e   :  { %5698 = vmatpush3.bf16.msra.mxu0 %v5971_v16 }
0x215f   :  { %5699 = vmatprep.subr.bf16.mxu0 %v7871_v3 }
0x2162   :  { %5700 = vmatpush3.bf16.msra.mxu0 %v5972_v28 }
0x2163   :  { %5701 = vmatprep.subr.bf16.mxu0 %v7871_v3 }
0x2166   :  { %5702 = vmatpush3.bf16.msra.mxu0 %v5973_v19 }
0x2167   :  { %5703 = vmatprep.subr.bf16.mxu0 %v7871_v3 }
0x2168   :  { %4018 = vperm.xlu1 %5730, %v4016_v17  }
0x216a   :  { %5704 = vmatpush3.bf16.msra.mxu0 %v5974_v34 }
0x216b   :  { %5705 = vmatprep.subr.bf16.mxu0 %v7871_v3 }
0x216e   :  { %5706 = vmatpush3.bf16.msra.mxu0 %v5975_v50 }
0x216f   :  { %5707 = vmatprep.subr.bf16.mxu0 %v7871_v3 }
0x2172   :  { %5708 = vmatpush3.bf16.msra.mxu0 %v5976_v10 }
0x21e0   :  { %v3988_v38 = vpop.xlane.xlu1 %3987 }
0x21e1   :  { %vm3989_vm12 = vcmp.eq.f32.partialorder %v3980_v29, %v3988_v38  ;;  %v6001_v29 = vld [vmem:[%s7849_s9] ss:$8 sps:$4 sm:$0xff]  }
0x21e2   :  { %v3990_v31 = vsel %vm3989_vm12, %v6628_v35, 2147483647 }
0x21e3   :  { %v3992_v27 = vshra.s32 %v3990_v31, 16  ;;  %v3991_v20 = vand.u32 65535, %v3990_v31  ;;  %v4142_v31 = vld [vmem:[%s7847_s6] sm:$0x3] }
0x21e4   :  { %v4019_v0 = vpop.permute.xlu1 %4018  ;;  %v4151_v23 = vrot.slane %v4142_v31, %v6343_v59 }
0x21e5   :  { %v3994_v62 = vcvt.s32.f32 %v3992_v27  ;;  %v3993_v30 = vcvt.s32.f32 %v3991_v20  ;;  %v4021_v21 = vmul.f32 %v5304_v37, %v4019_v0  ;;  %v4216_v27 = vld [vmem:[%s7848_s7] sm:$0x3]  ;;  %v6006_v37 = vld [vmem:[%s7850_s8 + $0x34] ss:$8 sps:$4 sm:$0xff]   ;;  %v6009_v0 = vld [vmem:[%s7850_s8 + $0x24] ss:$8 sps:$4 sm:$0xff]  }
0x21e6   :  { %v4221_v39 = vrot.slane %v4216_v27, %v6259_v7  ;;  %v4225_v10 = vrot.slane %v4216_v27, %v6343_v59  ;;  %4402 = vmatprep.subr.bf16.mxu0 %v6006_v37  ;;  %v6043_v37 = vld [vmem:[%s7854_s14 + $0x4] ss:$8 sps:$4 sm:$0xff]  }
0x21e7   :  { %3995 = vmin.xlane.f32.xlu0 %v3994_v62 }
0x2270   :  { %v3996_v61 = vpop.xlane.xlu0 %3995 }
0x2271   :  { %vm3997_vm13 = vcmp.eq.f32.partialorder %v3994_v62, %v3996_v61  ;;  %v4002_v6 = vcvt.f32.s32 %v3996_v61  ;;  %v4147_v62 = vrot.slane %v4142_v31, %v6259_v7 }
0x2272   :  { %v3998_v32 = vsel %vm3997_vm13, %v3993_v30, inf }
0x2273   :  { %3999 = vmin.xlane.f32.xlu0 %v3998_v32  ;;  %v4003_v42 = vshll.u32 %v4002_v6, 16 }
0x2289   :  { %4029 = vperm.xlu0 %5729, %v4027_v8  }
0x22fc   :  { %v4000_v41 = vpop.xlane.xlu0 %3999 }
0x22fd   :  { %v4001_v46 = vcvt.f32.s32 %v4000_v41 }
0x22ff   :  { %v4004_v44 = vadd.s32 %v4003_v42, %v4001_v46 }
0x2301   :  { %vm4005_vm14 = vcmp.eq.s32.totalorder %v6628_v35, %v4004_v44  ;;  %v6004_v44 = vld [vmem:[%s7850_s8 + $0x30] ss:$8 sps:$4 sm:$0xff]  }
0x2302   :  { %v5302_v24 = vsel %vm4005_vm14, 1.0, %v7871_v3 }
0x2304   :  { %v4030_v40 = vpop.permute.xlu0 %4029 }
0x2305   :  { %v4032_v26 = vmul.f32 %v5302_v24, %v4030_v40  ;;  %v6007_v24 = vld [vmem:[%s7850_s8 + $0x20] ss:$8 sps:$4 sm:$0xff]   ;;  %v6012_v40 = vld [vmem:[%s7850_s8 + $0x14] ss:$8 sps:$4 sm:$0xff]  }
0x2307   :  { %v4033_v49 = vadd.f32 %v4032_v26, %v4021_v21  ;;  %v6010_v26 = vld [vmem:[%s7850_s8 + $0x10] ss:$8 sps:$4 sm:$0xff]  }
0x2309   :  { %v4034_v51 = vpack.c.bf16 %v4033_v49, %v4033_v49  ;;  %v6015_v49 = vld [vmem:[%s7850_s8 + $0x4] ss:$8 sps:$4 sm:$0xff]  }
0x230b   :  { %5710 = vmatmul.mubr.bf16.vlgmr.msra.gmra.mxu0 %v4034_v51  ;;  %v6013_v51 = vld [vmem:[%s7850_s8] ss:$8 sps:$4 sm:$0xff]  }
0x230c   :  { %4426 = vmatprep.mubr.bf16.mxu0 %v6146_v1  ;;  %4403 = vmatpush1.bf16.msra.mxu0 %v6004_v44 }
0x230d   :  { %4404 = vmatprep.subr.bf16.mxu0 %v6009_v0  ;;  %v6041_v0 = vld [vmem:[%s7854_s14] ss:$8 sps:$4 sm:$0xff]  }
0x2310   :  { %4405 = vmatpush1.bf16.msra.mxu0 %v6007_v24  ;;  %v6044_v24 = vld [vmem:[%s7855_s16 + $0x78] sm:$0xff]  }
0x2311   :  { %4406 = vmatprep.subr.bf16.mxu0 %v6012_v40  ;;  %v6045_v40 = vld [vmem:[%s7855_s16 + $0x38] sm:$0xff]  }
0x2314   :  { %4407 = vmatpush1.bf16.msra.mxu0 %v6010_v26  ;;  %v6047_v26 = vld [vmem:[%s7855_s16 + $0x30] sm:$0xff]  }
0x2315   :  { %4408 = vmatprep.subr.bf16.mxu0 %v6015_v49  ;;  %v6048_v49 = vld [vmem:[%s7855_s16 + $0x68] sm:$0xff]  }
0x2318   :  { %4409 = vmatpush1.bf16.msra.mxu0 %v6013_v51  ;;  %v6049_v51 = vld [vmem:[%s7855_s16 + $0x28] sm:$0xff]  }
0x2319   :  { %5713 = vmatprep.subr.bf16.mxu0 %v7871_v3 }
0x23cb   :  { %v4133_v35 = vpop.f32.mrf.mxu0 }
0x23cc   :  { %v4139_v53 = vpack.c.bf16 %v4133_v35, %v4133_v35 }
0x23cd   :  { %v5711_v45 = vpop.f32.mrf.mxu0 }
0x23ce   :  { %5315 = vmatmul.mubr.msk.bf16.vlgmr.msra.gmra.mxu1 %vm219_vm1, %v4139_v53 }
0x23cf   :  { %4277 = vmatpush1.bf16.msra.mxu1 %v5980_v11  ;;  %v4136_v60 = vpop.f32.mrf.mxu0  ;;  %4300 = vmatprep.mubr.bf16.mxu1 %v6146_v1 }
0x23d0   :  { %4278 = vmatprep.subr.bf16.mxu1 %v5985_v58 }
0x23d1   :  { %v5712_v9 = vpop.f32.mrf.mxu0 }
0x23d3   :  { %4279 = vmatpush1.bf16.msra.mxu1 %v5983_v63  ;;  %v4443_v63 = vld [vmem:[%s7851_s11] sm:$0x3] }
0x23d4   :  { %4280 = vmatprep.subr.bf16.mxu1 %v5988_v2  ;;  %v4336_v2 = vld [vmem:[%s7852_s10] sm:$0x3] }
0x23d5   :  { %v4341_v9 = vrot.slane %v4336_v2, %v6259_v7 }
0x23d7   :  { %4281 = vmatpush1.bf16.msra.mxu1 %v5986_v4 }
0x23d8   :  { %4282 = vmatprep.subr.bf16.mxu1 %v5991_v18 }
0x23db   :  { %4283 = vmatpush1.bf16.msra.mxu1 %v5989_v47 }
0x23dc   :  { %4503 = vmatprep.subr.bf16.mxu1 %v5994_v48 }
0x23de   :  { %5324 = vmatmul.mubr.msk.bf16.vlgmr.msra.gmra.mxu1 %vm325_vm2, %v7451_v22  ;;  %v6003_v22 = vld [vmem:[%s7849_s9 + $0x4] ss:$8 sps:$4 sm:$0xff]  }
0x23df   :  { %4504 = vmatpush1.bf16.msra.mxu1 %v5992_v56  ;;  %4527 = vmatprep.mubr.bf16.mxu1 %v6146_v1 }
0x23e0   :  { %4505 = vmatprep.subr.bf16.mxu1 %v5997_v54 }
0x23e3   :  { %4506 = vmatpush1.bf16.msra.mxu1 %v5995_v13 }
0x23e4   :  { %4507 = vmatprep.subr.bf16.mxu1 %v6000_v14 }
0x23e7   :  { %4508 = vmatpush1.bf16.msra.mxu1 %v5998_v55 }
0x23e8   :  { %4509 = vmatprep.subr.bf16.mxu1 %v6003_v22 }
0x23eb   :  { %4510 = vmatpush1.bf16.msra.mxu1 %v6001_v29  ;;  %v4452_v29 = vrot.slane %v4443_v63, %v6343_v59 }
0x23ee   :  { %5343 = vmatmul.mubr.msk.bf16.vlgmr.msra.gmra.mxu1 %vm325_vm2, %v7491_v36 }
0x23ef   :  { %4781 = vmatprep.mubr.bf16.mxu1 %v6146_v1 }
0x248e   :  { %v4201_v43 = vpop.f32.mrf.mxu1 }
0x248f   :  { %v4202_v36 = vadd.f32 %v4201_v43, %v4147_v62  ;;  %v4345_v43 = vrot.slane %v4336_v2, %v6343_v59  ;;  %v6016_v62 = vld [vmem:[%s7853_s12 + $0x18] sm:$0xff]  }
0x2490   :  { %v4203_v57 = vpop.f32.mrf.mxu1 }
0x2491   :  { %v4204_v41 = vadd.f32 %v4203_v57, %v4151_v23  ;;  %v6029_v23 = vld [vmem:[%s7854_s14 + $0x40] ss:$8 sps:$4 sm:$0xff]  }
0x2492   :  { %v4205_v17 = vpop.f32.mrf.mxu1 }
0x2494   :  { %v4206_v38 = vpop.f32.mrf.mxu1 }
0x249e   :  { %v4302_v12 = vpop.f32.mrf.mxu1 }
0x249f   :  { %v4303_v16 = vadd.f32 %v4302_v12, %v4221_v39  ;;  %v6017_v39 = vld [vmem:[%s7853_s12 + $0x10] sm:$0xff]  }
0x24a0   :  { %v4304_v1 = vpop.f32.mrf.mxu1 }
0x24a1   :  { %v4309_v28 = vadd.f32 %v4303_v16, %v4202_v36  ;;  %v4305_v25 = vadd.f32 %v4304_v1, %v4225_v10  ;;  %v6018_v36 = vld [vmem:[%s7853_s12 + $0x8] sm:$0xff]   ;;  %v6019_v16 = vld [vmem:[%s7853_s12] sm:$0xff]   ;;  %v6020_v1 = vld [vmem:[%s7854_s14 + $0x70] ss:$8 sps:$4 sm:$0xff]  }
0x24a2   :  { %v4306_v19 = vpop.f32.mrf.mxu1 }
0x24a3   :  { %v5325_v20 = vmul.f32 -1.442695, %v4309_v28  ;;  %v6022_v28 = vld [vmem:[%s7854_s14 + $0x74] ss:$8 sps:$4 sm:$0xff]   ;;  %v6025_v19 = vld [vmem:[%s7854_s14 + $0x64] ss:$8 sps:$4 sm:$0xff]  }
0x24a4   :  { %v4307_v61 = vpop.f32.mrf.mxu1  ;;  %4749 = vmatprep.subr.bf16.mxu1 %v6022_v28 }
0x24a5   :  { %6108 = vpow2.f32 %v5325_v20  ;;  %4750 = vmatpush1.bf16.msra.mxu1 %v6020_v1  ;;  %v6023_v20 = vld [vmem:[%s7854_s14 + $0x60] ss:$8 sps:$4 sm:$0xff]  }
0x24a6   :  { %4751 = vmatprep.subr.bf16.mxu1 %v6025_v19 }
0x24a9   :  { %4752 = vmatpush1.bf16.msra.mxu1 %v6023_v20 }
0x24ae   :  { %v4529_v30 = vpop.f32.mrf.mxu1 }
0x24b0   :  { %v4531_v32 = vpop.f32.mrf.mxu1 }
0x24b1   :  { %v4532_v57 = vadd.f32 %v4531_v32, %v4452_v29 }
0x24b2   :  { %v6109_v34 = vpop.eup %6108  ;;  %v4533_v5 = vpop.f32.mrf.mxu1 }
0x24b3   :  { %v4313_v50 = vadd.f32 1.0, %v6109_v34  ;;  %v6026_v5 = vld [vmem:[%s7854_s14 + $0x50] ss:$8 sps:$4 sm:$0xff]  }
0x24b4   :  { %v4534_v8 = vpop.f32.mrf.mxu1 }
0x24b5   :  { %6110 = vrcp.f32 %v4313_v50  ;;  %v6031_v50 = vld [vmem:[%s7854_s14 + $0x44] ss:$8 sps:$4 sm:$0xff]  }
0x24c2   :  { %v6111_v6 = vpop.eup %6110 }
0x24c3   :  { %v4316_v42 = vmul.f32 %v6111_v6, %v4305_v25  ;;  %v4319_v52 = vsub.f32 1.0, %v6111_v6  ;;  %v4325_v11 = vmul.f32 %v6111_v6, %v7446_v15  ;;  %v4448_v15 = vrot.slane %v4443_v63, %v6259_v7  ;;  %v6032_v25 = vld [vmem:[%s7854_s14 + $0x30] ss:$8 sps:$4 sm:$0xff]   ;;  %v6037_v6 = vld [vmem:[%s7854_s14 + $0x24] ss:$8 sps:$4 sm:$0xff]  }
0x24c5   :  { %v4317_v46 = vadd.f32 %v4316_v42, %v4204_v41  ;;  %v4530_v18 = vadd.f32 %v4529_v30, %v4448_v15  ;;  %v6035_v41 = vld [vmem:[%s7854_s14 + $0x20] ss:$8 sps:$4 sm:$0xff]   ;;  %v6040_v42 = vld [vmem:[%s7854_s14 + $0x14] ss:$8 sps:$4 sm:$0xff]  }
0x24c7   :  { %6112 = vtanh.f32 %v4317_v46  ;;  %v6038_v46 = vld [vmem:[%s7854_s14 + $0x10] ss:$8 sps:$4 sm:$0xff]  }
0x24d4   :  { %v6113_v21 = vpop.eup %6112 }
0x24d5   :  { %4321 = vrot.lane.b32.xlu1 %v6113_v21, %s6149_s30  ;;  %v6046_v21 = vld [vmem:[%s7855_s16 + $0x70] sm:$0xff]  }
0x2547   :  { %v4322_v35 = vpop.permute.xlu1 %4321 }
0x2548   :  { %v4324_v53 = vmul.f32 %v4322_v35, %v4319_v52  ;;  %v6050_v52 = vld [vmem:[%s7855_s16 + $0x60] sm:$0xff]  }
0x2549   :  { %v6051_v35 = vld [vmem:[%s7855_s16 + $0x20] sm:$0xff]  }
0x254a   :  { %v4326_v58 = vadd.f32 %v4325_v11, %v4324_v53  ;;  %v6052_v11 = vld [vmem:[%s7855_s16 + $0x58] sm:$0xff]  }
0x254b   :  { %v6053_v53 = vld [vmem:[%s7855_s16 + $0x18] sm:$0xff]  }
0x254c   :  { %v4327_v45 = vpack.c.bf16 %v4326_v58, %v4326_v58  ;;  %v6054_v58 = vld [vmem:[%s7855_s16 + $0x50] sm:$0xff]  }
0x254e   :  { %4349 = vrot.lane.b32.xlu1 %v4327_v45, %s6149_s30  ;;  %v6055_v45 = vld [vmem:[%s7855_s16 + $0x10] sm:$0xff]  }
0x25c0   :  { %v4350_v60 = vpop.permute.xlu1 %4349 }
0x25c1   :  { %5334 = vmatmul.mubr.msk.bf16.vlgmr.msra.gmra.mxu0 %vm325_vm2, %v4350_v60  ;;  %v5345_v60 = vld [vmem:[%s7856_s13] ss:$0 sm:$0xff] }
0x25c2   :  { %5721 = vmatprep.mubr.msk.bf16.mxu0 %vm6148_vm0, %v7871_v3  ;;  %5714 = vmatpush3.bf16.msra.mxu0 %v6016_v62 }
0x25c3   :  { %5715 = vmatprep.subr.bf16.mxu0 %v7871_v3 }
0x25c6   :  { %5716 = vmatpush3.bf16.msra.mxu0 %v6017_v39  ;;  %v5367_v39 = vld [vmem:[%s7858_s17] ss:$0 sm:$0xff] }
0x25c7   :  { %5717 = vmatprep.subr.bf16.mxu0 %v7871_v3 }
0x25ca   :  { %5718 = vmatpush3.bf16.msra.mxu0 %v6018_v36 }
0x25cb   :  { %5719 = vmatprep.subr.bf16.mxu0 %v7871_v3  ;;  %v6028_v3 = vld [vmem:[%s7854_s14 + $0x54] ss:$8 sps:$4 sm:$0xff]  }
0x25cc   :  { %4753 = vmatprep.subr.bf16.mxu1 %v6028_v3 }
0x25cd   :  { %4754 = vmatpush1.bf16.msra.mxu1 %v6026_v5 }
0x25ce   :  { %5720 = vmatpush3.bf16.msra.mxu0 %v6019_v16  ;;  %4755 = vmatprep.subr.bf16.mxu1 %v6031_v50 }
0x25cf   :  { %5543 = vmatprep.subr.bf16.mxu0 %v6044_v24 }
0x25d1   :  { %4756 = vmatpush1.bf16.msra.mxu1 %v6029_v23 }
0x2681   :  { %v4428_v4 = vpop.f32.mrf.mxu0 }
0x2682   :  { %v4429_v47 = vadd.f32 %v4428_v4, %v4341_v9 }
0x2683   :  { %v4430_v48 = vpop.f32.mrf.mxu0 }
0x2684   :  { %v4536_v56 = vadd.f32 %v4530_v18, %v4429_v47  ;;  %v4431_v38 = vadd.f32 %v4430_v48, %v4345_v43  ;;  %v6056_v47 = vld [vmem:[%s7855_s16 + $0x48] sm:$0xff]  }
0x2685   :  { %v4432_v54 = vpop.f32.mrf.mxu0  ;;  %v6057_v48 = vld [vmem:[%s7855_s16 + $0x8] sm:$0xff]  }
0x2686   :  { %v5344_v13 = vmul.f32 -1.442695, %v4536_v56  ;;  %v6058_v56 = vld [vmem:[%s7855_s16 + $0x40] sm:$0xff]  }
0x2687   :  { %v4433_v14 = vpop.f32.mrf.mxu0  ;;  %v6059_v54 = vld [vmem:[%s7855_s16] sm:$0xff]  }
0x2688   :  { %6114 = vpow2.f32 %v5344_v13  ;;  %v4657_v13 = vld [vmem:[%s7857_s15] sm:$0x3] }
0x2689   :  { %v4662_v14 = vrot.slane %v4657_v13, %v6259_v7 }
0x2695   :  { %v6115_v55 = vpop.eup %6114 }
0x2696   :  { %v4540_v22 = vadd.f32 1.0, %v6115_v55  ;;  %v4666_v55 = vrot.slane %v4657_v13, %v6343_v59 }
0x2698   :  { %6116 = vrcp.f32 %v4540_v22 }
0x26a5   :  { %v6117_v17 = vpop.eup %6116 }
0x26a6   :  { %v4543_v31 = vmul.f32 %v6117_v17, %v4532_v57  ;;  %v4546_v61 = vsub.f32 1.0, %v6117_v17  ;;  %v4552_v32 = vmul.f32 %v6117_v17, %v7486_v33  ;;  %v6034_v33 = vld [vmem:[%s7854_s14 + $0x34] ss:$8 sps:$4 sm:$0xff]  }
0x26a7   :  { %4757 = vmatprep.subr.bf16.mxu1 %v6034_v33 }
0x26a8   :  { %v4544_v27 = vadd.f32 %v4543_v31, %v4431_v38  ;;  %4758 = vmatpush1.bf16.msra.mxu1 %v6032_v25 }
0x26a9   :  { %4759 = vmatprep.subr.bf16.mxu1 %v6037_v6 }
0x26aa   :  { %6118 = vtanh.f32 %v4544_v27 }
0x26ac   :  { %4760 = vmatpush1.bf16.msra.mxu1 %v6035_v41 }
0x26ad   :  { %4761 = vmatprep.subr.bf16.mxu1 %v6040_v42 }
0x26b0   :  { %4762 = vmatpush1.bf16.msra.mxu1 %v6038_v46 }
0x26b1   :  { %4763 = vmatprep.subr.bf16.mxu1 %v6043_v37 }
0x26b4   :  { %4764 = vmatpush1.bf16.msra.mxu1 %v6041_v0 }
0x26b7   :  { %v6119_v12 = vpop.eup %6118 }
0x26b8   :  { %4548 = vrot.lane.b32.xlu0 %v6119_v12, %s6149_s30 }
0x272a   :  { %v4549_v30 = vpop.permute.xlu0 %4548 }
0x272b   :  { %v4551_v34 = vmul.f32 %v4549_v30, %v4546_v61 }
0x272d   :  { %v4553_v8 = vadd.f32 %v4552_v32, %v4551_v34 }
0x272f   :  { %v4554_v10 = vpack.c.bf16 %v4553_v8, %v4553_v8 }
0x2731   :  { %4571 = vrot.lane.b32.xlu1 %v4554_v10, %s6149_s30 }
0x27a3   :  { %v4572_v44 = vpop.permute.xlu1 %4571 }
0x27a4   :  { %5722 = vmatmul.mubr.msk.bf16.vlgmr.msra.gmra.mxu0 %vm325_vm2, %v4572_v44 }
0x27a5   :  { %5544 = vmatpush3.bf16.msra.mxu0 %v6045_v40 }
0x27a6   :  { %5545 = vmatprep.subr.bf16.mxu0 %v6046_v21 }
0x27a9   :  { %5546 = vmatpush3.bf16.msra.mxu0 %v6047_v26 }
0x27aa   :  { %5547 = vmatprep.subr.bf16.mxu0 %v6048_v49 }
0x27ad   :  { %5548 = vmatpush3.bf16.msra.mxu0 %v6049_v51 }
0x27ae   :  { %5549 = vmatprep.subr.bf16.mxu0 %v6050_v52 }
0x27b1   :  { %5550 = vmatpush3.bf16.msra.mxu0 %v6051_v35 }
0x27b2   :  { %5551 = vmatprep.subr.bf16.mxu0 %v6052_v11 }
0x27b5   :  { %5552 = vmatpush3.bf16.msra.mxu0 %v6053_v53 }
0x27b6   :  { %5553 = vmatprep.subr.bf16.mxu0 %v6054_v58 }
0x27b9   :  { %5554 = vmatpush3.bf16.msra.mxu0 %v6055_v45 }
0x27ba   :  { %5555 = vmatprep.subr.bf16.mxu0 %v6056_v47 }
0x27bd   :  { %5556 = vmatpush3.bf16.msra.mxu0 %v6057_v48 }
0x27be   :  { %5557 = vmatprep.subr.bf16.mxu0 %v6058_v56 }
0x27c1   :  { %5558 = vmatpush3.bf16.msra.mxu0 %v6059_v54 }
0x2864   :  { %v4634_v63 = vpop.f32.mrf.mxu0 }
0x2865   :  { %v4635_v2 = vadd.f32 %v5345_v60, %v4634_v63 }
0x2866   :  { %v5723_v15 = vpop.f32.mrf.mxu0 }
0x2867   :  { %v4640_v9 = vpack.c.bf16 %v4635_v2, %v4635_v2 }
0x2868   :  { %v4637_v4 = vpop.f32.mrf.mxu0 }
0x2869   :  { %4782 = vmatmul.mubr.bf16.vlgmr.msra.gmra.mxu1 %v4640_v9 }
0x286a   :  { %v5724_v18 = vpop.f32.mrf.mxu0 }
0x2929   :  { %v4783_v22 = vpop.f32.mrf.mxu1 }
0x292a   :  { %v4784_v29 = vadd.f32 %v4783_v22, %v4662_v14 }
0x292b   :  { %v4785_v43 = vpop.f32.mrf.mxu1 }
0x292c   :  { %v4786_v57 = vadd.f32 %v4785_v43, %v4666_v55  ;;  %v4790_v31 = vpack.c.bf16 %v4784_v29, %v4784_v29 }
0x292d   :  { %v4787_v17 = vpop.f32.mrf.mxu1 }
0x292e   :  { %v4791_v38 = vpack.c.bf16 %v4786_v57, %v4786_v57 }
0x292f   :  { %v4788_v27 = vpop.f32.mrf.mxu1 }
0x2930   :  { %4959 = vmatprep.mubr.bf16.mxu0 %v4791_v38 }
0x2931   :  { %4960 = vmatmul.mubr.bf16.vlgmr.msra.gmra.mxu0 %v4790_v31 }
0x29f1   :  { %v5559_v62 = vpop.f32.mrf.mxu0 }
0x29f3   :  { %v5560_v12 = vpop.f32.mrf.mxu0 }
0x29f4   :  { %v5561_v36 = vadd.f32 %v5560_v12, %v5559_v62 }
0x29f5   :  { %v5562_v7 = vpop.f32.mrf.mxu0 }
0x29f6   :  { %v4962_v16 = vadd.f32 %v5561_v36, %v5367_v39 }
0x29f7   :  { %v5563_v59 = vpop.f32.mrf.mxu0 }
0x29f8   :  { %5384 = vst [vmem:[%s7859_s18 + $0x20] sm:$0xff] %v4962_v16 }

</bundles_post_ra>
